<compile_context>
chip_gen: v7x
topology: tpu7x:2x2x1
jax: 0.10.0
libtpu: 0.0.40
codegen_flags: <defaults>
</compile_context>

<pallas_src>
import functools
import numpy as np
import jax
import jax.numpy as jnp
from jax.experimental import pallas as pl
from jax.experimental.pallas import tpu as pltpu

EPS = 1e-5
NEG_SLOPE = 0.2
VMEM_LIMIT = 48 * 1024 * 1024   # <= v7x physical 64 MiB, well under v5e/v6e 128 MiB


def _cparams(sems):
    return pltpu.CompilerParams(dimension_semantics=sems,
                                vmem_limit_bytes=VMEM_LIMIT)


# ----------------------------------------------------------------------------
# Kernel 1: 3x3 conv (in-kernel shifted-window matmuls) + InstanceNorm2d
#           + LeakyReLU.  Grid = (N, Cout tiles).
# ----------------------------------------------------------------------------
def _conv3x3_in_lrelu_kernel(x_ref, w_ref, mask_ref, o_ref, *, W):
    # x_ref   : (1, Cin, (H+2)*(W+2)+2)  bf16  zero-padded, flattened (+2 tail)
    # w_ref   : (9, tc, Cin)             bf16  tap-major weights
    # mask_ref: (1, H*Wp)                f32   1.0 on valid columns (col%Wp < W)
    # o_ref   : (1, tc, H*Wp)            f32
    Wp = W + 2
    tc = o_ref.shape[1]
    hwp = o_ref.shape[2]                      # H * Wp
    acc = jnp.zeros((tc, hwp), jnp.float32)
    for t in range(9):
        ky, kx = t // 3, t % 3
        tap = x_ref[0, :, pl.ds(ky * Wp + kx, hwp)]     # (Cin, H*Wp) bf16
        acc = acc + jnp.dot(w_ref[t], tap, preferred_element_type=jnp.float32)
    # single-pass InstanceNorm stats over the H*W valid positions
    mask = mask_ref[...]                      # (1, hwp)
    accv = acc * mask
    inv_n = 1.0 / float((hwp // Wp) * W)      # 1 / (H*W)
    mu = jnp.sum(accv, axis=1, keepdims=True) * inv_n
    ex2 = jnp.sum(accv * accv, axis=1, keepdims=True) * inv_n
    var = jnp.maximum(ex2 - mu * mu, 0.0)
    y = (acc - mu) * jax.lax.rsqrt(var + EPS)
    o_ref[0] = jnp.where(y >= 0, y, NEG_SLOPE * y)


def conv3x3_in_lrelu(x, w):
    # x: (N, Cin, H, W) f32, w: (Cout, Cin, 3, 3) f32
    N, Cin, H, W = x.shape
    Cout = w.shape[0]
    Hp, Wp = H + 2, W + 2
    xp = jnp.pad(x, ((0, 0), (0, 0), (1, 1), (1, 1)))
    xf = xp.reshape(N, Cin, Hp * Wp)
    xf = jnp.pad(xf, ((0, 0), (0, 0), (0, 2))).astype(jnp.bfloat16)  # tail for last tap
    w9 = jnp.transpose(w, (2, 3, 0, 1)).reshape(9, Cout, Cin).astype(jnp.bfloat16)
    mask = jnp.asarray((np.arange(H * Wp) % Wp < W).astype(np.float32).reshape(1, H * Wp))

    tc = Cout if Cout <= 128 else 128
    assert Cout % tc == 0
    kern = functools.partial(_conv3x3_in_lrelu_kernel, W=W)
    out = pl.pallas_call(
        kern,
        out_shape=jax.ShapeDtypeStruct((N, Cout, H * Wp), jnp.float32),
        grid=(N, Cout // tc),
        in_specs=[pl.BlockSpec((1, Cin, Hp * Wp + 2), lambda n, c: (n, 0, 0)),
                  pl.BlockSpec((9, tc, Cin), lambda n, c: (0, c, 0)),
                  pl.BlockSpec((1, H * Wp), lambda n, c: (0, 0))],
        out_specs=pl.BlockSpec((1, tc, H * Wp), lambda n, c: (n, c, 0)),
        compiler_params=_cparams(("parallel", "parallel")),
    )(xf, w9, mask)
    return out.reshape(N, Cout, H, Wp)[:, :, :, :W]


# ----------------------------------------------------------------------------
# Kernel 2: ConvTranspose2d(k=2, s=2) + InstanceNorm2d + LeakyReLU.
#           Single fused (4*Cout, Cin) matmul; IN stats shared across taps.
# ----------------------------------------------------------------------------
def _tconv2x2_in_lrelu_kernel(x_ref, w_ref, o_ref):
    # x_ref: (1, Cin, HW) bf16   w_ref: (4*Cout, Cin) bf16   o_ref: (1, 4, Cout, HW) f32
    cout = o_ref.shape[2]
    hw = o_ref.shape[3]
    y = jnp.dot(w_ref[...], x_ref[0], preferred_element_type=jnp.float32)  # (4*Cout, HW)
    s = jnp.sum(y, axis=1, keepdims=True)
    s2 = jnp.sum(y * y, axis=1, keepdims=True)
    gs = s[0:cout] + s[cout:2 * cout] + s[2 * cout:3 * cout] + s[3 * cout:4 * cout]
    gs2 = s2[0:cout] + s2[cout:2 * cout] + s2[2 * cout:3 * cout] + s2[3 * cout:4 * cout]
    inv_n = 1.0 / (4.0 * hw)
    mu = gs * inv_n
    var = jnp.maximum(gs2 * inv_n - mu * mu, 0.0)
    inv = jax.lax.rsqrt(var + EPS)
    for t in range(4):
        yt = (y[t * cout:(t + 1) * cout] - mu) * inv
        o_ref[0, t] = jnp.where(yt >= 0, yt, NEG_SLOPE * yt)


def tconv2x2_in_lrelu(x, w):
    # x: (N, Cin, H, W), w: (Cin, Cout, 2, 2)  (PyTorch ConvTranspose2d layout)
    N, Cin, H, W = x.shape
    Cout = w.shape[1]
    xf = x.reshape(N, Cin, H * W).astype(jnp.bfloat16)
    # rows ordered (dy, dx, cout): row (dy*2+dx)*Cout + c  ->  w[:, c, dy, dx]
    wf = jnp.transpose(w, (2, 3, 1, 0)).reshape(4 * Cout, Cin).astype(jnp.bfloat16)
    out = pl.pallas_call(
        _tconv2x2_in_lrelu_kernel,
        out_shape=jax.ShapeDtypeStruct((N, 4, Cout, H * W), jnp.float32),
        grid=(N,),
        in_specs=[pl.BlockSpec((1, Cin, H * W), lambda n: (n, 0, 0)),
                  pl.BlockSpec((4 * Cout, Cin), lambda n: (0, 0))],
        out_specs=pl.BlockSpec((1, 4, Cout, H * W), lambda n: (n, 0, 0, 0)),
        compiler_params=_cparams(("parallel",)),
    )(xf, wf)
    # TODO(synk): de-interleave kept as XLA glue; could be removed with strided
    #             in-kernel stores or by folding into the next conv's taps.
    out = out.reshape(N, 2, 2, Cout, H, W)                 # (n, dy, dx, c, i, j)
    out = jnp.transpose(out, (0, 3, 4, 1, 5, 2))           # (n, c, i, dy, j, dx)
    return out.reshape(N, Cout, 2 * H, 2 * W)


# ----------------------------------------------------------------------------
# Kernel 3: final 1x1 conv with bias, per sample
# ----------------------------------------------------------------------------
def _conv1x1_bias_kernel(x_ref, w_ref, b_ref, o_ref):
    # x_ref: (1, Cin, HW)  w_ref: (Cout, Cin)  b_ref: (Cout, 1)  o_ref: (1, Cout, HW)
    y = jnp.dot(w_ref[...], x_ref[0], preferred_element_type=jnp.float32)
    o_ref[0] = y + b_ref[...]


def conv1x1_bias(x, w, b):
    N, Cin, H, W = x.shape
    Cout = w.shape[0]
    out = pl.pallas_call(
        _conv1x1_bias_kernel,
        out_shape=jax.ShapeDtypeStruct((N, Cout, H * W), jnp.float32),
        grid=(N,),
        in_specs=[pl.BlockSpec((1, Cin, H * W), lambda n: (n, 0, 0)),
                  pl.BlockSpec((Cout, Cin), lambda n: (0, 0)),
                  pl.BlockSpec((Cout, 1), lambda n: (0, 0))],
        out_specs=pl.BlockSpec((1, Cout, H * W), lambda n: (n, 0, 0)),
        compiler_params=_cparams(("parallel",)),
    )(x.reshape(N, Cin, H * W), w, b)
    return out.reshape(N, Cout, H, W)


# ----------------------------------------------------------------------------
# Kernel 4: data consistency with centered DFT as batched dense matmuls (f32)
# ----------------------------------------------------------------------------
def _dc_kernel(x_ref, kr_ref, ki_ref, m_ref, mean_ref, std_ref,
               f1_ref, f2_ref, b1_ref, b2_ref, o_ref):
    n = pl.program_id(0)
    mean = mean_ref[n]                 # SMEM scalar
    std = std_ref[n]                   # SMEM scalar
    H = x_ref.shape[2]
    W = x_ref.shape[3]
    x = x_ref[0, 0] * std + mean       # (H, W) denormalized image

    # forward centered FFT (ortho):  K = A_H @ x @ A_W^T, real/imag batched
    t = jnp.dot(f1_ref[...], x, preferred_element_type=jnp.float32)      # (2H, W) = [Ar@x ; Ai@x]
    k4 = jnp.dot(t, f2_ref[...], preferred_element_type=jnp.float32)     # (2H, 2W)
    kr = k4[:H, :W] - k4[H:, W:]
    ki = k4[:H, W:] + k4[H:, :W]

    # data consistency: K = K + m*(k0 - K)
    m = m_ref[0, 0]
    kdr = kr + m * (kr_ref[0, 0] - kr)
    kdi = ki + m * (ki_ref[0, 0] - ki)

    # inverse centered FFT:  X = B_H @ Kd @ B_W^T
    ua = jnp.dot(b1_ref[...], kdr, preferred_element_type=jnp.float32)   # (2H, W) = [Br@kdr ; Bi@kdr]
    ub = jnp.dot(b1_ref[...], kdi, preferred_element_type=jnp.float32)   # (2H, W) = [Br@kdi ; Bi@kdi]
    ur = ua[:H] - ub[H:]
    ui = ub[:H] + ua[H:]
    xa = jnp.dot(ur, b2_ref[...], preferred_element_type=jnp.float32)    # (H, 2W) = [ur@Bwr , ur@Bwi]
    xb = jnp.dot(ui, b2_ref[...], preferred_element_type=jnp.float32)    # (H, 2W)
    xr = xa[:, :W] - xb[:, W:]
    xi = xa[:, W:] + xb[:, :W]

    mag = jnp.sqrt(xr * xr + xi * xi)
    o_ref[0, 0] = (mag - mean) / std


def _centered_dft_mats(n):
    eye = np.eye(n, dtype=np.complex64)
    fwd = np.fft.fftshift(np.fft.fft(np.fft.ifftshift(eye, axes=0),
                                     axis=0, norm="ortho"), axes=0)
    inv = np.fft.fftshift(np.fft.ifft(np.fft.ifftshift(eye, axes=0),
                                      axis=0, norm="ortho"), axes=0)
    return fwd.astype(np.complex64), inv.astype(np.complex64)


def data_consistency(k, m, x, mean, std):
    # k: (N,1,H,W) complex64; m, x: (N,1,H,W) f32; mean, std: (N,1,1,1) f32
    N, _, H, W = x.shape
    AH, BH = _centered_dft_mats(H)
    AW, BW = _centered_dft_mats(W)
    f1 = jnp.asarray(np.concatenate([AH.real, AH.imag], axis=0), jnp.float32)      # (2H, H)
    f2 = jnp.asarray(np.concatenate([AW.T.real, AW.T.imag], axis=1), jnp.float32)  # (W, 2W)
    b1 = jnp.asarray(np.concatenate([BH.real, BH.imag], axis=0), jnp.float32)      # (2H, H)
    b2 = jnp.asarray(np.concatenate([BW.T.real, BW.T.imag], axis=1), jnp.float32)  # (W, 2W)

    kr = jnp.real(k).astype(jnp.float32)
    ki = jnp.imag(k).astype(jnp.float32)
    mean_s = mean.reshape(N).astype(jnp.float32)
    std_s = std.reshape(N).astype(jnp.float32)

    per = pl.BlockSpec((1, 1, H, W), lambda n: (n, 0, 0, 0))
    smem = pl.BlockSpec(memory_space=pltpu.MemorySpace.SMEM)
    full_hh = pl.BlockSpec((2 * H, H), lambda n: (0, 0))
    full_ww = pl.BlockSpec((W, 2 * W), lambda n: (0, 0))

    out = pl.pallas_call(
        _dc_kernel,
        out_shape=jax.ShapeDtypeStruct((N, 1, H, W), jnp.float32),
        grid=(N,),
        in_specs=[per, per, per, per, smem, smem, full_hh, full_ww, full_hh, full_ww],
        out_specs=per,
        compiler_params=_cparams(("parallel",)),
    )(x, kr, ki, m, mean_s, std_s, f1, f2, b1, b2)
    return out


# ----------------------------------------------------------------------------
# U-Net assembly (glue)
# ----------------------------------------------------------------------------
def _avg_pool2x2(x):
    # TODO(synk): pool/concat kept as XLA glue (one extra feature-map round trip).
    N, C, H, W = x.shape
    return x.reshape(N, C, H // 2, 2, W // 2, 2).mean(axis=(3, 5))


def _conv_block(x, blk):
    x = conv3x3_in_lrelu(x, blk[0])
    x = conv3x3_in_lrelu(x, blk[1])
    return x
    # Dropout2d(p=0.0) is an identity -> omitted.


def unet_apply(params, x):
    stack = []
    out = x
    for blk in params["down"]:
        out = _conv_block(out, blk)
        stack.append(out)
        out = _avg_pool2x2(out)
    out = _conv_block(out, params["bottleneck"])
    for tw, blk in zip(params["up_t"], params["up_conv"]):
        skip = stack.pop()
        out = tconv2x2_in_lrelu(out, tw)
        out = jnp.concatenate([out, skip], axis=1)
        out = _conv_block(out, blk)
    out = conv1x1_bias(out, params["final_w"], params["final_b"])
    return out


def unet_dc_cascade(params, k, m, x, mean, std):
    # cascade = [Unet(1,1,n_filters,num_layers), DataConsistencyModule()]
    x = unet_apply(params, x)
    x = data_consistency(k, m, x, mean, std)
    return x


# ----------------------------------------------------------------------------
# Deterministic parameter init (shapes implied by Unet(1,1,chans,num_pool))
# ----------------------------------------------------------------------------
def init_unet_params(key, in_ch, out_ch, chans, num_pool):
    keys = iter(jax.random.split(key, 64))

    def nrm(shape, scale=0.1):
        return scale * jax.random.normal(next(keys), shape, jnp.float32)

    down = [(nrm((chans, in_ch, 3, 3)), nrm((chans, chans, 3, 3)))]
    ch = chans
    for _ in range(num_pool - 1):
        down.append((nrm((ch * 2, ch, 3, 3)), nrm((ch * 2, ch * 2, 3, 3))))
        ch *= 2
    bottleneck = (nrm((ch * 2, ch, 3, 3)), nrm((ch * 2, ch * 2, 3, 3)))
    up_t, up_conv = [], []
    for _ in range(num_pool - 1):
        up_t.append(nrm((ch * 2, ch, 2, 2)))                       # ConvTranspose2d(ch*2, ch)
        up_conv.append((nrm((ch, ch * 2, 3, 3)), nrm((ch, ch, 3, 3))))
        ch //= 2
    up_t.append(nrm((ch * 2, ch, 2, 2)))
    up_conv.append((nrm((ch, ch * 2, 3, 3)), nrm((ch, ch, 3, 3))))
    final_w = nrm((out_ch, ch))
    final_b = jnp.zeros((out_ch, 1), jnp.float32)
    return dict(down=down, bottleneck=bottleneck, up_t=up_t, up_conv=up_conv,
                final_w=final_w, final_b=final_b)


# ----------------------------------------------------------------------------
if __name__ == "__main__":
    key = jax.random.PRNGKey(0)
    kp, kx, kr_, ki_ = jax.random.split(key, 4)

    N, H, W = 2, 16, 16
    n_filters, num_layers = 4, 2

    params = init_unet_params(kp, 1, 1, n_filters, num_layers)

    x = jax.random.normal(kx, (N, 1, H, W), jnp.float32)
    kspace = (jax.random.normal(kr_, (N, 1, H, W), jnp.float32)
              + 1j * jax.random.normal(ki_, (N, 1, H, W), jnp.float32)).astype(jnp.complex64)
    cols = (jnp.arange(W) % 2 == 0).astype(jnp.float32)            # simple column mask
    m = jnp.broadcast_to(cols, (N, 1, H, W)).astype(jnp.float32)
    mean = jnp.full((N, 1, 1, 1), 0.1, jnp.float32)
    std = jnp.full((N, 1, 1, 1), 1.5, jnp.float32)

    fwd = jax.jit(unet_dc_cascade)
    out = fwd(params, kspace, m, x, mean, std)
    jax.block_until_ready(out)
    assert out.shape == (N, 1, H, W) and out.dtype == jnp.float32
    print("KERNEL_OK")
</pallas_src>

<mosaic_0001>
module attributes {stable_mosaic.version = 11 : i64} {
  func.func @_conv3x3_in_lrelu_kernel(%arg0: i32, %arg1: i32, %arg2: memref<1x1x326xbf16, #tpu.memory_space<vmem>>, %arg3: memref<9x4x1xbf16, #tpu.memory_space<vmem>>, %arg4: memref<1x288xf32, #tpu.memory_space<vmem>>, %arg5: memref<1x4x288xf32, #tpu.memory_space<vmem>>) attributes {dimension_semantics = [#tpu.dimension_semantics<parallel>, #tpu.dimension_semantics<parallel>], iteration_bounds = array<i64: 2, 1>, scalar_prefetch = 0 : i64, scratch_operands = 0 : i64, tpu.core_type = #tpu.core_type<tc>, window_params = [{transform_indices = @transform_0, window_bounds = array<i64: 1, 1, 326>}, {transform_indices = @transform_1, window_bounds = array<i64: 9, 4, 1>}, {pipeline_mode = #tpu.pipeline_mode<synchronous>, transform_indices = @transform_2, window_bounds = array<i64: 1, 288>}, {transform_indices = @transform_3, window_bounds = array<i64: 1, 4, 288>}]} {
    %cst = arith.constant 0.000000e+00 : f32
    %0 = vector.broadcast %cst : f32 to vector<4x288xf32>
    %c0 = arith.constant 0 : index
    %c0_0 = arith.constant 0 : index
    %c0_1 = arith.constant 0 : index
    %1 = vector.load %arg2[%c0, %c0_0, %c0_1] : memref<1x1x326xbf16, #tpu.memory_space<vmem>>, vector<1x1x288xbf16>
    %2 = vector.shape_cast %1 : vector<1x1x288xbf16> to vector<1x288xbf16>
    %c0_2 = arith.constant 0 : index
    %c0_3 = arith.constant 0 : index
    %c0_4 = arith.constant 0 : index
    %3 = vector.load %arg3[%c0_2, %c0_3, %c0_4] : memref<9x4x1xbf16, #tpu.memory_space<vmem>>, vector<1x4x1xbf16>
    %4 = vector.shape_cast %3 : vector<1x4x1xbf16> to vector<4x1xbf16>
    %cst_5 = arith.constant dense<0.000000e+00> : vector<4x288xf32>
    %5 = tpu.matmul %4, %2, %cst_5 {dimension_numbers = #tpu.dot_dimension_numbers<[1], [0], [0], [1], [0, 0, 1, 1], [], []>} : vector<4x1xbf16>, vector<1x288xbf16>, vector<4x288xf32> -> vector<4x288xf32>
    %6 = arith.addf %0, %5 : vector<4x288xf32>
    %c0_6 = arith.constant 0 : index
    %c0_7 = arith.constant 0 : index
    %c1 = arith.constant 1 : index
    %7 = vector.load %arg2[%c0_6, %c0_7, %c1] : memref<1x1x326xbf16, #tpu.memory_space<vmem>>, vector<1x1x288xbf16>
    %8 = vector.shape_cast %7 : vector<1x1x288xbf16> to vector<1x288xbf16>
    %c1_8 = arith.constant 1 : index
    %c0_9 = arith.constant 0 : index
    %c0_10 = arith.constant 0 : index
    %9 = vector.load %arg3[%c1_8, %c0_9, %c0_10] : memref<9x4x1xbf16, #tpu.memory_space<vmem>>, vector<1x4x1xbf16>
    %10 = vector.shape_cast %9 : vector<1x4x1xbf16> to vector<4x1xbf16>
    %cst_11 = arith.constant dense<0.000000e+00> : vector<4x288xf32>
    %11 = tpu.matmul %10, %8, %cst_11 {dimension_numbers = #tpu.dot_dimension_numbers<[1], [0], [0], [1], [0, 0, 1, 1], [], []>} : vector<4x1xbf16>, vector<1x288xbf16>, vector<4x288xf32> -> vector<4x288xf32>
    %12 = arith.addf %6, %11 : vector<4x288xf32>
    %c0_12 = arith.constant 0 : index
    %c0_13 = arith.constant 0 : index
    %c2 = arith.constant 2 : index
    %13 = vector.load %arg2[%c0_12, %c0_13, %c2] : memref<1x1x326xbf16, #tpu.memory_space<vmem>>, vector<1x1x288xbf16>
    %14 = vector.shape_cast %13 : vector<1x1x288xbf16> to vector<1x288xbf16>
    %c2_14 = arith.constant 2 : index
    %c0_15 = arith.constant 0 : index
    %c0_16 = arith.constant 0 : index
    %15 = vector.load %arg3[%c2_14, %c0_15, %c0_16] : memref<9x4x1xbf16, #tpu.memory_space<vmem>>, vector<1x4x1xbf16>
    %16 = vector.shape_cast %15 : vector<1x4x1xbf16> to vector<4x1xbf16>
    %cst_17 = arith.constant dense<0.000000e+00> : vector<4x288xf32>
    %17 = tpu.matmul %16, %14, %cst_17 {dimension_numbers = #tpu.dot_dimension_numbers<[1], [0], [0], [1], [0, 0, 1, 1], [], []>} : vector<4x1xbf16>, vector<1x288xbf16>, vector<4x288xf32> -> vector<4x288xf32>
    %18 = arith.addf %12, %17 : vector<4x288xf32>
    %c0_18 = arith.constant 0 : index
    %c0_19 = arith.constant 0 : index
    %c18 = arith.constant 18 : index
    %19 = vector.load %arg2[%c0_18, %c0_19, %c18] : memref<1x1x326xbf16, #tpu.memory_space<vmem>>, vector<1x1x288xbf16>
    %20 = vector.shape_cast %19 : vector<1x1x288xbf16> to vector<1x288xbf16>
    %c3 = arith.constant 3 : index
    %c0_20 = arith.constant 0 : index
    %c0_21 = arith.constant 0 : index
    %21 = vector.load %arg3[%c3, %c0_20, %c0_21] : memref<9x4x1xbf16, #tpu.memory_space<vmem>>, vector<1x4x1xbf16>
    %22 = vector.shape_cast %21 : vector<1x4x1xbf16> to vector<4x1xbf16>
    %cst_22 = arith.constant dense<0.000000e+00> : vector<4x288xf32>
    %23 = tpu.matmul %22, %20, %cst_22 {dimension_numbers = #tpu.dot_dimension_numbers<[1], [0], [0], [1], [0, 0, 1, 1], [], []>} : vector<4x1xbf16>, vector<1x288xbf16>, vector<4x288xf32> -> vector<4x288xf32>
    %24 = arith.addf %18, %23 : vector<4x288xf32>
    %c0_23 = arith.constant 0 : index
    %c0_24 = arith.constant 0 : index
    %c19 = arith.constant 19 : index
    %25 = vector.load %arg2[%c0_23, %c0_24, %c19] : memref<1x1x326xbf16, #tpu.memory_space<vmem>>, vector<1x1x288xbf16>
    %26 = vector.shape_cast %25 : vector<1x1x288xbf16> to vector<1x288xbf16>
    %c4 = arith.constant 4 : index
    %c0_25 = arith.constant 0 : index
    %c0_26 = arith.constant 0 : index
    %27 = vector.load %arg3[%c4, %c0_25, %c0_26] : memref<9x4x1xbf16, #tpu.memory_space<vmem>>, vector<1x4x1xbf16>
    %28 = vector.shape_cast %27 : vector<1x4x1xbf16> to vector<4x1xbf16>
    %cst_27 = arith.constant dense<0.000000e+00> : vector<4x288xf32>
    %29 = tpu.matmul %28, %26, %cst_27 {dimension_numbers = #tpu.dot_dimension_numbers<[1], [0], [0], [1], [0, 0, 1, 1], [], []>} : vector<4x1xbf16>, vector<1x288xbf16>, vector<4x288xf32> -> vector<4x288xf32>
    %30 = arith.addf %24, %29 : vector<4x288xf32>
    %c0_28 = arith.constant 0 : index
    %c0_29 = arith.constant 0 : index
    %c20 = arith.constant 20 : index
    %31 = vector.load %arg2[%c0_28, %c0_29, %c20] : memref<1x1x326xbf16, #tpu.memory_space<vmem>>, vector<1x1x288xbf16>
    %32 = vector.shape_cast %31 : vector<1x1x288xbf16> to vector<1x288xbf16>
    %c5 = arith.constant 5 : index
    %c0_30 = arith.constant 0 : index
    %c0_31 = arith.constant 0 : index
    %33 = vector.load %arg3[%c5, %c0_30, %c0_31] : memref<9x4x1xbf16, #tpu.memory_space<vmem>>, vector<1x4x1xbf16>
    %34 = vector.shape_cast %33 : vector<1x4x1xbf16> to vector<4x1xbf16>
    %cst_32 = arith.constant dense<0.000000e+00> : vector<4x288xf32>
    %35 = tpu.matmul %34, %32, %cst_32 {dimension_numbers = #tpu.dot_dimension_numbers<[1], [0], [0], [1], [0, 0, 1, 1], [], []>} : vector<4x1xbf16>, vector<1x288xbf16>, vector<4x288xf32> -> vector<4x288xf32>
    %36 = arith.addf %30, %35 : vector<4x288xf32>
    %c0_33 = arith.constant 0 : index
    %c0_34 = arith.constant 0 : index
    %c36 = arith.constant 36 : index
    %37 = vector.load %arg2[%c0_33, %c0_34, %c36] : memref<1x1x326xbf16, #tpu.memory_space<vmem>>, vector<1x1x288xbf16>
    %38 = vector.shape_cast %37 : vector<1x1x288xbf16> to vector<1x288xbf16>
    %c6 = arith.constant 6 : index
    %c0_35 = arith.constant 0 : index
    %c0_36 = arith.constant 0 : index
    %39 = vector.load %arg3[%c6, %c0_35, %c0_36] : memref<9x4x1xbf16, #tpu.memory_space<vmem>>, vector<1x4x1xbf16>
    %40 = vector.shape_cast %39 : vector<1x4x1xbf16> to vector<4x1xbf16>
    %cst_37 = arith.constant dense<0.000000e+00> : vector<4x288xf32>
    %41 = tpu.matmul %40, %38, %cst_37 {dimension_numbers = #tpu.dot_dimension_numbers<[1], [0], [0], [1], [0, 0, 1, 1], [], []>} : vector<4x1xbf16>, vector<1x288xbf16>, vector<4x288xf32> -> vector<4x288xf32>
    %42 = arith.addf %36, %41 : vector<4x288xf32>
    %c0_38 = arith.constant 0 : index
    %c0_39 = arith.constant 0 : index
    %c37 = arith.constant 37 : index
    %43 = vector.load %arg2[%c0_38, %c0_39, %c37] : memref<1x1x326xbf16, #tpu.memory_space<vmem>>, vector<1x1x288xbf16>
    %44 = vector.shape_cast %43 : vector<1x1x288xbf16> to vector<1x288xbf16>
    %c7 = arith.constant 7 : index
    %c0_40 = arith.constant 0 : index
    %c0_41 = arith.constant 0 : index
    %45 = vector.load %arg3[%c7, %c0_40, %c0_41] : memref<9x4x1xbf16, #tpu.memory_space<vmem>>, vector<1x4x1xbf16>
    %46 = vector.shape_cast %45 : vector<1x4x1xbf16> to vector<4x1xbf16>
    %cst_42 = arith.constant dense<0.000000e+00> : vector<4x288xf32>
    %47 = tpu.matmul %46, %44, %cst_42 {dimension_numbers = #tpu.dot_dimension_numbers<[1], [0], [0], [1], [0, 0, 1, 1], [], []>} : vector<4x1xbf16>, vector<1x288xbf16>, vector<4x288xf32> -> vector<4x288xf32>
    %48 = arith.addf %42, %47 : vector<4x288xf32>
    %c0_43 = arith.constant 0 : index
    %c0_44 = arith.constant 0 : index
    %c38 = arith.constant 38 : index
    %49 = vector.load %arg2[%c0_43, %c0_44, %c38] : memref<1x1x326xbf16, #tpu.memory_space<vmem>>, vector<1x1x288xbf16>
    %50 = vector.shape_cast %49 : vector<1x1x288xbf16> to vector<1x288xbf16>
    %c8 = arith.constant 8 : index
    %c0_45 = arith.constant 0 : index
    %c0_46 = arith.constant 0 : index
    %51 = vector.load %arg3[%c8, %c0_45, %c0_46] : memref<9x4x1xbf16, #tpu.memory_space<vmem>>, vector<1x4x1xbf16>
    %52 = vector.shape_cast %51 : vector<1x4x1xbf16> to vector<4x1xbf16>
    %cst_47 = arith.constant dense<0.000000e+00> : vector<4x288xf32>
    %53 = tpu.matmul %52, %50, %cst_47 {dimension_numbers = #tpu.dot_dimension_numbers<[1], [0], [0], [1], [0, 0, 1, 1], [], []>} : vector<4x1xbf16>, vector<1x288xbf16>, vector<4x288xf32> -> vector<4x288xf32>
    %54 = arith.addf %48, %53 : vector<4x288xf32>
    %c0_48 = arith.constant 0 : index
    %c0_49 = arith.constant 0 : index
    %55 = vector.load %arg4[%c0_48, %c0_49] : memref<1x288xf32, #tpu.memory_space<vmem>>, vector<1x288xf32>
    %56 = vector.broadcast %55 : vector<1x288xf32> to vector<4x288xf32>
    %57 = arith.mulf %54, %56 : vector<4x288xf32>
    %cst_50 = arith.constant dense<0.000000e+00> : vector<4xf32>
    %58 = vector.multi_reduction <add>, %57, %cst_50 [1] : vector<4x288xf32> to vector<4xf32>
    %59 = vector.shape_cast %58 : vector<4xf32> to vector<4x1xf32>
    %cst_51 = arith.constant 3.906250e-03 : f32
    %60 = vector.broadcast %cst_51 : f32 to vector<4x1xf32>
    %61 = arith.mulf %59, %60 : vector<4x1xf32>
    %62 = arith.mulf %57, %57 : vector<4x288xf32>
    %cst_52 = arith.constant dense<0.000000e+00> : vector<4xf32>
    %63 = vector.multi_reduction <add>, %62, %cst_52 [1] : vector<4x288xf32> to vector<4xf32>
    %64 = vector.shape_cast %63 : vector<4xf32> to vector<4x1xf32>
    %cst_53 = arith.constant 3.906250e-03 : f32
    %65 = vector.broadcast %cst_53 : f32 to vector<4x1xf32>
    %66 = arith.mulf %64, %65 : vector<4x1xf32>
    %67 = arith.mulf %61, %61 : vector<4x1xf32>
    %68 = arith.subf %66, %67 : vector<4x1xf32>
    %cst_54 = arith.constant 0.000000e+00 : f32
    %69 = vector.broadcast %cst_54 : f32 to vector<4x1xf32>
    %70 = arith.maximumf %68, %69 : vector<4x1xf32>
    %71 = vector.broadcast %61 : vector<4x1xf32> to vector<4x288xf32>
    %72 = arith.subf %54, %71 : vector<4x288xf32>
    %cst_55 = arith.constant 9.99999974E-6 : f32
    %73 = vector.broadcast %cst_55 : f32 to vector<4x1xf32>
    %74 = arith.addf %70, %73 : vector<4x1xf32>
    %75 = math.rsqrt %74 : vector<4x1xf32>
    %76 = vector.broadcast %75 : vector<4x1xf32> to vector<4x288xf32>
    %77 = arith.mulf %72, %76 : vector<4x288xf32>
    %cst_56 = arith.constant 0.000000e+00 : f32
    %78 = vector.broadcast %cst_56 : f32 to vector<4x288xf32>
    %79 = arith.cmpf oge, %77, %78 : vector<4x288xf32>
    %cst_57 = arith.constant 2.000000e-01 : f32
    %80 = vector.broadcast %cst_57 : f32 to vector<4x288xf32>
    %81 = arith.mulf %80, %77 : vector<4x288xf32>
    %82 = arith.select %79, %77, %81 : vector<4x288xi1>, vector<4x288xf32>
    %c0_58 = arith.constant 0 : index
    %c0_59 = arith.constant 0 : index
    %c0_60 = arith.constant 0 : index
    %83 = vector.load %arg5[%c0_58, %c0_59, %c0_60] : memref<1x4x288xf32, #tpu.memory_space<vmem>>, vector<1x4x288xf32>
    %84 = vector.shape_cast %83 : vector<1x4x288xf32> to vector<4x288xf32>
    %85 = vector.shape_cast %82 : vector<4x288xf32> to vector<1x4x288xf32>
    tpu.vector_store %arg5[%c0_58, %c0_59, %c0_60], %85 {strides = array<i32>} : memref<1x4x288xf32, #tpu.memory_space<vmem>>, vector<1x4x288xf32>,
    return
  }
  func.func @transform_0(%arg0: i32, %arg1: i32) -> (i32, i32, i32) {
    %c0_i32 = arith.constant 0 : i32
    %c0_i32_0 = arith.constant 0 : i32
    %c0_i32_1 = arith.constant 0 : i32
    return %arg0, %c0_i32, %c0_i32_0 : i32, i32, i32
  }
  func.func @transform_1(%arg0: i32, %arg1: i32) -> (i32, i32, i32) {
    %c0_i32 = arith.constant 0 : i32
    %c0_i32_0 = arith.constant 0 : i32
    %c0_i32_1 = arith.constant 0 : i32
    return %c0_i32, %arg1, %c0_i32_0 : i32, i32, i32
  }
  func.func @transform_2(%arg0: i32, %arg1: i32) -> (i32, i32) {
    %c0_i32 = arith.constant 0 : i32
    %c0_i32_0 = arith.constant 0 : i32
    %c0_i32_1 = arith.constant 0 : i32
    return %c0_i32, %c0_i32_0 : i32, i32
  }
  func.func @transform_3(%arg0: i32, %arg1: i32) -> (i32, i32, i32) {
    %c0_i32 = arith.constant 0 : i32
    %c0_i32_0 = arith.constant 0 : i32
    return %arg0, %arg1, %c0_i32 : i32, i32, i32
  }
}

module attributes {stable_mosaic.version = 11 : i64} {
  func.func @_conv3x3_in_lrelu_kernel(%arg0: i32, %arg1: i32, %arg2: memref<1x4x326xbf16, #tpu.memory_space<vmem>>, %arg3: memref<9x4x4xbf16, #tpu.memory_space<vmem>>, %arg4: memref<1x288xf32, #tpu.memory_space<vmem>>, %arg5: memref<1x4x288xf32, #tpu.memory_space<vmem>>) attributes {dimension_semantics = [#tpu.dimension_semantics<parallel>, #tpu.dimension_semantics<parallel>], iteration_bounds = array<i64: 2, 1>, scalar_prefetch = 0 : i64, scratch_operands = 0 : i64, tpu.core_type = #tpu.core_type<tc>, window_params = [{transform_indices = @transform_0, window_bounds = array<i64: 1, 4, 326>}, {transform_indices = @transform_1, window_bounds = array<i64: 9, 4, 4>}, {pipeline_mode = #tpu.pipeline_mode<synchronous>, transform_indices = @transform_2, window_bounds = array<i64: 1, 288>}, {transform_indices = @transform_3, window_bounds = array<i64: 1, 4, 288>}]} {
    %cst = arith.constant 0.000000e+00 : f32
    %0 = vector.broadcast %cst : f32 to vector<4x288xf32>
    %c0 = arith.constant 0 : index
    %c0_0 = arith.constant 0 : index
    %c0_1 = arith.constant 0 : index
    %1 = vector.load %arg2[%c0, %c0_0, %c0_1] : memref<1x4x326xbf16, #tpu.memory_space<vmem>>, vector<1x4x288xbf16>
    %2 = vector.shape_cast %1 : vector<1x4x288xbf16> to vector<4x288xbf16>
    %c0_2 = arith.constant 0 : index
    %c0_3 = arith.constant 0 : index
    %c0_4 = arith.constant 0 : index
    %3 = vector.load %arg3[%c0_2, %c0_3, %c0_4] : memref<9x4x4xbf16, #tpu.memory_space<vmem>>, vector<1x4x4xbf16>
    %4 = vector.shape_cast %3 : vector<1x4x4xbf16> to vector<4x4xbf16>
    %cst_5 = arith.constant dense<0.000000e+00> : vector<4x288xf32>
    %5 = tpu.matmul %4, %2, %cst_5 {dimension_numbers = #tpu.dot_dimension_numbers<[1], [0], [0], [1], [0, 0, 1, 1], [], []>} : vector<4x4xbf16>, vector<4x288xbf16>, vector<4x288xf32> -> vector<4x288xf32>
    %6 = arith.addf %0, %5 : vector<4x288xf32>
    %c0_6 = arith.constant 0 : index
    %c0_7 = arith.constant 0 : index
    %c1 = arith.constant 1 : index
    %7 = vector.load %arg2[%c0_6, %c0_7, %c1] : memref<1x4x326xbf16, #tpu.memory_space<vmem>>, vector<1x4x288xbf16>
    %8 = vector.shape_cast %7 : vector<1x4x288xbf16> to vector<4x288xbf16>
    %c1_8 = arith.constant 1 : index
    %c0_9 = arith.constant 0 : index
    %c0_10 = arith.constant 0 : index
    %9 = vector.load %arg3[%c1_8, %c0_9, %c0_10] : memref<9x4x4xbf16, #tpu.memory_space<vmem>>, vector<1x4x4xbf16>
    %10 = vector.shape_cast %9 : vector<1x4x4xbf16> to vector<4x4xbf16>
    %cst_11 = arith.constant dense<0.000000e+00> : vector<4x288xf32>
    %11 = tpu.matmul %10, %8, %cst_11 {dimension_numbers = #tpu.dot_dimension_numbers<[1], [0], [0], [1], [0, 0, 1, 1], [], []>} : vector<4x4xbf16>, vector<4x288xbf16>, vector<4x288xf32> -> vector<4x288xf32>
    %12 = arith.addf %6, %11 : vector<4x288xf32>
    %c0_12 = arith.constant 0 : index
    %c0_13 = arith.constant 0 : index
    %c2 = arith.constant 2 : index
    %13 = vector.load %arg2[%c0_12, %c0_13, %c2] : memref<1x4x326xbf16, #tpu.memory_space<vmem>>, vector<1x4x288xbf16>
    %14 = vector.shape_cast %13 : vector<1x4x288xbf16> to vector<4x288xbf16>
    %c2_14 = arith.constant 2 : index
    %c0_15 = arith.constant 0 : index
    %c0_16 = arith.constant 0 : index
    %15 = vector.load %arg3[%c2_14, %c0_15, %c0_16] : memref<9x4x4xbf16, #tpu.memory_space<vmem>>, vector<1x4x4xbf16>
    %16 = vector.shape_cast %15 : vector<1x4x4xbf16> to vector<4x4xbf16>
    %cst_17 = arith.constant dense<0.000000e+00> : vector<4x288xf32>
    %17 = tpu.matmul %16, %14, %cst_17 {dimension_numbers = #tpu.dot_dimension_numbers<[1], [0], [0], [1], [0, 0, 1, 1], [], []>} : vector<4x4xbf16>, vector<4x288xbf16>, vector<4x288xf32> -> vector<4x288xf32>
    %18 = arith.addf %12, %17 : vector<4x288xf32>
    %c0_18 = arith.constant 0 : index
    %c0_19 = arith.constant 0 : index
    %c18 = arith.constant 18 : index
    %19 = vector.load %arg2[%c0_18, %c0_19, %c18] : memref<1x4x326xbf16, #tpu.memory_space<vmem>>, vector<1x4x288xbf16>
    %20 = vector.shape_cast %19 : vector<1x4x288xbf16> to vector<4x288xbf16>
    %c3 = arith.constant 3 : index
    %c0_20 = arith.constant 0 : index
    %c0_21 = arith.constant 0 : index
    %21 = vector.load %arg3[%c3, %c0_20, %c0_21] : memref<9x4x4xbf16, #tpu.memory_space<vmem>>, vector<1x4x4xbf16>
    %22 = vector.shape_cast %21 : vector<1x4x4xbf16> to vector<4x4xbf16>
    %cst_22 = arith.constant dense<0.000000e+00> : vector<4x288xf32>
    %23 = tpu.matmul %22, %20, %cst_22 {dimension_numbers = #tpu.dot_dimension_numbers<[1], [0], [0], [1], [0, 0, 1, 1], [], []>} : vector<4x4xbf16>, vector<4x288xbf16>, vector<4x288xf32> -> vector<4x288xf32>
    %24 = arith.addf %18, %23 : vector<4x288xf32>
    %c0_23 = arith.constant 0 : index
    %c0_24 = arith.constant 0 : index
    %c19 = arith.constant 19 : index
    %25 = vector.load %arg2[%c0_23, %c0_24, %c19] : memref<1x4x326xbf16, #tpu.memory_space<vmem>>, vector<1x4x288xbf16>
    %26 = vector.shape_cast %25 : vector<1x4x288xbf16> to vector<4x288xbf16>
    %c4 = arith.constant 4 : index
    %c0_25 = arith.constant 0 : index
    %c0_26 = arith.constant 0 : index
    %27 = vector.load %arg3[%c4, %c0_25, %c0_26] : memref<9x4x4xbf16, #tpu.memory_space<vmem>>, vector<1x4x4xbf16>
    %28 = vector.shape_cast %27 : vector<1x4x4xbf16> to vector<4x4xbf16>
    %cst_27 = arith.constant dense<0.000000e+00> : vector<4x288xf32>
    %29 = tpu.matmul %28, %26, %cst_27 {dimension_numbers = #tpu.dot_dimension_numbers<[1], [0], [0], [1], [0, 0, 1, 1], [], []>} : vector<4x4xbf16>, vector<4x288xbf16>, vector<4x288xf32> -> vector<4x288xf32>
    %30 = arith.addf %24, %29 : vector<4x288xf32>
    %c0_28 = arith.constant 0 : index
    %c0_29 = arith.constant 0 : index
    %c20 = arith.constant 20 : index
    %31 = vector.load %arg2[%c0_28, %c0_29, %c20] : memref<1x4x326xbf16, #tpu.memory_space<vmem>>, vector<1x4x288xbf16>
    %32 = vector.shape_cast %31 : vector<1x4x288xbf16> to vector<4x288xbf16>
    %c5 = arith.constant 5 : index
    %c0_30 = arith.constant 0 : index
    %c0_31 = arith.constant 0 : index
    %33 = vector.load %arg3[%c5, %c0_30, %c0_31] : memref<9x4x4xbf16, #tpu.memory_space<vmem>>, vector<1x4x4xbf16>
    %34 = vector.shape_cast %33 : vector<1x4x4xbf16> to vector<4x4xbf16>
    %cst_32 = arith.constant dense<0.000000e+00> : vector<4x288xf32>
    %35 = tpu.matmul %34, %32, %cst_32 {dimension_numbers = #tpu.dot_dimension_numbers<[1], [0], [0], [1], [0, 0, 1, 1], [], []>} : vector<4x4xbf16>, vector<4x288xbf16>, vector<4x288xf32> -> vector<4x288xf32>
    %36 = arith.addf %30, %35 : vector<4x288xf32>
    %c0_33 = arith.constant 0 : index
    %c0_34 = arith.constant 0 : index
    %c36 = arith.constant 36 : index
    %37 = vector.load %arg2[%c0_33, %c0_34, %c36] : memref<1x4x326xbf16, #tpu.memory_space<vmem>>, vector<1x4x288xbf16>
    %38 = vector.shape_cast %37 : vector<1x4x288xbf16> to vector<4x288xbf16>
    %c6 = arith.constant 6 : index
    %c0_35 = arith.constant 0 : index
    %c0_36 = arith.constant 0 : index
    %39 = vector.load %arg3[%c6, %c0_35, %c0_36] : memref<9x4x4xbf16, #tpu.memory_space<vmem>>, vector<1x4x4xbf16>
    %40 = vector.shape_cast %39 : vector<1x4x4xbf16> to vector<4x4xbf16>
    %cst_37 = arith.constant dense<0.000000e+00> : vector<4x288xf32>
    %41 = tpu.matmul %40, %38, %cst_37 {dimension_numbers = #tpu.dot_dimension_numbers<[1], [0], [0], [1], [0, 0, 1, 1], [], []>} : vector<4x4xbf16>, vector<4x288xbf16>, vector<4x288xf32> -> vector<4x288xf32>
    %42 = arith.addf %36, %41 : vector<4x288xf32>
    %c0_38 = arith.constant 0 : index
    %c0_39 = arith.constant 0 : index
    %c37 = arith.constant 37 : index
    %43 = vector.load %arg2[%c0_38, %c0_39, %c37] : memref<1x4x326xbf16, #tpu.memory_space<vmem>>, vector<1x4x288xbf16>
    %44 = vector.shape_cast %43 : vector<1x4x288xbf16> to vector<4x288xbf16>
    %c7 = arith.constant 7 : index
    %c0_40 = arith.constant 0 : index
    %c0_41 = arith.constant 0 : index
    %45 = vector.load %arg3[%c7, %c0_40, %c0_41] : memref<9x4x4xbf16, #tpu.memory_space<vmem>>, vector<1x4x4xbf16>
    %46 = vector.shape_cast %45 : vector<1x4x4xbf16> to vector<4x4xbf16>
    %cst_42 = arith.constant dense<0.000000e+00> : vector<4x288xf32>
    %47 = tpu.matmul %46, %44, %cst_42 {dimension_numbers = #tpu.dot_dimension_numbers<[1], [0], [0], [1], [0, 0, 1, 1], [], []>} : vector<4x4xbf16>, vector<4x288xbf16>, vector<4x288xf32> -> vector<4x288xf32>
    %48 = arith.addf %42, %47 : vector<4x288xf32>
    %c0_43 = arith.constant 0 : index
    %c0_44 = arith.constant 0 : index
    %c38 = arith.constant 38 : index
    %49 = vector.load %arg2[%c0_43, %c0_44, %c38] : memref<1x4x326xbf16, #tpu.memory_space<vmem>>, vector<1x4x288xbf16>
    %50 = vector.shape_cast %49 : vector<1x4x288xbf16> to vector<4x288xbf16>
    %c8 = arith.constant 8 : index
    %c0_45 = arith.constant 0 : index
    %c0_46 = arith.constant 0 : index
    %51 = vector.load %arg3[%c8, %c0_45, %c0_46] : memref<9x4x4xbf16, #tpu.memory_space<vmem>>, vector<1x4x4xbf16>
    %52 = vector.shape_cast %51 : vector<1x4x4xbf16> to vector<4x4xbf16>
    %cst_47 = arith.constant dense<0.000000e+00> : vector<4x288xf32>
    %53 = tpu.matmul %52, %50, %cst_47 {dimension_numbers = #tpu.dot_dimension_numbers<[1], [0], [0], [1], [0, 0, 1, 1], [], []>} : vector<4x4xbf16>, vector<4x288xbf16>, vector<4x288xf32> -> vector<4x288xf32>
    %54 = arith.addf %48, %53 : vector<4x288xf32>
    %c0_48 = arith.constant 0 : index
    %c0_49 = arith.constant 0 : index
    %55 = vector.load %arg4[%c0_48, %c0_49] : memref<1x288xf32, #tpu.memory_space<vmem>>, vector<1x288xf32>
    %56 = vector.broadcast %55 : vector<1x288xf32> to vector<4x288xf32>
    %57 = arith.mulf %54, %56 : vector<4x288xf32>
    %cst_50 = arith.constant dense<0.000000e+00> : vector<4xf32>
    %58 = vector.multi_reduction <add>, %57, %cst_50 [1] : vector<4x288xf32> to vector<4xf32>
    %59 = vector.shape_cast %58 : vector<4xf32> to vector<4x1xf32>
    %cst_51 = arith.constant 3.906250e-03 : f32
    %60 = vector.broadcast %cst_51 : f32 to vector<4x1xf32>
    %61 = arith.mulf %59, %60 : vector<4x1xf32>
    %62 = arith.mulf %57, %57 : vector<4x288xf32>
    %cst_52 = arith.constant dense<0.000000e+00> : vector<4xf32>
    %63 = vector.multi_reduction <add>, %62, %cst_52 [1] : vector<4x288xf32> to vector<4xf32>
    %64 = vector.shape_cast %63 : vector<4xf32> to vector<4x1xf32>
    %cst_53 = arith.constant 3.906250e-03 : f32
    %65 = vector.broadcast %cst_53 : f32 to vector<4x1xf32>
    %66 = arith.mulf %64, %65 : vector<4x1xf32>
    %67 = arith.mulf %61, %61 : vector<4x1xf32>
    %68 = arith.subf %66, %67 : vector<4x1xf32>
    %cst_54 = arith.constant 0.000000e+00 : f32
    %69 = vector.broadcast %cst_54 : f32 to vector<4x1xf32>
    %70 = arith.maximumf %68, %69 : vector<4x1xf32>
    %71 = vector.broadcast %61 : vector<4x1xf32> to vector<4x288xf32>
    %72 = arith.subf %54, %71 : vector<4x288xf32>
    %cst_55 = arith.constant 9.99999974E-6 : f32
    %73 = vector.broadcast %cst_55 : f32 to vector<4x1xf32>
    %74 = arith.addf %70, %73 : vector<4x1xf32>
    %75 = math.rsqrt %74 : vector<4x1xf32>
    %76 = vector.broadcast %75 : vector<4x1xf32> to vector<4x288xf32>
    %77 = arith.mulf %72, %76 : vector<4x288xf32>
    %cst_56 = arith.constant 0.000000e+00 : f32
    %78 = vector.broadcast %cst_56 : f32 to vector<4x288xf32>
    %79 = arith.cmpf oge, %77, %78 : vector<4x288xf32>
    %cst_57 = arith.constant 2.000000e-01 : f32
    %80 = vector.broadcast %cst_57 : f32 to vector<4x288xf32>
    %81 = arith.mulf %80, %77 : vector<4x288xf32>
    %82 = arith.select %79, %77, %81 : vector<4x288xi1>, vector<4x288xf32>
    %c0_58 = arith.constant 0 : index
    %c0_59 = arith.constant 0 : index
    %c0_60 = arith.constant 0 : index
    %83 = vector.load %arg5[%c0_58, %c0_59, %c0_60] : memref<1x4x288xf32, #tpu.memory_space<vmem>>, vector<1x4x288xf32>
    %84 = vector.shape_cast %83 : vector<1x4x288xf32> to vector<4x288xf32>
    %85 = vector.shape_cast %82 : vector<4x288xf32> to vector<1x4x288xf32>
    tpu.vector_store %arg5[%c0_58, %c0_59, %c0_60], %85 {strides = array<i32>} : memref<1x4x288xf32, #tpu.memory_space<vmem>>, vector<1x4x288xf32>,
    return
  }
  func.func @transform_0(%arg0: i32, %arg1: i32) -> (i32, i32, i32) {
    %c0_i32 = arith.constant 0 : i32
    %c0_i32_0 = arith.constant 0 : i32
    %c0_i32_1 = arith.constant 0 : i32
    return %arg0, %c0_i32, %c0_i32_0 : i32, i32, i32
  }
  func.func @transform_1(%arg0: i32, %arg1: i32) -> (i32, i32, i32) {
    %c0_i32 = arith.constant 0 : i32
    %c0_i32_0 = arith.constant 0 : i32
    %c0_i32_1 = arith.constant 0 : i32
    return %c0_i32, %arg1, %c0_i32_0 : i32, i32, i32
  }
  func.func @transform_2(%arg0: i32, %arg1: i32) -> (i32, i32) {
    %c0_i32 = arith.constant 0 : i32
    %c0_i32_0 = arith.constant 0 : i32
    %c0_i32_1 = arith.constant 0 : i32
    return %c0_i32, %c0_i32_0 : i32, i32
  }
  func.func @transform_3(%arg0: i32, %arg1: i32) -> (i32, i32, i32) {
    %c0_i32 = arith.constant 0 : i32
    %c0_i32_0 = arith.constant 0 : i32
    return %arg0, %arg1, %c0_i32 : i32, i32, i32
  }
}

module attributes {stable_mosaic.version = 11 : i64} {
  func.func @_conv3x3_in_lrelu_kernel(%arg0: i32, %arg1: i32, %arg2: memref<1x4x102xbf16, #tpu.memory_space<vmem>>, %arg3: memref<9x8x4xbf16, #tpu.memory_space<vmem>>, %arg4: memref<1x80xf32, #tpu.memory_space<vmem>>, %arg5: memref<1x8x80xf32, #tpu.memory_space<vmem>>) attributes {dimension_semantics = [#tpu.dimension_semantics<parallel>, #tpu.dimension_semantics<parallel>], iteration_bounds = array<i64: 2, 1>, scalar_prefetch = 0 : i64, scratch_operands = 0 : i64, tpu.core_type = #tpu.core_type<tc>, window_params = [{transform_indices = @transform_0, window_bounds = array<i64: 1, 4, 102>}, {transform_indices = @transform_1, window_bounds = array<i64: 9, 8, 4>}, {pipeline_mode = #tpu.pipeline_mode<synchronous>, transform_indices = @transform_2, window_bounds = array<i64: 1, 80>}, {transform_indices = @transform_3, window_bounds = array<i64: 1, 8, 80>}]} {
    %cst = arith.constant 0.000000e+00 : f32
    %0 = vector.broadcast %cst : f32 to vector<8x80xf32>
    %c0 = arith.constant 0 : index
    %c0_0 = arith.constant 0 : index
    %c0_1 = arith.constant 0 : index
    %1 = vector.load %arg2[%c0, %c0_0, %c0_1] : memref<1x4x102xbf16, #tpu.memory_space<vmem>>, vector<1x4x80xbf16>
    %2 = vector.shape_cast %1 : vector<1x4x80xbf16> to vector<4x80xbf16>
    %c0_2 = arith.constant 0 : index
    %c0_3 = arith.constant 0 : index
    %c0_4 = arith.constant 0 : index
    %3 = vector.load %arg3[%c0_2, %c0_3, %c0_4] : memref<9x8x4xbf16, #tpu.memory_space<vmem>>, vector<1x8x4xbf16>
    %4 = vector.shape_cast %3 : vector<1x8x4xbf16> to vector<8x4xbf16>
    %cst_5 = arith.constant dense<0.000000e+00> : vector<8x80xf32>
    %5 = tpu.matmul %4, %2, %cst_5 {dimension_numbers = #tpu.dot_dimension_numbers<[1], [0], [0], [1], [0, 0, 1, 1], [], []>} : vector<8x4xbf16>, vector<4x80xbf16>, vector<8x80xf32> -> vector<8x80xf32>
    %6 = arith.addf %0, %5 : vector<8x80xf32>
    %c0_6 = arith.constant 0 : index
    %c0_7 = arith.constant 0 : index
    %c1 = arith.constant 1 : index
    %7 = vector.load %arg2[%c0_6, %c0_7, %c1] : memref<1x4x102xbf16, #tpu.memory_space<vmem>>, vector<1x4x80xbf16>
    %8 = vector.shape_cast %7 : vector<1x4x80xbf16> to vector<4x80xbf16>
    %c1_8 = arith.constant 1 : index
    %c0_9 = arith.constant 0 : index
    %c0_10 = arith.constant 0 : index
    %9 = vector.load %arg3[%c1_8, %c0_9, %c0_10] : memref<9x8x4xbf16, #tpu.memory_space<vmem>>, vector<1x8x4xbf16>
    %10 = vector.shape_cast %9 : vector<1x8x4xbf16> to vector<8x4xbf16>
    %cst_11 = arith.constant dense<0.000000e+00> : vector<8x80xf32>
    %11 = tpu.matmul %10, %8, %cst_11 {dimension_numbers = #tpu.dot_dimension_numbers<[1], [0], [0], [1], [0, 0, 1, 1], [], []>} : vector<8x4xbf16>, vector<4x80xbf16>, vector<8x80xf32> -> vector<8x80xf32>
    %12 = arith.addf %6, %11 : vector<8x80xf32>
    %c0_12 = arith.constant 0 : index
    %c0_13 = arith.constant 0 : index
    %c2 = arith.constant 2 : index
    %13 = vector.load %arg2[%c0_12, %c0_13, %c2] : memref<1x4x102xbf16, #tpu.memory_space<vmem>>, vector<1x4x80xbf16>
    %14 = vector.shape_cast %13 : vector<1x4x80xbf16> to vector<4x80xbf16>
    %c2_14 = arith.constant 2 : index
    %c0_15 = arith.constant 0 : index
    %c0_16 = arith.constant 0 : index
    %15 = vector.load %arg3[%c2_14, %c0_15, %c0_16] : memref<9x8x4xbf16, #tpu.memory_space<vmem>>, vector<1x8x4xbf16>
    %16 = vector.shape_cast %15 : vector<1x8x4xbf16> to vector<8x4xbf16>
    %cst_17 = arith.constant dense<0.000000e+00> : vector<8x80xf32>
    %17 = tpu.matmul %16, %14, %cst_17 {dimension_numbers = #tpu.dot_dimension_numbers<[1], [0], [0], [1], [0, 0, 1, 1], [], []>} : vector<8x4xbf16>, vector<4x80xbf16>, vector<8x80xf32> -> vector<8x80xf32>
    %18 = arith.addf %12, %17 : vector<8x80xf32>
    %c0_18 = arith.constant 0 : index
    %c0_19 = arith.constant 0 : index
    %c10 = arith.constant 10 : index
    %19 = vector.load %arg2[%c0_18, %c0_19, %c10] : memref<1x4x102xbf16, #tpu.memory_space<vmem>>, vector<1x4x80xbf16>
    %20 = vector.shape_cast %19 : vector<1x4x80xbf16> to vector<4x80xbf16>
    %c3 = arith.constant 3 : index
    %c0_20 = arith.constant 0 : index
    %c0_21 = arith.constant 0 : index
    %21 = vector.load %arg3[%c3, %c0_20, %c0_21] : memref<9x8x4xbf16, #tpu.memory_space<vmem>>, vector<1x8x4xbf16>
    %22 = vector.shape_cast %21 : vector<1x8x4xbf16> to vector<8x4xbf16>
    %cst_22 = arith.constant dense<0.000000e+00> : vector<8x80xf32>
    %23 = tpu.matmul %22, %20, %cst_22 {dimension_numbers = #tpu.dot_dimension_numbers<[1], [0], [0], [1], [0, 0, 1, 1], [], []>} : vector<8x4xbf16>, vector<4x80xbf16>, vector<8x80xf32> -> vector<8x80xf32>
    %24 = arith.addf %18, %23 : vector<8x80xf32>
    %c0_23 = arith.constant 0 : index
    %c0_24 = arith.constant 0 : index
    %c11 = arith.constant 11 : index
    %25 = vector.load %arg2[%c0_23, %c0_24, %c11] : memref<1x4x102xbf16, #tpu.memory_space<vmem>>, vector<1x4x80xbf16>
    %26 = vector.shape_cast %25 : vector<1x4x80xbf16> to vector<4x80xbf16>
    %c4 = arith.constant 4 : index
    %c0_25 = arith.constant 0 : index
    %c0_26 = arith.constant 0 : index
    %27 = vector.load %arg3[%c4, %c0_25, %c0_26] : memref<9x8x4xbf16, #tpu.memory_space<vmem>>, vector<1x8x4xbf16>
    %28 = vector.shape_cast %27 : vector<1x8x4xbf16> to vector<8x4xbf16>
    %cst_27 = arith.constant dense<0.000000e+00> : vector<8x80xf32>
    %29 = tpu.matmul %28, %26, %cst_27 {dimension_numbers = #tpu.dot_dimension_numbers<[1], [0], [0], [1], [0, 0, 1, 1], [], []>} : vector<8x4xbf16>, vector<4x80xbf16>, vector<8x80xf32> -> vector<8x80xf32>
    %30 = arith.addf %24, %29 : vector<8x80xf32>
    %c0_28 = arith.constant 0 : index
    %c0_29 = arith.constant 0 : index
    %c12 = arith.constant 12 : index
    %31 = vector.load %arg2[%c0_28, %c0_29, %c12] : memref<1x4x102xbf16, #tpu.memory_space<vmem>>, vector<1x4x80xbf16>
    %32 = vector.shape_cast %31 : vector<1x4x80xbf16> to vector<4x80xbf16>
    %c5 = arith.constant 5 : index
    %c0_30 = arith.constant 0 : index
    %c0_31 = arith.constant 0 : index
    %33 = vector.load %arg3[%c5, %c0_30, %c0_31] : memref<9x8x4xbf16, #tpu.memory_space<vmem>>, vector<1x8x4xbf16>
    %34 = vector.shape_cast %33 : vector<1x8x4xbf16> to vector<8x4xbf16>
    %cst_32 = arith.constant dense<0.000000e+00> : vector<8x80xf32>
    %35 = tpu.matmul %34, %32, %cst_32 {dimension_numbers = #tpu.dot_dimension_numbers<[1], [0], [0], [1], [0, 0, 1, 1], [], []>} : vector<8x4xbf16>, vector<4x80xbf16>, vector<8x80xf32> -> vector<8x80xf32>
    %36 = arith.addf %30, %35 : vector<8x80xf32>
    %c0_33 = arith.constant 0 : index
    %c0_34 = arith.constant 0 : index
    %c20 = arith.constant 20 : index
    %37 = vector.load %arg2[%c0_33, %c0_34, %c20] : memref<1x4x102xbf16, #tpu.memory_space<vmem>>, vector<1x4x80xbf16>
    %38 = vector.shape_cast %37 : vector<1x4x80xbf16> to vector<4x80xbf16>
    %c6 = arith.constant 6 : index
    %c0_35 = arith.constant 0 : index
    %c0_36 = arith.constant 0 : index
    %39 = vector.load %arg3[%c6, %c0_35, %c0_36] : memref<9x8x4xbf16, #tpu.memory_space<vmem>>, vector<1x8x4xbf16>
    %40 = vector.shape_cast %39 : vector<1x8x4xbf16> to vector<8x4xbf16>
    %cst_37 = arith.constant dense<0.000000e+00> : vector<8x80xf32>
    %41 = tpu.matmul %40, %38, %cst_37 {dimension_numbers = #tpu.dot_dimension_numbers<[1], [0], [0], [1], [0, 0, 1, 1], [], []>} : vector<8x4xbf16>, vector<4x80xbf16>, vector<8x80xf32> -> vector<8x80xf32>
    %42 = arith.addf %36, %41 : vector<8x80xf32>
    %c0_38 = arith.constant 0 : index
    %c0_39 = arith.constant 0 : index
    %c21 = arith.constant 21 : index
    %43 = vector.load %arg2[%c0_38, %c0_39, %c21] : memref<1x4x102xbf16, #tpu.memory_space<vmem>>, vector<1x4x80xbf16>
    %44 = vector.shape_cast %43 : vector<1x4x80xbf16> to vector<4x80xbf16>
    %c7 = arith.constant 7 : index
    %c0_40 = arith.constant 0 : index
    %c0_41 = arith.constant 0 : index
    %45 = vector.load %arg3[%c7, %c0_40, %c0_41] : memref<9x8x4xbf16, #tpu.memory_space<vmem>>, vector<1x8x4xbf16>
    %46 = vector.shape_cast %45 : vector<1x8x4xbf16> to vector<8x4xbf16>
    %cst_42 = arith.constant dense<0.000000e+00> : vector<8x80xf32>
    %47 = tpu.matmul %46, %44, %cst_42 {dimension_numbers = #tpu.dot_dimension_numbers<[1], [0], [0], [1], [0, 0, 1, 1], [], []>} : vector<8x4xbf16>, vector<4x80xbf16>, vector<8x80xf32> -> vector<8x80xf32>
    %48 = arith.addf %42, %47 : vector<8x80xf32>
    %c0_43 = arith.constant 0 : index
    %c0_44 = arith.constant 0 : index
    %c22 = arith.constant 22 : index
    %49 = vector.load %arg2[%c0_43, %c0_44, %c22] : memref<1x4x102xbf16, #tpu.memory_space<vmem>>, vector<1x4x80xbf16>
    %50 = vector.shape_cast %49 : vector<1x4x80xbf16> to vector<4x80xbf16>
    %c8 = arith.constant 8 : index
    %c0_45 = arith.constant 0 : index
    %c0_46 = arith.constant 0 : index
    %51 = vector.load %arg3[%c8, %c0_45, %c0_46] : memref<9x8x4xbf16, #tpu.memory_space<vmem>>, vector<1x8x4xbf16>
    %52 = vector.shape_cast %51 : vector<1x8x4xbf16> to vector<8x4xbf16>
    %cst_47 = arith.constant dense<0.000000e+00> : vector<8x80xf32>
    %53 = tpu.matmul %52, %50, %cst_47 {dimension_numbers = #tpu.dot_dimension_numbers<[1], [0], [0], [1], [0, 0, 1, 1], [], []>} : vector<8x4xbf16>, vector<4x80xbf16>, vector<8x80xf32> -> vector<8x80xf32>
    %54 = arith.addf %48, %53 : vector<8x80xf32>
    %c0_48 = arith.constant 0 : index
    %c0_49 = arith.constant 0 : index
    %55 = vector.load %arg4[%c0_48, %c0_49] : memref<1x80xf32, #tpu.memory_space<vmem>>, vector<1x80xf32>
    %56 = vector.broadcast %55 : vector<1x80xf32> to vector<8x80xf32>
    %57 = arith.mulf %54, %56 : vector<8x80xf32>
    %cst_50 = arith.constant dense<0.000000e+00> : vector<8xf32>
    %58 = vector.multi_reduction <add>, %57, %cst_50 [1] : vector<8x80xf32> to vector<8xf32>
    %59 = vector.shape_cast %58 : vector<8xf32> to vector<8x1xf32>
    %cst_51 = arith.constant 1.562500e-02 : f32
    %60 = vector.broadcast %cst_51 : f32 to vector<8x1xf32>
    %61 = arith.mulf %59, %60 : vector<8x1xf32>
    %62 = arith.mulf %57, %57 : vector<8x80xf32>
    %cst_52 = arith.constant dense<0.000000e+00> : vector<8xf32>
    %63 = vector.multi_reduction <add>, %62, %cst_52 [1] : vector<8x80xf32> to vector<8xf32>
    %64 = vector.shape_cast %63 : vector<8xf32> to vector<8x1xf32>
    %cst_53 = arith.constant 1.562500e-02 : f32
    %65 = vector.broadcast %cst_53 : f32 to vector<8x1xf32>
    %66 = arith.mulf %64, %65 : vector<8x1xf32>
    %67 = arith.mulf %61, %61 : vector<8x1xf32>
    %68 = arith.subf %66, %67 : vector<8x1xf32>
    %cst_54 = arith.constant 0.000000e+00 : f32
    %69 = vector.broadcast %cst_54 : f32 to vector<8x1xf32>
    %70 = arith.maximumf %68, %69 : vector<8x1xf32>
    %71 = vector.broadcast %61 : vector<8x1xf32> to vector<8x80xf32>
    %72 = arith.subf %54, %71 : vector<8x80xf32>
    %cst_55 = arith.constant 9.99999974E-6 : f32
    %73 = vector.broadcast %cst_55 : f32 to vector<8x1xf32>
    %74 = arith.addf %70, %73 : vector<8x1xf32>
    %75 = math.rsqrt %74 : vector<8x1xf32>
    %76 = vector.broadcast %75 : vector<8x1xf32> to vector<8x80xf32>
    %77 = arith.mulf %72, %76 : vector<8x80xf32>
    %cst_56 = arith.constant 0.000000e+00 : f32
    %78 = vector.broadcast %cst_56 : f32 to vector<8x80xf32>
    %79 = arith.cmpf oge, %77, %78 : vector<8x80xf32>
    %cst_57 = arith.constant 2.000000e-01 : f32
    %80 = vector.broadcast %cst_57 : f32 to vector<8x80xf32>
    %81 = arith.mulf %80, %77 : vector<8x80xf32>
    %82 = arith.select %79, %77, %81 : vector<8x80xi1>, vector<8x80xf32>
    %c0_58 = arith.constant 0 : index
    %c0_59 = arith.constant 0 : index
    %c0_60 = arith.constant 0 : index
    %83 = vector.load %arg5[%c0_58, %c0_59, %c0_60] : memref<1x8x80xf32, #tpu.memory_space<vmem>>, vector<1x8x80xf32>
    %84 = vector.shape_cast %83 : vector<1x8x80xf32> to vector<8x80xf32>
    %85 = vector.shape_cast %82 : vector<8x80xf32> to vector<1x8x80xf32>
    tpu.vector_store %arg5[%c0_58, %c0_59, %c0_60], %85 {strides = array<i32>} : memref<1x8x80xf32, #tpu.memory_space<vmem>>, vector<1x8x80xf32>,
    return
  }
  func.func @transform_0(%arg0: i32, %arg1: i32) -> (i32, i32, i32) {
    %c0_i32 = arith.constant 0 : i32
    %c0_i32_0 = arith.constant 0 : i32
    %c0_i32_1 = arith.constant 0 : i32
    return %arg0, %c0_i32, %c0_i32_0 : i32, i32, i32
  }
  func.func @transform_1(%arg0: i32, %arg1: i32) -> (i32, i32, i32) {
    %c0_i32 = arith.constant 0 : i32
    %c0_i32_0 = arith.constant 0 : i32
    %c0_i32_1 = arith.constant 0 : i32
    return %c0_i32, %arg1, %c0_i32_0 : i32, i32, i32
  }
  func.func @transform_2(%arg0: i32, %arg1: i32) -> (i32, i32) {
    %c0_i32 = arith.constant 0 : i32
    %c0_i32_0 = arith.constant 0 : i32
    %c0_i32_1 = arith.constant 0 : i32
    return %c0_i32, %c0_i32_0 : i32, i32
  }
  func.func @transform_3(%arg0: i32, %arg1: i32) -> (i32, i32, i32) {
    %c0_i32 = arith.constant 0 : i32
    %c0_i32_0 = arith.constant 0 : i32
    return %arg0, %arg1, %c0_i32 : i32, i32, i32
  }
}

module attributes {stable_mosaic.version = 11 : i64} {
  func.func @_conv3x3_in_lrelu_kernel(%arg0: i32, %arg1: i32, %arg2: memref<1x8x102xbf16, #tpu.memory_space<vmem>>, %arg3: memref<9x8x8xbf16, #tpu.memory_space<vmem>>, %arg4: memref<1x80xf32, #tpu.memory_space<vmem>>, %arg5: memref<1x8x80xf32, #tpu.memory_space<vmem>>) attributes {dimension_semantics = [#tpu.dimension_semantics<parallel>, #tpu.dimension_semantics<parallel>], iteration_bounds = array<i64: 2, 1>, scalar_prefetch = 0 : i64, scratch_operands = 0 : i64, tpu.core_type = #tpu.core_type<tc>, window_params = [{transform_indices = @transform_0, window_bounds = array<i64: 1, 8, 102>}, {transform_indices = @transform_1, window_bounds = array<i64: 9, 8, 8>}, {pipeline_mode = #tpu.pipeline_mode<synchronous>, transform_indices = @transform_2, window_bounds = array<i64: 1, 80>}, {transform_indices = @transform_3, window_bounds = array<i64: 1, 8, 80>}]} {
    %cst = arith.constant 0.000000e+00 : f32
    %0 = vector.broadcast %cst : f32 to vector<8x80xf32>
    %c0 = arith.constant 0 : index
    %c0_0 = arith.constant 0 : index
    %c0_1 = arith.constant 0 : index
    %1 = vector.load %arg2[%c0, %c0_0, %c0_1] : memref<1x8x102xbf16, #tpu.memory_space<vmem>>, vector<1x8x80xbf16>
    %2 = vector.shape_cast %1 : vector<1x8x80xbf16> to vector<8x80xbf16>
    %c0_2 = arith.constant 0 : index
    %c0_3 = arith.constant 0 : index
    %c0_4 = arith.constant 0 : index
    %3 = vector.load %arg3[%c0_2, %c0_3, %c0_4] : memref<9x8x8xbf16, #tpu.memory_space<vmem>>, vector<1x8x8xbf16>
    %4 = vector.shape_cast %3 : vector<1x8x8xbf16> to vector<8x8xbf16>
    %cst_5 = arith.constant dense<0.000000e+00> : vector<8x80xf32>
    %5 = tpu.matmul %4, %2, %cst_5 {dimension_numbers = #tpu.dot_dimension_numbers<[1], [0], [0], [1], [0, 0, 1, 1], [], []>} : vector<8x8xbf16>, vector<8x80xbf16>, vector<8x80xf32> -> vector<8x80xf32>
    %6 = arith.addf %0, %5 : vector<8x80xf32>
    %c0_6 = arith.constant 0 : index
    %c0_7 = arith.constant 0 : index
    %c1 = arith.constant 1 : index
    %7 = vector.load %arg2[%c0_6, %c0_7, %c1] : memref<1x8x102xbf16, #tpu.memory_space<vmem>>, vector<1x8x80xbf16>
    %8 = vector.shape_cast %7 : vector<1x8x80xbf16> to vector<8x80xbf16>
    %c1_8 = arith.constant 1 : index
    %c0_9 = arith.constant 0 : index
    %c0_10 = arith.constant 0 : index
    %9 = vector.load %arg3[%c1_8, %c0_9, %c0_10] : memref<9x8x8xbf16, #tpu.memory_space<vmem>>, vector<1x8x8xbf16>
    %10 = vector.shape_cast %9 : vector<1x8x8xbf16> to vector<8x8xbf16>
    %cst_11 = arith.constant dense<0.000000e+00> : vector<8x80xf32>
    %11 = tpu.matmul %10, %8, %cst_11 {dimension_numbers = #tpu.dot_dimension_numbers<[1], [0], [0], [1], [0, 0, 1, 1], [], []>} : vector<8x8xbf16>, vector<8x80xbf16>, vector<8x80xf32> -> vector<8x80xf32>
    %12 = arith.addf %6, %11 : vector<8x80xf32>
    %c0_12 = arith.constant 0 : index
    %c0_13 = arith.constant 0 : index
    %c2 = arith.constant 2 : index
    %13 = vector.load %arg2[%c0_12, %c0_13, %c2] : memref<1x8x102xbf16, #tpu.memory_space<vmem>>, vector<1x8x80xbf16>
    %14 = vector.shape_cast %13 : vector<1x8x80xbf16> to vector<8x80xbf16>
    %c2_14 = arith.constant 2 : index
    %c0_15 = arith.constant 0 : index
    %c0_16 = arith.constant 0 : index
    %15 = vector.load %arg3[%c2_14, %c0_15, %c0_16] : memref<9x8x8xbf16, #tpu.memory_space<vmem>>, vector<1x8x8xbf16>
    %16 = vector.shape_cast %15 : vector<1x8x8xbf16> to vector<8x8xbf16>
    %cst_17 = arith.constant dense<0.000000e+00> : vector<8x80xf32>
    %17 = tpu.matmul %16, %14, %cst_17 {dimension_numbers = #tpu.dot_dimension_numbers<[1], [0], [0], [1], [0, 0, 1, 1], [], []>} : vector<8x8xbf16>, vector<8x80xbf16>, vector<8x80xf32> -> vector<8x80xf32>
    %18 = arith.addf %12, %17 : vector<8x80xf32>
    %c0_18 = arith.constant 0 : index
    %c0_19 = arith.constant 0 : index
    %c10 = arith.constant 10 : index
    %19 = vector.load %arg2[%c0_18, %c0_19, %c10] : memref<1x8x102xbf16, #tpu.memory_space<vmem>>, vector<1x8x80xbf16>
    %20 = vector.shape_cast %19 : vector<1x8x80xbf16> to vector<8x80xbf16>
    %c3 = arith.constant 3 : index
    %c0_20 = arith.constant 0 : index
    %c0_21 = arith.constant 0 : index
    %21 = vector.load %arg3[%c3, %c0_20, %c0_21] : memref<9x8x8xbf16, #tpu.memory_space<vmem>>, vector<1x8x8xbf16>
    %22 = vector.shape_cast %21 : vector<1x8x8xbf16> to vector<8x8xbf16>
    %cst_22 = arith.constant dense<0.000000e+00> : vector<8x80xf32>
    %23 = tpu.matmul %22, %20, %cst_22 {dimension_numbers = #tpu.dot_dimension_numbers<[1], [0], [0], [1], [0, 0, 1, 1], [], []>} : vector<8x8xbf16>, vector<8x80xbf16>, vector<8x80xf32> -> vector<8x80xf32>
    %24 = arith.addf %18, %23 : vector<8x80xf32>
    %c0_23 = arith.constant 0 : index
    %c0_24 = arith.constant 0 : index
    %c11 = arith.constant 11 : index
    %25 = vector.load %arg2[%c0_23, %c0_24, %c11] : memref<1x8x102xbf16, #tpu.memory_space<vmem>>, vector<1x8x80xbf16>
    %26 = vector.shape_cast %25 : vector<1x8x80xbf16> to vector<8x80xbf16>
    %c4 = arith.constant 4 : index
    %c0_25 = arith.constant 0 : index
    %c0_26 = arith.constant 0 : index
    %27 = vector.load %arg3[%c4, %c0_25, %c0_26] : memref<9x8x8xbf16, #tpu.memory_space<vmem>>, vector<1x8x8xbf16>
    %28 = vector.shape_cast %27 : vector<1x8x8xbf16> to vector<8x8xbf16>
    %cst_27 = arith.constant dense<0.000000e+00> : vector<8x80xf32>
    %29 = tpu.matmul %28, %26, %cst_27 {dimension_numbers = #tpu.dot_dimension_numbers<[1], [0], [0], [1], [0, 0, 1, 1], [], []>} : vector<8x8xbf16>, vector<8x80xbf16>, vector<8x80xf32> -> vector<8x80xf32>
    %30 = arith.addf %24, %29 : vector<8x80xf32>
    %c0_28 = arith.constant 0 : index
    %c0_29 = arith.constant 0 : index
    %c12 = arith.constant 12 : index
    %31 = vector.load %arg2[%c0_28, %c0_29, %c12] : memref<1x8x102xbf16, #tpu.memory_space<vmem>>, vector<1x8x80xbf16>
    %32 = vector.shape_cast %31 : vector<1x8x80xbf16> to vector<8x80xbf16>
    %c5 = arith.constant 5 : index
    %c0_30 = arith.constant 0 : index
    %c0_31 = arith.constant 0 : index
    %33 = vector.load %arg3[%c5, %c0_30, %c0_31] : memref<9x8x8xbf16, #tpu.memory_space<vmem>>, vector<1x8x8xbf16>
    %34 = vector.shape_cast %33 : vector<1x8x8xbf16> to vector<8x8xbf16>
    %cst_32 = arith.constant dense<0.000000e+00> : vector<8x80xf32>
    %35 = tpu.matmul %34, %32, %cst_32 {dimension_numbers = #tpu.dot_dimension_numbers<[1], [0], [0], [1], [0, 0, 1, 1], [], []>} : vector<8x8xbf16>, vector<8x80xbf16>, vector<8x80xf32> -> vector<8x80xf32>
    %36 = arith.addf %30, %35 : vector<8x80xf32>
    %c0_33 = arith.constant 0 : index
    %c0_34 = arith.constant 0 : index
    %c20 = arith.constant 20 : index
    %37 = vector.load %arg2[%c0_33, %c0_34, %c20] : memref<1x8x102xbf16, #tpu.memory_space<vmem>>, vector<1x8x80xbf16>
    %38 = vector.shape_cast %37 : vector<1x8x80xbf16> to vector<8x80xbf16>
    %c6 = arith.constant 6 : index
    %c0_35 = arith.constant 0 : index
    %c0_36 = arith.constant 0 : index
    %39 = vector.load %arg3[%c6, %c0_35, %c0_36] : memref<9x8x8xbf16, #tpu.memory_space<vmem>>, vector<1x8x8xbf16>
    %40 = vector.shape_cast %39 : vector<1x8x8xbf16> to vector<8x8xbf16>
    %cst_37 = arith.constant dense<0.000000e+00> : vector<8x80xf32>
    %41 = tpu.matmul %40, %38, %cst_37 {dimension_numbers = #tpu.dot_dimension_numbers<[1], [0], [0], [1], [0, 0, 1, 1], [], []>} : vector<8x8xbf16>, vector<8x80xbf16>, vector<8x80xf32> -> vector<8x80xf32>
    %42 = arith.addf %36, %41 : vector<8x80xf32>
    %c0_38 = arith.constant 0 : index
    %c0_39 = arith.constant 0 : index
    %c21 = arith.constant 21 : index
    %43 = vector.load %arg2[%c0_38, %c0_39, %c21] : memref<1x8x102xbf16, #tpu.memory_space<vmem>>, vector<1x8x80xbf16>
    %44 = vector.shape_cast %43 : vector<1x8x80xbf16> to vector<8x80xbf16>
    %c7 = arith.constant 7 : index
    %c0_40 = arith.constant 0 : index
    %c0_41 = arith.constant 0 : index
    %45 = vector.load %arg3[%c7, %c0_40, %c0_41] : memref<9x8x8xbf16, #tpu.memory_space<vmem>>, vector<1x8x8xbf16>
    %46 = vector.shape_cast %45 : vector<1x8x8xbf16> to vector<8x8xbf16>
    %cst_42 = arith.constant dense<0.000000e+00> : vector<8x80xf32>
    %47 = tpu.matmul %46, %44, %cst_42 {dimension_numbers = #tpu.dot_dimension_numbers<[1], [0], [0], [1], [0, 0, 1, 1], [], []>} : vector<8x8xbf16>, vector<8x80xbf16>, vector<8x80xf32> -> vector<8x80xf32>
    %48 = arith.addf %42, %47 : vector<8x80xf32>
    %c0_43 = arith.constant 0 : index
    %c0_44 = arith.constant 0 : index
    %c22 = arith.constant 22 : index
    %49 = vector.load %arg2[%c0_43, %c0_44, %c22] : memref<1x8x102xbf16, #tpu.memory_space<vmem>>, vector<1x8x80xbf16>
    %50 = vector.shape_cast %49 : vector<1x8x80xbf16> to vector<8x80xbf16>
    %c8 = arith.constant 8 : index
    %c0_45 = arith.constant 0 : index
    %c0_46 = arith.constant 0 : index
    %51 = vector.load %arg3[%c8, %c0_45, %c0_46] : memref<9x8x8xbf16, #tpu.memory_space<vmem>>, vector<1x8x8xbf16>
    %52 = vector.shape_cast %51 : vector<1x8x8xbf16> to vector<8x8xbf16>
    %cst_47 = arith.constant dense<0.000000e+00> : vector<8x80xf32>
    %53 = tpu.matmul %52, %50, %cst_47 {dimension_numbers = #tpu.dot_dimension_numbers<[1], [0], [0], [1], [0, 0, 1, 1], [], []>} : vector<8x8xbf16>, vector<8x80xbf16>, vector<8x80xf32> -> vector<8x80xf32>
    %54 = arith.addf %48, %53 : vector<8x80xf32>
    %c0_48 = arith.constant 0 : index
    %c0_49 = arith.constant 0 : index
    %55 = vector.load %arg4[%c0_48, %c0_49] : memref<1x80xf32, #tpu.memory_space<vmem>>, vector<1x80xf32>
    %56 = vector.broadcast %55 : vector<1x80xf32> to vector<8x80xf32>
    %57 = arith.mulf %54, %56 : vector<8x80xf32>
    %cst_50 = arith.constant dense<0.000000e+00> : vector<8xf32>
    %58 = vector.multi_reduction <add>, %57, %cst_50 [1] : vector<8x80xf32> to vector<8xf32>
    %59 = vector.shape_cast %58 : vector<8xf32> to vector<8x1xf32>
    %cst_51 = arith.constant 1.562500e-02 : f32
    %60 = vector.broadcast %cst_51 : f32 to vector<8x1xf32>
    %61 = arith.mulf %59, %60 : vector<8x1xf32>
    %62 = arith.mulf %57, %57 : vector<8x80xf32>
    %cst_52 = arith.constant dense<0.000000e+00> : vector<8xf32>
    %63 = vector.multi_reduction <add>, %62, %cst_52 [1] : vector<8x80xf32> to vector<8xf32>
    %64 = vector.shape_cast %63 : vector<8xf32> to vector<8x1xf32>
    %cst_53 = arith.constant 1.562500e-02 : f32
    %65 = vector.broadcast %cst_53 : f32 to vector<8x1xf32>
    %66 = arith.mulf %64, %65 : vector<8x1xf32>
    %67 = arith.mulf %61, %61 : vector<8x1xf32>
    %68 = arith.subf %66, %67 : vector<8x1xf32>
    %cst_54 = arith.constant 0.000000e+00 : f32
    %69 = vector.broadcast %cst_54 : f32 to vector<8x1xf32>
    %70 = arith.maximumf %68, %69 : vector<8x1xf32>
    %71 = vector.broadcast %61 : vector<8x1xf32> to vector<8x80xf32>
    %72 = arith.subf %54, %71 : vector<8x80xf32>
    %cst_55 = arith.constant 9.99999974E-6 : f32
    %73 = vector.broadcast %cst_55 : f32 to vector<8x1xf32>
    %74 = arith.addf %70, %73 : vector<8x1xf32>
    %75 = math.rsqrt %74 : vector<8x1xf32>
    %76 = vector.broadcast %75 : vector<8x1xf32> to vector<8x80xf32>
    %77 = arith.mulf %72, %76 : vector<8x80xf32>
    %cst_56 = arith.constant 0.000000e+00 : f32
    %78 = vector.broadcast %cst_56 : f32 to vector<8x80xf32>
    %79 = arith.cmpf oge, %77, %78 : vector<8x80xf32>
    %cst_57 = arith.constant 2.000000e-01 : f32
    %80 = vector.broadcast %cst_57 : f32 to vector<8x80xf32>
    %81 = arith.mulf %80, %77 : vector<8x80xf32>
    %82 = arith.select %79, %77, %81 : vector<8x80xi1>, vector<8x80xf32>
    %c0_58 = arith.constant 0 : index
    %c0_59 = arith.constant 0 : index
    %c0_60 = arith.constant 0 : index
    %83 = vector.load %arg5[%c0_58, %c0_59, %c0_60] : memref<1x8x80xf32, #tpu.memory_space<vmem>>, vector<1x8x80xf32>
    %84 = vector.shape_cast %83 : vector<1x8x80xf32> to vector<8x80xf32>
    %85 = vector.shape_cast %82 : vector<8x80xf32> to vector<1x8x80xf32>
    tpu.vector_store %arg5[%c0_58, %c0_59, %c0_60], %85 {strides = array<i32>} : memref<1x8x80xf32, #tpu.memory_space<vmem>>, vector<1x8x80xf32>,
    return
  }
  func.func @transform_0(%arg0: i32, %arg1: i32) -> (i32, i32, i32) {
    %c0_i32 = arith.constant 0 : i32
    %c0_i32_0 = arith.constant 0 : i32
    %c0_i32_1 = arith.constant 0 : i32
    return %arg0, %c0_i32, %c0_i32_0 : i32, i32, i32
  }
  func.func @transform_1(%arg0: i32, %arg1: i32) -> (i32, i32, i32) {
    %c0_i32 = arith.constant 0 : i32
    %c0_i32_0 = arith.constant 0 : i32
    %c0_i32_1 = arith.constant 0 : i32
    return %c0_i32, %arg1, %c0_i32_0 : i32, i32, i32
  }
  func.func @transform_2(%arg0: i32, %arg1: i32) -> (i32, i32) {
    %c0_i32 = arith.constant 0 : i32
    %c0_i32_0 = arith.constant 0 : i32
    %c0_i32_1 = arith.constant 0 : i32
    return %c0_i32, %c0_i32_0 : i32, i32
  }
  func.func @transform_3(%arg0: i32, %arg1: i32) -> (i32, i32, i32) {
    %c0_i32 = arith.constant 0 : i32
    %c0_i32_0 = arith.constant 0 : i32
    return %arg0, %arg1, %c0_i32 : i32, i32, i32
  }
}

module attributes {stable_mosaic.version = 11 : i64} {
  func.func @_conv3x3_in_lrelu_kernel(%arg0: i32, %arg1: i32, %arg2: memref<1x8x38xbf16, #tpu.memory_space<vmem>>, %arg3: memref<9x16x8xbf16, #tpu.memory_space<vmem>>, %arg4: memref<1x24xf32, #tpu.memory_space<vmem>>, %arg5: memref<1x16x24xf32, #tpu.memory_space<vmem>>) attributes {dimension_semantics = [#tpu.dimension_semantics<parallel>, #tpu.dimension_semantics<parallel>], iteration_bounds = array<i64: 2, 1>, scalar_prefetch = 0 : i64, scratch_operands = 0 : i64, tpu.core_type = #tpu.core_type<tc>, window_params = [{transform_indices = @transform_0, window_bounds = array<i64: 1, 8, 38>}, {transform_indices = @transform_1, window_bounds = array<i64: 9, 16, 8>}, {pipeline_mode = #tpu.pipeline_mode<synchronous>, transform_indices = @transform_2, window_bounds = array<i64: 1, 24>}, {transform_indices = @transform_3, window_bounds = array<i64: 1, 16, 24>}]} {
    %cst = arith.constant 0.000000e+00 : f32
    %0 = vector.broadcast %cst : f32 to vector<16x24xf32>
    %c0 = arith.constant 0 : index
    %c0_0 = arith.constant 0 : index
    %c0_1 = arith.constant 0 : index
    %1 = vector.load %arg2[%c0, %c0_0, %c0_1] : memref<1x8x38xbf16, #tpu.memory_space<vmem>>, vector<1x8x24xbf16>
    %2 = vector.shape_cast %1 : vector<1x8x24xbf16> to vector<8x24xbf16>
    %c0_2 = arith.constant 0 : index
    %c0_3 = arith.constant 0 : index
    %c0_4 = arith.constant 0 : index
    %3 = vector.load %arg3[%c0_2, %c0_3, %c0_4] : memref<9x16x8xbf16, #tpu.memory_space<vmem>>, vector<1x16x8xbf16>
    %4 = vector.shape_cast %3 : vector<1x16x8xbf16> to vector<16x8xbf16>
    %cst_5 = arith.constant dense<0.000000e+00> : vector<16x24xf32>
    %5 = tpu.matmul %4, %2, %cst_5 {dimension_numbers = #tpu.dot_dimension_numbers<[1], [0], [0], [1], [0, 0, 1, 1], [], []>} : vector<16x8xbf16>, vector<8x24xbf16>, vector<16x24xf32> -> vector<16x24xf32>
    %6 = arith.addf %0, %5 : vector<16x24xf32>
    %c0_6 = arith.constant 0 : index
    %c0_7 = arith.constant 0 : index
    %c1 = arith.constant 1 : index
    %7 = vector.load %arg2[%c0_6, %c0_7, %c1] : memref<1x8x38xbf16, #tpu.memory_space<vmem>>, vector<1x8x24xbf16>
    %8 = vector.shape_cast %7 : vector<1x8x24xbf16> to vector<8x24xbf16>
    %c1_8 = arith.constant 1 : index
    %c0_9 = arith.constant 0 : index
    %c0_10 = arith.constant 0 : index
    %9 = vector.load %arg3[%c1_8, %c0_9, %c0_10] : memref<9x16x8xbf16, #tpu.memory_space<vmem>>, vector<1x16x8xbf16>
    %10 = vector.shape_cast %9 : vector<1x16x8xbf16> to vector<16x8xbf16>
    %cst_11 = arith.constant dense<0.000000e+00> : vector<16x24xf32>
    %11 = tpu.matmul %10, %8, %cst_11 {dimension_numbers = #tpu.dot_dimension_numbers<[1], [0], [0], [1], [0, 0, 1, 1], [], []>} : vector<16x8xbf16>, vector<8x24xbf16>, vector<16x24xf32> -> vector<16x24xf32>
    %12 = arith.addf %6, %11 : vector<16x24xf32>
    %c0_12 = arith.constant 0 : index
    %c0_13 = arith.constant 0 : index
    %c2 = arith.constant 2 : index
    %13 = vector.load %arg2[%c0_12, %c0_13, %c2] : memref<1x8x38xbf16, #tpu.memory_space<vmem>>, vector<1x8x24xbf16>
    %14 = vector.shape_cast %13 : vector<1x8x24xbf16> to vector<8x24xbf16>
    %c2_14 = arith.constant 2 : index
    %c0_15 = arith.constant 0 : index
    %c0_16 = arith.constant 0 : index
    %15 = vector.load %arg3[%c2_14, %c0_15, %c0_16] : memref<9x16x8xbf16, #tpu.memory_space<vmem>>, vector<1x16x8xbf16>
    %16 = vector.shape_cast %15 : vector<1x16x8xbf16> to vector<16x8xbf16>
    %cst_17 = arith.constant dense<0.000000e+00> : vector<16x24xf32>
    %17 = tpu.matmul %16, %14, %cst_17 {dimension_numbers = #tpu.dot_dimension_numbers<[1], [0], [0], [1], [0, 0, 1, 1], [], []>} : vector<16x8xbf16>, vector<8x24xbf16>, vector<16x24xf32> -> vector<16x24xf32>
    %18 = arith.addf %12, %17 : vector<16x24xf32>
    %c0_18 = arith.constant 0 : index
    %c0_19 = arith.constant 0 : index
    %c6 = arith.constant 6 : index
    %19 = vector.load %arg2[%c0_18, %c0_19, %c6] : memref<1x8x38xbf16, #tpu.memory_space<vmem>>, vector<1x8x24xbf16>
    %20 = vector.shape_cast %19 : vector<1x8x24xbf16> to vector<8x24xbf16>
    %c3 = arith.constant 3 : index
    %c0_20 = arith.constant 0 : index
    %c0_21 = arith.constant 0 : index
    %21 = vector.load %arg3[%c3, %c0_20, %c0_21] : memref<9x16x8xbf16, #tpu.memory_space<vmem>>, vector<1x16x8xbf16>
    %22 = vector.shape_cast %21 : vector<1x16x8xbf16> to vector<16x8xbf16>
    %cst_22 = arith.constant dense<0.000000e+00> : vector<16x24xf32>
    %23 = tpu.matmul %22, %20, %cst_22 {dimension_numbers = #tpu.dot_dimension_numbers<[1], [0], [0], [1], [0, 0, 1, 1], [], []>} : vector<16x8xbf16>, vector<8x24xbf16>, vector<16x24xf32> -> vector<16x24xf32>
    %24 = arith.addf %18, %23 : vector<16x24xf32>
    %c0_23 = arith.constant 0 : index
    %c0_24 = arith.constant 0 : index
    %c7 = arith.constant 7 : index
    %25 = vector.load %arg2[%c0_23, %c0_24, %c7] : memref<1x8x38xbf16, #tpu.memory_space<vmem>>, vector<1x8x24xbf16>
    %26 = vector.shape_cast %25 : vector<1x8x24xbf16> to vector<8x24xbf16>
    %c4 = arith.constant 4 : index
    %c0_25 = arith.constant 0 : index
    %c0_26 = arith.constant 0 : index
    %27 = vector.load %arg3[%c4, %c0_25, %c0_26] : memref<9x16x8xbf16, #tpu.memory_space<vmem>>, vector<1x16x8xbf16>
    %28 = vector.shape_cast %27 : vector<1x16x8xbf16> to vector<16x8xbf16>
    %cst_27 = arith.constant dense<0.000000e+00> : vector<16x24xf32>
    %29 = tpu.matmul %28, %26, %cst_27 {dimension_numbers = #tpu.dot_dimension_numbers<[1], [0], [0], [1], [0, 0, 1, 1], [], []>} : vector<16x8xbf16>, vector<8x24xbf16>, vector<16x24xf32> -> vector<16x24xf32>
    %30 = arith.addf %24, %29 : vector<16x24xf32>
    %c0_28 = arith.constant 0 : index
    %c0_29 = arith.constant 0 : index
    %c8 = arith.constant 8 : index
    %31 = vector.load %arg2[%c0_28, %c0_29, %c8] : memref<1x8x38xbf16, #tpu.memory_space<vmem>>, vector<1x8x24xbf16>
    %32 = vector.shape_cast %31 : vector<1x8x24xbf16> to vector<8x24xbf16>
    %c5 = arith.constant 5 : index
    %c0_30 = arith.constant 0 : index
    %c0_31 = arith.constant 0 : index
    %33 = vector.load %arg3[%c5, %c0_30, %c0_31] : memref<9x16x8xbf16, #tpu.memory_space<vmem>>, vector<1x16x8xbf16>
    %34 = vector.shape_cast %33 : vector<1x16x8xbf16> to vector<16x8xbf16>
    %cst_32 = arith.constant dense<0.000000e+00> : vector<16x24xf32>
    %35 = tpu.matmul %34, %32, %cst_32 {dimension_numbers = #tpu.dot_dimension_numbers<[1], [0], [0], [1], [0, 0, 1, 1], [], []>} : vector<16x8xbf16>, vector<8x24xbf16>, vector<16x24xf32> -> vector<16x24xf32>
    %36 = arith.addf %30, %35 : vector<16x24xf32>
    %c0_33 = arith.constant 0 : index
    %c0_34 = arith.constant 0 : index
    %c12 = arith.constant 12 : index
    %37 = vector.load %arg2[%c0_33, %c0_34, %c12] : memref<1x8x38xbf16, #tpu.memory_space<vmem>>, vector<1x8x24xbf16>
    %38 = vector.shape_cast %37 : vector<1x8x24xbf16> to vector<8x24xbf16>
    %c6_35 = arith.constant 6 : index
    %c0_36 = arith.constant 0 : index
    %c0_37 = arith.constant 0 : index
    %39 = vector.load %arg3[%c6_35, %c0_36, %c0_37] : memref<9x16x8xbf16, #tpu.memory_space<vmem>>, vector<1x16x8xbf16>
    %40 = vector.shape_cast %39 : vector<1x16x8xbf16> to vector<16x8xbf16>
    %cst_38 = arith.constant dense<0.000000e+00> : vector<16x24xf32>
    %41 = tpu.matmul %40, %38, %cst_38 {dimension_numbers = #tpu.dot_dimension_numbers<[1], [0], [0], [1], [0, 0, 1, 1], [], []>} : vector<16x8xbf16>, vector<8x24xbf16>, vector<16x24xf32> -> vector<16x24xf32>
    %42 = arith.addf %36, %41 : vector<16x24xf32>
    %c0_39 = arith.constant 0 : index
    %c0_40 = arith.constant 0 : index
    %c13 = arith.constant 13 : index
    %43 = vector.load %arg2[%c0_39, %c0_40, %c13] : memref<1x8x38xbf16, #tpu.memory_space<vmem>>, vector<1x8x24xbf16>
    %44 = vector.shape_cast %43 : vector<1x8x24xbf16> to vector<8x24xbf16>
    %c7_41 = arith.constant 7 : index
    %c0_42 = arith.constant 0 : index
    %c0_43 = arith.constant 0 : index
    %45 = vector.load %arg3[%c7_41, %c0_42, %c0_43] : memref<9x16x8xbf16, #tpu.memory_space<vmem>>, vector<1x16x8xbf16>
    %46 = vector.shape_cast %45 : vector<1x16x8xbf16> to vector<16x8xbf16>
    %cst_44 = arith.constant dense<0.000000e+00> : vector<16x24xf32>
    %47 = tpu.matmul %46, %44, %cst_44 {dimension_numbers = #tpu.dot_dimension_numbers<[1], [0], [0], [1], [0, 0, 1, 1], [], []>} : vector<16x8xbf16>, vector<8x24xbf16>, vector<16x24xf32> -> vector<16x24xf32>
    %48 = arith.addf %42, %47 : vector<16x24xf32>
    %c0_45 = arith.constant 0 : index
    %c0_46 = arith.constant 0 : index
    %c14 = arith.constant 14 : index
    %49 = vector.load %arg2[%c0_45, %c0_46, %c14] : memref<1x8x38xbf16, #tpu.memory_space<vmem>>, vector<1x8x24xbf16>
    %50 = vector.shape_cast %49 : vector<1x8x24xbf16> to vector<8x24xbf16>
    %c8_47 = arith.constant 8 : index
    %c0_48 = arith.constant 0 : index
    %c0_49 = arith.constant 0 : index
    %51 = vector.load %arg3[%c8_47, %c0_48, %c0_49] : memref<9x16x8xbf16, #tpu.memory_space<vmem>>, vector<1x16x8xbf16>
    %52 = vector.shape_cast %51 : vector<1x16x8xbf16> to vector<16x8xbf16>
    %cst_50 = arith.constant dense<0.000000e+00> : vector<16x24xf32>
    %53 = tpu.matmul %52, %50, %cst_50 {dimension_numbers = #tpu.dot_dimension_numbers<[1], [0], [0], [1], [0, 0, 1, 1], [], []>} : vector<16x8xbf16>, vector<8x24xbf16>, vector<16x24xf32> -> vector<16x24xf32>
    %54 = arith.addf %48, %53 : vector<16x24xf32>
    %c0_51 = arith.constant 0 : index
    %c0_52 = arith.constant 0 : index
    %55 = vector.load %arg4[%c0_51, %c0_52] : memref<1x24xf32, #tpu.memory_space<vmem>>, vector<1x24xf32>
    %56 = vector.broadcast %55 : vector<1x24xf32> to vector<16x24xf32>
    %57 = arith.mulf %54, %56 : vector<16x24xf32>
    %cst_53 = arith.constant dense<0.000000e+00> : vector<16xf32>
    %58 = vector.multi_reduction <add>, %57, %cst_53 [1] : vector<16x24xf32> to vector<16xf32>
    %59 = vector.shape_cast %58 : vector<16xf32> to vector<16x1xf32>
    %cst_54 = arith.constant 6.250000e-02 : f32
    %60 = vector.broadcast %cst_54 : f32 to vector<16x1xf32>
    %61 = arith.mulf %59, %60 : vector<16x1xf32>
    %62 = arith.mulf %57, %57 : vector<16x24xf32>
    %cst_55 = arith.constant dense<0.000000e+00> : vector<16xf32>
    %63 = vector.multi_reduction <add>, %62, %cst_55 [1] : vector<16x24xf32> to vector<16xf32>
    %64 = vector.shape_cast %63 : vector<16xf32> to vector<16x1xf32>
    %cst_56 = arith.constant 6.250000e-02 : f32
    %65 = vector.broadcast %cst_56 : f32 to vector<16x1xf32>
    %66 = arith.mulf %64, %65 : vector<16x1xf32>
    %67 = arith.mulf %61, %61 : vector<16x1xf32>
    %68 = arith.subf %66, %67 : vector<16x1xf32>
    %cst_57 = arith.constant 0.000000e+00 : f32
    %69 = vector.broadcast %cst_57 : f32 to vector<16x1xf32>
    %70 = arith.maximumf %68, %69 : vector<16x1xf32>
    %71 = vector.broadcast %61 : vector<16x1xf32> to vector<16x24xf32>
    %72 = arith.subf %54, %71 : vector<16x24xf32>
    %cst_58 = arith.constant 9.99999974E-6 : f32
    %73 = vector.broadcast %cst_58 : f32 to vector<16x1xf32>
    %74 = arith.addf %70, %73 : vector<16x1xf32>
    %75 = math.rsqrt %74 : vector<16x1xf32>
    %76 = vector.broadcast %75 : vector<16x1xf32> to vector<16x24xf32>
    %77 = arith.mulf %72, %76 : vector<16x24xf32>
    %cst_59 = arith.constant 0.000000e+00 : f32
    %78 = vector.broadcast %cst_59 : f32 to vector<16x24xf32>
    %79 = arith.cmpf oge, %77, %78 : vector<16x24xf32>
    %cst_60 = arith.constant 2.000000e-01 : f32
    %80 = vector.broadcast %cst_60 : f32 to vector<16x24xf32>
    %81 = arith.mulf %80, %77 : vector<16x24xf32>
    %82 = arith.select %79, %77, %81 : vector<16x24xi1>, vector<16x24xf32>
    %c0_61 = arith.constant 0 : index
    %c0_62 = arith.constant 0 : index
    %c0_63 = arith.constant 0 : index
    %83 = vector.load %arg5[%c0_61, %c0_62, %c0_63] : memref<1x16x24xf32, #tpu.memory_space<vmem>>, vector<1x16x24xf32>
    %84 = vector.shape_cast %83 : vector<1x16x24xf32> to vector<16x24xf32>
    %85 = vector.shape_cast %82 : vector<16x24xf32> to vector<1x16x24xf32>
    tpu.vector_store %arg5[%c0_61, %c0_62, %c0_63], %85 {strides = array<i32>} : memref<1x16x24xf32, #tpu.memory_space<vmem>>, vector<1x16x24xf32>,
    return
  }
  func.func @transform_0(%arg0: i32, %arg1: i32) -> (i32, i32, i32) {
    %c0_i32 = arith.constant 0 : i32
    %c0_i32_0 = arith.constant 0 : i32
    %c0_i32_1 = arith.constant 0 : i32
    return %arg0, %c0_i32, %c0_i32_0 : i32, i32, i32
  }
  func.func @transform_1(%arg0: i32, %arg1: i32) -> (i32, i32, i32) {
    %c0_i32 = arith.constant 0 : i32
    %c0_i32_0 = arith.constant 0 : i32
    %c0_i32_1 = arith.constant 0 : i32
    return %c0_i32, %arg1, %c0_i32_0 : i32, i32, i32
  }
  func.func @transform_2(%arg0: i32, %arg1: i32) -> (i32, i32) {
    %c0_i32 = arith.constant 0 : i32
    %c0_i32_0 = arith.constant 0 : i32
    %c0_i32_1 = arith.constant 0 : i32
    return %c0_i32, %c0_i32_0 : i32, i32
  }
  func.func @transform_3(%arg0: i32, %arg1: i32) -> (i32, i32, i32) {
    %c0_i32 = arith.constant 0 : i32
    %c0_i32_0 = arith.constant 0 : i32
    return %arg0, %arg1, %c0_i32 : i32, i32, i32
  }
}

module attributes {stable_mosaic.version = 11 : i64} {
  func.func @_conv3x3_in_lrelu_kernel(%arg0: i32, %arg1: i32, %arg2: memref<1x16x38xbf16, #tpu.memory_space<vmem>>, %arg3: memref<9x16x16xbf16, #tpu.memory_space<vmem>>, %arg4: memref<1x24xf32, #tpu.memory_space<vmem>>, %arg5: memref<1x16x24xf32, #tpu.memory_space<vmem>>) attributes {dimension_semantics = [#tpu.dimension_semantics<parallel>, #tpu.dimension_semantics<parallel>], iteration_bounds = array<i64: 2, 1>, scalar_prefetch = 0 : i64, scratch_operands = 0 : i64, tpu.core_type = #tpu.core_type<tc>, window_params = [{transform_indices = @transform_0, window_bounds = array<i64: 1, 16, 38>}, {transform_indices = @transform_1, window_bounds = array<i64: 9, 16, 16>}, {pipeline_mode = #tpu.pipeline_mode<synchronous>, transform_indices = @transform_2, window_bounds = array<i64: 1, 24>}, {transform_indices = @transform_3, window_bounds = array<i64: 1, 16, 24>}]} {
    %cst = arith.constant 0.000000e+00 : f32
    %0 = vector.broadcast %cst : f32 to vector<16x24xf32>
    %c0 = arith.constant 0 : index
    %c0_0 = arith.constant 0 : index
    %c0_1 = arith.constant 0 : index
    %1 = vector.load %arg2[%c0, %c0_0, %c0_1] : memref<1x16x38xbf16, #tpu.memory_space<vmem>>, vector<1x16x24xbf16>
    %2 = vector.shape_cast %1 : vector<1x16x24xbf16> to vector<16x24xbf16>
    %c0_2 = arith.constant 0 : index
    %c0_3 = arith.constant 0 : index
    %c0_4 = arith.constant 0 : index
    %3 = vector.load %arg3[%c0_2, %c0_3, %c0_4] : memref<9x16x16xbf16, #tpu.memory_space<vmem>>, vector<1x16x16xbf16>
    %4 = vector.shape_cast %3 : vector<1x16x16xbf16> to vector<16x16xbf16>
    %cst_5 = arith.constant dense<0.000000e+00> : vector<16x24xf32>
    %5 = tpu.matmul %4, %2, %cst_5 {dimension_numbers = #tpu.dot_dimension_numbers<[1], [0], [0], [1], [0, 0, 1, 1], [], []>} : vector<16x16xbf16>, vector<16x24xbf16>, vector<16x24xf32> -> vector<16x24xf32>
    %6 = arith.addf %0, %5 : vector<16x24xf32>
    %c0_6 = arith.constant 0 : index
    %c0_7 = arith.constant 0 : index
    %c1 = arith.constant 1 : index
    %7 = vector.load %arg2[%c0_6, %c0_7, %c1] : memref<1x16x38xbf16, #tpu.memory_space<vmem>>, vector<1x16x24xbf16>
    %8 = vector.shape_cast %7 : vector<1x16x24xbf16> to vector<16x24xbf16>
    %c1_8 = arith.constant 1 : index
    %c0_9 = arith.constant 0 : index
    %c0_10 = arith.constant 0 : index
    %9 = vector.load %arg3[%c1_8, %c0_9, %c0_10] : memref<9x16x16xbf16, #tpu.memory_space<vmem>>, vector<1x16x16xbf16>
    %10 = vector.shape_cast %9 : vector<1x16x16xbf16> to vector<16x16xbf16>
    %cst_11 = arith.constant dense<0.000000e+00> : vector<16x24xf32>
    %11 = tpu.matmul %10, %8, %cst_11 {dimension_numbers = #tpu.dot_dimension_numbers<[1], [0], [0], [1], [0, 0, 1, 1], [], []>} : vector<16x16xbf16>, vector<16x24xbf16>, vector<16x24xf32> -> vector<16x24xf32>
    %12 = arith.addf %6, %11 : vector<16x24xf32>
    %c0_12 = arith.constant 0 : index
    %c0_13 = arith.constant 0 : index
    %c2 = arith.constant 2 : index
    %13 = vector.load %arg2[%c0_12, %c0_13, %c2] : memref<1x16x38xbf16, #tpu.memory_space<vmem>>, vector<1x16x24xbf16>
    %14 = vector.shape_cast %13 : vector<1x16x24xbf16> to vector<16x24xbf16>
    %c2_14 = arith.constant 2 : index
    %c0_15 = arith.constant 0 : index
    %c0_16 = arith.constant 0 : index
    %15 = vector.load %arg3[%c2_14, %c0_15, %c0_16] : memref<9x16x16xbf16, #tpu.memory_space<vmem>>, vector<1x16x16xbf16>
    %16 = vector.shape_cast %15 : vector<1x16x16xbf16> to vector<16x16xbf16>
    %cst_17 = arith.constant dense<0.000000e+00> : vector<16x24xf32>
    %17 = tpu.matmul %16, %14, %cst_17 {dimension_numbers = #tpu.dot_dimension_numbers<[1], [0], [0], [1], [0, 0, 1, 1], [], []>} : vector<16x16xbf16>, vector<16x24xbf16>, vector<16x24xf32> -> vector<16x24xf32>
    %18 = arith.addf %12, %17 : vector<16x24xf32>
    %c0_18 = arith.constant 0 : index
    %c0_19 = arith.constant 0 : index
    %c6 = arith.constant 6 : index
    %19 = vector.load %arg2[%c0_18, %c0_19, %c6] : memref<1x16x38xbf16, #tpu.memory_space<vmem>>, vector<1x16x24xbf16>
    %20 = vector.shape_cast %19 : vector<1x16x24xbf16> to vector<16x24xbf16>
    %c3 = arith.constant 3 : index
    %c0_20 = arith.constant 0 : index
    %c0_21 = arith.constant 0 : index
    %21 = vector.load %arg3[%c3, %c0_20, %c0_21] : memref<9x16x16xbf16, #tpu.memory_space<vmem>>, vector<1x16x16xbf16>
    %22 = vector.shape_cast %21 : vector<1x16x16xbf16> to vector<16x16xbf16>
    %cst_22 = arith.constant dense<0.000000e+00> : vector<16x24xf32>
    %23 = tpu.matmul %22, %20, %cst_22 {dimension_numbers = #tpu.dot_dimension_numbers<[1], [0], [0], [1], [0, 0, 1, 1], [], []>} : vector<16x16xbf16>, vector<16x24xbf16>, vector<16x24xf32> -> vector<16x24xf32>
    %24 = arith.addf %18, %23 : vector<16x24xf32>
    %c0_23 = arith.constant 0 : index
    %c0_24 = arith.constant 0 : index
    %c7 = arith.constant 7 : index
    %25 = vector.load %arg2[%c0_23, %c0_24, %c7] : memref<1x16x38xbf16, #tpu.memory_space<vmem>>, vector<1x16x24xbf16>
    %26 = vector.shape_cast %25 : vector<1x16x24xbf16> to vector<16x24xbf16>
    %c4 = arith.constant 4 : index
    %c0_25 = arith.constant 0 : index
    %c0_26 = arith.constant 0 : index
    %27 = vector.load %arg3[%c4, %c0_25, %c0_26] : memref<9x16x16xbf16, #tpu.memory_space<vmem>>, vector<1x16x16xbf16>
    %28 = vector.shape_cast %27 : vector<1x16x16xbf16> to vector<16x16xbf16>
    %cst_27 = arith.constant dense<0.000000e+00> : vector<16x24xf32>
    %29 = tpu.matmul %28, %26, %cst_27 {dimension_numbers = #tpu.dot_dimension_numbers<[1], [0], [0], [1], [0, 0, 1, 1], [], []>} : vector<16x16xbf16>, vector<16x24xbf16>, vector<16x24xf32> -> vector<16x24xf32>
    %30 = arith.addf %24, %29 : vector<16x24xf32>
    %c0_28 = arith.constant 0 : index
    %c0_29 = arith.constant 0 : index
    %c8 = arith.constant 8 : index
    %31 = vector.load %arg2[%c0_28, %c0_29, %c8] : memref<1x16x38xbf16, #tpu.memory_space<vmem>>, vector<1x16x24xbf16>
    %32 = vector.shape_cast %31 : vector<1x16x24xbf16> to vector<16x24xbf16>
    %c5 = arith.constant 5 : index
    %c0_30 = arith.constant 0 : index
    %c0_31 = arith.constant 0 : index
    %33 = vector.load %arg3[%c5, %c0_30, %c0_31] : memref<9x16x16xbf16, #tpu.memory_space<vmem>>, vector<1x16x16xbf16>
    %34 = vector.shape_cast %33 : vector<1x16x16xbf16> to vector<16x16xbf16>
    %cst_32 = arith.constant dense<0.000000e+00> : vector<16x24xf32>
    %35 = tpu.matmul %34, %32, %cst_32 {dimension_numbers = #tpu.dot_dimension_numbers<[1], [0], [0], [1], [0, 0, 1, 1], [], []>} : vector<16x16xbf16>, vector<16x24xbf16>, vector<16x24xf32> -> vector<16x24xf32>
    %36 = arith.addf %30, %35 : vector<16x24xf32>
    %c0_33 = arith.constant 0 : index
    %c0_34 = arith.constant 0 : index
    %c12 = arith.constant 12 : index
    %37 = vector.load %arg2[%c0_33, %c0_34, %c12] : memref<1x16x38xbf16, #tpu.memory_space<vmem>>, vector<1x16x24xbf16>
    %38 = vector.shape_cast %37 : vector<1x16x24xbf16> to vector<16x24xbf16>
    %c6_35 = arith.constant 6 : index
    %c0_36 = arith.constant 0 : index
    %c0_37 = arith.constant 0 : index
    %39 = vector.load %arg3[%c6_35, %c0_36, %c0_37] : memref<9x16x16xbf16, #tpu.memory_space<vmem>>, vector<1x16x16xbf16>
    %40 = vector.shape_cast %39 : vector<1x16x16xbf16> to vector<16x16xbf16>
    %cst_38 = arith.constant dense<0.000000e+00> : vector<16x24xf32>
    %41 = tpu.matmul %40, %38, %cst_38 {dimension_numbers = #tpu.dot_dimension_numbers<[1], [0], [0], [1], [0, 0, 1, 1], [], []>} : vector<16x16xbf16>, vector<16x24xbf16>, vector<16x24xf32> -> vector<16x24xf32>
    %42 = arith.addf %36, %41 : vector<16x24xf32>
    %c0_39 = arith.constant 0 : index
    %c0_40 = arith.constant 0 : index
    %c13 = arith.constant 13 : index
    %43 = vector.load %arg2[%c0_39, %c0_40, %c13] : memref<1x16x38xbf16, #tpu.memory_space<vmem>>, vector<1x16x24xbf16>
    %44 = vector.shape_cast %43 : vector<1x16x24xbf16> to vector<16x24xbf16>
    %c7_41 = arith.constant 7 : index
    %c0_42 = arith.constant 0 : index
    %c0_43 = arith.constant 0 : index
    %45 = vector.load %arg3[%c7_41, %c0_42, %c0_43] : memref<9x16x16xbf16, #tpu.memory_space<vmem>>, vector<1x16x16xbf16>
    %46 = vector.shape_cast %45 : vector<1x16x16xbf16> to vector<16x16xbf16>
    %cst_44 = arith.constant dense<0.000000e+00> : vector<16x24xf32>
    %47 = tpu.matmul %46, %44, %cst_44 {dimension_numbers = #tpu.dot_dimension_numbers<[1], [0], [0], [1], [0, 0, 1, 1], [], []>} : vector<16x16xbf16>, vector<16x24xbf16>, vector<16x24xf32> -> vector<16x24xf32>
    %48 = arith.addf %42, %47 : vector<16x24xf32>
    %c0_45 = arith.constant 0 : index
    %c0_46 = arith.constant 0 : index
    %c14 = arith.constant 14 : index
    %49 = vector.load %arg2[%c0_45, %c0_46, %c14] : memref<1x16x38xbf16, #tpu.memory_space<vmem>>, vector<1x16x24xbf16>
    %50 = vector.shape_cast %49 : vector<1x16x24xbf16> to vector<16x24xbf16>
    %c8_47 = arith.constant 8 : index
    %c0_48 = arith.constant 0 : index
    %c0_49 = arith.constant 0 : index
    %51 = vector.load %arg3[%c8_47, %c0_48, %c0_49] : memref<9x16x16xbf16, #tpu.memory_space<vmem>>, vector<1x16x16xbf16>
    %52 = vector.shape_cast %51 : vector<1x16x16xbf16> to vector<16x16xbf16>
    %cst_50 = arith.constant dense<0.000000e+00> : vector<16x24xf32>
    %53 = tpu.matmul %52, %50, %cst_50 {dimension_numbers = #tpu.dot_dimension_numbers<[1], [0], [0], [1], [0, 0, 1, 1], [], []>} : vector<16x16xbf16>, vector<16x24xbf16>, vector<16x24xf32> -> vector<16x24xf32>
    %54 = arith.addf %48, %53 : vector<16x24xf32>
    %c0_51 = arith.constant 0 : index
    %c0_52 = arith.constant 0 : index
    %55 = vector.load %arg4[%c0_51, %c0_52] : memref<1x24xf32, #tpu.memory_space<vmem>>, vector<1x24xf32>
    %56 = vector.broadcast %55 : vector<1x24xf32> to vector<16x24xf32>
    %57 = arith.mulf %54, %56 : vector<16x24xf32>
    %cst_53 = arith.constant dense<0.000000e+00> : vector<16xf32>
    %58 = vector.multi_reduction <add>, %57, %cst_53 [1] : vector<16x24xf32> to vector<16xf32>
    %59 = vector.shape_cast %58 : vector<16xf32> to vector<16x1xf32>
    %cst_54 = arith.constant 6.250000e-02 : f32
    %60 = vector.broadcast %cst_54 : f32 to vector<16x1xf32>
    %61 = arith.mulf %59, %60 : vector<16x1xf32>
    %62 = arith.mulf %57, %57 : vector<16x24xf32>
    %cst_55 = arith.constant dense<0.000000e+00> : vector<16xf32>
    %63 = vector.multi_reduction <add>, %62, %cst_55 [1] : vector<16x24xf32> to vector<16xf32>
    %64 = vector.shape_cast %63 : vector<16xf32> to vector<16x1xf32>
    %cst_56 = arith.constant 6.250000e-02 : f32
    %65 = vector.broadcast %cst_56 : f32 to vector<16x1xf32>
    %66 = arith.mulf %64, %65 : vector<16x1xf32>
    %67 = arith.mulf %61, %61 : vector<16x1xf32>
    %68 = arith.subf %66, %67 : vector<16x1xf32>
    %cst_57 = arith.constant 0.000000e+00 : f32
    %69 = vector.broadcast %cst_57 : f32 to vector<16x1xf32>
    %70 = arith.maximumf %68, %69 : vector<16x1xf32>
    %71 = vector.broadcast %61 : vector<16x1xf32> to vector<16x24xf32>
    %72 = arith.subf %54, %71 : vector<16x24xf32>
    %cst_58 = arith.constant 9.99999974E-6 : f32
    %73 = vector.broadcast %cst_58 : f32 to vector<16x1xf32>
    %74 = arith.addf %70, %73 : vector<16x1xf32>
    %75 = math.rsqrt %74 : vector<16x1xf32>
    %76 = vector.broadcast %75 : vector<16x1xf32> to vector<16x24xf32>
    %77 = arith.mulf %72, %76 : vector<16x24xf32>
    %cst_59 = arith.constant 0.000000e+00 : f32
    %78 = vector.broadcast %cst_59 : f32 to vector<16x24xf32>
    %79 = arith.cmpf oge, %77, %78 : vector<16x24xf32>
    %cst_60 = arith.constant 2.000000e-01 : f32
    %80 = vector.broadcast %cst_60 : f32 to vector<16x24xf32>
    %81 = arith.mulf %80, %77 : vector<16x24xf32>
    %82 = arith.select %79, %77, %81 : vector<16x24xi1>, vector<16x24xf32>
    %c0_61 = arith.constant 0 : index
    %c0_62 = arith.constant 0 : index
    %c0_63 = arith.constant 0 : index
    %83 = vector.load %arg5[%c0_61, %c0_62, %c0_63] : memref<1x16x24xf32, #tpu.memory_space<vmem>>, vector<1x16x24xf32>
    %84 = vector.shape_cast %83 : vector<1x16x24xf32> to vector<16x24xf32>
    %85 = vector.shape_cast %82 : vector<16x24xf32> to vector<1x16x24xf32>
    tpu.vector_store %arg5[%c0_61, %c0_62, %c0_63], %85 {strides = array<i32>} : memref<1x16x24xf32, #tpu.memory_space<vmem>>, vector<1x16x24xf32>,
    return
  }
  func.func @transform_0(%arg0: i32, %arg1: i32) -> (i32, i32, i32) {
    %c0_i32 = arith.constant 0 : i32
    %c0_i32_0 = arith.constant 0 : i32
    %c0_i32_1 = arith.constant 0 : i32
    return %arg0, %c0_i32, %c0_i32_0 : i32, i32, i32
  }
  func.func @transform_1(%arg0: i32, %arg1: i32) -> (i32, i32, i32) {
    %c0_i32 = arith.constant 0 : i32
    %c0_i32_0 = arith.constant 0 : i32
    %c0_i32_1 = arith.constant 0 : i32
    return %c0_i32, %arg1, %c0_i32_0 : i32, i32, i32
  }
  func.func @transform_2(%arg0: i32, %arg1: i32) -> (i32, i32) {
    %c0_i32 = arith.constant 0 : i32
    %c0_i32_0 = arith.constant 0 : i32
    %c0_i32_1 = arith.constant 0 : i32
    return %c0_i32, %c0_i32_0 : i32, i32
  }
  func.func @transform_3(%arg0: i32, %arg1: i32) -> (i32, i32, i32) {
    %c0_i32 = arith.constant 0 : i32
    %c0_i32_0 = arith.constant 0 : i32
    return %arg0, %arg1, %c0_i32 : i32, i32, i32
  }
}

module attributes {stable_mosaic.version = 11 : i64} {
  func.func @_tconv2x2_in_lrelu_kernel(%arg0: i32, %arg1: memref<1x16x16xbf16, #tpu.memory_space<vmem>>, %arg2: memref<32x16xbf16, #tpu.memory_space<vmem>>, %arg3: memref<1x4x8x16xf32, #tpu.memory_space<vmem>>) attributes {dimension_semantics = [#tpu.dimension_semantics<parallel>], iteration_bounds = array<i64: 2>, scalar_prefetch = 0 : i64, scratch_operands = 0 : i64, tpu.core_type = #tpu.core_type<tc>, window_params = [{transform_indices = @transform_0, window_bounds = array<i64: 1, 16, 16>}, {pipeline_mode = #tpu.pipeline_mode<synchronous>, transform_indices = @transform_1, window_bounds = array<i64: 32, 16>}, {transform_indices = @transform_2, window_bounds = array<i64: 1, 4, 8, 16>}]} {
    %c0 = arith.constant 0 : index
    %c0_0 = arith.constant 0 : index
    %0 = vector.load %arg2[%c0, %c0_0] : memref<32x16xbf16, #tpu.memory_space<vmem>>, vector<32x16xbf16>
    %c0_1 = arith.constant 0 : index
    %c0_2 = arith.constant 0 : index
    %c0_3 = arith.constant 0 : index
    %1 = vector.load %arg1[%c0_1, %c0_2, %c0_3] : memref<1x16x16xbf16, #tpu.memory_space<vmem>>, vector<1x16x16xbf16>
    %2 = vector.shape_cast %1 : vector<1x16x16xbf16> to vector<16x16xbf16>
    %cst = arith.constant dense<0.000000e+00> : vector<32x16xf32>
    %3 = tpu.matmul %0, %2, %cst {dimension_numbers = #tpu.dot_dimension_numbers<[1], [0], [0], [1], [0, 0, 1, 1], [], []>} : vector<32x16xbf16>, vector<16x16xbf16>, vector<32x16xf32> -> vector<32x16xf32>
    %cst_4 = arith.constant dense<0.000000e+00> : vector<32xf32>
    %4 = vector.multi_reduction <add>, %3, %cst_4 [1] : vector<32x16xf32> to vector<32xf32>
    %5 = vector.shape_cast %4 : vector<32xf32> to vector<32x1xf32>
    %6 = arith.mulf %3, %3 : vector<32x16xf32>
    %cst_5 = arith.constant dense<0.000000e+00> : vector<32xf32>
    %7 = vector.multi_reduction <add>, %6, %cst_5 [1] : vector<32x16xf32> to vector<32xf32>
    %8 = vector.shape_cast %7 : vector<32xf32> to vector<32x1xf32>
    %9 = vector.extract_strided_slice %5 {offsets = [0, 0], sizes = [8, 1], strides = [1, 1]} : vector<32x1xf32> to vector<8x1xf32>
    %10 = vector.extract_strided_slice %5 {offsets = [8, 0], sizes = [8, 1], strides = [1, 1]} : vector<32x1xf32> to vector<8x1xf32>
    %11 = arith.addf %9, %10 : vector<8x1xf32>
    %12 = vector.extract_strided_slice %5 {offsets = [16, 0], sizes = [8, 1], strides = [1, 1]} : vector<32x1xf32> to vector<8x1xf32>
    %13 = arith.addf %11, %12 : vector<8x1xf32>
    %14 = vector.extract_strided_slice %5 {offsets = [24, 0], sizes = [8, 1], strides = [1, 1]} : vector<32x1xf32> to vector<8x1xf32>
    %15 = arith.addf %13, %14 : vector<8x1xf32>
    %16 = vector.extract_strided_slice %8 {offsets = [0, 0], sizes = [8, 1], strides = [1, 1]} : vector<32x1xf32> to vector<8x1xf32>
    %17 = vector.extract_strided_slice %8 {offsets = [8, 0], sizes = [8, 1], strides = [1, 1]} : vector<32x1xf32> to vector<8x1xf32>
    %18 = arith.addf %16, %17 : vector<8x1xf32>
    %19 = vector.extract_strided_slice %8 {offsets = [16, 0], sizes = [8, 1], strides = [1, 1]} : vector<32x1xf32> to vector<8x1xf32>
    %20 = arith.addf %18, %19 : vector<8x1xf32>
    %21 = vector.extract_strided_slice %8 {offsets = [24, 0], sizes = [8, 1], strides = [1, 1]} : vector<32x1xf32> to vector<8x1xf32>
    %22 = arith.addf %20, %21 : vector<8x1xf32>
    %cst_6 = arith.constant 1.562500e-02 : f32
    %23 = vector.broadcast %cst_6 : f32 to vector<8x1xf32>
    %24 = arith.mulf %15, %23 : vector<8x1xf32>
    %cst_7 = arith.constant 1.562500e-02 : f32
    %25 = vector.broadcast %cst_7 : f32 to vector<8x1xf32>
    %26 = arith.mulf %22, %25 : vector<8x1xf32>
    %27 = arith.mulf %24, %24 : vector<8x1xf32>
    %28 = arith.subf %26, %27 : vector<8x1xf32>
    %cst_8 = arith.constant 0.000000e+00 : f32
    %29 = vector.broadcast %cst_8 : f32 to vector<8x1xf32>
    %30 = arith.maximumf %28, %29 : vector<8x1xf32>
    %cst_9 = arith.constant 9.99999974E-6 : f32
    %31 = vector.broadcast %cst_9 : f32 to vector<8x1xf32>
    %32 = arith.addf %30, %31 : vector<8x1xf32>
    %33 = math.rsqrt %32 : vector<8x1xf32>
    %34 = vector.extract_strided_slice %3 {offsets = [0, 0], sizes = [8, 16], strides = [1, 1]} : vector<32x16xf32> to vector<8x16xf32>
    %35 = vector.broadcast %24 : vector<8x1xf32> to vector<8x16xf32>
    %36 = arith.subf %34, %35 : vector<8x16xf32>
    %37 = vector.broadcast %33 : vector<8x1xf32> to vector<8x16xf32>
    %38 = arith.mulf %36, %37 : vector<8x16xf32>
    %cst_10 = arith.constant 0.000000e+00 : f32
    %39 = vector.broadcast %cst_10 : f32 to vector<8x16xf32>
    %40 = arith.cmpf oge, %38, %39 : vector<8x16xf32>
    %cst_11 = arith.constant 2.000000e-01 : f32
    %41 = vector.broadcast %cst_11 : f32 to vector<8x16xf32>
    %42 = arith.mulf %41, %38 : vector<8x16xf32>
    %43 = arith.select %40, %38, %42 : vector<8x16xi1>, vector<8x16xf32>
    %c0_12 = arith.constant 0 : index
    %c0_13 = arith.constant 0 : index
    %c0_14 = arith.constant 0 : index
    %c0_15 = arith.constant 0 : index
    %44 = vector.load %arg3[%c0_12, %c0_13, %c0_14, %c0_15] : memref<1x4x8x16xf32, #tpu.memory_space<vmem>>, vector<1x1x8x16xf32>
    %45 = vector.shape_cast %44 : vector<1x1x8x16xf32> to vector<8x16xf32>
    %46 = vector.shape_cast %43 : vector<8x16xf32> to vector<1x1x8x16xf32>
    tpu.vector_store %arg3[%c0_12, %c0_13, %c0_14, %c0_15], %46 {strides = array<i32>} : memref<1x4x8x16xf32, #tpu.memory_space<vmem>>, vector<1x1x8x16xf32>,
    %47 = vector.extract_strided_slice %3 {offsets = [8, 0], sizes = [8, 16], strides = [1, 1]} : vector<32x16xf32> to vector<8x16xf32>
    %48 = vector.broadcast %24 : vector<8x1xf32> to vector<8x16xf32>
    %49 = arith.subf %47, %48 : vector<8x16xf32>
    %50 = vector.broadcast %33 : vector<8x1xf32> to vector<8x16xf32>
    %51 = arith.mulf %49, %50 : vector<8x16xf32>
    %cst_16 = arith.constant 0.000000e+00 : f32
    %52 = vector.broadcast %cst_16 : f32 to vector<8x16xf32>
    %53 = arith.cmpf oge, %51, %52 : vector<8x16xf32>
    %cst_17 = arith.constant 2.000000e-01 : f32
    %54 = vector.broadcast %cst_17 : f32 to vector<8x16xf32>
    %55 = arith.mulf %54, %51 : vector<8x16xf32>
    %56 = arith.select %53, %51, %55 : vector<8x16xi1>, vector<8x16xf32>
    %c0_18 = arith.constant 0 : index
    %c1 = arith.constant 1 : index
    %c0_19 = arith.constant 0 : index
    %c0_20 = arith.constant 0 : index
    %57 = vector.load %arg3[%c0_18, %c1, %c0_19, %c0_20] : memref<1x4x8x16xf32, #tpu.memory_space<vmem>>, vector<1x1x8x16xf32>
    %58 = vector.shape_cast %57 : vector<1x1x8x16xf32> to vector<8x16xf32>
    %59 = vector.shape_cast %56 : vector<8x16xf32> to vector<1x1x8x16xf32>
    tpu.vector_store %arg3[%c0_18, %c1, %c0_19, %c0_20], %59 {strides = array<i32>} : memref<1x4x8x16xf32, #tpu.memory_space<vmem>>, vector<1x1x8x16xf32>,
    %60 = vector.extract_strided_slice %3 {offsets = [16, 0], sizes = [8, 16], strides = [1, 1]} : vector<32x16xf32> to vector<8x16xf32>
    %61 = vector.broadcast %24 : vector<8x1xf32> to vector<8x16xf32>
    %62 = arith.subf %60, %61 : vector<8x16xf32>
    %63 = vector.broadcast %33 : vector<8x1xf32> to vector<8x16xf32>
    %64 = arith.mulf %62, %63 : vector<8x16xf32>
    %cst_21 = arith.constant 0.000000e+00 : f32
    %65 = vector.broadcast %cst_21 : f32 to vector<8x16xf32>
    %66 = arith.cmpf oge, %64, %65 : vector<8x16xf32>
    %cst_22 = arith.constant 2.000000e-01 : f32
    %67 = vector.broadcast %cst_22 : f32 to vector<8x16xf32>
    %68 = arith.mulf %67, %64 : vector<8x16xf32>
    %69 = arith.select %66, %64, %68 : vector<8x16xi1>, vector<8x16xf32>
    %c0_23 = arith.constant 0 : index
    %c2 = arith.constant 2 : index
    %c0_24 = arith.constant 0 : index
    %c0_25 = arith.constant 0 : index
    %70 = vector.load %arg3[%c0_23, %c2, %c0_24, %c0_25] : memref<1x4x8x16xf32, #tpu.memory_space<vmem>>, vector<1x1x8x16xf32>
    %71 = vector.shape_cast %70 : vector<1x1x8x16xf32> to vector<8x16xf32>
    %72 = vector.shape_cast %69 : vector<8x16xf32> to vector<1x1x8x16xf32>
    tpu.vector_store %arg3[%c0_23, %c2, %c0_24, %c0_25], %72 {strides = array<i32>} : memref<1x4x8x16xf32, #tpu.memory_space<vmem>>, vector<1x1x8x16xf32>,
    %73 = vector.extract_strided_slice %3 {offsets = [24, 0], sizes = [8, 16], strides = [1, 1]} : vector<32x16xf32> to vector<8x16xf32>
    %74 = vector.broadcast %24 : vector<8x1xf32> to vector<8x16xf32>
    %75 = arith.subf %73, %74 : vector<8x16xf32>
    %76 = vector.broadcast %33 : vector<8x1xf32> to vector<8x16xf32>
    %77 = arith.mulf %75, %76 : vector<8x16xf32>
    %cst_26 = arith.constant 0.000000e+00 : f32
    %78 = vector.broadcast %cst_26 : f32 to vector<8x16xf32>
    %79 = arith.cmpf oge, %77, %78 : vector<8x16xf32>
    %cst_27 = arith.constant 2.000000e-01 : f32
    %80 = vector.broadcast %cst_27 : f32 to vector<8x16xf32>
    %81 = arith.mulf %80, %77 : vector<8x16xf32>
    %82 = arith.select %79, %77, %81 : vector<8x16xi1>, vector<8x16xf32>
    %c0_28 = arith.constant 0 : index
    %c3 = arith.constant 3 : index
    %c0_29 = arith.constant 0 : index
    %c0_30 = arith.constant 0 : index
    %83 = vector.load %arg3[%c0_28, %c3, %c0_29, %c0_30] : memref<1x4x8x16xf32, #tpu.memory_space<vmem>>, vector<1x1x8x16xf32>
    %84 = vector.shape_cast %83 : vector<1x1x8x16xf32> to vector<8x16xf32>
    %85 = vector.shape_cast %82 : vector<8x16xf32> to vector<1x1x8x16xf32>
    tpu.vector_store %arg3[%c0_28, %c3, %c0_29, %c0_30], %85 {strides = array<i32>} : memref<1x4x8x16xf32, #tpu.memory_space<vmem>>, vector<1x1x8x16xf32>,
    return
  }
  func.func @transform_0(%arg0: i32) -> (i32, i32, i32) {
    %c0_i32 = arith.constant 0 : i32
    %c0_i32_0 = arith.constant 0 : i32
    %c0_i32_1 = arith.constant 0 : i32
    return %arg0, %c0_i32, %c0_i32_0 : i32, i32, i32
  }
  func.func @transform_1(%arg0: i32) -> (i32, i32) {
    %c0_i32 = arith.constant 0 : i32
    %c0_i32_0 = arith.constant 0 : i32
    %c0_i32_1 = arith.constant 0 : i32
    return %c0_i32, %c0_i32_0 : i32, i32
  }
  func.func @transform_2(%arg0: i32) -> (i32, i32, i32, i32) {
    %c0_i32 = arith.constant 0 : i32
    %c0_i32_0 = arith.constant 0 : i32
    %c0_i32_1 = arith.constant 0 : i32
    %c0_i32_2 = arith.constant 0 : i32
    return %arg0, %c0_i32, %c0_i32_0, %c0_i32_1 : i32, i32, i32, i32
  }
}

module attributes {stable_mosaic.version = 11 : i64} {
  func.func @_conv3x3_in_lrelu_kernel(%arg0: i32, %arg1: i32, %arg2: memref<1x16x102xbf16, #tpu.memory_space<vmem>>, %arg3: memref<9x8x16xbf16, #tpu.memory_space<vmem>>, %arg4: memref<1x80xf32, #tpu.memory_space<vmem>>, %arg5: memref<1x8x80xf32, #tpu.memory_space<vmem>>) attributes {dimension_semantics = [#tpu.dimension_semantics<parallel>, #tpu.dimension_semantics<parallel>], iteration_bounds = array<i64: 2, 1>, scalar_prefetch = 0 : i64, scratch_operands = 0 : i64, tpu.core_type = #tpu.core_type<tc>, window_params = [{transform_indices = @transform_0, window_bounds = array<i64: 1, 16, 102>}, {transform_indices = @transform_1, window_bounds = array<i64: 9, 8, 16>}, {pipeline_mode = #tpu.pipeline_mode<synchronous>, transform_indices = @transform_2, window_bounds = array<i64: 1, 80>}, {transform_indices = @transform_3, window_bounds = array<i64: 1, 8, 80>}]} {
    %cst = arith.constant 0.000000e+00 : f32
    %0 = vector.broadcast %cst : f32 to vector<8x80xf32>
    %c0 = arith.constant 0 : index
    %c0_0 = arith.constant 0 : index
    %c0_1 = arith.constant 0 : index
    %1 = vector.load %arg2[%c0, %c0_0, %c0_1] : memref<1x16x102xbf16, #tpu.memory_space<vmem>>, vector<1x16x80xbf16>
    %2 = vector.shape_cast %1 : vector<1x16x80xbf16> to vector<16x80xbf16>
    %c0_2 = arith.constant 0 : index
    %c0_3 = arith.constant 0 : index
    %c0_4 = arith.constant 0 : index
    %3 = vector.load %arg3[%c0_2, %c0_3, %c0_4] : memref<9x8x16xbf16, #tpu.memory_space<vmem>>, vector<1x8x16xbf16>
    %4 = vector.shape_cast %3 : vector<1x8x16xbf16> to vector<8x16xbf16>
    %cst_5 = arith.constant dense<0.000000e+00> : vector<8x80xf32>
    %5 = tpu.matmul %4, %2, %cst_5 {dimension_numbers = #tpu.dot_dimension_numbers<[1], [0], [0], [1], [0, 0, 1, 1], [], []>} : vector<8x16xbf16>, vector<16x80xbf16>, vector<8x80xf32> -> vector<8x80xf32>
    %6 = arith.addf %0, %5 : vector<8x80xf32>
    %c0_6 = arith.constant 0 : index
    %c0_7 = arith.constant 0 : index
    %c1 = arith.constant 1 : index
    %7 = vector.load %arg2[%c0_6, %c0_7, %c1] : memref<1x16x102xbf16, #tpu.memory_space<vmem>>, vector<1x16x80xbf16>
    %8 = vector.shape_cast %7 : vector<1x16x80xbf16> to vector<16x80xbf16>
    %c1_8 = arith.constant 1 : index
    %c0_9 = arith.constant 0 : index
    %c0_10 = arith.constant 0 : index
    %9 = vector.load %arg3[%c1_8, %c0_9, %c0_10] : memref<9x8x16xbf16, #tpu.memory_space<vmem>>, vector<1x8x16xbf16>
    %10 = vector.shape_cast %9 : vector<1x8x16xbf16> to vector<8x16xbf16>
    %cst_11 = arith.constant dense<0.000000e+00> : vector<8x80xf32>
    %11 = tpu.matmul %10, %8, %cst_11 {dimension_numbers = #tpu.dot_dimension_numbers<[1], [0], [0], [1], [0, 0, 1, 1], [], []>} : vector<8x16xbf16>, vector<16x80xbf16>, vector<8x80xf32> -> vector<8x80xf32>
    %12 = arith.addf %6, %11 : vector<8x80xf32>
    %c0_12 = arith.constant 0 : index
    %c0_13 = arith.constant 0 : index
    %c2 = arith.constant 2 : index
    %13 = vector.load %arg2[%c0_12, %c0_13, %c2] : memref<1x16x102xbf16, #tpu.memory_space<vmem>>, vector<1x16x80xbf16>
    %14 = vector.shape_cast %13 : vector<1x16x80xbf16> to vector<16x80xbf16>
    %c2_14 = arith.constant 2 : index
    %c0_15 = arith.constant 0 : index
    %c0_16 = arith.constant 0 : index
    %15 = vector.load %arg3[%c2_14, %c0_15, %c0_16] : memref<9x8x16xbf16, #tpu.memory_space<vmem>>, vector<1x8x16xbf16>
    %16 = vector.shape_cast %15 : vector<1x8x16xbf16> to vector<8x16xbf16>
    %cst_17 = arith.constant dense<0.000000e+00> : vector<8x80xf32>
    %17 = tpu.matmul %16, %14, %cst_17 {dimension_numbers = #tpu.dot_dimension_numbers<[1], [0], [0], [1], [0, 0, 1, 1], [], []>} : vector<8x16xbf16>, vector<16x80xbf16>, vector<8x80xf32> -> vector<8x80xf32>
    %18 = arith.addf %12, %17 : vector<8x80xf32>
    %c0_18 = arith.constant 0 : index
    %c0_19 = arith.constant 0 : index
    %c10 = arith.constant 10 : index
    %19 = vector.load %arg2[%c0_18, %c0_19, %c10] : memref<1x16x102xbf16, #tpu.memory_space<vmem>>, vector<1x16x80xbf16>
    %20 = vector.shape_cast %19 : vector<1x16x80xbf16> to vector<16x80xbf16>
    %c3 = arith.constant 3 : index
    %c0_20 = arith.constant 0 : index
    %c0_21 = arith.constant 0 : index
    %21 = vector.load %arg3[%c3, %c0_20, %c0_21] : memref<9x8x16xbf16, #tpu.memory_space<vmem>>, vector<1x8x16xbf16>
    %22 = vector.shape_cast %21 : vector<1x8x16xbf16> to vector<8x16xbf16>
    %cst_22 = arith.constant dense<0.000000e+00> : vector<8x80xf32>
    %23 = tpu.matmul %22, %20, %cst_22 {dimension_numbers = #tpu.dot_dimension_numbers<[1], [0], [0], [1], [0, 0, 1, 1], [], []>} : vector<8x16xbf16>, vector<16x80xbf16>, vector<8x80xf32> -> vector<8x80xf32>
    %24 = arith.addf %18, %23 : vector<8x80xf32>
    %c0_23 = arith.constant 0 : index
    %c0_24 = arith.constant 0 : index
    %c11 = arith.constant 11 : index
    %25 = vector.load %arg2[%c0_23, %c0_24, %c11] : memref<1x16x102xbf16, #tpu.memory_space<vmem>>, vector<1x16x80xbf16>
    %26 = vector.shape_cast %25 : vector<1x16x80xbf16> to vector<16x80xbf16>
    %c4 = arith.constant 4 : index
    %c0_25 = arith.constant 0 : index
    %c0_26 = arith.constant 0 : index
    %27 = vector.load %arg3[%c4, %c0_25, %c0_26] : memref<9x8x16xbf16, #tpu.memory_space<vmem>>, vector<1x8x16xbf16>
    %28 = vector.shape_cast %27 : vector<1x8x16xbf16> to vector<8x16xbf16>
    %cst_27 = arith.constant dense<0.000000e+00> : vector<8x80xf32>
    %29 = tpu.matmul %28, %26, %cst_27 {dimension_numbers = #tpu.dot_dimension_numbers<[1], [0], [0], [1], [0, 0, 1, 1], [], []>} : vector<8x16xbf16>, vector<16x80xbf16>, vector<8x80xf32> -> vector<8x80xf32>
    %30 = arith.addf %24, %29 : vector<8x80xf32>
    %c0_28 = arith.constant 0 : index
    %c0_29 = arith.constant 0 : index
    %c12 = arith.constant 12 : index
    %31 = vector.load %arg2[%c0_28, %c0_29, %c12] : memref<1x16x102xbf16, #tpu.memory_space<vmem>>, vector<1x16x80xbf16>
    %32 = vector.shape_cast %31 : vector<1x16x80xbf16> to vector<16x80xbf16>
    %c5 = arith.constant 5 : index
    %c0_30 = arith.constant 0 : index
    %c0_31 = arith.constant 0 : index
    %33 = vector.load %arg3[%c5, %c0_30, %c0_31] : memref<9x8x16xbf16, #tpu.memory_space<vmem>>, vector<1x8x16xbf16>
    %34 = vector.shape_cast %33 : vector<1x8x16xbf16> to vector<8x16xbf16>
    %cst_32 = arith.constant dense<0.000000e+00> : vector<8x80xf32>
    %35 = tpu.matmul %34, %32, %cst_32 {dimension_numbers = #tpu.dot_dimension_numbers<[1], [0], [0], [1], [0, 0, 1, 1], [], []>} : vector<8x16xbf16>, vector<16x80xbf16>, vector<8x80xf32> -> vector<8x80xf32>
    %36 = arith.addf %30, %35 : vector<8x80xf32>
    %c0_33 = arith.constant 0 : index
    %c0_34 = arith.constant 0 : index
    %c20 = arith.constant 20 : index
    %37 = vector.load %arg2[%c0_33, %c0_34, %c20] : memref<1x16x102xbf16, #tpu.memory_space<vmem>>, vector<1x16x80xbf16>
    %38 = vector.shape_cast %37 : vector<1x16x80xbf16> to vector<16x80xbf16>
    %c6 = arith.constant 6 : index
    %c0_35 = arith.constant 0 : index
    %c0_36 = arith.constant 0 : index
    %39 = vector.load %arg3[%c6, %c0_35, %c0_36] : memref<9x8x16xbf16, #tpu.memory_space<vmem>>, vector<1x8x16xbf16>
    %40 = vector.shape_cast %39 : vector<1x8x16xbf16> to vector<8x16xbf16>
    %cst_37 = arith.constant dense<0.000000e+00> : vector<8x80xf32>
    %41 = tpu.matmul %40, %38, %cst_37 {dimension_numbers = #tpu.dot_dimension_numbers<[1], [0], [0], [1], [0, 0, 1, 1], [], []>} : vector<8x16xbf16>, vector<16x80xbf16>, vector<8x80xf32> -> vector<8x80xf32>
    %42 = arith.addf %36, %41 : vector<8x80xf32>
    %c0_38 = arith.constant 0 : index
    %c0_39 = arith.constant 0 : index
    %c21 = arith.constant 21 : index
    %43 = vector.load %arg2[%c0_38, %c0_39, %c21] : memref<1x16x102xbf16, #tpu.memory_space<vmem>>, vector<1x16x80xbf16>
    %44 = vector.shape_cast %43 : vector<1x16x80xbf16> to vector<16x80xbf16>
    %c7 = arith.constant 7 : index
    %c0_40 = arith.constant 0 : index
    %c0_41 = arith.constant 0 : index
    %45 = vector.load %arg3[%c7, %c0_40, %c0_41] : memref<9x8x16xbf16, #tpu.memory_space<vmem>>, vector<1x8x16xbf16>
    %46 = vector.shape_cast %45 : vector<1x8x16xbf16> to vector<8x16xbf16>
    %cst_42 = arith.constant dense<0.000000e+00> : vector<8x80xf32>
    %47 = tpu.matmul %46, %44, %cst_42 {dimension_numbers = #tpu.dot_dimension_numbers<[1], [0], [0], [1], [0, 0, 1, 1], [], []>} : vector<8x16xbf16>, vector<16x80xbf16>, vector<8x80xf32> -> vector<8x80xf32>
    %48 = arith.addf %42, %47 : vector<8x80xf32>
    %c0_43 = arith.constant 0 : index
    %c0_44 = arith.constant 0 : index
    %c22 = arith.constant 22 : index
    %49 = vector.load %arg2[%c0_43, %c0_44, %c22] : memref<1x16x102xbf16, #tpu.memory_space<vmem>>, vector<1x16x80xbf16>
    %50 = vector.shape_cast %49 : vector<1x16x80xbf16> to vector<16x80xbf16>
    %c8 = arith.constant 8 : index
    %c0_45 = arith.constant 0 : index
    %c0_46 = arith.constant 0 : index
    %51 = vector.load %arg3[%c8, %c0_45, %c0_46] : memref<9x8x16xbf16, #tpu.memory_space<vmem>>, vector<1x8x16xbf16>
    %52 = vector.shape_cast %51 : vector<1x8x16xbf16> to vector<8x16xbf16>
    %cst_47 = arith.constant dense<0.000000e+00> : vector<8x80xf32>
    %53 = tpu.matmul %52, %50, %cst_47 {dimension_numbers = #tpu.dot_dimension_numbers<[1], [0], [0], [1], [0, 0, 1, 1], [], []>} : vector<8x16xbf16>, vector<16x80xbf16>, vector<8x80xf32> -> vector<8x80xf32>
    %54 = arith.addf %48, %53 : vector<8x80xf32>
    %c0_48 = arith.constant 0 : index
    %c0_49 = arith.constant 0 : index
    %55 = vector.load %arg4[%c0_48, %c0_49] : memref<1x80xf32, #tpu.memory_space<vmem>>, vector<1x80xf32>
    %56 = vector.broadcast %55 : vector<1x80xf32> to vector<8x80xf32>
    %57 = arith.mulf %54, %56 : vector<8x80xf32>
    %cst_50 = arith.constant dense<0.000000e+00> : vector<8xf32>
    %58 = vector.multi_reduction <add>, %57, %cst_50 [1] : vector<8x80xf32> to vector<8xf32>
    %59 = vector.shape_cast %58 : vector<8xf32> to vector<8x1xf32>
    %cst_51 = arith.constant 1.562500e-02 : f32
    %60 = vector.broadcast %cst_51 : f32 to vector<8x1xf32>
    %61 = arith.mulf %59, %60 : vector<8x1xf32>
    %62 = arith.mulf %57, %57 : vector<8x80xf32>
    %cst_52 = arith.constant dense<0.000000e+00> : vector<8xf32>
    %63 = vector.multi_reduction <add>, %62, %cst_52 [1] : vector<8x80xf32> to vector<8xf32>
    %64 = vector.shape_cast %63 : vector<8xf32> to vector<8x1xf32>
    %cst_53 = arith.constant 1.562500e-02 : f32
    %65 = vector.broadcast %cst_53 : f32 to vector<8x1xf32>
    %66 = arith.mulf %64, %65 : vector<8x1xf32>
    %67 = arith.mulf %61, %61 : vector<8x1xf32>
    %68 = arith.subf %66, %67 : vector<8x1xf32>
    %cst_54 = arith.constant 0.000000e+00 : f32
    %69 = vector.broadcast %cst_54 : f32 to vector<8x1xf32>
    %70 = arith.maximumf %68, %69 : vector<8x1xf32>
    %71 = vector.broadcast %61 : vector<8x1xf32> to vector<8x80xf32>
    %72 = arith.subf %54, %71 : vector<8x80xf32>
    %cst_55 = arith.constant 9.99999974E-6 : f32
    %73 = vector.broadcast %cst_55 : f32 to vector<8x1xf32>
    %74 = arith.addf %70, %73 : vector<8x1xf32>
    %75 = math.rsqrt %74 : vector<8x1xf32>
    %76 = vector.broadcast %75 : vector<8x1xf32> to vector<8x80xf32>
    %77 = arith.mulf %72, %76 : vector<8x80xf32>
    %cst_56 = arith.constant 0.000000e+00 : f32
    %78 = vector.broadcast %cst_56 : f32 to vector<8x80xf32>
    %79 = arith.cmpf oge, %77, %78 : vector<8x80xf32>
    %cst_57 = arith.constant 2.000000e-01 : f32
    %80 = vector.broadcast %cst_57 : f32 to vector<8x80xf32>
    %81 = arith.mulf %80, %77 : vector<8x80xf32>
    %82 = arith.select %79, %77, %81 : vector<8x80xi1>, vector<8x80xf32>
    %c0_58 = arith.constant 0 : index
    %c0_59 = arith.constant 0 : index
    %c0_60 = arith.constant 0 : index
    %83 = vector.load %arg5[%c0_58, %c0_59, %c0_60] : memref<1x8x80xf32, #tpu.memory_space<vmem>>, vector<1x8x80xf32>
    %84 = vector.shape_cast %83 : vector<1x8x80xf32> to vector<8x80xf32>
    %85 = vector.shape_cast %82 : vector<8x80xf32> to vector<1x8x80xf32>
    tpu.vector_store %arg5[%c0_58, %c0_59, %c0_60], %85 {strides = array<i32>} : memref<1x8x80xf32, #tpu.memory_space<vmem>>, vector<1x8x80xf32>,
    return
  }
  func.func @transform_0(%arg0: i32, %arg1: i32) -> (i32, i32, i32) {
    %c0_i32 = arith.constant 0 : i32
    %c0_i32_0 = arith.constant 0 : i32
    %c0_i32_1 = arith.constant 0 : i32
    return %arg0, %c0_i32, %c0_i32_0 : i32, i32, i32
  }
  func.func @transform_1(%arg0: i32, %arg1: i32) -> (i32, i32, i32) {
    %c0_i32 = arith.constant 0 : i32
    %c0_i32_0 = arith.constant 0 : i32
    %c0_i32_1 = arith.constant 0 : i32
    return %c0_i32, %arg1, %c0_i32_0 : i32, i32, i32
  }
  func.func @transform_2(%arg0: i32, %arg1: i32) -> (i32, i32) {
    %c0_i32 = arith.constant 0 : i32
    %c0_i32_0 = arith.constant 0 : i32
    %c0_i32_1 = arith.constant 0 : i32
    return %c0_i32, %c0_i32_0 : i32, i32
  }
  func.func @transform_3(%arg0: i32, %arg1: i32) -> (i32, i32, i32) {
    %c0_i32 = arith.constant 0 : i32
    %c0_i32_0 = arith.constant 0 : i32
    return %arg0, %arg1, %c0_i32 : i32, i32, i32
  }
}

module attributes {stable_mosaic.version = 11 : i64} {
  func.func @_tconv2x2_in_lrelu_kernel(%arg0: i32, %arg1: memref<1x8x64xbf16, #tpu.memory_space<vmem>>, %arg2: memref<16x8xbf16, #tpu.memory_space<vmem>>, %arg3: memref<1x4x4x64xf32, #tpu.memory_space<vmem>>) attributes {dimension_semantics = [#tpu.dimension_semantics<parallel>], iteration_bounds = array<i64: 2>, scalar_prefetch = 0 : i64, scratch_operands = 0 : i64, tpu.core_type = #tpu.core_type<tc>, window_params = [{transform_indices = @transform_0, window_bounds = array<i64: 1, 8, 64>}, {pipeline_mode = #tpu.pipeline_mode<synchronous>, transform_indices = @transform_1, window_bounds = array<i64: 16, 8>}, {transform_indices = @transform_2, window_bounds = array<i64: 1, 4, 4, 64>}]} {
    %c0 = arith.constant 0 : index
    %c0_0 = arith.constant 0 : index
    %0 = vector.load %arg2[%c0, %c0_0] : memref<16x8xbf16, #tpu.memory_space<vmem>>, vector<16x8xbf16>
    %c0_1 = arith.constant 0 : index
    %c0_2 = arith.constant 0 : index
    %c0_3 = arith.constant 0 : index
    %1 = vector.load %arg1[%c0_1, %c0_2, %c0_3] : memref<1x8x64xbf16, #tpu.memory_space<vmem>>, vector<1x8x64xbf16>
    %2 = vector.shape_cast %1 : vector<1x8x64xbf16> to vector<8x64xbf16>
    %cst = arith.constant dense<0.000000e+00> : vector<16x64xf32>
    %3 = tpu.matmul %0, %2, %cst {dimension_numbers = #tpu.dot_dimension_numbers<[1], [0], [0], [1], [0, 0, 1, 1], [], []>} : vector<16x8xbf16>, vector<8x64xbf16>, vector<16x64xf32> -> vector<16x64xf32>
    %cst_4 = arith.constant dense<0.000000e+00> : vector<16xf32>
    %4 = vector.multi_reduction <add>, %3, %cst_4 [1] : vector<16x64xf32> to vector<16xf32>
    %5 = vector.shape_cast %4 : vector<16xf32> to vector<16x1xf32>
    %6 = arith.mulf %3, %3 : vector<16x64xf32>
    %cst_5 = arith.constant dense<0.000000e+00> : vector<16xf32>
    %7 = vector.multi_reduction <add>, %6, %cst_5 [1] : vector<16x64xf32> to vector<16xf32>
    %8 = vector.shape_cast %7 : vector<16xf32> to vector<16x1xf32>
    %9 = vector.extract_strided_slice %5 {offsets = [0, 0], sizes = [4, 1], strides = [1, 1]} : vector<16x1xf32> to vector<4x1xf32>
    %10 = vector.extract_strided_slice %5 {offsets = [4, 0], sizes = [4, 1], strides = [1, 1]} : vector<16x1xf32> to vector<4x1xf32>
    %11 = arith.addf %9, %10 : vector<4x1xf32>
    %12 = vector.extract_strided_slice %5 {offsets = [8, 0], sizes = [4, 1], strides = [1, 1]} : vector<16x1xf32> to vector<4x1xf32>
    %13 = arith.addf %11, %12 : vector<4x1xf32>
    %14 = vector.extract_strided_slice %5 {offsets = [12, 0], sizes = [4, 1], strides = [1, 1]} : vector<16x1xf32> to vector<4x1xf32>
    %15 = arith.addf %13, %14 : vector<4x1xf32>
    %16 = vector.extract_strided_slice %8 {offsets = [0, 0], sizes = [4, 1], strides = [1, 1]} : vector<16x1xf32> to vector<4x1xf32>
    %17 = vector.extract_strided_slice %8 {offsets = [4, 0], sizes = [4, 1], strides = [1, 1]} : vector<16x1xf32> to vector<4x1xf32>
    %18 = arith.addf %16, %17 : vector<4x1xf32>
    %19 = vector.extract_strided_slice %8 {offsets = [8, 0], sizes = [4, 1], strides = [1, 1]} : vector<16x1xf32> to vector<4x1xf32>
    %20 = arith.addf %18, %19 : vector<4x1xf32>
    %21 = vector.extract_strided_slice %8 {offsets = [12, 0], sizes = [4, 1], strides = [1, 1]} : vector<16x1xf32> to vector<4x1xf32>
    %22 = arith.addf %20, %21 : vector<4x1xf32>
    %cst_6 = arith.constant 3.906250e-03 : f32
    %23 = vector.broadcast %cst_6 : f32 to vector<4x1xf32>
    %24 = arith.mulf %15, %23 : vector<4x1xf32>
    %cst_7 = arith.constant 3.906250e-03 : f32
    %25 = vector.broadcast %cst_7 : f32 to vector<4x1xf32>
    %26 = arith.mulf %22, %25 : vector<4x1xf32>
    %27 = arith.mulf %24, %24 : vector<4x1xf32>
    %28 = arith.subf %26, %27 : vector<4x1xf32>
    %cst_8 = arith.constant 0.000000e+00 : f32
    %29 = vector.broadcast %cst_8 : f32 to vector<4x1xf32>
    %30 = arith.maximumf %28, %29 : vector<4x1xf32>
    %cst_9 = arith.constant 9.99999974E-6 : f32
    %31 = vector.broadcast %cst_9 : f32 to vector<4x1xf32>
    %32 = arith.addf %30, %31 : vector<4x1xf32>
    %33 = math.rsqrt %32 : vector<4x1xf32>
    %34 = vector.extract_strided_slice %3 {offsets = [0, 0], sizes = [4, 64], strides = [1, 1]} : vector<16x64xf32> to vector<4x64xf32>
    %35 = vector.broadcast %24 : vector<4x1xf32> to vector<4x64xf32>
    %36 = arith.subf %34, %35 : vector<4x64xf32>
    %37 = vector.broadcast %33 : vector<4x1xf32> to vector<4x64xf32>
    %38 = arith.mulf %36, %37 : vector<4x64xf32>
    %cst_10 = arith.constant 0.000000e+00 : f32
    %39 = vector.broadcast %cst_10 : f32 to vector<4x64xf32>
    %40 = arith.cmpf oge, %38, %39 : vector<4x64xf32>
    %cst_11 = arith.constant 2.000000e-01 : f32
    %41 = vector.broadcast %cst_11 : f32 to vector<4x64xf32>
    %42 = arith.mulf %41, %38 : vector<4x64xf32>
    %43 = arith.select %40, %38, %42 : vector<4x64xi1>, vector<4x64xf32>
    %c0_12 = arith.constant 0 : index
    %c0_13 = arith.constant 0 : index
    %c0_14 = arith.constant 0 : index
    %c0_15 = arith.constant 0 : index
    %44 = vector.load %arg3[%c0_12, %c0_13, %c0_14, %c0_15] : memref<1x4x4x64xf32, #tpu.memory_space<vmem>>, vector<1x1x4x64xf32>
    %45 = vector.shape_cast %44 : vector<1x1x4x64xf32> to vector<4x64xf32>
    %46 = vector.shape_cast %43 : vector<4x64xf32> to vector<1x1x4x64xf32>
    tpu.vector_store %arg3[%c0_12, %c0_13, %c0_14, %c0_15], %46 {strides = array<i32>} : memref<1x4x4x64xf32, #tpu.memory_space<vmem>>, vector<1x1x4x64xf32>,
    %47 = vector.extract_strided_slice %3 {offsets = [4, 0], sizes = [4, 64], strides = [1, 1]} : vector<16x64xf32> to vector<4x64xf32>
    %48 = vector.broadcast %24 : vector<4x1xf32> to vector<4x64xf32>
    %49 = arith.subf %47, %48 : vector<4x64xf32>
    %50 = vector.broadcast %33 : vector<4x1xf32> to vector<4x64xf32>
    %51 = arith.mulf %49, %50 : vector<4x64xf32>
    %cst_16 = arith.constant 0.000000e+00 : f32
    %52 = vector.broadcast %cst_16 : f32 to vector<4x64xf32>
    %53 = arith.cmpf oge, %51, %52 : vector<4x64xf32>
    %cst_17 = arith.constant 2.000000e-01 : f32
    %54 = vector.broadcast %cst_17 : f32 to vector<4x64xf32>
    %55 = arith.mulf %54, %51 : vector<4x64xf32>
    %56 = arith.select %53, %51, %55 : vector<4x64xi1>, vector<4x64xf32>
    %c0_18 = arith.constant 0 : index
    %c1 = arith.constant 1 : index
    %c0_19 = arith.constant 0 : index
    %c0_20 = arith.constant 0 : index
    %57 = vector.load %arg3[%c0_18, %c1, %c0_19, %c0_20] : memref<1x4x4x64xf32, #tpu.memory_space<vmem>>, vector<1x1x4x64xf32>
    %58 = vector.shape_cast %57 : vector<1x1x4x64xf32> to vector<4x64xf32>
    %59 = vector.shape_cast %56 : vector<4x64xf32> to vector<1x1x4x64xf32>
    tpu.vector_store %arg3[%c0_18, %c1, %c0_19, %c0_20], %59 {strides = array<i32>} : memref<1x4x4x64xf32, #tpu.memory_space<vmem>>, vector<1x1x4x64xf32>,
    %60 = vector.extract_strided_slice %3 {offsets = [8, 0], sizes = [4, 64], strides = [1, 1]} : vector<16x64xf32> to vector<4x64xf32>
    %61 = vector.broadcast %24 : vector<4x1xf32> to vector<4x64xf32>
    %62 = arith.subf %60, %61 : vector<4x64xf32>
    %63 = vector.broadcast %33 : vector<4x1xf32> to vector<4x64xf32>
    %64 = arith.mulf %62, %63 : vector<4x64xf32>
    %cst_21 = arith.constant 0.000000e+00 : f32
    %65 = vector.broadcast %cst_21 : f32 to vector<4x64xf32>
    %66 = arith.cmpf oge, %64, %65 : vector<4x64xf32>
    %cst_22 = arith.constant 2.000000e-01 : f32
    %67 = vector.broadcast %cst_22 : f32 to vector<4x64xf32>
    %68 = arith.mulf %67, %64 : vector<4x64xf32>
    %69 = arith.select %66, %64, %68 : vector<4x64xi1>, vector<4x64xf32>
    %c0_23 = arith.constant 0 : index
    %c2 = arith.constant 2 : index
    %c0_24 = arith.constant 0 : index
    %c0_25 = arith.constant 0 : index
    %70 = vector.load %arg3[%c0_23, %c2, %c0_24, %c0_25] : memref<1x4x4x64xf32, #tpu.memory_space<vmem>>, vector<1x1x4x64xf32>
    %71 = vector.shape_cast %70 : vector<1x1x4x64xf32> to vector<4x64xf32>
    %72 = vector.shape_cast %69 : vector<4x64xf32> to vector<1x1x4x64xf32>
    tpu.vector_store %arg3[%c0_23, %c2, %c0_24, %c0_25], %72 {strides = array<i32>} : memref<1x4x4x64xf32, #tpu.memory_space<vmem>>, vector<1x1x4x64xf32>,
    %73 = vector.extract_strided_slice %3 {offsets = [12, 0], sizes = [4, 64], strides = [1, 1]} : vector<16x64xf32> to vector<4x64xf32>
    %74 = vector.broadcast %24 : vector<4x1xf32> to vector<4x64xf32>
    %75 = arith.subf %73, %74 : vector<4x64xf32>
    %76 = vector.broadcast %33 : vector<4x1xf32> to vector<4x64xf32>
    %77 = arith.mulf %75, %76 : vector<4x64xf32>
    %cst_26 = arith.constant 0.000000e+00 : f32
    %78 = vector.broadcast %cst_26 : f32 to vector<4x64xf32>
    %79 = arith.cmpf oge, %77, %78 : vector<4x64xf32>
    %cst_27 = arith.constant 2.000000e-01 : f32
    %80 = vector.broadcast %cst_27 : f32 to vector<4x64xf32>
    %81 = arith.mulf %80, %77 : vector<4x64xf32>
    %82 = arith.select %79, %77, %81 : vector<4x64xi1>, vector<4x64xf32>
    %c0_28 = arith.constant 0 : index
    %c3 = arith.constant 3 : index
    %c0_29 = arith.constant 0 : index
    %c0_30 = arith.constant 0 : index
    %83 = vector.load %arg3[%c0_28, %c3, %c0_29, %c0_30] : memref<1x4x4x64xf32, #tpu.memory_space<vmem>>, vector<1x1x4x64xf32>
    %84 = vector.shape_cast %83 : vector<1x1x4x64xf32> to vector<4x64xf32>
    %85 = vector.shape_cast %82 : vector<4x64xf32> to vector<1x1x4x64xf32>
    tpu.vector_store %arg3[%c0_28, %c3, %c0_29, %c0_30], %85 {strides = array<i32>} : memref<1x4x4x64xf32, #tpu.memory_space<vmem>>, vector<1x1x4x64xf32>,
    return
  }
  func.func @transform_0(%arg0: i32) -> (i32, i32, i32) {
    %c0_i32 = arith.constant 0 : i32
    %c0_i32_0 = arith.constant 0 : i32
    %c0_i32_1 = arith.constant 0 : i32
    return %arg0, %c0_i32, %c0_i32_0 : i32, i32, i32
  }
  func.func @transform_1(%arg0: i32) -> (i32, i32) {
    %c0_i32 = arith.constant 0 : i32
    %c0_i32_0 = arith.constant 0 : i32
    %c0_i32_1 = arith.constant 0 : i32
    return %c0_i32, %c0_i32_0 : i32, i32
  }
  func.func @transform_2(%arg0: i32) -> (i32, i32, i32, i32) {
    %c0_i32 = arith.constant 0 : i32
    %c0_i32_0 = arith.constant 0 : i32
    %c0_i32_1 = arith.constant 0 : i32
    %c0_i32_2 = arith.constant 0 : i32
    return %arg0, %c0_i32, %c0_i32_0, %c0_i32_1 : i32, i32, i32, i32
  }
}

module attributes {stable_mosaic.version = 11 : i64} {
  func.func @_conv1x1_bias_kernel(%arg0: i32, %arg1: memref<1x4x256xf32, #tpu.memory_space<vmem>>, %arg2: memref<1x4xf32, #tpu.memory_space<vmem>>, %arg3: memref<1x1xf32, #tpu.memory_space<vmem>>, %arg4: memref<1x1x256xf32, #tpu.memory_space<vmem>>) attributes {dimension_semantics = [#tpu.dimension_semantics<parallel>], iteration_bounds = array<i64: 2>, scalar_prefetch = 0 : i64, scratch_operands = 0 : i64, tpu.core_type = #tpu.core_type<tc>, window_params = [{transform_indices = @transform_0, window_bounds = array<i64: 1, 4, 256>}, {pipeline_mode = #tpu.pipeline_mode<synchronous>, transform_indices = @transform_1, window_bounds = array<i64: 1, 4>}, {pipeline_mode = #tpu.pipeline_mode<synchronous>, transform_indices = @transform_2, window_bounds = array<i64: 1, 1>}, {transform_indices = @transform_3, window_bounds = array<i64: 1, 1, 256>}]} {
    %c0 = arith.constant 0 : index
    %c0_0 = arith.constant 0 : index
    %0 = vector.load %arg2[%c0, %c0_0] : memref<1x4xf32, #tpu.memory_space<vmem>>, vector<1x4xf32>
    %c0_1 = arith.constant 0 : index
    %c0_2 = arith.constant 0 : index
    %c0_3 = arith.constant 0 : index
    %1 = vector.load %arg1[%c0_1, %c0_2, %c0_3] : memref<1x4x256xf32, #tpu.memory_space<vmem>>, vector<1x4x256xf32>
    %2 = vector.shape_cast %1 : vector<1x4x256xf32> to vector<4x256xf32>
    %cst = arith.constant dense<0.000000e+00> : vector<1x256xf32>
    %3 = tpu.matmul %0, %2, %cst {dimension_numbers = #tpu.dot_dimension_numbers<[1], [0], [0], [1], [0, 0, 1, 1], [], []>} : vector<1x4xf32>, vector<4x256xf32>, vector<1x256xf32> -> vector<1x256xf32>
    %c0_4 = arith.constant 0 : index
    %c0_5 = arith.constant 0 : index
    %4 = vector.load %arg3[%c0_4, %c0_5] : memref<1x1xf32, #tpu.memory_space<vmem>>, vector<1x1xf32>
    %5 = vector.broadcast %4 : vector<1x1xf32> to vector<1x256xf32>
    %6 = arith.addf %3, %5 : vector<1x256xf32>
    %c0_6 = arith.constant 0 : index
    %c0_7 = arith.constant 0 : index
    %c0_8 = arith.constant 0 : index
    %7 = vector.load %arg4[%c0_6, %c0_7, %c0_8] : memref<1x1x256xf32, #tpu.memory_space<vmem>>, vector<1x1x256xf32>
    %8 = vector.shape_cast %7 : vector<1x1x256xf32> to vector<1x256xf32>
    %9 = vector.shape_cast %6 : vector<1x256xf32> to vector<1x1x256xf32>
    tpu.vector_store %arg4[%c0_6, %c0_7, %c0_8], %9 {strides = array<i32>} : memref<1x1x256xf32, #tpu.memory_space<vmem>>, vector<1x1x256xf32>,
    return
  }
  func.func @transform_0(%arg0: i32) -> (i32, i32, i32) {
    %c0_i32 = arith.constant 0 : i32
    %c0_i32_0 = arith.constant 0 : i32
    %c0_i32_1 = arith.constant 0 : i32
    return %arg0, %c0_i32, %c0_i32_0 : i32, i32, i32
  }
  func.func @transform_1(%arg0: i32) -> (i32, i32) {
    %c0_i32 = arith.constant 0 : i32
    %c0_i32_0 = arith.constant 0 : i32
    %c0_i32_1 = arith.constant 0 : i32
    return %c0_i32, %c0_i32_0 : i32, i32
  }
  func.func @transform_2(%arg0: i32) -> (i32, i32) {
    %c0_i32 = arith.constant 0 : i32
    %c0_i32_0 = arith.constant 0 : i32
    %c0_i32_1 = arith.constant 0 : i32
    return %c0_i32, %c0_i32_0 : i32, i32
  }
  func.func @transform_3(%arg0: i32) -> (i32, i32, i32) {
    %c0_i32 = arith.constant 0 : i32
    %c0_i32_0 = arith.constant 0 : i32
    %c0_i32_1 = arith.constant 0 : i32
    return %arg0, %c0_i32, %c0_i32_0 : i32, i32, i32
  }
}

module attributes {stable_mosaic.version = 11 : i64} {
  func.func @_conv3x3_in_lrelu_kernel(%arg0: i32, %arg1: i32, %arg2: memref<1x8x326xbf16, #tpu.memory_space<vmem>>, %arg3: memref<9x4x8xbf16, #tpu.memory_space<vmem>>, %arg4: memref<1x288xf32, #tpu.memory_space<vmem>>, %arg5: memref<1x4x288xf32, #tpu.memory_space<vmem>>) attributes {dimension_semantics = [#tpu.dimension_semantics<parallel>, #tpu.dimension_semantics<parallel>], iteration_bounds = array<i64: 2, 1>, scalar_prefetch = 0 : i64, scratch_operands = 0 : i64, tpu.core_type = #tpu.core_type<tc>, window_params = [{transform_indices = @transform_0, window_bounds = array<i64: 1, 8, 326>}, {transform_indices = @transform_1, window_bounds = array<i64: 9, 4, 8>}, {pipeline_mode = #tpu.pipeline_mode<synchronous>, transform_indices = @transform_2, window_bounds = array<i64: 1, 288>}, {transform_indices = @transform_3, window_bounds = array<i64: 1, 4, 288>}]} {
    %cst = arith.constant 0.000000e+00 : f32
    %0 = vector.broadcast %cst : f32 to vector<4x288xf32>
    %c0 = arith.constant 0 : index
    %c0_0 = arith.constant 0 : index
    %c0_1 = arith.constant 0 : index
    %1 = vector.load %arg2[%c0, %c0_0, %c0_1] : memref<1x8x326xbf16, #tpu.memory_space<vmem>>, vector<1x8x288xbf16>
    %2 = vector.shape_cast %1 : vector<1x8x288xbf16> to vector<8x288xbf16>
    %c0_2 = arith.constant 0 : index
    %c0_3 = arith.constant 0 : index
    %c0_4 = arith.constant 0 : index
    %3 = vector.load %arg3[%c0_2, %c0_3, %c0_4] : memref<9x4x8xbf16, #tpu.memory_space<vmem>>, vector<1x4x8xbf16>
    %4 = vector.shape_cast %3 : vector<1x4x8xbf16> to vector<4x8xbf16>
    %cst_5 = arith.constant dense<0.000000e+00> : vector<4x288xf32>
    %5 = tpu.matmul %4, %2, %cst_5 {dimension_numbers = #tpu.dot_dimension_numbers<[1], [0], [0], [1], [0, 0, 1, 1], [], []>} : vector<4x8xbf16>, vector<8x288xbf16>, vector<4x288xf32> -> vector<4x288xf32>
    %6 = arith.addf %0, %5 : vector<4x288xf32>
    %c0_6 = arith.constant 0 : index
    %c0_7 = arith.constant 0 : index
    %c1 = arith.constant 1 : index
    %7 = vector.load %arg2[%c0_6, %c0_7, %c1] : memref<1x8x326xbf16, #tpu.memory_space<vmem>>, vector<1x8x288xbf16>
    %8 = vector.shape_cast %7 : vector<1x8x288xbf16> to vector<8x288xbf16>
    %c1_8 = arith.constant 1 : index
    %c0_9 = arith.constant 0 : index
    %c0_10 = arith.constant 0 : index
    %9 = vector.load %arg3[%c1_8, %c0_9, %c0_10] : memref<9x4x8xbf16, #tpu.memory_space<vmem>>, vector<1x4x8xbf16>
    %10 = vector.shape_cast %9 : vector<1x4x8xbf16> to vector<4x8xbf16>
    %cst_11 = arith.constant dense<0.000000e+00> : vector<4x288xf32>
    %11 = tpu.matmul %10, %8, %cst_11 {dimension_numbers = #tpu.dot_dimension_numbers<[1], [0], [0], [1], [0, 0, 1, 1], [], []>} : vector<4x8xbf16>, vector<8x288xbf16>, vector<4x288xf32> -> vector<4x288xf32>
    %12 = arith.addf %6, %11 : vector<4x288xf32>
    %c0_12 = arith.constant 0 : index
    %c0_13 = arith.constant 0 : index
    %c2 = arith.constant 2 : index
    %13 = vector.load %arg2[%c0_12, %c0_13, %c2] : memref<1x8x326xbf16, #tpu.memory_space<vmem>>, vector<1x8x288xbf16>
    %14 = vector.shape_cast %13 : vector<1x8x288xbf16> to vector<8x288xbf16>
    %c2_14 = arith.constant 2 : index
    %c0_15 = arith.constant 0 : index
    %c0_16 = arith.constant 0 : index
    %15 = vector.load %arg3[%c2_14, %c0_15, %c0_16] : memref<9x4x8xbf16, #tpu.memory_space<vmem>>, vector<1x4x8xbf16>
    %16 = vector.shape_cast %15 : vector<1x4x8xbf16> to vector<4x8xbf16>
    %cst_17 = arith.constant dense<0.000000e+00> : vector<4x288xf32>
    %17 = tpu.matmul %16, %14, %cst_17 {dimension_numbers = #tpu.dot_dimension_numbers<[1], [0], [0], [1], [0, 0, 1, 1], [], []>} : vector<4x8xbf16>, vector<8x288xbf16>, vector<4x288xf32> -> vector<4x288xf32>
    %18 = arith.addf %12, %17 : vector<4x288xf32>
    %c0_18 = arith.constant 0 : index
    %c0_19 = arith.constant 0 : index
    %c18 = arith.constant 18 : index
    %19 = vector.load %arg2[%c0_18, %c0_19, %c18] : memref<1x8x326xbf16, #tpu.memory_space<vmem>>, vector<1x8x288xbf16>
    %20 = vector.shape_cast %19 : vector<1x8x288xbf16> to vector<8x288xbf16>
    %c3 = arith.constant 3 : index
    %c0_20 = arith.constant 0 : index
    %c0_21 = arith.constant 0 : index
    %21 = vector.load %arg3[%c3, %c0_20, %c0_21] : memref<9x4x8xbf16, #tpu.memory_space<vmem>>, vector<1x4x8xbf16>
    %22 = vector.shape_cast %21 : vector<1x4x8xbf16> to vector<4x8xbf16>
    %cst_22 = arith.constant dense<0.000000e+00> : vector<4x288xf32>
    %23 = tpu.matmul %22, %20, %cst_22 {dimension_numbers = #tpu.dot_dimension_numbers<[1], [0], [0], [1], [0, 0, 1, 1], [], []>} : vector<4x8xbf16>, vector<8x288xbf16>, vector<4x288xf32> -> vector<4x288xf32>
    %24 = arith.addf %18, %23 : vector<4x288xf32>
    %c0_23 = arith.constant 0 : index
    %c0_24 = arith.constant 0 : index
    %c19 = arith.constant 19 : index
    %25 = vector.load %arg2[%c0_23, %c0_24, %c19] : memref<1x8x326xbf16, #tpu.memory_space<vmem>>, vector<1x8x288xbf16>
    %26 = vector.shape_cast %25 : vector<1x8x288xbf16> to vector<8x288xbf16>
    %c4 = arith.constant 4 : index
    %c0_25 = arith.constant 0 : index
    %c0_26 = arith.constant 0 : index
    %27 = vector.load %arg3[%c4, %c0_25, %c0_26] : memref<9x4x8xbf16, #tpu.memory_space<vmem>>, vector<1x4x8xbf16>
    %28 = vector.shape_cast %27 : vector<1x4x8xbf16> to vector<4x8xbf16>
    %cst_27 = arith.constant dense<0.000000e+00> : vector<4x288xf32>
    %29 = tpu.matmul %28, %26, %cst_27 {dimension_numbers = #tpu.dot_dimension_numbers<[1], [0], [0], [1], [0, 0, 1, 1], [], []>} : vector<4x8xbf16>, vector<8x288xbf16>, vector<4x288xf32> -> vector<4x288xf32>
    %30 = arith.addf %24, %29 : vector<4x288xf32>
    %c0_28 = arith.constant 0 : index
    %c0_29 = arith.constant 0 : index
    %c20 = arith.constant 20 : index
    %31 = vector.load %arg2[%c0_28, %c0_29, %c20] : memref<1x8x326xbf16, #tpu.memory_space<vmem>>, vector<1x8x288xbf16>
    %32 = vector.shape_cast %31 : vector<1x8x288xbf16> to vector<8x288xbf16>
    %c5 = arith.constant 5 : index
    %c0_30 = arith.constant 0 : index
    %c0_31 = arith.constant 0 : index
    %33 = vector.load %arg3[%c5, %c0_30, %c0_31] : memref<9x4x8xbf16, #tpu.memory_space<vmem>>, vector<1x4x8xbf16>
    %34 = vector.shape_cast %33 : vector<1x4x8xbf16> to vector<4x8xbf16>
    %cst_32 = arith.constant dense<0.000000e+00> : vector<4x288xf32>
    %35 = tpu.matmul %34, %32, %cst_32 {dimension_numbers = #tpu.dot_dimension_numbers<[1], [0], [0], [1], [0, 0, 1, 1], [], []>} : vector<4x8xbf16>, vector<8x288xbf16>, vector<4x288xf32> -> vector<4x288xf32>
    %36 = arith.addf %30, %35 : vector<4x288xf32>
    %c0_33 = arith.constant 0 : index
    %c0_34 = arith.constant 0 : index
    %c36 = arith.constant 36 : index
    %37 = vector.load %arg2[%c0_33, %c0_34, %c36] : memref<1x8x326xbf16, #tpu.memory_space<vmem>>, vector<1x8x288xbf16>
    %38 = vector.shape_cast %37 : vector<1x8x288xbf16> to vector<8x288xbf16>
    %c6 = arith.constant 6 : index
    %c0_35 = arith.constant 0 : index
    %c0_36 = arith.constant 0 : index
    %39 = vector.load %arg3[%c6, %c0_35, %c0_36] : memref<9x4x8xbf16, #tpu.memory_space<vmem>>, vector<1x4x8xbf16>
    %40 = vector.shape_cast %39 : vector<1x4x8xbf16> to vector<4x8xbf16>
    %cst_37 = arith.constant dense<0.000000e+00> : vector<4x288xf32>
    %41 = tpu.matmul %40, %38, %cst_37 {dimension_numbers = #tpu.dot_dimension_numbers<[1], [0], [0], [1], [0, 0, 1, 1], [], []>} : vector<4x8xbf16>, vector<8x288xbf16>, vector<4x288xf32> -> vector<4x288xf32>
    %42 = arith.addf %36, %41 : vector<4x288xf32>
    %c0_38 = arith.constant 0 : index
    %c0_39 = arith.constant 0 : index
    %c37 = arith.constant 37 : index
    %43 = vector.load %arg2[%c0_38, %c0_39, %c37] : memref<1x8x326xbf16, #tpu.memory_space<vmem>>, vector<1x8x288xbf16>
    %44 = vector.shape_cast %43 : vector<1x8x288xbf16> to vector<8x288xbf16>
    %c7 = arith.constant 7 : index
    %c0_40 = arith.constant 0 : index
    %c0_41 = arith.constant 0 : index
    %45 = vector.load %arg3[%c7, %c0_40, %c0_41] : memref<9x4x8xbf16, #tpu.memory_space<vmem>>, vector<1x4x8xbf16>
    %46 = vector.shape_cast %45 : vector<1x4x8xbf16> to vector<4x8xbf16>
    %cst_42 = arith.constant dense<0.000000e+00> : vector<4x288xf32>
    %47 = tpu.matmul %46, %44, %cst_42 {dimension_numbers = #tpu.dot_dimension_numbers<[1], [0], [0], [1], [0, 0, 1, 1], [], []>} : vector<4x8xbf16>, vector<8x288xbf16>, vector<4x288xf32> -> vector<4x288xf32>
    %48 = arith.addf %42, %47 : vector<4x288xf32>
    %c0_43 = arith.constant 0 : index
    %c0_44 = arith.constant 0 : index
    %c38 = arith.constant 38 : index
    %49 = vector.load %arg2[%c0_43, %c0_44, %c38] : memref<1x8x326xbf16, #tpu.memory_space<vmem>>, vector<1x8x288xbf16>
    %50 = vector.shape_cast %49 : vector<1x8x288xbf16> to vector<8x288xbf16>
    %c8 = arith.constant 8 : index
    %c0_45 = arith.constant 0 : index
    %c0_46 = arith.constant 0 : index
    %51 = vector.load %arg3[%c8, %c0_45, %c0_46] : memref<9x4x8xbf16, #tpu.memory_space<vmem>>, vector<1x4x8xbf16>
    %52 = vector.shape_cast %51 : vector<1x4x8xbf16> to vector<4x8xbf16>
    %cst_47 = arith.constant dense<0.000000e+00> : vector<4x288xf32>
    %53 = tpu.matmul %52, %50, %cst_47 {dimension_numbers = #tpu.dot_dimension_numbers<[1], [0], [0], [1], [0, 0, 1, 1], [], []>} : vector<4x8xbf16>, vector<8x288xbf16>, vector<4x288xf32> -> vector<4x288xf32>
    %54 = arith.addf %48, %53 : vector<4x288xf32>
    %c0_48 = arith.constant 0 : index
    %c0_49 = arith.constant 0 : index
    %55 = vector.load %arg4[%c0_48, %c0_49] : memref<1x288xf32, #tpu.memory_space<vmem>>, vector<1x288xf32>
    %56 = vector.broadcast %55 : vector<1x288xf32> to vector<4x288xf32>
    %57 = arith.mulf %54, %56 : vector<4x288xf32>
    %cst_50 = arith.constant dense<0.000000e+00> : vector<4xf32>
    %58 = vector.multi_reduction <add>, %57, %cst_50 [1] : vector<4x288xf32> to vector<4xf32>
    %59 = vector.shape_cast %58 : vector<4xf32> to vector<4x1xf32>
    %cst_51 = arith.constant 3.906250e-03 : f32
    %60 = vector.broadcast %cst_51 : f32 to vector<4x1xf32>
    %61 = arith.mulf %59, %60 : vector<4x1xf32>
    %62 = arith.mulf %57, %57 : vector<4x288xf32>
    %cst_52 = arith.constant dense<0.000000e+00> : vector<4xf32>
    %63 = vector.multi_reduction <add>, %62, %cst_52 [1] : vector<4x288xf32> to vector<4xf32>
    %64 = vector.shape_cast %63 : vector<4xf32> to vector<4x1xf32>
    %cst_53 = arith.constant 3.906250e-03 : f32
    %65 = vector.broadcast %cst_53 : f32 to vector<4x1xf32>
    %66 = arith.mulf %64, %65 : vector<4x1xf32>
    %67 = arith.mulf %61, %61 : vector<4x1xf32>
    %68 = arith.subf %66, %67 : vector<4x1xf32>
    %cst_54 = arith.constant 0.000000e+00 : f32
    %69 = vector.broadcast %cst_54 : f32 to vector<4x1xf32>
    %70 = arith.maximumf %68, %69 : vector<4x1xf32>
    %71 = vector.broadcast %61 : vector<4x1xf32> to vector<4x288xf32>
    %72 = arith.subf %54, %71 : vector<4x288xf32>
    %cst_55 = arith.constant 9.99999974E-6 : f32
    %73 = vector.broadcast %cst_55 : f32 to vector<4x1xf32>
    %74 = arith.addf %70, %73 : vector<4x1xf32>
    %75 = math.rsqrt %74 : vector<4x1xf32>
    %76 = vector.broadcast %75 : vector<4x1xf32> to vector<4x288xf32>
    %77 = arith.mulf %72, %76 : vector<4x288xf32>
    %cst_56 = arith.constant 0.000000e+00 : f32
    %78 = vector.broadcast %cst_56 : f32 to vector<4x288xf32>
    %79 = arith.cmpf oge, %77, %78 : vector<4x288xf32>
    %cst_57 = arith.constant 2.000000e-01 : f32
    %80 = vector.broadcast %cst_57 : f32 to vector<4x288xf32>
    %81 = arith.mulf %80, %77 : vector<4x288xf32>
    %82 = arith.select %79, %77, %81 : vector<4x288xi1>, vector<4x288xf32>
    %c0_58 = arith.constant 0 : index
    %c0_59 = arith.constant 0 : index
    %c0_60 = arith.constant 0 : index
    %83 = vector.load %arg5[%c0_58, %c0_59, %c0_60] : memref<1x4x288xf32, #tpu.memory_space<vmem>>, vector<1x4x288xf32>
    %84 = vector.shape_cast %83 : vector<1x4x288xf32> to vector<4x288xf32>
    %85 = vector.shape_cast %82 : vector<4x288xf32> to vector<1x4x288xf32>
    tpu.vector_store %arg5[%c0_58, %c0_59, %c0_60], %85 {strides = array<i32>} : memref<1x4x288xf32, #tpu.memory_space<vmem>>, vector<1x4x288xf32>,
    return
  }
  func.func @transform_0(%arg0: i32, %arg1: i32) -> (i32, i32, i32) {
    %c0_i32 = arith.constant 0 : i32
    %c0_i32_0 = arith.constant 0 : i32
    %c0_i32_1 = arith.constant 0 : i32
    return %arg0, %c0_i32, %c0_i32_0 : i32, i32, i32
  }
  func.func @transform_1(%arg0: i32, %arg1: i32) -> (i32, i32, i32) {
    %c0_i32 = arith.constant 0 : i32
    %c0_i32_0 = arith.constant 0 : i32
    %c0_i32_1 = arith.constant 0 : i32
    return %c0_i32, %arg1, %c0_i32_0 : i32, i32, i32
  }
  func.func @transform_2(%arg0: i32, %arg1: i32) -> (i32, i32) {
    %c0_i32 = arith.constant 0 : i32
    %c0_i32_0 = arith.constant 0 : i32
    %c0_i32_1 = arith.constant 0 : i32
    return %c0_i32, %c0_i32_0 : i32, i32
  }
  func.func @transform_3(%arg0: i32, %arg1: i32) -> (i32, i32, i32) {
    %c0_i32 = arith.constant 0 : i32
    %c0_i32_0 = arith.constant 0 : i32
    return %arg0, %arg1, %c0_i32 : i32, i32, i32
  }
}

module attributes {stable_mosaic.version = 11 : i64} {
  func.func @_dc_kernel(%arg0: i32, %arg1: memref<1x1x16x16xf32, #tpu.memory_space<vmem>>, %arg2: memref<1x1x16x16xf32, #tpu.memory_space<vmem>>, %arg3: memref<1x1x16x16xf32, #tpu.memory_space<vmem>>, %arg4: memref<1x1x16x16xf32, #tpu.memory_space<vmem>>, %arg5: memref<2xf32, #tpu.memory_space<smem>>, %arg6: memref<2xf32, #tpu.memory_space<smem>>, %arg7: memref<32x16xf32, #tpu.memory_space<vmem>>, %arg8: memref<16x32xf32, #tpu.memory_space<vmem>>, %arg9: memref<32x16xf32, #tpu.memory_space<vmem>>, %arg10: memref<16x32xf32, #tpu.memory_space<vmem>>, %arg11: memref<1x1x16x16xf32, #tpu.memory_space<vmem>>) attributes {dimension_semantics = [#tpu.dimension_semantics<parallel>], iteration_bounds = array<i64: 2>, scalar_prefetch = 0 : i64, scratch_operands = 0 : i64, tpu.core_type = #tpu.core_type<tc>, window_params = [{transform_indices = @transform_0, window_bounds = array<i64: 1, 1, 16, 16>}, {transform_indices = @transform_1, window_bounds = array<i64: 1, 1, 16, 16>}, {transform_indices = @transform_2, window_bounds = array<i64: 1, 1, 16, 16>}, {transform_indices = @transform_3, window_bounds = array<i64: 1, 1, 16, 16>}, {transform_indices = @transform_4, window_bounds = array<i64: 2>}, {transform_indices = @transform_5, window_bounds = array<i64: 2>}, {pipeline_mode = #tpu.pipeline_mode<synchronous>, transform_indices = @transform_6, window_bounds = array<i64: 32, 16>}, {pipeline_mode = #tpu.pipeline_mode<synchronous>, transform_indices = @transform_7, window_bounds = array<i64: 16, 32>}, {pipeline_mode = #tpu.pipeline_mode<synchronous>, transform_indices = @transform_8, window_bounds = array<i64: 32, 16>}, {pipeline_mode = #tpu.pipeline_mode<synchronous>, transform_indices = @transform_9, window_bounds = array<i64: 16, 32>}, {transform_indices = @transform_10, window_bounds = array<i64: 1, 1, 16, 16>}]} {
    %0 = arith.index_cast %arg0 : i32 to index
    %1 = memref.load %arg5[%0] : memref<2xf32, #tpu.memory_space<smem>>
    %2 = arith.index_cast %arg0 : i32 to index
    %3 = memref.load %arg6[%2] : memref<2xf32, #tpu.memory_space<smem>>
    %c0 = arith.constant 0 : index
    %c0_0 = arith.constant 0 : index
    %c0_1 = arith.constant 0 : index
    %c0_2 = arith.constant 0 : index
    %4 = vector.load %arg1[%c0, %c0_0, %c0_1, %c0_2] : memref<1x1x16x16xf32, #tpu.memory_space<vmem>>, vector<1x1x16x16xf32>
    %5 = vector.shape_cast %4 : vector<1x1x16x16xf32> to vector<16x16xf32>
    %6 = vector.broadcast %3 : f32 to vector<16x16xf32>
    %7 = arith.mulf %5, %6 : vector<16x16xf32>
    %8 = vector.broadcast %1 : f32 to vector<16x16xf32>
    %9 = arith.addf %7, %8 : vector<16x16xf32>
    %c0_3 = arith.constant 0 : index
    %c0_4 = arith.constant 0 : index
    %10 = vector.load %arg7[%c0_3, %c0_4] : memref<32x16xf32, #tpu.memory_space<vmem>>, vector<32x16xf32>
    %cst = arith.constant dense<0.000000e+00> : vector<32x16xf32>
    %11 = tpu.matmul %10, %9, %cst {dimension_numbers = #tpu.dot_dimension_numbers<[1], [0], [0], [1], [0, 0, 1, 1], [], []>} : vector<32x16xf32>, vector<16x16xf32>, vector<32x16xf32> -> vector<32x16xf32>
    %c0_5 = arith.constant 0 : index
    %c0_6 = arith.constant 0 : index
    %12 = vector.load %arg8[%c0_5, %c0_6] : memref<16x32xf32, #tpu.memory_space<vmem>>, vector<16x32xf32>
    %cst_7 = arith.constant dense<0.000000e+00> : vector<32x32xf32>
    %13 = tpu.matmul %11, %12, %cst_7 {dimension_numbers = #tpu.dot_dimension_numbers<[1], [0], [0], [1], [0, 0, 1, 1], [], []>} : vector<32x16xf32>, vector<16x32xf32>, vector<32x32xf32> -> vector<32x32xf32>
    %14 = vector.extract_strided_slice %13 {offsets = [0, 0], sizes = [16, 16], strides = [1, 1]} : vector<32x32xf32> to vector<16x16xf32>
    %15 = vector.extract_strided_slice %13 {offsets = [16, 16], sizes = [16, 16], strides = [1, 1]} : vector<32x32xf32> to vector<16x16xf32>
    %16 = arith.subf %14, %15 : vector<16x16xf32>
    %17 = vector.extract_strided_slice %13 {offsets = [0, 16], sizes = [16, 16], strides = [1, 1]} : vector<32x32xf32> to vector<16x16xf32>
    %18 = vector.extract_strided_slice %13 {offsets = [16, 0], sizes = [16, 16], strides = [1, 1]} : vector<32x32xf32> to vector<16x16xf32>
    %19 = arith.addf %17, %18 : vector<16x16xf32>
    %c0_8 = arith.constant 0 : index
    %c0_9 = arith.constant 0 : index
    %c0_10 = arith.constant 0 : index
    %c0_11 = arith.constant 0 : index
    %20 = vector.load %arg4[%c0_8, %c0_9, %c0_10, %c0_11] : memref<1x1x16x16xf32, #tpu.memory_space<vmem>>, vector<1x1x16x16xf32>
    %21 = vector.shape_cast %20 : vector<1x1x16x16xf32> to vector<16x16xf32>
    %c0_12 = arith.constant 0 : index
    %c0_13 = arith.constant 0 : index
    %c0_14 = arith.constant 0 : index
    %c0_15 = arith.constant 0 : index
    %22 = vector.load %arg2[%c0_12, %c0_13, %c0_14, %c0_15] : memref<1x1x16x16xf32, #tpu.memory_space<vmem>>, vector<1x1x16x16xf32>
    %23 = vector.shape_cast %22 : vector<1x1x16x16xf32> to vector<16x16xf32>
    %24 = arith.subf %23, %16 : vector<16x16xf32>
    %25 = arith.mulf %21, %24 : vector<16x16xf32>
    %26 = arith.addf %16, %25 : vector<16x16xf32>
    %c0_16 = arith.constant 0 : index
    %c0_17 = arith.constant 0 : index
    %c0_18 = arith.constant 0 : index
    %c0_19 = arith.constant 0 : index
    %27 = vector.load %arg3[%c0_16, %c0_17, %c0_18, %c0_19] : memref<1x1x16x16xf32, #tpu.memory_space<vmem>>, vector<1x1x16x16xf32>
    %28 = vector.shape_cast %27 : vector<1x1x16x16xf32> to vector<16x16xf32>
    %29 = arith.subf %28, %19 : vector<16x16xf32>
    %30 = arith.mulf %21, %29 : vector<16x16xf32>
    %31 = arith.addf %19, %30 : vector<16x16xf32>
    %c0_20 = arith.constant 0 : index
    %c0_21 = arith.constant 0 : index
    %32 = vector.load %arg9[%c0_20, %c0_21] : memref<32x16xf32, #tpu.memory_space<vmem>>, vector<32x16xf32>
    %cst_22 = arith.constant dense<0.000000e+00> : vector<32x16xf32>
    %33 = tpu.matmul %32, %26, %cst_22 {dimension_numbers = #tpu.dot_dimension_numbers<[1], [0], [0], [1], [0, 0, 1, 1], [], []>} : vector<32x16xf32>, vector<16x16xf32>, vector<32x16xf32> -> vector<32x16xf32>
    %c0_23 = arith.constant 0 : index
    %c0_24 = arith.constant 0 : index
    %34 = vector.load %arg9[%c0_23, %c0_24] : memref<32x16xf32, #tpu.memory_space<vmem>>, vector<32x16xf32>
    %cst_25 = arith.constant dense<0.000000e+00> : vector<32x16xf32>
    %35 = tpu.matmul %34, %31, %cst_25 {dimension_numbers = #tpu.dot_dimension_numbers<[1], [0], [0], [1], [0, 0, 1, 1], [], []>} : vector<32x16xf32>, vector<16x16xf32>, vector<32x16xf32> -> vector<32x16xf32>
    %36 = vector.extract_strided_slice %33 {offsets = [0, 0], sizes = [16, 16], strides = [1, 1]} : vector<32x16xf32> to vector<16x16xf32>
    %37 = vector.extract_strided_slice %35 {offsets = [16, 0], sizes = [16, 16], strides = [1, 1]} : vector<32x16xf32> to vector<16x16xf32>
    %38 = arith.subf %36, %37 : vector<16x16xf32>
    %39 = vector.extract_strided_slice %35 {offsets = [0, 0], sizes = [16, 16], strides = [1, 1]} : vector<32x16xf32> to vector<16x16xf32>
    %40 = vector.extract_strided_slice %33 {offsets = [16, 0], sizes = [16, 16], strides = [1, 1]} : vector<32x16xf32> to vector<16x16xf32>
    %41 = arith.addf %39, %40 : vector<16x16xf32>
    %c0_26 = arith.constant 0 : index
    %c0_27 = arith.constant 0 : index
    %42 = vector.load %arg10[%c0_26, %c0_27] : memref<16x32xf32, #tpu.memory_space<vmem>>, vector<16x32xf32>
    %cst_28 = arith.constant dense<0.000000e+00> : vector<16x32xf32>
    %43 = tpu.matmul %38, %42, %cst_28 {dimension_numbers = #tpu.dot_dimension_numbers<[1], [0], [0], [1], [0, 0, 1, 1], [], []>} : vector<16x16xf32>, vector<16x32xf32>, vector<16x32xf32> -> vector<16x32xf32>
    %c0_29 = arith.constant 0 : index
    %c0_30 = arith.constant 0 : index
    %44 = vector.load %arg10[%c0_29, %c0_30] : memref<16x32xf32, #tpu.memory_space<vmem>>, vector<16x32xf32>
    %cst_31 = arith.constant dense<0.000000e+00> : vector<16x32xf32>
    %45 = tpu.matmul %41, %44, %cst_31 {dimension_numbers = #tpu.dot_dimension_numbers<[1], [0], [0], [1], [0, 0, 1, 1], [], []>} : vector<16x16xf32>, vector<16x32xf32>, vector<16x32xf32> -> vector<16x32xf32>
    %46 = vector.extract_strided_slice %43 {offsets = [0, 0], sizes = [16, 16], strides = [1, 1]} : vector<16x32xf32> to vector<16x16xf32>
    %47 = vector.extract_strided_slice %45 {offsets = [0, 16], sizes = [16, 16], strides = [1, 1]} : vector<16x32xf32> to vector<16x16xf32>
    %48 = arith.subf %46, %47 : vector<16x16xf32>
    %49 = vector.extract_strided_slice %43 {offsets = [0, 16], sizes = [16, 16], strides = [1, 1]} : vector<16x32xf32> to vector<16x16xf32>
    %50 = vector.extract_strided_slice %45 {offsets = [0, 0], sizes = [16, 16], strides = [1, 1]} : vector<16x32xf32> to vector<16x16xf32>
    %51 = arith.addf %49, %50 : vector<16x16xf32>
    %52 = arith.mulf %48, %48 : vector<16x16xf32>
    %53 = arith.mulf %51, %51 : vector<16x16xf32>
    %54 = arith.addf %52, %53 : vector<16x16xf32>
    %55 = math.sqrt %54 : vector<16x16xf32>
    %56 = vector.broadcast %1 : f32 to vector<16x16xf32>
    %57 = arith.subf %55, %56 : vector<16x16xf32>
    %58 = vector.broadcast %3 : f32 to vector<16x16xf32>
    %59 = arith.divf %57, %58 : vector<16x16xf32>
    %c0_32 = arith.constant 0 : index
    %c0_33 = arith.constant 0 : index
    %c0_34 = arith.constant 0 : index
    %c0_35 = arith.constant 0 : index
    %60 = vector.load %arg11[%c0_32, %c0_33, %c0_34, %c0_35] : memref<1x1x16x16xf32, #tpu.memory_space<vmem>>, vector<1x1x16x16xf32>
    %61 = vector.shape_cast %60 : vector<1x1x16x16xf32> to vector<16x16xf32>
    %62 = vector.shape_cast %59 : vector<16x16xf32> to vector<1x1x16x16xf32>
    tpu.vector_store %arg11[%c0_32, %c0_33, %c0_34, %c0_35], %62 {strides = array<i32>} : memref<1x1x16x16xf32, #tpu.memory_space<vmem>>, vector<1x1x16x16xf32>,
    return
  }
  func.func @transform_0(%arg0: i32) -> (i32, i32, i32, i32) {
    %c0_i32 = arith.constant 0 : i32
    %c0_i32_0 = arith.constant 0 : i32
    %c0_i32_1 = arith.constant 0 : i32
    %c0_i32_2 = arith.constant 0 : i32
    return %arg0, %c0_i32, %c0_i32_0, %c0_i32_1 : i32, i32, i32, i32
  }
  func.func @transform_1(%arg0: i32) -> (i32, i32, i32, i32) {
    %c0_i32 = arith.constant 0 : i32
    %c0_i32_0 = arith.constant 0 : i32
    %c0_i32_1 = arith.constant 0 : i32
    %c0_i32_2 = arith.constant 0 : i32
    return %arg0, %c0_i32, %c0_i32_0, %c0_i32_1 : i32, i32, i32, i32
  }
  func.func @transform_2(%arg0: i32) -> (i32, i32, i32, i32) {
    %c0_i32 = arith.constant 0 : i32
    %c0_i32_0 = arith.constant 0 : i32
    %c0_i32_1 = arith.constant 0 : i32
    %c0_i32_2 = arith.constant 0 : i32
    return %arg0, %c0_i32, %c0_i32_0, %c0_i32_1 : i32, i32, i32, i32
  }
  func.func @transform_3(%arg0: i32) -> (i32, i32, i32, i32) {
    %c0_i32 = arith.constant 0 : i32
    %c0_i32_0 = arith.constant 0 : i32
    %c0_i32_1 = arith.constant 0 : i32
    %c0_i32_2 = arith.constant 0 : i32
    return %arg0, %c0_i32, %c0_i32_0, %c0_i32_1 : i32, i32, i32, i32
  }
  func.func @transform_4(%arg0: i32) -> i32 {
    %c0_i32 = arith.constant 0 : i32
    %c0_i32_0 = arith.constant 0 : i32
    return %c0_i32 : i32
  }
  func.func @transform_5(%arg0: i32) -> i32 {
    %c0_i32 = arith.constant 0 : i32
    %c0_i32_0 = arith.constant 0 : i32
    return %c0_i32 : i32
  }
  func.func @transform_6(%arg0: i32) -> (i32, i32) {
    %c0_i32 = arith.constant 0 : i32
    %c0_i32_0 = arith.constant 0 : i32
    %c0_i32_1 = arith.constant 0 : i32
    return %c0_i32, %c0_i32_0 : i32, i32
  }
  func.func @transform_7(%arg0: i32) -> (i32, i32) {
    %c0_i32 = arith.constant 0 : i32
    %c0_i32_0 = arith.constant 0 : i32
    %c0_i32_1 = arith.constant 0 : i32
    return %c0_i32, %c0_i32_0 : i32, i32
  }
  func.func @transform_8(%arg0: i32) -> (i32, i32) {
    %c0_i32 = arith.constant 0 : i32
    %c0_i32_0 = arith.constant 0 : i32
    %c0_i32_1 = arith.constant 0 : i32
    return %c0_i32, %c0_i32_0 : i32, i32
  }
  func.func @transform_9(%arg0: i32) -> (i32, i32) {
    %c0_i32 = arith.constant 0 : i32
    %c0_i32_0 = arith.constant 0 : i32
    %c0_i32_1 = arith.constant 0 : i32
    return %c0_i32, %c0_i32_0 : i32, i32
  }
  func.func @transform_10(%arg0: i32) -> (i32, i32, i32, i32) {
    %c0_i32 = arith.constant 0 : i32
    %c0_i32_0 = arith.constant 0 : i32
    %c0_i32_1 = arith.constant 0 : i32
    %c0_i32_2 = arith.constant 0 : i32
    return %arg0, %c0_i32, %c0_i32_0, %c0_i32_1 : i32, i32, i32, i32
  }
}

</mosaic_0001>

<bundles_post_ra>
// kernel: unet_dc_cascade.15
= control target key start
LH: loop header
LB: loop body
LE: loop exit
PB: predicated region body
PF: predicated region fallthrough
CT: control target
= control target key end

     0   :  { %s1755_s12 = smov 0   ;;  %s1757_s13 = smov 0   ;;  %s1958_s0 = inlined_call_operand.vmem [shape: bf16[2,4,326], index: 0, kind: input, shape index: {}]   ;;  %s1959_s1 = inlined_call_operand.vmem [shape: bf16[9,4,4], index: 1, kind: input, shape index: {}]   ;;  %s1960_s2 = inlined_call_operand.vmem [shape: f32[1,288], index: 2, kind: input, shape index: {}]   ;;  %s1961_s3 = inlined_call_operand.vmem [shape: f32[2,4,288], index: 3, kind: output, shape index: {}]  }
   0x1   :  { %s1759_s14 = smov 0  }
   0x2 LB: > { %s25_s15 = sadd.s32 1, %s1717_s13  ;;  %p1475_p0 = scmp.ge.s32.totalorder %s1721_s14, 1  ;;  %s1721_s14 = sphi %s1759_s14, %s13_s14   ;;  %s1717_s13 = sphi %s1757_s13, %s1963_s13   ;;  %s1713_s12 = sphi %s1755_s12, %s1962_s12  }
   0x3   : > { %p27_p1 = scmp.ge.s32.totalorder %s25_s15, 2  ;;  %p160_p2 = scmp.lt.s32.totalorder %s1721_s14, 3 }
   0x5   : > { %s1965_s15 = smov (%p27_p1, %s25_s15), 0  ;;  %p161_p3 = pnand %p1475_p0, %p160_p2 }
   0x6   : > { %p192_p4 = scmp.lt.s32.totalorder (!%p161_p3), %s1713_s12, 1  ;;  %v220_v0 = vlaneseq (!%p161_p3)  ;;  %v1723_v1 = vmov (!%p161_p3), 1983009808   ;;  %v1724_v3 = vmov (!%p161_p3), 0.0   ;;  %vm1725_vm0 = vmmov (!%p161_p3), 0   ;;  %s1727_s20 = smov (!%p161_p3), 127  }
   0x7   : > { %164 = sbr.rel (%p161_p3) target bundleno = 633 (0x279), region = 32  ;;  %v218_v2 = vunpack.c.l.s4 (!%p161_p3), %v1723_v1  ;;  %1533 = vmatprep.subr.bf16.mxu1 (!%p161_p3), %v1724_v3  ;;  %1535 = vmatprep.mubr.msk.bf16.mxu1 (!%p161_p3), %vm1725_vm0, %v1724_v3  ;;  %v1726_v6 = vmov (!%p161_p3), 0   ;;  %s1728_s21 = smov (!%p161_p3), 126   ;;  %vm245_vm1 = vcmask (!%p161_p3), 1041408   ;;  %vm238_vm2 = vcmask (!%p161_p3), 1039360  }
   0x8   : > { %v1776_v4 = vshrl.u32 (!%p161_p3), %v220_v0, 7  ;;  %287 = vmatprep.mubr.bf16.mxu0 (!%p161_p3), %v1726_v6  ;;  %s1729_s22 = smov (!%p161_p3), 110   ;;  %s1730_s23 = smov (!%p161_p3), 109   ;;  %v1478_v52 = vld [vmem:[%s1959_s1 + $0x2] sm:$0x3] (!%p161_p3)  ;;  %vm241_vm3 = vcmask (!%p161_p3), 31744  }
   0x9   : > { %v219_v5 = vunpack.c.0.s8 (!%p161_p3), %v218_v2  ;;  %s1731_s24 = smov (!%p161_p3), 108   ;;  %s1732_s25 = smov (!%p161_p3), 92   ;;  %vm455_vm4 = vcmask (!%p161_p3), 1031168   ;;  %v212_v63 = vld [vmem:[%s1959_s1] sm:$0x3] (!%p161_p3)  ;;  %vm580_vm5 = vcmask (!%p161_p3), 900096  }
   0xa   : > { %s1733_s26 = smov (!%p161_p3), 91   ;;  %s1734_s27 = smov (!%p161_p3), 90   ;;  %vm705_vm6 = vcmask (!%p161_p3), 891904   ;;  %vm830_vm7 = vcmask (!%p161_p3), 883712   ;;  %vm955_vm8 = vcmask (!%p161_p3), 752640   ;;  %vm1080_vm9 = vcmask (!%p161_p3), 744448  }
   0xb   : > { %v1783_v7 = vsub.s32 (!%p161_p3), %v219_v5, %v1776_v4  ;;  %vm1205_vm10 = vcmask (!%p161_p3), 736256   ;;  %vm1324_vm11 = vcmask (!%p161_p3), 1043456   ;;  %vm1328_vm12 = vcmask (!%p161_p3), 257024  }
   0xe   : > { %s1967_s12 = smov (!%p192_p4, %s1713_s12), 1 }
   0xf   : > { %s1651_s16 = smul.u32 6, %s1967_s12 }
  0x11   : > { %s1788_s19 = scalar_lea.vmem %s1958_s0, %s1651_s16 }
  0x12   : > { %v211_v8 = vld [vmem:[%s1788_s19] sm:$0x3f] }
  0x13   : > { %v1792_v9 = vrot.slane %v211_v8, %v1783_v7  ;;  %v216_v10 = vcombine.high %v211_v8, %v211_v8  ;;  %v429_v11 = vld [vmem:[%s1788_s19] sm:$0x3f] }
  0x14   : > { %v440_v14 = vrot.slane %v429_v11, %v1783_v7  ;;  %v433_v15 = vcombine.high %v429_v11, %v429_v11  ;;  %v554_v17 = vld [vmem:[%s1788_s19] sm:$0x3f] }
  0x15   : > { %232 = vrot.lane.b32.xlu0 %v1792_v9, %s1727_s20  ;;  %v1797_v12 = vrot.slane %v216_v10, %v1783_v7  ;;  %v1801_v13 = vcombine.high %v1792_v9, %v1792_v9  ;;  %v565_v19 = vrot.slane %v554_v17, %v1783_v7  ;;  %v558_v20 = vcombine.high %v554_v17, %v554_v17  ;;  %v679_v22 = vld [vmem:[%s1788_s19] sm:$0x3f] }
  0x16   : > { %v448_v16 = vcombine.high %v440_v14, %v440_v14  ;;  %v447_v18 = vrot.slane %v433_v15, %v1783_v7  ;;  %v690_v24 = vrot.slane %v679_v22, %v1783_v7  ;;  %v683_v25 = vcombine.high %v679_v22, %v679_v22  ;;  %v804_v27 = vld [vmem:[%s1788_s19] sm:$0x3f] }
  0x17   : > { %236 = vrot.lane.b32.xlu1 %v1797_v12, %s1727_s20  ;;  %v573_v21 = vcombine.high %v565_v19, %v565_v19  ;;  %v572_v23 = vrot.slane %v558_v20, %v1783_v7  ;;  %v815_v29 = vrot.slane %v804_v27, %v1783_v7  ;;  %v808_v30 = vcombine.high %v804_v27, %v804_v27  ;;  %v929_v32 = vld [vmem:[%s1788_s19] sm:$0x3f] }
  0x18   : > { %v698_v26 = vcombine.high %v690_v24, %v690_v24  ;;  %v697_v28 = vrot.slane %v683_v25, %v1783_v7  ;;  %v940_v34 = vrot.slane %v929_v32, %v1783_v7  ;;  %v933_v35 = vcombine.high %v929_v32, %v929_v32  ;;  %v1054_v37 = vld [vmem:[%s1788_s19] sm:$0x3f] }
  0x19   : > { %234 = vrot.lane.b32.xlu0 %v1801_v13, %s1727_s20  ;;  %v823_v31 = vcombine.high %v815_v29, %v815_v29  ;;  %v822_v33 = vrot.slane %v808_v30, %v1783_v7  ;;  %v1065_v39 = vrot.slane %v1054_v37, %v1783_v7  ;;  %v1058_v40 = vcombine.high %v1054_v37, %v1054_v37  ;;  %v1179_v42 = vld [vmem:[%s1788_s19] sm:$0x3f] }
  0x1a   : > { %v948_v36 = vcombine.high %v940_v34, %v940_v34  ;;  %v947_v38 = vrot.slane %v933_v35, %v1783_v7  ;;  %v1190_v44 = vrot.slane %v1179_v42, %v1783_v7  ;;  %v1183_v45 = vcombine.high %v1179_v42, %v1179_v42  ;;  %v1485_v10 = vld [vmem:[%s1959_s1 + $0x4] sm:$0x3]  ;;  %v1501_v42 = vld [vmem:[%s1959_s1 + $0xc] sm:$0x3] }
  0x1b   : > { %449 = vrot.lane.b32.xlu1 %v440_v14, %s1728_s21  ;;  %v1073_v41 = vcombine.high %v1065_v39, %v1065_v39  ;;  %v1072_v43 = vrot.slane %v1058_v40, %v1783_v7  ;;  %v346_v55 = vsel %vm245_vm1, %v1797_v12, 0  ;;  %v340_v58 = vsel %vm245_vm1, %v1792_v9, 0 }
  0x1c   : > { %v1198_v46 = vcombine.high %v1190_v44, %v1190_v44  ;;  %v1197_v47 = vrot.slane %v1183_v45, %v1783_v7 }
  0x1d   : > { %451 = vrot.lane.b32.xlu0 %v448_v16, %s1728_s21 }
  0x1f   : > { %453 = vrot.lane.b32.xlu1 %v447_v18, %s1728_s21  ;;  %v1489_v18 = vld [vmem:[%s1959_s1 + $0x6] sm:$0x3] }
  0x21   : > { %574 = vrot.lane.b32.xlu0 %v565_v19, %s1729_s22 }
  0x23   : > { %576 = vrot.lane.b32.xlu1 %v573_v21, %s1729_s22 }
  0x25   : > { %578 = vrot.lane.b32.xlu0 %v572_v23, %s1729_s22 }
  0x27   : > { %699 = vrot.lane.b32.xlu1 %v690_v24, %s1730_s23 }
  0x29   : > { %701 = vrot.lane.b32.xlu0 %v698_v26, %s1730_s23  ;;  %v1493_v26 = vld [vmem:[%s1959_s1 + $0x8] sm:$0x3] }
  0x2b   : > { %703 = vrot.lane.b32.xlu1 %v697_v28, %s1730_s23 }
  0x2d   : > { %824 = vrot.lane.b32.xlu0 %v815_v29, %s1731_s24 }
  0x2f   : > { %826 = vrot.lane.b32.xlu1 %v823_v31, %s1731_s24 }
  0x31   : > { %828 = vrot.lane.b32.xlu0 %v822_v33, %s1731_s24 }
  0x33   : > { %949 = vrot.lane.b32.xlu1 %v940_v34, %s1732_s25  ;;  %v1497_v34 = vld [vmem:[%s1959_s1 + $0xa] sm:$0x3] }
  0x35   : > { %951 = vrot.lane.b32.xlu0 %v948_v36, %s1732_s25 }
  0x37   : > { %953 = vrot.lane.b32.xlu1 %v947_v38, %s1732_s25  ;;  %s1652_s25 = smul.u32 12, %s1967_s12 }
  0x39   : > { %1074 = vrot.lane.b32.xlu0 %v1065_v39, %s1733_s26  ;;  %s209_s28 = scalar_lea.vmem %s1961_s3, %s1652_s25 }
  0x3b   : > { %1076 = vrot.lane.b32.xlu1 %v1073_v41, %s1733_s26 }
  0x3d   : > { %1078 = vrot.lane.b32.xlu0 %v1072_v43, %s1733_s26 }
  0x3f   : > { %1199 = vrot.lane.b32.xlu1 %v1190_v44, %s1734_s27 }
  0x41   : > { %1201 = vrot.lane.b32.xlu0 %v1198_v46, %s1734_s27 }
  0x43   : > { %1203 = vrot.lane.b32.xlu1 %v1197_v47, %s1734_s27 }
  0x87   : > { %v233_v48 = vpop.permute.xlu0 %232 }
  0x89   : > { %v237_v49 = vpop.permute.xlu1 %236 }
  0x8a   : > { %v253_v50 = vsel %vm245_vm1, %v237_v49, 0 }
  0x8b   : > { %v235_v51 = vpop.permute.xlu0 %234  ;;  %1534 = vmatpush3.bf16.msra.mxu1 %v253_v50 }
  0x8c   : > { %v240_v53 = vsel %vm238_vm2, %v235_v51, %v237_v49  ;;  %v239_v54 = vsel %vm238_vm2, %v233_v48, %v235_v51  ;;  %1539 = vmatprep.subr.bf16.mxu1 %v1724_v3  ;;  %v1505_v49 = vld [vmem:[%s1959_s1 + $0xe] sm:$0x3] }
  0x8d   : > { %1479 = vmatprep.subr.msk.bf16.mxu0 %vm245_vm1, %v240_v53  ;;  %v247_v56 = vsel %vm245_vm1, %v239_v54, 0  ;;  %v450_v57 = vpop.permute.xlu1 %449  ;;  %v1509_v53 = vld [vmem:[%s1959_s1 + $0x10] sm:$0x3]  ;;  %v1316_v54 = vsub.s32 2, %v1776_v4 }
  0x8e   : > { %256 = vmatpush1.bf16.msra.mxu0 %v247_v56  ;;  %1536 = vmatmul.mubr.msk.bf16.vlgmr.msra.gmra.mrb[0].mxu1 %vm241_vm3, %v1478_v52  ;;  %v1312_v56 = vsub.s32 1, %v1776_v4 }
  0x8f   : > { %1482 = vmatprep.subr.msk.bf16.mxu0 %vm245_vm1, %v1801_v13  ;;  %1540 = vmatpush3.bf16.msra.mxu1 %v346_v55  ;;  %v452_v59 = vpop.permute.xlu0 %451  ;;  %v1304_v55 = vld [vmem:[%s1960_s2] sm:$0x7] }
  0x90   : > { %1541 = vmatprep.mubr.msk.bf16.mxu1 %vm1725_vm0, %v1724_v3  ;;  %1545 = vmatprep.subr.bf16.mxu1 %v1724_v3  ;;  %v456_v0 = vsel %vm455_vm4, %v450_v57, %v452_v59  ;;  %v1317_v57 = vrot.slane %v1304_v55, %v1316_v54 }
  0x91   : > { %1480 = vmatmul.mubr.msk.bf16.vlgmr.msra.gmra.mrb[0].mxu0 %vm241_vm3, %v1478_v52  ;;  %v454_v60 = vpop.permute.xlu1 %453  ;;  %v462_v7 = vsel %vm245_vm1, %v456_v0, 0 }
  0x92   : > { %349 = vmatpush1.bf16.msra.mxu0 %v340_v58  ;;  %v457_v61 = vsel %vm455_vm4, %v452_v59, %v454_v60  ;;  %380 = vmatprep.mubr.bf16.mxu0 %v1726_v6  ;;  %v468_v1 = vsel %vm245_vm1, %v454_v60, 0  ;;  %v1313_v60 = vrot.slane %v1304_v55, %v1312_v56 }
  0x93   : > { %1486 = vmatprep.subr.msk.bf16.mxu0 %vm245_vm1, %v457_v61  ;;  %v575_v62 = vpop.permute.xlu0 %574 }
  0x95   : > { %v577_v2 = vpop.permute.xlu1 %576 }
  0x96   : > { %v581_v11 = vsel %vm580_vm5, %v575_v62, %v577_v2 }
  0x97   : > { %v579_v5 = vpop.permute.xlu0 %578  ;;  %v587_v15 = vsel %vm245_vm1, %v581_v11, 0 }
  0x98   : > { %v582_v8 = vsel %vm580_vm5, %v577_v2, %v579_v5  ;;  %v593_v12 = vsel %vm245_vm1, %v579_v5, 0 }
  0x99   : > { %v700_v9 = vpop.permute.xlu1 %699 }
  0x9a   : > { %1542 = vmatmul.mubr.msk.bf16.vlgmr.msra.gmra.mrb[0].mxu1 %vm241_vm3, %v212_v63 }
  0x9b   : > { %1546 = vmatpush3.bf16.msra.mxu1 %v468_v1  ;;  %1547 = vmatprep.mubr.msk.bf16.mxu1 %vm1725_vm0, %v1724_v3  ;;  %v702_v13 = vpop.permute.xlu0 %701 }
  0x9c   : > { %1551 = vmatprep.subr.bf16.mxu1 %v1724_v3  ;;  %v706_v19 = vsel %vm705_vm6, %v700_v9, %v702_v13 }
  0x9d   : > { %1483 = vmatmul.mubr.msk.bf16.vlgmr.msra.gmra.mrb[0].mxu0 %vm241_vm3, %v212_v63  ;;  %v704_v14 = vpop.permute.xlu1 %703  ;;  %v712_v23 = vsel %vm245_vm1, %v706_v19, 0 }
  0x9e   : > { %471 = vmatpush1.bf16.msra.mxu0 %v462_v7  ;;  %502 = vmatprep.mubr.bf16.mxu0 %v1726_v6  ;;  %v707_v16 = vsel %vm705_vm6, %v702_v13, %v704_v14  ;;  %v718_v20 = vsel %vm245_vm1, %v704_v14, 0 }
  0x9f   : > { %1490 = vmatprep.subr.msk.bf16.mxu0 %vm245_vm1, %v582_v8  ;;  %v825_v17 = vpop.permute.xlu0 %824 }
  0xa1   : > { %v827_v21 = vpop.permute.xlu1 %826 }
  0xa2   : > { %v831_v27 = vsel %vm830_vm7, %v825_v17, %v827_v21 }
  0xa3   : > { %v829_v22 = vpop.permute.xlu0 %828  ;;  %v837_v31 = vsel %vm245_vm1, %v831_v27, 0 }
  0xa4   : > { %v832_v24 = vsel %vm830_vm7, %v827_v21, %v829_v22  ;;  %v843_v28 = vsel %vm245_vm1, %v829_v22, 0 }
  0xa5   : > { %v950_v25 = vpop.permute.xlu1 %949 }
  0xa6   : > { %1548 = vmatmul.mubr.msk.bf16.vlgmr.msra.gmra.mrb[0].mxu1 %vm241_vm3, %v1485_v10 }
  0xa7   : > { %1552 = vmatpush3.bf16.msra.mxu1 %v593_v12  ;;  %1553 = vmatprep.mubr.msk.bf16.mxu1 %vm1725_vm0, %v1724_v3  ;;  %v952_v29 = vpop.permute.xlu0 %951 }
  0xa8   : > { %1557 = vmatprep.subr.bf16.mxu1 %v1724_v3  ;;  %v956_v35 = vsel %vm955_vm8, %v950_v25, %v952_v29 }
  0xa9   : > { %1487 = vmatmul.mubr.msk.bf16.vlgmr.msra.gmra.mrb[0].mxu0 %vm241_vm3, %v1485_v10  ;;  %v954_v30 = vpop.permute.xlu1 %953  ;;  %v962_v39 = vsel %vm245_vm1, %v956_v35, 0 }
  0xaa   : > { %596 = vmatpush1.bf16.msra.mxu0 %v587_v15  ;;  %627 = vmatprep.mubr.bf16.mxu0 %v1726_v6  ;;  %v957_v32 = vsel %vm955_vm8, %v952_v29, %v954_v30  ;;  %v968_v36 = vsel %vm245_vm1, %v954_v30, 0 }
  0xab   : > { %1494 = vmatprep.subr.msk.bf16.mxu0 %vm245_vm1, %v707_v16  ;;  %v1075_v33 = vpop.permute.xlu0 %1074 }
  0xad   : > { %v1077_v37 = vpop.permute.xlu1 %1076 }
  0xae   : > { %v1081_v43 = vsel %vm1080_vm9, %v1075_v33, %v1077_v37 }
  0xaf   : > { %v1079_v38 = vpop.permute.xlu0 %1078  ;;  %v1087_v47 = vsel %vm245_vm1, %v1081_v43, 0 }
  0xb0   : > { %v1082_v40 = vsel %vm1080_vm9, %v1077_v37, %v1079_v38  ;;  %v1093_v44 = vsel %vm245_vm1, %v1079_v38, 0 }
  0xb1   : > { %v1200_v41 = vpop.permute.xlu1 %1199 }
  0xb2   : > { %1554 = vmatmul.mubr.msk.bf16.vlgmr.msra.gmra.mrb[0].mxu1 %vm241_vm3, %v1489_v18 }
  0xb3   : > { %1558 = vmatpush3.bf16.msra.mxu1 %v718_v20  ;;  %1559 = vmatprep.mubr.msk.bf16.mxu1 %vm1725_vm0, %v1724_v3  ;;  %v1202_v45 = vpop.permute.xlu0 %1201 }
  0xb4   : > { %1563 = vmatprep.subr.bf16.mxu1 %v1724_v3  ;;  %v1206_v50 = vsel %vm1205_vm10, %v1200_v41, %v1202_v45 }
  0xb5   : > { %1491 = vmatmul.mubr.msk.bf16.vlgmr.msra.gmra.mrb[0].mxu0 %vm241_vm3, %v1489_v18  ;;  %v1204_v46 = vpop.permute.xlu1 %1203  ;;  %v1212_v52 = vsel %vm245_vm1, %v1206_v50, 0 }
  0xb6   : > { %721 = vmatpush1.bf16.msra.mxu0 %v712_v23  ;;  %752 = vmatprep.mubr.bf16.mxu0 %v1726_v6  ;;  %v1207_v48 = vsel %vm1205_vm10, %v1202_v45, %v1204_v46  ;;  %v1218_v51 = vsel %vm245_vm1, %v1204_v46, 0 }
  0xb7   : > { %1498 = vmatprep.subr.msk.bf16.mxu0 %vm245_vm1, %v832_v24 }
  0xbe   : > { %1560 = vmatmul.mubr.msk.bf16.vlgmr.msra.gmra.mrb[0].mxu1 %vm241_vm3, %v1493_v26 }
  0xbf   : > { %1564 = vmatpush3.bf16.msra.mxu1 %v843_v28  ;;  %1565 = vmatprep.mubr.msk.bf16.mxu1 %vm1725_vm0, %v1724_v3 }
  0xc0   : > { %1569 = vmatprep.subr.bf16.mxu1 %v1724_v3 }
  0xc1   : > { %1495 = vmatmul.mubr.msk.bf16.vlgmr.msra.gmra.mrb[0].mxu0 %vm241_vm3, %v1493_v26 }
  0xc2   : > { %846 = vmatpush1.bf16.msra.mxu0 %v837_v31  ;;  %877 = vmatprep.mubr.bf16.mxu0 %v1726_v6 }
  0xc3   : > { %1502 = vmatprep.subr.msk.bf16.mxu0 %vm245_vm1, %v957_v32 }
  0xca   : > { %1566 = vmatmul.mubr.msk.bf16.vlgmr.msra.gmra.mrb[0].mxu1 %vm241_vm3, %v1497_v34 }
  0xcb   : > { %1570 = vmatpush3.bf16.msra.mxu1 %v968_v36  ;;  %1571 = vmatprep.mubr.msk.bf16.mxu1 %vm1725_vm0, %v1724_v3 }
  0xcc   : > { %1575 = vmatprep.subr.bf16.mxu1 %v1724_v3 }
  0xcd   : > { %1499 = vmatmul.mubr.msk.bf16.vlgmr.msra.gmra.mrb[0].mxu0 %vm241_vm3, %v1497_v34 }
  0xce   : > { %971 = vmatpush1.bf16.msra.mxu0 %v962_v39  ;;  %1002 = vmatprep.mubr.bf16.mxu0 %v1726_v6 }
  0xcf   : > { %1506 = vmatprep.subr.msk.bf16.mxu0 %vm245_vm1, %v1082_v40 }
  0xd6   : > { %1572 = vmatmul.mubr.msk.bf16.vlgmr.msra.gmra.mrb[0].mxu1 %vm241_vm3, %v1501_v42 }
  0xd7   : > { %1576 = vmatpush3.bf16.msra.mxu1 %v1093_v44  ;;  %1577 = vmatprep.mubr.msk.bf16.mxu1 %vm1725_vm0, %v1724_v3 }
  0xd8   : > { %1581 = vmatprep.subr.bf16.mxu1 %v1724_v3 }
  0xd9   : > { %1503 = vmatmul.mubr.msk.bf16.vlgmr.msra.gmra.mrb[0].mxu0 %vm241_vm3, %v1501_v42 }
  0xda   : > { %1096 = vmatpush1.bf16.msra.mxu0 %v1087_v47  ;;  %1127 = vmatprep.mubr.bf16.mxu0 %v1726_v6 }
  0xdb   : > { %1510 = vmatprep.subr.msk.bf16.mxu0 %vm245_vm1, %v1207_v48 }
  0xe2   : > { %1578 = vmatmul.mubr.msk.bf16.vlgmr.msra.gmra.mrb[0].mxu1 %vm241_vm3, %v1505_v49 }
  0xe3   : > { %1582 = vmatpush3.bf16.msra.mxu1 %v1218_v51  ;;  %1583 = vmatprep.mubr.msk.bf16.mxu1 %vm1725_vm0, %v1724_v3  ;;  %v1308_v3 = vsub.s32 0, %v1776_v4 }
  0xe5   : > { %1507 = vmatmul.mubr.msk.bf16.vlgmr.msra.gmra.mrb[0].mxu0 %vm241_vm3, %v1505_v49  ;;  %v1309_v58 = vrot.slane %v1304_v55, %v1308_v3 }
  0xe6   : > { %1221 = vmatpush1.bf16.msra.mxu0 %v1212_v52  ;;  %1252 = vmatprep.mubr.bf16.mxu0 %v1726_v6 }
  0xee   : > { %1584 = vmatmul.mubr.msk.bf16.vlgmr.msra.gmra.mrb[0].mxu1 %vm241_vm3, %v1509_v53 }
  0xf1   : > { %1511 = vmatmul.mubr.msk.bf16.vlgmr.msra.gmra.mrb[0].mxu0 %vm241_vm3, %v1509_v53 }
 0x1c1   : > { %v1295_v6 = vpop.f32.mrb[0].mxu1 }
 0x1c2   : > { %v1585_v59 = vpop.f32.mrb[1].mxu1  ;;  %v1323_v62 = vmul.f32 %v1317_v57, %v1295_v6 }
 0x1c3   : > { %v1298_v61 = vpop.f32.mrb[2].mxu1 }
 0x1c4   : > { %v1254_v63 = vpop.f32.mrb[0].mxu0  ;;  %v1586_v0 = vpop.f32.mrb[3].mxu1  ;;  %v1336_v4 = vmul.f32 %v1323_v62, %v1323_v62  ;;  %v1329_v15 = vsel %vm1328_vm12, %v1323_v62, 0.0 }
 0x1c5   : > { %v1321_v1 = vmul.f32 %v1309_v58, %v1254_v63  ;;  %v1256_v2 = vpop.f32.mrb[1].mxu0 }
 0x1c6   : > { %v1322_v5 = vmul.f32 %v1313_v60, %v1256_v2  ;;  %v1258_v7 = vpop.f32.mrb[2].mxu0  ;;  %v1340_v19 = vsel %vm1328_vm12, %v1336_v4, 0.0 }
 0x1c7   : > { %v1325_v8 = vsel %vm1324_vm11, %v1321_v1, 0.0  ;;  %v1334_v9 = vmul.f32 %v1321_v1, %v1321_v1  ;;  %v1259_v10 = vpop.f32.mrb[3].mxu0 }
 0x1c8   : > { %v1326_v11 = vsel %vm1324_vm11, %v1322_v5, 0.0  ;;  %v1335_v12 = vmul.f32 %v1322_v5, %v1322_v5 }
 0x1c9   : > { %v1327_v13 = vadd.f32 %v1326_v11, %v1325_v8  ;;  %v1337_v14 = vsel %vm1324_vm11, %v1334_v9, 0.0 }
 0x1ca   : > { %v1338_v16 = vsel %vm1324_vm11, %v1335_v12, 0.0 }
 0x1cb   : > { %v1330_v17 = vadd.f32 %v1329_v15, %v1327_v13  ;;  %v1339_v18 = vadd.f32 %v1338_v16, %v1337_v14 }
 0x1cd   : > { %1331 = vadd.xlane.f32.xlu0 %v1330_v17  ;;  %v1341_v20 = vadd.f32 %v1340_v19, %v1339_v18 }
 0x1cf   : > { %1342 = vadd.xlane.f32.xlu1 %v1341_v20 }
 0x25a   : > { %v1332_v21 = vpop.xlane.xlu0 %1331 }
 0x25b   : > { %v1333_v22 = vmul.f32 0.00390625, %v1332_v21 }
 0x25c   : > { %v1343_v23 = vpop.xlane.xlu1 %1342 }
 0x25d   : > { %v1344_v24 = vmul.f32 0.00390625, %v1343_v23  ;;  %v1345_v25 = vmul.f32 %v1333_v22, %v1333_v22  ;;  %v1348_v29 = vsub.f32 %v1254_v63, %v1333_v22  ;;  %v1349_v30 = vsub.f32 %v1256_v2, %v1333_v22 }
 0x25e   : > { %v1350_v31 = vsub.f32 %v1295_v6, %v1333_v22 }
 0x25f   : > { %v1346_v26 = vsub.f32 %v1344_v24, %v1345_v25 }
 0x261   : > { %v1347_v27 = vmax.f32 %v1346_v26, 0.0 }
 0x263   : > { %v1351_v28 = vadd.f32 1e-05, %v1347_v27 }
 0x265   : > { %1697 = vrsqrt.f32 %v1351_v28 }
 0x26f   : > { %v1698_v32 = vpop.eup %1697 }
 0x270   : > { %v1353_v33 = vmul.f32 %v1698_v32, %v1348_v29  ;;  %v1354_v34 = vmul.f32 %v1698_v32, %v1349_v30  ;;  %v1355_v35 = vmul.f32 %v1698_v32, %v1350_v31 }
 0x272   : > { %vm1356_vm13 = vcmp.ge.f32.partialorder %v1353_v33, 0.0  ;;  %vm1357_vm14 = vcmp.ge.f32.partialorder %v1354_v34, 0.0  ;;  %vm1358_vm15 = vcmp.ge.f32.partialorder %v1355_v35, 0.0  ;;  %v1359_v36 = vmul.f32 0.2, %v1353_v33 }
 0x273   : > { %v1360_v37 = vmul.f32 0.2, %v1354_v34  ;;  %v1361_v38 = vmul.f32 0.2, %v1355_v35 }
 0x274   : > { %v1362_v39 = vsel %vm1356_vm13, %v1353_v33, %v1359_v36 }
 0x275   : > { %v1363_v40 = vsel %vm1357_vm14, %v1354_v34, %v1360_v37  ;;  %v1364_v41 = vsel %vm1358_vm15, %v1355_v35, %v1361_v38 }
 0x276   : > { %v1367_v42 = vcombine.low %v1362_v39, %v1363_v40  ;;  %1370 = vst.msk [vmem:[%s209_s28 + $0x8] sm:$0xf] %vm1328_vm12, %v1364_v41 }
 0x278   : > { %1369 = vst [vmem:[%s209_s28] sm:$0xff] %v1367_v42 }
 0x279 PF: > { %s13_s14 = sadd.s32 1, %s1721_s14   ;;  %s1962_s12 = smov %s1717_s13 }
 0x27a   : > { %p10_p5 = scmp.ge.s32.totalorder %s13_s14, 4   ;;  %s1963_s13 = smov %s1965_s15 }
 0x27c   :  { %12 = sbr.rel (!%p10_p5) target bundleno = 2 (0x2), region = 73 }

// kernel: unet_dc_cascade.14
= control target key start
LH: loop header
LB: loop body
LE: loop exit
PB: predicated region body
PF: predicated region fallthrough
CT: control target
= control target key end

     0   :  { %s1800_s12 = smov 0   ;;  %s1802_s13 = smov 0   ;;  %s1991_s0 = inlined_call_operand.vmem [shape: bf16[2,1,326], index: 0, kind: input, shape index: {}]   ;;  %s1992_s1 = inlined_call_operand.vmem [shape: bf16[9,4,1], index: 1, kind: input, shape index: {}]   ;;  %s1993_s2 = inlined_call_operand.vmem [shape: f32[1,288], index: 2, kind: input, shape index: {}]   ;;  %s1994_s3 = inlined_call_operand.vmem [shape: f32[2,4,288], index: 3, kind: output, shape index: {}]  }
   0x1   :  { %s1804_s14 = smov 0  }
   0x2 LB: > { %s25_s15 = sadd.s32 1, %s1762_s13  ;;  %p1530_p0 = scmp.ge.s32.totalorder %s1766_s14, 1  ;;  %s1766_s14 = sphi %s1804_s14, %s13_s14   ;;  %s1762_s13 = sphi %s1802_s13, %s1996_s13   ;;  %s1758_s12 = sphi %s1800_s12, %s1995_s12  }
   0x3   : > { %p27_p1 = scmp.ge.s32.totalorder %s25_s15, 2  ;;  %p159_p2 = scmp.lt.s32.totalorder %s1766_s14, 3 }
   0x5   : > { %s1998_s15 = smov (%p27_p1, %s25_s15), 0  ;;  %p160_p3 = pnand %p1530_p0, %p159_p2 }
   0x6   : > { %p190_p4 = scmp.lt.s32.totalorder (!%p160_p3), %s1758_s12, 1  ;;  %v224_v0 = vlaneseq (!%p160_p3)  ;;  %v1768_v1 = vmov (!%p160_p3), 1966171168   ;;  %v1769_v3 = vmov (!%p160_p3), 0   ;;  %v1770_v6 = vmov (!%p160_p3), 0.0   ;;  %s1772_s20 = smov (!%p160_p3), 127  }
   0x7   : > { %163 = sbr.rel (%p160_p3) target bundleno = 637 (0x27d), region = 32  ;;  %v222_v2 = vunpack.c.l.s4 (!%p160_p3), %v1768_v1  ;;  %293 = vmatprep.mubr.bf16.mxu0 (!%p160_p3), %v1769_v3  ;;  %1586 = vmatprep.subr.bf16.mxu1 (!%p160_p3), %v1770_v6  ;;  %vm1771_vm0 = vmmov (!%p160_p3), 0   ;;  %s1773_s21 = smov (!%p160_p3), 126   ;;  %vm249_vm1 = vcmask (!%p160_p3), 1040384   ;;  %vm242_vm2 = vcmask (!%p160_p3), 1039360  }
   0x8   : > { %v1821_v4 = vshrl.u32 (!%p160_p3), %v224_v0, 7  ;;  %1588 = vmatprep.mubr.msk.bf16.mxu1 (!%p160_p3), %vm1771_vm0, %v1770_v6  ;;  %s1774_s22 = smov (!%p160_p3), 110   ;;  %s1775_s23 = smov (!%p160_p3), 109   ;;  %v1844_v15 = vsel (!%p160_p3), %vm249_vm1, 65535, %v1769_v3  ;;  %vm468_vm3 = vcmask (!%p160_p3), 1031168   ;;  %vm245_vm4 = vcmask (!%p160_p3), 7168  }
   0x9   : > { %v223_v5 = vunpack.c.0.s8 (!%p160_p3), %v222_v2  ;;  %s1776_s24 = smov (!%p160_p3), 108   ;;  %s1777_s25 = smov (!%p160_p3), 92   ;;  %v1532_v25 = vld [vmem:[%s1992_s1 + $0x2] sm:$0x3] (!%p160_p3)  ;;  %vm600_vm5 = vcmask (!%p160_p3), 900096   ;;  %vm732_vm6 = vcmask (!%p160_p3), 891904  }
   0xa   : > { %s1778_s26 = smov (!%p160_p3), 91   ;;  %s1779_s27 = smov (!%p160_p3), 90   ;;  %v209_v35 = vld [vmem:[%s1992_s1] sm:$0x3] (!%p160_p3)  ;;  %v1538_v44 = vld [vmem:[%s1992_s1 + $0x4] sm:$0x3] (!%p160_p3) }
   0xb   : > { %v226_v7 = vsub.s32 (!%p160_p3), %v223_v5, %v1821_v4  ;;  %vm864_vm7 = vcmask (!%p160_p3), 883712   ;;  %v1542_v53 = vld [vmem:[%s1992_s1 + $0x6] sm:$0x3] (!%p160_p3)  ;;  %vm996_vm8 = vcmask (!%p160_p3), 752640   ;;  %v1546_v62 = vld [vmem:[%s1992_s1 + $0x8] sm:$0x3] (!%p160_p3) }
   0xc   : > { %vm1128_vm9 = vcmask (!%p160_p3), 744448   ;;  %vm1260_vm10 = vcmask (!%p160_p3), 736256   ;;  %vm1379_vm11 = vcmask (!%p160_p3), 1043456   ;;  %vm1383_vm12 = vcmask (!%p160_p3), 257024  }
   0xe   : > { %s2000_s12 = smov (!%p190_p4, %s1758_s12), 1 }
   0xf   : > { %s1704_s16 = smul.u32 3, %s2000_s12 }
  0x11   : > { %s193_s19 = scalar_lea.vmem %s1991_s0, %s1704_s16 }
  0x12   : > { %v1533_v8 = vld.sshfl [vmem:[%s193_s19] sm:$0x13 pattern:$0x75316420] }
  0x13   : > { %v1831_v9 = vrot.slane %v1533_v8, %v226_v7  ;;  %v220_v10 = vcombine.high %v1533_v8, %v1533_v8 }
  0x15   : > { %236 = vrot.lane.b32.xlu1 %v1831_v9, %s1772_s20  ;;  %v234_v11 = vrot.slane %v220_v10, %v226_v7  ;;  %v235_v12 = vcombine.high %v1831_v9, %v1831_v9  ;;  %v346_v27 = vand.u32 %v1844_v15, %v1831_v9  ;;  %v1550_v10 = vld [vmem:[%s1992_s1 + $0xa] sm:$0x3] }
  0x17   : > { %238 = vrot.lane.b32.xlu0 %v234_v11, %s1772_s20  ;;  %v349_v20 = vand.u32 %v1844_v15, %v234_v11  ;;  %v352_v23 = vand.u32 %v1844_v15, %v235_v12 }
  0x19   : > { %464 = vrot.lane.b32.xlu1 %v234_v11, %s1773_s21 }
  0x1b   : > { %240 = vrot.lane.b32.xlu0 %v235_v12, %s1772_s20 }
  0x1d   : > { %462 = vrot.lane.b32.xlu1 %v1831_v9, %s1773_s21 }
  0x1f   : > { %466 = vrot.lane.b32.xlu0 %v235_v12, %s1773_s21 }
  0x21   : > { %598 = vrot.lane.b32.xlu1 %v235_v12, %s1774_s22 }
  0x23   : > { %596 = vrot.lane.b32.xlu0 %v234_v11, %s1774_s22 }
  0x25   : > { %728 = vrot.lane.b32.xlu1 %v234_v11, %s1775_s23 }
  0x27   : > { %594 = vrot.lane.b32.xlu0 %v1831_v9, %s1774_s22 }
  0x29   : > { %726 = vrot.lane.b32.xlu1 %v1831_v9, %s1775_s23 }
  0x2b   : > { %730 = vrot.lane.b32.xlu0 %v235_v12, %s1775_s23 }
  0x2d   : > { %862 = vrot.lane.b32.xlu1 %v235_v12, %s1776_s24 }
  0x2f   : > { %860 = vrot.lane.b32.xlu0 %v234_v11, %s1776_s24 }
  0x31   : > { %992 = vrot.lane.b32.xlu1 %v234_v11, %s1777_s25 }
  0x33   : > { %858 = vrot.lane.b32.xlu0 %v1831_v9, %s1776_s24 }
  0x35   : > { %990 = vrot.lane.b32.xlu1 %v1831_v9, %s1777_s25 }
  0x37   : > { %994 = vrot.lane.b32.xlu0 %v235_v12, %s1777_s25  ;;  %s1705_s25 = smul.u32 12, %s2000_s12 }
  0x39   : > { %1126 = vrot.lane.b32.xlu1 %v235_v12, %s1778_s26  ;;  %s206_s28 = scalar_lea.vmem %s1994_s3, %s1705_s25 }
  0x3b   : > { %1124 = vrot.lane.b32.xlu0 %v234_v11, %s1778_s26 }
  0x3d   : > { %1256 = vrot.lane.b32.xlu1 %v234_v11, %s1779_s27 }
  0x3f   : > { %1122 = vrot.lane.b32.xlu0 %v1831_v9, %s1778_s26 }
  0x41   : > { %1254 = vrot.lane.b32.xlu1 %v1831_v9, %s1779_s27 }
  0x43   : > { %1258 = vrot.lane.b32.xlu0 %v235_v12, %s1779_s27 }
  0x87   : > { %v237_v14 = vpop.permute.xlu1 %236 }
  0x89   : > { %v239_v13 = vpop.permute.xlu0 %238 }
  0x8a   : > { %v243_v16 = vsel %vm242_vm2, %v237_v14, %v239_v13 }
  0x8b   : > { %v465_v22 = vpop.permute.xlu1 %464  ;;  %v253_v24 = vand.u32 %v1844_v15, %v243_v16 }
  0x8d   : > { %v241_v17 = vpop.permute.xlu0 %240 }
  0x8e   : > { %v259_v18 = vand.u32 %v1844_v15, %v241_v17  ;;  %v244_v19 = vsel %vm242_vm2, %v239_v13, %v241_v17 }
  0x8f   : > { %v256_v21 = vand.u32 %v1844_v15, %v244_v19  ;;  %v463_v30 = vpop.permute.xlu1 %462 }
  0x90   : > { %1587 = vmatpush3.bf16.msra.mxu1 %v259_v18  ;;  %v469_v32 = vsel %vm468_vm3, %v463_v30, %v465_v22  ;;  %v1359_v30 = vld [vmem:[%s1993_s2] sm:$0x7] }
  0x91   : > { %261 = vmatprep.subr.bf16.mxu0 %v256_v21  ;;  %1592 = vmatprep.subr.bf16.mxu1 %v1770_v6  ;;  %v467_v26 = vpop.permute.xlu0 %466  ;;  %v475_v37 = vand.u32 %v469_v32, %v1844_v15 }
  0x92   : > { %262 = vmatpush1.bf16.msra.mxu0 %v253_v24  ;;  %v470_v28 = vsel %vm468_vm3, %v465_v22, %v467_v26  ;;  %v481_v34 = vand.u32 %v467_v26, %v1844_v15 }
  0x93   : > { %1589 = vmatmul.mubr.msk.bf16.vlgmr.msra.gmra.mrb[0].mxu1 %vm245_vm4, %v1532_v25  ;;  %354 = vmatprep.subr.bf16.mxu0 %v349_v20  ;;  %v478_v29 = vand.u32 %v470_v28, %v1844_v15  ;;  %v599_v31 = vpop.permute.xlu1 %598  ;;  %v1554_v20 = vld [vmem:[%s1992_s1 + $0xc] sm:$0x3] }
  0x94   : > { %1593 = vmatpush3.bf16.msra.mxu1 %v352_v23  ;;  %1594 = vmatprep.mubr.msk.bf16.mxu1 %vm1771_vm0, %v1770_v6  ;;  %v613_v43 = vand.u32 %v599_v31, %v1844_v15 }
  0x95   : > { %1534 = vmatmul.mubr.msk.bf16.vlgmr.msra.gmra.mrb[0].mxu0 %vm245_vm4, %v1532_v25  ;;  %1598 = vmatprep.subr.bf16.mxu1 %v1770_v6  ;;  %v597_v33 = vpop.permute.xlu0 %596 }
  0x96   : > { %355 = vmatpush1.bf16.msra.mxu0 %v346_v27  ;;  %386 = vmatprep.mubr.bf16.mxu0 %v1769_v3  ;;  %v602_v36 = vsel %vm600_vm5, %v597_v33, %v599_v31  ;;  %v1558_v27 = vld [vmem:[%s1992_s1 + $0xe] sm:$0x3]  ;;  %v1367_v31 = vsub.s32 1, %v1821_v4 }
  0x97   : > { %483 = vmatprep.subr.bf16.mxu0 %v478_v29  ;;  %v610_v38 = vand.u32 %v602_v36, %v1844_v15  ;;  %v729_v42 = vpop.permute.xlu1 %728  ;;  %v1562_v29 = vld [vmem:[%s1992_s1 + $0x10] sm:$0x3] }
  0x99   : > { %v595_v39 = vpop.permute.xlu0 %594 }
  0x9a   : > { %v601_v41 = vsel %vm600_vm5, %v595_v39, %v597_v33 }
  0x9b   : > { %v607_v46 = vand.u32 %v601_v41, %v1844_v15  ;;  %v727_v48 = vpop.permute.xlu1 %726 }
  0x9c   : > { %v733_v50 = vsel %vm732_vm6, %v727_v48, %v729_v42 }
  0x9d   : > { %v731_v40 = vpop.permute.xlu0 %730  ;;  %v739_v55 = vand.u32 %v733_v50, %v1844_v15 }
  0x9e   : > { %v734_v45 = vsel %vm732_vm6, %v729_v42, %v731_v40  ;;  %v745_v52 = vand.u32 %v731_v40, %v1844_v15 }
  0x9f   : > { %1595 = vmatmul.mubr.msk.bf16.vlgmr.msra.gmra.mrb[0].mxu1 %vm245_vm4, %v209_v35  ;;  %v742_v47 = vand.u32 %v734_v45, %v1844_v15  ;;  %v863_v49 = vpop.permute.xlu1 %862 }
  0xa0   : > { %1599 = vmatpush3.bf16.msra.mxu1 %v481_v34  ;;  %1600 = vmatprep.mubr.msk.bf16.mxu1 %vm1771_vm0, %v1770_v6  ;;  %v877_v61 = vand.u32 %v863_v49, %v1844_v15  ;;  %v1368_v34 = vrot.slane %v1359_v30, %v1367_v31 }
  0xa1   : > { %1536 = vmatmul.mubr.msk.bf16.vlgmr.msra.gmra.mrb[0].mxu0 %vm245_vm4, %v209_v35  ;;  %1604 = vmatprep.subr.bf16.mxu1 %v1770_v6  ;;  %v861_v51 = vpop.permute.xlu0 %860 }
  0xa2   : > { %484 = vmatpush1.bf16.msra.mxu0 %v475_v37  ;;  %515 = vmatprep.mubr.bf16.mxu0 %v1769_v3  ;;  %v866_v54 = vsel %vm864_vm7, %v861_v51, %v863_v49 }
  0xa3   : > { %615 = vmatprep.subr.bf16.mxu0 %v610_v38  ;;  %v874_v56 = vand.u32 %v866_v54, %v1844_v15  ;;  %v993_v60 = vpop.permute.xlu1 %992 }
  0xa5   : > { %v859_v57 = vpop.permute.xlu0 %858 }
  0xa6   : > { %v865_v59 = vsel %vm864_vm7, %v859_v57, %v861_v51 }
  0xa7   : > { %v871_v0 = vand.u32 %v865_v59, %v1844_v15  ;;  %v991_v2 = vpop.permute.xlu1 %990 }
  0xa8   : > { %v997_v7 = vsel %vm996_vm8, %v991_v2, %v993_v60 }
  0xa9   : > { %v995_v58 = vpop.permute.xlu0 %994  ;;  %v1003_v12 = vand.u32 %v997_v7, %v1844_v15 }
  0xaa   : > { %v998_v63 = vsel %vm996_vm8, %v993_v60, %v995_v58  ;;  %v1009_v9 = vand.u32 %v995_v58, %v1844_v15 }
  0xab   : > { %1601 = vmatmul.mubr.msk.bf16.vlgmr.msra.gmra.mrb[0].mxu1 %vm245_vm4, %v1538_v44  ;;  %v1006_v1 = vand.u32 %v998_v63, %v1844_v15  ;;  %v1127_v5 = vpop.permute.xlu1 %1126 }
  0xac   : > { %1605 = vmatpush3.bf16.msra.mxu1 %v613_v43  ;;  %1606 = vmatprep.mubr.msk.bf16.mxu1 %vm1771_vm0, %v1770_v6  ;;  %v1141_v19 = vand.u32 %v1127_v5, %v1844_v15 }
  0xad   : > { %1540 = vmatmul.mubr.msk.bf16.vlgmr.msra.gmra.mrb[0].mxu0 %vm245_vm4, %v1538_v44  ;;  %1610 = vmatprep.subr.bf16.mxu1 %v1770_v6  ;;  %v1125_v8 = vpop.permute.xlu0 %1124 }
  0xae   : > { %616 = vmatpush1.bf16.msra.mxu0 %v607_v46  ;;  %647 = vmatprep.mubr.bf16.mxu0 %v1769_v3  ;;  %v1130_v11 = vsel %vm1128_vm9, %v1125_v8, %v1127_v5 }
  0xaf   : > { %747 = vmatprep.subr.bf16.mxu0 %v742_v47  ;;  %v1138_v13 = vand.u32 %v1130_v11, %v1844_v15  ;;  %v1257_v18 = vpop.permute.xlu1 %1256 }
  0xb1   : > { %v1123_v14 = vpop.permute.xlu0 %1122 }
  0xb2   : > { %v1129_v17 = vsel %vm1128_vm9, %v1123_v14, %v1125_v8 }
  0xb3   : > { %v1135_v22 = vand.u32 %v1129_v17, %v1844_v15  ;;  %v1255_v24 = vpop.permute.xlu1 %1254 }
  0xb4   : > { %v1261_v25 = vsel %vm1260_vm10, %v1255_v24, %v1257_v18 }
  0xb5   : > { %v1259_v16 = vpop.permute.xlu0 %1258  ;;  %v1267_v28 = vand.u32 %v1261_v25, %v1844_v15 }
  0xb6   : > { %v1262_v21 = vsel %vm1260_vm10, %v1257_v18, %v1259_v16  ;;  %v1273_v26 = vand.u32 %v1259_v16, %v1844_v15 }
  0xb7   : > { %1607 = vmatmul.mubr.msk.bf16.vlgmr.msra.gmra.mrb[0].mxu1 %vm245_vm4, %v1542_v53  ;;  %v1270_v23 = vand.u32 %v1262_v21, %v1844_v15  ;;  %v1371_v15 = vsub.s32 2, %v1821_v4 }
  0xb8   : > { %1611 = vmatpush3.bf16.msra.mxu1 %v745_v52  ;;  %1612 = vmatprep.mubr.msk.bf16.mxu1 %vm1771_vm0, %v1770_v6 }
  0xb9   : > { %1544 = vmatmul.mubr.msk.bf16.vlgmr.msra.gmra.mrb[0].mxu0 %vm245_vm4, %v1542_v53  ;;  %1616 = vmatprep.subr.bf16.mxu1 %v1770_v6  ;;  %v1372_v32 = vrot.slane %v1359_v30, %v1371_v15 }
  0xba   : > { %748 = vmatpush1.bf16.msra.mxu0 %v739_v55  ;;  %779 = vmatprep.mubr.bf16.mxu0 %v1769_v3 }
  0xbb   : > { %879 = vmatprep.subr.bf16.mxu0 %v874_v56 }
  0xc3   : > { %1613 = vmatmul.mubr.msk.bf16.vlgmr.msra.gmra.mrb[0].mxu1 %vm245_vm4, %v1546_v62 }
  0xc4   : > { %1617 = vmatpush3.bf16.msra.mxu1 %v877_v61  ;;  %1618 = vmatprep.mubr.msk.bf16.mxu1 %vm1771_vm0, %v1770_v6 }
  0xc5   : > { %1548 = vmatmul.mubr.msk.bf16.vlgmr.msra.gmra.mrb[0].mxu0 %vm245_vm4, %v1546_v62  ;;  %1622 = vmatprep.subr.bf16.mxu1 %v1770_v6 }
  0xc6   : > { %880 = vmatpush1.bf16.msra.mxu0 %v871_v0  ;;  %911 = vmatprep.mubr.bf16.mxu0 %v1769_v3 }
  0xc7   : > { %1011 = vmatprep.subr.bf16.mxu0 %v1006_v1 }
  0xcf   : > { %1619 = vmatmul.mubr.msk.bf16.vlgmr.msra.gmra.mrb[0].mxu1 %vm245_vm4, %v1550_v10 }
  0xd0   : > { %1623 = vmatpush3.bf16.msra.mxu1 %v1009_v9  ;;  %1624 = vmatprep.mubr.msk.bf16.mxu1 %vm1771_vm0, %v1770_v6 }
  0xd1   : > { %1552 = vmatmul.mubr.msk.bf16.vlgmr.msra.gmra.mrb[0].mxu0 %vm245_vm4, %v1550_v10  ;;  %1628 = vmatprep.subr.bf16.mxu1 %v1770_v6 }
  0xd2   : > { %1012 = vmatpush1.bf16.msra.mxu0 %v1003_v12  ;;  %1043 = vmatprep.mubr.bf16.mxu0 %v1769_v3 }
  0xd3   : > { %1143 = vmatprep.subr.bf16.mxu0 %v1138_v13 }
  0xdb   : > { %1625 = vmatmul.mubr.msk.bf16.vlgmr.msra.gmra.mrb[0].mxu1 %vm245_vm4, %v1554_v20 }
  0xdc   : > { %1629 = vmatpush3.bf16.msra.mxu1 %v1141_v19  ;;  %1630 = vmatprep.mubr.msk.bf16.mxu1 %vm1771_vm0, %v1770_v6 }
  0xdd   : > { %1556 = vmatmul.mubr.msk.bf16.vlgmr.msra.gmra.mrb[0].mxu0 %vm245_vm4, %v1554_v20  ;;  %1634 = vmatprep.subr.bf16.mxu1 %v1770_v6 }
  0xde   : > { %1144 = vmatpush1.bf16.msra.mxu0 %v1135_v22  ;;  %1175 = vmatprep.mubr.bf16.mxu0 %v1769_v3 }
  0xdf   : > { %1275 = vmatprep.subr.bf16.mxu0 %v1270_v23 }
  0xe7   : > { %1631 = vmatmul.mubr.msk.bf16.vlgmr.msra.gmra.mrb[0].mxu1 %vm245_vm4, %v1558_v27 }
  0xe8   : > { %1635 = vmatpush3.bf16.msra.mxu1 %v1273_v26  ;;  %1636 = vmatprep.mubr.msk.bf16.mxu1 %vm1771_vm0, %v1770_v6  ;;  %v1363_v6 = vsub.s32 0, %v1821_v4 }
  0xe9   : > { %1560 = vmatmul.mubr.msk.bf16.vlgmr.msra.gmra.mrb[0].mxu0 %vm245_vm4, %v1558_v27 }
  0xea   : > { %1276 = vmatpush1.bf16.msra.mxu0 %v1267_v28  ;;  %1307 = vmatprep.mubr.bf16.mxu0 %v1769_v3  ;;  %v1364_v3 = vrot.slane %v1359_v30, %v1363_v6 }
  0xf3   : > { %1637 = vmatmul.mubr.msk.bf16.vlgmr.msra.gmra.mrb[0].mxu1 %vm245_vm4, %v1562_v29 }
  0xf5   : > { %1564 = vmatmul.mubr.msk.bf16.vlgmr.msra.gmra.mrb[0].mxu0 %vm245_vm4, %v1562_v29 }
 0x1c6   : > { %v1350_v33 = vpop.f32.mrb[0].mxu1 }
 0x1c7   : > { %v1638_v35 = vpop.f32.mrb[1].mxu1  ;;  %v1378_v36 = vmul.f32 %v1372_v32, %v1350_v33 }
 0x1c8   : > { %v1309_v37 = vpop.f32.mrb[0].mxu0  ;;  %v1353_v38 = vpop.f32.mrb[2].mxu1 }
 0x1c9   : > { %v1376_v39 = vmul.f32 %v1364_v3, %v1309_v37  ;;  %v1311_v40 = vpop.f32.mrb[1].mxu0  ;;  %v1639_v41 = vpop.f32.mrb[3].mxu1  ;;  %v1391_v4 = vmul.f32 %v1378_v36, %v1378_v36  ;;  %v1384_v51 = vsel %vm1383_vm12, %v1378_v36, 0.0 }
 0x1ca   : > { %v1377_v42 = vmul.f32 %v1368_v34, %v1311_v40  ;;  %v1313_v43 = vpop.f32.mrb[2].mxu0 }
 0x1cb   : > { %v1380_v44 = vsel %vm1379_vm11, %v1376_v39, 0.0  ;;  %v1389_v45 = vmul.f32 %v1376_v39, %v1376_v39  ;;  %v1314_v46 = vpop.f32.mrb[3].mxu0  ;;  %v1395_v55 = vsel %vm1383_vm12, %v1391_v4, 0.0 }
 0x1cc   : > { %v1381_v47 = vsel %vm1379_vm11, %v1377_v42, 0.0  ;;  %v1390_v48 = vmul.f32 %v1377_v42, %v1377_v42 }
 0x1cd   : > { %v1382_v49 = vadd.f32 %v1381_v47, %v1380_v44  ;;  %v1392_v50 = vsel %vm1379_vm11, %v1389_v45, 0.0 }
 0x1ce   : > { %v1393_v52 = vsel %vm1379_vm11, %v1390_v48, 0.0 }
 0x1cf   : > { %v1385_v53 = vadd.f32 %v1384_v51, %v1382_v49  ;;  %v1394_v54 = vadd.f32 %v1393_v52, %v1392_v50 }
 0x1d1   : > { %1386 = vadd.xlane.f32.xlu0 %v1385_v53  ;;  %v1396_v56 = vadd.f32 %v1395_v55, %v1394_v54 }
 0x1d3   : > { %1397 = vadd.xlane.f32.xlu1 %v1396_v56 }
 0x25e   : > { %v1387_v57 = vpop.xlane.xlu0 %1386 }
 0x25f   : > { %v1388_v58 = vmul.f32 0.00390625, %v1387_v57 }
 0x260   : > { %v1398_v59 = vpop.xlane.xlu1 %1397 }
 0x261   : > { %v1399_v60 = vmul.f32 0.00390625, %v1398_v59  ;;  %v1400_v61 = vmul.f32 %v1388_v58, %v1388_v58  ;;  %v1403_v1 = vsub.f32 %v1309_v37, %v1388_v58  ;;  %v1404_v2 = vsub.f32 %v1311_v40, %v1388_v58 }
 0x262   : > { %v1405_v5 = vsub.f32 %v1350_v33, %v1388_v58 }
 0x263   : > { %v1401_v62 = vsub.f32 %v1399_v60, %v1400_v61 }
 0x265   : > { %v1402_v63 = vmax.f32 %v1401_v62, 0.0 }
 0x267   : > { %v1406_v0 = vadd.f32 1e-05, %v1402_v63 }
 0x269   : > { %1742 = vrsqrt.f32 %v1406_v0 }
 0x273   : > { %v1743_v7 = vpop.eup %1742 }
 0x274   : > { %v1408_v8 = vmul.f32 %v1743_v7, %v1403_v1  ;;  %v1409_v9 = vmul.f32 %v1743_v7, %v1404_v2  ;;  %v1410_v10 = vmul.f32 %v1743_v7, %v1405_v5 }
 0x276   : > { %vm1411_vm13 = vcmp.ge.f32.partialorder %v1408_v8, 0.0  ;;  %vm1412_vm14 = vcmp.ge.f32.partialorder %v1409_v9, 0.0  ;;  %vm1413_vm15 = vcmp.ge.f32.partialorder %v1410_v10, 0.0  ;;  %v1414_v11 = vmul.f32 0.2, %v1408_v8 }
 0x277   : > { %v1415_v12 = vmul.f32 0.2, %v1409_v9  ;;  %v1416_v13 = vmul.f32 0.2, %v1410_v10 }
 0x278   : > { %v1417_v14 = vsel %vm1411_vm13, %v1408_v8, %v1414_v11 }
 0x279   : > { %v1418_v16 = vsel %vm1412_vm14, %v1409_v9, %v1415_v12  ;;  %v1419_v17 = vsel %vm1413_vm15, %v1410_v10, %v1416_v13 }
 0x27a   : > { %v1422_v18 = vcombine.low %v1417_v14, %v1418_v16  ;;  %1425 = vst.msk [vmem:[%s206_s28 + $0x8] sm:$0xf] %vm1383_vm12, %v1419_v17 }
 0x27c   : > { %1424 = vst [vmem:[%s206_s28] sm:$0xff] %v1422_v18 }
 0x27d PF: > { %s13_s14 = sadd.s32 1, %s1766_s14   ;;  %s1995_s12 = smov %s1762_s13 }
 0x27e   : > { %p10_p5 = scmp.ge.s32.totalorder %s13_s14, 4   ;;  %s1996_s13 = smov %s1998_s15 }
 0x280   :  { %12 = sbr.rel (!%p10_p5) target bundleno = 2 (0x2), region = 73 }

// kernel: unet_dc_cascade.16
= control target key start
LH: loop header
LB: loop body
LE: loop exit
PB: predicated region body
PF: predicated region fallthrough
CT: control target
= control target key end

     0   :  { %s1076_s12 = smov 0   ;;  %s1078_s13 = smov 0   ;;  %s1191_s0 = inlined_call_operand.vmem [shape: bf16[2,4,102], index: 0, kind: input, shape index: {}]   ;;  %s1192_s1 = inlined_call_operand.vmem [shape: bf16[9,8,4], index: 1, kind: input, shape index: {}]   ;;  %s1193_s2 = inlined_call_operand.vmem [shape: f32[1,80], index: 2, kind: input, shape index: {}]   ;;  %s1194_s3 = inlined_call_operand.vmem [shape: f32[2,8,80], index: 3, kind: output, shape index: {}]  }
   0x1   :  { %s1080_s14 = smov 0  }
   0x2 LB: > { %s25_s15 = sadd.s32 1, %s1039_s13  ;;  %p853_p0 = scmp.ge.s32.totalorder %s1043_s14, 1  ;;  %s1043_s14 = sphi %s1080_s14, %s13_s14   ;;  %s1039_s13 = sphi %s1078_s13, %s1196_s13   ;;  %s1035_s12 = sphi %s1076_s12, %s1195_s12  }
   0x3   : > { %p27_p1 = scmp.ge.s32.totalorder %s25_s15, 2  ;;  %p159_p2 = scmp.lt.s32.totalorder %s1043_s14, 3 }
   0x5   : > { %s1198_s15 = smov (%p27_p1, %s25_s15), 0  ;;  %p160_p3 = pnand %p853_p0, %p159_p2 }
   0x6   : > { %p188_p4 = scmp.lt.s32.totalorder (!%p160_p3), %s1035_s12, 1  ;;  %v212_v0 = vlaneseq (!%p160_p3)  ;;  %v1045_v1 = vmov (!%p160_p3), 1983009808   ;;  %v1046_v3 = vmov (!%p160_p3), 0.0   ;;  %vm1047_vm0 = vmmov (!%p160_p3), 0   ;;  %s1048_s20 = smov (!%p160_p3), 117  }
   0x7   : > { %163 = sbr.rel (%p160_p3) target bundleno = 571 (0x23b), region = 32  ;;  %v210_v2 = vunpack.c.l.s4 (!%p160_p3), %v1045_v1  ;;  %925 = vmatprep.subr.bf16.mxu0 (!%p160_p3), %v1046_v3  ;;  %901 = vmatprep.subr.bf16.mxu1 (!%p160_p3), %v1046_v3  ;;  %s1049_s21 = smov (!%p160_p3), 116   ;;  %vm222_vm1 = vcmask (!%p160_p3), 1041408   ;;  %vm218_vm2 = vcmask (!%p160_p3), 31744   ;;  %v865_v13 = vld [vmem:[%s1192_s1 + $0x10] sm:$0xf] (!%p160_p3) }
   0x8   : > { %v213_v4 = vshrl.u32 (!%p160_p3), %v212_v0, 7  ;;  %927 = vmatprep.mubr.msk.bf16.mxu0 (!%p160_p3), %vm1047_vm0, %v1046_v3  ;;  %903 = vmatprep.mubr.msk.bf16.mxu1 (!%p160_p3), %vm1047_vm0, %v1046_v3  ;;  %s1050_s22 = smov (!%p160_p3), 127   ;;  %s1051_s23 = smov (!%p160_p3), 108   ;;  %v856_v17 = vld [vmem:[%s1192_s1 + $0x4] sm:$0xf] (!%p160_p3)  ;;  %vm740_vm3 = vcmask (!%p160_p3), 654336  }
   0x9   : > { %v211_v5 = vunpack.c.0.s8 (!%p160_p3), %v210_v2  ;;  %s1052_s24 = smov (!%p160_p3), 107   ;;  %s1053_s25 = smov (!%p160_p3), 126   ;;  %v868_v20 = vld [vmem:[%s1192_s1 + $0x14] sm:$0xf] (!%p160_p3)  ;;  %v205_v23 = vld [vmem:[%s1192_s1] sm:$0xf] (!%p160_p3) }
   0xa   : > { %s1054_s26 = smov (!%p160_p3), 106   ;;  %s1055_s27 = smov (!%p160_p3), 118   ;;  %v871_v26 = vld [vmem:[%s1192_s1 + $0x18] sm:$0xf] (!%p160_p3)  ;;  %v859_v29 = vld [vmem:[%s1192_s1 + $0x8] sm:$0xf] (!%p160_p3) }
   0xb   : > { %v214_v6 = vsub.s32 (!%p160_p3), %v211_v5, %v213_v4  ;;  %v874_v32 = vld [vmem:[%s1192_s1 + $0x1c] sm:$0xf] (!%p160_p3)  ;;  %v862_v34 = vld [vmem:[%s1192_s1 + $0xc] sm:$0xf] (!%p160_p3)  ;;  %v877_v35 = vld [vmem:[%s1192_s1 + $0x20] sm:$0xf] (!%p160_p3) }
   0xc   : > { %v880_v41 = vld [vmem:[%s1193_s2] ss:$0 sm:$0xff] (!%p160_p3) }
   0xe   : > { %s1200_s12 = smov (!%p188_p4, %s1035_s12), 1 }
   0xf   : > { %s854_s16 = sshll.u32 %s1200_s12, 1 }
  0x10   : > { %s191_s19 = scalar_lea.vmem %s1191_s0, %s854_s16 }
  0x11   : > { %v866_v7 = vld.sshfl [vmem:[%s191_s19] sm:$0x3 pattern:$0x76325410] }
  0x12   : > { %v204_v8 = vld [vmem:[%s191_s19] sm:$0x3]  ;;  %443 = vrot.lane.b32.xlu0 %v866_v7, %s1048_s20  ;;  %503 = vrot.lane.b32.xlu1 %v866_v7, %s1049_s21 }
  0x13   : > { %v215_v9 = vrot.slane %v204_v8, %v214_v6  ;;  %v270_v18 = vsel %vm222_vm1, %v204_v8, 0 }
  0x16   : > { %216 = vrot.lane.b32.xlu0 %v215_v9, %s1050_s22  ;;  %563 = vrot.lane.b32.xlu1 %v866_v7, %s1051_s23 }
  0x1a   : > { %623 = vrot.lane.b32.xlu1 %v866_v7, %s1052_s24  ;;  %323 = vrot.lane.b32.xlu0 %v866_v7, %s1053_s25  ;;  %s855_s25 = sshll.u32 %s1200_s12, 3 }
  0x1b   : > { %s202_s28 = scalar_lea.vmem %s1194_s3, %s855_s25 }
  0x1e   : > { %683 = vrot.lane.b32.xlu1 %v866_v7, %s1054_s26  ;;  %383 = vrot.lane.b32.xlu0 %v866_v7, %s1055_s27 }
  0x84   : > { %v444_v10 = vpop.permute.xlu0 %443  ;;  %v504_v11 = vpop.permute.xlu1 %503 }
  0x85   : > { %v449_v12 = vsel %vm222_vm1, %v444_v10, 0  ;;  %v509_v14 = vsel %vm222_vm1, %v504_v11, 0 }
  0x86   : > { %926 = vmatpush3.bf16.msra.mxu0 %v449_v12 }
  0x87   : > { %931 = vmatprep.subr.bf16.mxu0 %v1046_v3 }
  0x88   : > { %v217_v15 = vpop.permute.xlu0 %216  ;;  %v564_v19 = vpop.permute.xlu1 %563 }
  0x89   : > { %928 = vmatmul.mubr.msk.bf16.vlgmr.msra.gmra.mrb[0].mxu0 %vm218_vm2, %v865_v13  ;;  %v224_v16 = vsel %vm222_vm1, %v217_v15, 0  ;;  %v569_v21 = vsel %vm222_vm1, %v564_v19, 0 }
  0x8a   : > { %902 = vmatpush3.bf16.msra.mxu1 %v224_v16  ;;  %932 = vmatpush3.bf16.msra.mxu0 %v509_v14 }
  0x8b   : > { %933 = vmatprep.mubr.msk.bf16.mxu0 %vm1047_vm0, %v1046_v3  ;;  %907 = vmatprep.subr.bf16.mxu1 %v1046_v3 }
  0x8c   : > { %937 = vmatprep.subr.bf16.mxu0 %v1046_v3  ;;  %v324_v22 = vpop.permute.xlu0 %323  ;;  %v624_v25 = vpop.permute.xlu1 %623 }
  0x8d   : > { %904 = vmatmul.mubr.msk.bf16.vlgmr.msra.gmra.mrb[0].mxu1 %vm218_vm2, %v856_v17  ;;  %v329_v24 = vsel %vm222_vm1, %v324_v22, 0  ;;  %v629_v27 = vsel %vm222_vm1, %v624_v25, 0 }
  0x8e   : > { %908 = vmatpush3.bf16.msra.mxu1 %v270_v18  ;;  %909 = vmatprep.mubr.msk.bf16.mxu1 %vm1047_vm0, %v1046_v3 }
  0x8f   : > { %913 = vmatprep.subr.bf16.mxu1 %v1046_v3 }
  0x90   : > { %v384_v28 = vpop.permute.xlu0 %383  ;;  %v684_v31 = vpop.permute.xlu1 %683 }
  0x91   : > { %v389_v30 = vsel %vm222_vm1, %v384_v28, 0  ;;  %v689_v33 = vsel %vm222_vm1, %v684_v31, 0 }
  0x95   : > { %934 = vmatmul.mubr.msk.bf16.vlgmr.msra.gmra.mrb[0].mxu0 %vm218_vm2, %v868_v20 }
  0x96   : > { %938 = vmatpush3.bf16.msra.mxu0 %v569_v21  ;;  %939 = vmatprep.mubr.msk.bf16.mxu0 %vm1047_vm0, %v1046_v3 }
  0x97   : > { %943 = vmatprep.subr.bf16.mxu0 %v1046_v3 }
  0x99   : > { %910 = vmatmul.mubr.msk.bf16.vlgmr.msra.gmra.mrb[0].mxu1 %vm218_vm2, %v205_v23 }
  0x9a   : > { %914 = vmatpush3.bf16.msra.mxu1 %v329_v24  ;;  %915 = vmatprep.mubr.msk.bf16.mxu1 %vm1047_vm0, %v1046_v3 }
  0x9b   : > { %919 = vmatprep.subr.bf16.mxu1 %v1046_v3 }
  0xa1   : > { %940 = vmatmul.mubr.msk.bf16.vlgmr.msra.gmra.mrb[0].mxu0 %vm218_vm2, %v871_v26 }
  0xa2   : > { %944 = vmatpush3.bf16.msra.mxu0 %v629_v27  ;;  %945 = vmatprep.mubr.msk.bf16.mxu0 %vm1047_vm0, %v1046_v3 }
  0xa3   : > { %949 = vmatprep.subr.bf16.mxu0 %v1046_v3 }
  0xa5   : > { %916 = vmatmul.mubr.msk.bf16.vlgmr.msra.gmra.mrb[0].mxu1 %vm218_vm2, %v859_v29 }
  0xa6   : > { %920 = vmatpush3.bf16.msra.mxu1 %v389_v30  ;;  %921 = vmatprep.mubr.msk.bf16.mxu1 %vm1047_vm0, %v1046_v3 }
  0xad   : > { %946 = vmatmul.mubr.msk.bf16.vlgmr.msra.gmra.mrb[0].mxu0 %vm218_vm2, %v874_v32 }
  0xae   : > { %950 = vmatpush3.bf16.msra.mxu0 %v689_v33  ;;  %951 = vmatprep.mubr.msk.bf16.mxu0 %vm1047_vm0, %v1046_v3 }
  0xb1   : > { %922 = vmatmul.mubr.msk.bf16.vlgmr.msra.gmra.mrb[0].mxu1 %vm218_vm2, %v862_v34 }
  0xb9   : > { %952 = vmatmul.mubr.msk.bf16.vlgmr.msra.gmra.mrb[0].mxu0 %vm218_vm2, %v877_v35 }
 0x184   : > { %v425_v36 = vpop.f32.mrb[0].mxu1 }
 0x185   : > { %v923_v37 = vpop.f32.mrb[1].mxu1 }
 0x186   : > { %v428_v38 = vpop.f32.mrb[2].mxu1 }
 0x187   : > { %v924_v39 = vpop.f32.mrb[3].mxu1 }
 0x18c   : > { %v725_v40 = vpop.f32.mrb[0].mxu0 }
 0x18d   : > { %v955_v42 = vadd.f32 %v725_v40, %v425_v36  ;;  %v953_v43 = vpop.f32.mrb[1].mxu0 }
 0x18e   : > { %v728_v44 = vpop.f32.mrb[2].mxu0 }
 0x18f   : > { %v954_v45 = vpop.f32.mrb[3].mxu0  ;;  %v739_v46 = vmul.f32 %v955_v42, %v880_v41 }
 0x191   : > { %v741_v47 = vsel %vm740_vm3, %v739_v46, 0.0  ;;  %v745_v48 = vmul.f32 %v739_v46, %v739_v46 }
 0x192   : > { %742 = vadd.xlane.f32.xlu0 %v741_v47 }
 0x193   : > { %v746_v49 = vsel %vm740_vm3, %v745_v48, 0.0 }
 0x194   : > { %747 = vadd.xlane.f32.xlu1 %v746_v49 }
 0x21f   : > { %v743_v50 = vpop.xlane.xlu0 %742 }
 0x220   : > { %v744_v51 = vmul.f32 0.015625, %v743_v50 }
 0x221   : > { %v748_v52 = vpop.xlane.xlu1 %747 }
 0x222   : > { %v750_v53 = vmul.f32 %v744_v51, %v744_v51  ;;  %v749_v54 = vmul.f32 0.015625, %v748_v52  ;;  %v753_v58 = vsub.f32 %v955_v42, %v744_v51 }
 0x224   : > { %v751_v55 = vsub.f32 %v749_v54, %v750_v53 }
 0x226   : > { %v752_v56 = vmax.f32 %v751_v55, 0.0 }
 0x228   : > { %v754_v57 = vadd.f32 1e-05, %v752_v56 }
 0x22a   : > { %1019 = vrsqrt.f32 %v754_v57 }
 0x234   : > { %v1020_v59 = vpop.eup %1019 }
 0x235   : > { %v756_v60 = vmul.f32 %v1020_v59, %v753_v58 }
 0x237   : > { %vm757_vm4 = vcmp.ge.f32.partialorder %v756_v60, 0.0  ;;  %v758_v61 = vmul.f32 0.2, %v756_v60 }
 0x239   : > { %v759_v62 = vsel %vm757_vm4, %v756_v60, %v758_v61 }
 0x23a   : > { %760 = vst.msk [vmem:[%s202_s28] sm:$0xff] %vm740_vm3, %v759_v62 }
 0x23b PF: > { %s13_s14 = sadd.s32 1, %s1043_s14   ;;  %s1195_s12 = smov %s1039_s13 }
 0x23c   : > { %p10_p5 = scmp.ge.s32.totalorder %s13_s14, 4   ;;  %s1196_s13 = smov %s1198_s15 }
 0x23e   :  { %12 = sbr.rel (!%p10_p5) target bundleno = 2 (0x2), region = 73 }

// kernel: unet_dc_cascade.17
= control target key start
LH: loop header
LB: loop body
LE: loop exit
PB: predicated region body
PF: predicated region fallthrough
CT: control target
= control target key end

     0   :  { %s1001_s12 = smov 0   ;;  %s1003_s13 = smov 0   ;;  %s1116_s0 = inlined_call_operand.vmem [shape: bf16[2,8,102], index: 0, kind: input, shape index: {}]   ;;  %s1117_s1 = inlined_call_operand.vmem [shape: bf16[9,8,8], index: 1, kind: input, shape index: {}]   ;;  %s1118_s2 = inlined_call_operand.vmem [shape: f32[1,80], index: 2, kind: input, shape index: {}]   ;;  %s1119_s3 = inlined_call_operand.vmem [shape: f32[2,8,80], index: 3, kind: output, shape index: {}]  }
   0x1   :  { %s1005_s14 = smov 0  }
   0x2 LB: > { %s25_s15 = sadd.s32 1, %s965_s13  ;;  %p785_p0 = scmp.ge.s32.totalorder %s969_s14, 1  ;;  %s969_s14 = sphi %s1005_s14, %s13_s14   ;;  %s965_s13 = sphi %s1003_s13, %s1121_s13   ;;  %s961_s12 = sphi %s1001_s12, %s1120_s12  }
   0x3   : > { %p27_p1 = scmp.ge.s32.totalorder %s25_s15, 2  ;;  %p159_p2 = scmp.lt.s32.totalorder %s969_s14, 3 }
   0x5   : > { %s1123_s15 = smov (%p27_p1, %s25_s15), 0  ;;  %p160_p3 = pnand %p785_p0, %p159_p2 }
   0x6   : > { %p188_p4 = scmp.lt.s32.totalorder (!%p160_p3), %s961_s12, 1  ;;  %v971_v0 = vmov (!%p160_p3), 0.0   ;;  %vm972_vm0 = vmmov (!%p160_p3), 0   ;;  %s973_s20 = smov (!%p160_p3), 117   ;;  %vm217_vm1 = vcmask (!%p160_p3), 1043456   ;;  %vm213_vm2 = vcmask (!%p160_p3), 64512  }
   0x7   : > { %163 = sbr.rel (%p160_p3) target bundleno = 573 (0x23d), region = 32  ;;  %851 = vmatprep.subr.bf16.mxu0 (!%p160_p3), %v971_v0  ;;  %853 = vmatprep.mubr.msk.bf16.mxu0 (!%p160_p3), %vm972_vm0, %v971_v0  ;;  %s974_s21 = smov (!%p160_p3), 116   ;;  %v796_v6 = vld [vmem:[%s1117_s1 + $0x10] sm:$0xf] (!%p160_p3)  ;;  %v788_v10 = vld [vmem:[%s1117_s1 + $0x4] sm:$0xf] (!%p160_p3) }
   0x8   : > { %827 = vmatprep.subr.bf16.mxu1 (!%p160_p3), %v971_v0  ;;  %829 = vmatprep.mubr.msk.bf16.mxu1 (!%p160_p3), %vm972_vm0, %v971_v0  ;;  %s975_s22 = smov (!%p160_p3), 127   ;;  %s976_s23 = smov (!%p160_p3), 108   ;;  %v798_v13 = vld [vmem:[%s1117_s1 + $0x14] sm:$0xf] (!%p160_p3)  ;;  %v205_v16 = vld [vmem:[%s1117_s1] sm:$0xf] (!%p160_p3) }
   0x9   : > { %s977_s24 = smov (!%p160_p3), 107   ;;  %s978_s25 = smov (!%p160_p3), 126   ;;  %v800_v19 = vld [vmem:[%s1117_s1 + $0x18] sm:$0xf] (!%p160_p3)  ;;  %v792_v22 = vld [vmem:[%s1117_s1 + $0x8] sm:$0xf] (!%p160_p3) }
   0xa   : > { %s979_s26 = smov (!%p160_p3), 106   ;;  %s980_s27 = smov (!%p160_p3), 118   ;;  %v802_v25 = vld [vmem:[%s1117_s1 + $0x1c] sm:$0xf] (!%p160_p3)  ;;  %v794_v27 = vld [vmem:[%s1117_s1 + $0xc] sm:$0xf] (!%p160_p3) }
   0xb   : > { %v804_v28 = vld [vmem:[%s1117_s1 + $0x20] sm:$0xf] (!%p160_p3)  ;;  %vm672_vm3 = vcmask (!%p160_p3), 654336  }
   0xc   : > { %v806_v34 = vld [vmem:[%s1118_s2] ss:$0 sm:$0xff] (!%p160_p3) }
   0xe   : > { %s1125_s12 = smov (!%p188_p4, %s961_s12), 1 }
   0xf   : > { %s786_s16 = sshll.u32 %s1125_s12, 2 }
  0x10   : > { %s191_s19 = scalar_lea.vmem %s1116_s0, %s786_s16 }
  0x11   : > { %v204_v1 = vld [vmem:[%s191_s19] sm:$0xf] }
  0x12   : > { %v789_v2 = vcombine.low %v204_v1, %v204_v1  ;;  %v265_v11 = vsel %vm217_vm1, %v204_v1, 0 }
  0x14   : > { %411 = vrot.lane.b32.xlu0 %v789_v2, %s973_s20  ;;  %462 = vrot.lane.b32.xlu1 %v789_v2, %s974_s21 }
  0x18   : > { %211 = vrot.lane.b32.xlu0 %v789_v2, %s975_s22  ;;  %513 = vrot.lane.b32.xlu1 %v789_v2, %s976_s23 }
  0x1c   : > { %564 = vrot.lane.b32.xlu1 %v789_v2, %s977_s24  ;;  %309 = vrot.lane.b32.xlu0 %v789_v2, %s978_s25  ;;  %s787_s25 = sshll.u32 %s1125_s12, 3 }
  0x1d   : > { %s202_s28 = scalar_lea.vmem %s1119_s3, %s787_s25 }
  0x20   : > { %615 = vrot.lane.b32.xlu1 %v789_v2, %s979_s26  ;;  %360 = vrot.lane.b32.xlu0 %v789_v2, %s980_s27 }
  0x86   : > { %v412_v3 = vpop.permute.xlu0 %411  ;;  %v463_v4 = vpop.permute.xlu1 %462 }
  0x87   : > { %v417_v5 = vsel %vm217_vm1, %v412_v3, 0  ;;  %v468_v7 = vsel %vm217_vm1, %v463_v4, 0 }
  0x88   : > { %852 = vmatpush3.bf16.msra.mxu0 %v417_v5 }
  0x89   : > { %857 = vmatprep.subr.bf16.mxu0 %v971_v0 }
  0x8a   : > { %v212_v8 = vpop.permute.xlu0 %211  ;;  %v514_v12 = vpop.permute.xlu1 %513 }
  0x8b   : > { %854 = vmatmul.mubr.msk.bf16.vlgmr.msra.gmra.mrb[0].mxu0 %vm213_vm2, %v796_v6  ;;  %v219_v9 = vsel %vm217_vm1, %v212_v8, 0  ;;  %v519_v14 = vsel %vm217_vm1, %v514_v12, 0 }
  0x8c   : > { %828 = vmatpush3.bf16.msra.mxu1 %v219_v9  ;;  %858 = vmatpush3.bf16.msra.mxu0 %v468_v7 }
  0x8d   : > { %859 = vmatprep.mubr.msk.bf16.mxu0 %vm972_vm0, %v971_v0  ;;  %833 = vmatprep.subr.bf16.mxu1 %v971_v0 }
  0x8e   : > { %863 = vmatprep.subr.bf16.mxu0 %v971_v0  ;;  %v310_v15 = vpop.permute.xlu0 %309  ;;  %v565_v18 = vpop.permute.xlu1 %564 }
  0x8f   : > { %830 = vmatmul.mubr.msk.bf16.vlgmr.msra.gmra.mrb[0].mxu1 %vm213_vm2, %v788_v10  ;;  %v315_v17 = vsel %vm217_vm1, %v310_v15, 0  ;;  %v570_v20 = vsel %vm217_vm1, %v565_v18, 0 }
  0x90   : > { %834 = vmatpush3.bf16.msra.mxu1 %v265_v11  ;;  %835 = vmatprep.mubr.msk.bf16.mxu1 %vm972_vm0, %v971_v0 }
  0x91   : > { %839 = vmatprep.subr.bf16.mxu1 %v971_v0 }
  0x92   : > { %v361_v21 = vpop.permute.xlu0 %360  ;;  %v616_v24 = vpop.permute.xlu1 %615 }
  0x93   : > { %v366_v23 = vsel %vm217_vm1, %v361_v21, 0  ;;  %v621_v26 = vsel %vm217_vm1, %v616_v24, 0 }
  0x97   : > { %860 = vmatmul.mubr.msk.bf16.vlgmr.msra.gmra.mrb[0].mxu0 %vm213_vm2, %v798_v13 }
  0x98   : > { %864 = vmatpush3.bf16.msra.mxu0 %v519_v14  ;;  %865 = vmatprep.mubr.msk.bf16.mxu0 %vm972_vm0, %v971_v0 }
  0x99   : > { %869 = vmatprep.subr.bf16.mxu0 %v971_v0 }
  0x9b   : > { %836 = vmatmul.mubr.msk.bf16.vlgmr.msra.gmra.mrb[0].mxu1 %vm213_vm2, %v205_v16 }
  0x9c   : > { %840 = vmatpush3.bf16.msra.mxu1 %v315_v17  ;;  %841 = vmatprep.mubr.msk.bf16.mxu1 %vm972_vm0, %v971_v0 }
  0x9d   : > { %845 = vmatprep.subr.bf16.mxu1 %v971_v0 }
  0xa3   : > { %866 = vmatmul.mubr.msk.bf16.vlgmr.msra.gmra.mrb[0].mxu0 %vm213_vm2, %v800_v19 }
  0xa4   : > { %870 = vmatpush3.bf16.msra.mxu0 %v570_v20  ;;  %871 = vmatprep.mubr.msk.bf16.mxu0 %vm972_vm0, %v971_v0 }
  0xa5   : > { %875 = vmatprep.subr.bf16.mxu0 %v971_v0 }
  0xa7   : > { %842 = vmatmul.mubr.msk.bf16.vlgmr.msra.gmra.mrb[0].mxu1 %vm213_vm2, %v792_v22 }
  0xa8   : > { %846 = vmatpush3.bf16.msra.mxu1 %v366_v23  ;;  %847 = vmatprep.mubr.msk.bf16.mxu1 %vm972_vm0, %v971_v0 }
  0xaf   : > { %872 = vmatmul.mubr.msk.bf16.vlgmr.msra.gmra.mrb[0].mxu0 %vm213_vm2, %v802_v25 }
  0xb0   : > { %876 = vmatpush3.bf16.msra.mxu0 %v621_v26  ;;  %877 = vmatprep.mubr.msk.bf16.mxu0 %vm972_vm0, %v971_v0 }
  0xb3   : > { %848 = vmatmul.mubr.msk.bf16.vlgmr.msra.gmra.mrb[0].mxu1 %vm213_vm2, %v794_v27 }
  0xbb   : > { %878 = vmatmul.mubr.msk.bf16.vlgmr.msra.gmra.mrb[0].mxu0 %vm213_vm2, %v804_v28 }
 0x186   : > { %v402_v29 = vpop.f32.mrb[0].mxu1 }
 0x187   : > { %v849_v30 = vpop.f32.mrb[1].mxu1 }
 0x188   : > { %v405_v31 = vpop.f32.mrb[2].mxu1 }
 0x189   : > { %v850_v32 = vpop.f32.mrb[3].mxu1 }
 0x18e   : > { %v657_v33 = vpop.f32.mrb[0].mxu0 }
 0x18f   : > { %v881_v35 = vadd.f32 %v657_v33, %v402_v29  ;;  %v879_v36 = vpop.f32.mrb[1].mxu0 }
 0x190   : > { %v660_v37 = vpop.f32.mrb[2].mxu0 }
 0x191   : > { %v880_v38 = vpop.f32.mrb[3].mxu0  ;;  %v671_v39 = vmul.f32 %v881_v35, %v806_v34 }
 0x193   : > { %v673_v40 = vsel %vm672_vm3, %v671_v39, 0.0  ;;  %v677_v41 = vmul.f32 %v671_v39, %v671_v39 }
 0x194   : > { %674 = vadd.xlane.f32.xlu0 %v673_v40 }
 0x195   : > { %v678_v42 = vsel %vm672_vm3, %v677_v41, 0.0 }
 0x196   : > { %679 = vadd.xlane.f32.xlu1 %v678_v42 }
 0x221   : > { %v675_v43 = vpop.xlane.xlu0 %674 }
 0x222   : > { %v676_v44 = vmul.f32 0.015625, %v675_v43 }
 0x223   : > { %v680_v45 = vpop.xlane.xlu1 %679 }
 0x224   : > { %v682_v46 = vmul.f32 %v676_v44, %v676_v44  ;;  %v681_v47 = vmul.f32 0.015625, %v680_v45  ;;  %v685_v51 = vsub.f32 %v881_v35, %v676_v44 }
 0x226   : > { %v683_v48 = vsub.f32 %v681_v47, %v682_v46 }
 0x228   : > { %v684_v49 = vmax.f32 %v683_v48, 0.0 }
 0x22a   : > { %v686_v50 = vadd.f32 1e-05, %v684_v49 }
 0x22c   : > { %945 = vrsqrt.f32 %v686_v50 }
 0x236   : > { %v946_v52 = vpop.eup %945 }
 0x237   : > { %v688_v53 = vmul.f32 %v946_v52, %v685_v51 }
 0x239   : > { %vm689_vm4 = vcmp.ge.f32.partialorder %v688_v53, 0.0  ;;  %v690_v54 = vmul.f32 0.2, %v688_v53 }
 0x23b   : > { %v691_v55 = vsel %vm689_vm4, %v688_v53, %v690_v54 }
 0x23c   : > { %692 = vst.msk [vmem:[%s202_s28] sm:$0xff] %vm672_vm3, %v691_v55 }
 0x23d PF: > { %s13_s14 = sadd.s32 1, %s969_s14   ;;  %s1120_s12 = smov %s965_s13 }
 0x23e   : > { %p10_p5 = scmp.ge.s32.totalorder %s13_s14, 4   ;;  %s1121_s13 = smov %s1123_s15 }
 0x240   :  { %12 = sbr.rel (!%p10_p5) target bundleno = 2 (0x2), region = 73 }

// kernel: unet_dc_cascade.18
= control target key start
LH: loop header
LB: loop body
LE: loop exit
PB: predicated region body
PF: predicated region fallthrough
CT: control target
= control target key end

     0   :  { %s1142_s12 = smov 0   ;;  %s1144_s13 = smov 0   ;;  %s1260_s0 = inlined_call_operand.vmem [shape: bf16[2,8,38], index: 0, kind: input, shape index: {}]   ;;  %s1261_s1 = inlined_call_operand.vmem [shape: bf16[9,16,8], index: 1, kind: input, shape index: {}]   ;;  %s1262_s2 = inlined_call_operand.vmem [shape: f32[1,24], index: 2, kind: input, shape index: {}]   ;;  %s1263_s3 = inlined_call_operand.vmem [shape: f32[2,16,24], index: 3, kind: output, shape index: {}]  }
   0x1   :  { %s1146_s14 = smov 0  }
   0x2 LB: > { %s25_s15 = sadd.s32 1, %s1106_s13  ;;  %p895_p0 = scmp.ge.s32.totalorder %s1110_s14, 1  ;;  %s1110_s14 = sphi %s1146_s14, %s13_s14   ;;  %s1106_s13 = sphi %s1144_s13, %s1265_s13   ;;  %s1102_s12 = sphi %s1142_s12, %s1264_s12  }
   0x3   : > { %p27_p1 = scmp.ge.s32.totalorder %s25_s15, 2  ;;  %p161_p2 = scmp.lt.s32.totalorder %s1110_s14, 3 }
   0x5   : > { %s1267_s15 = smov (%p27_p1, %s25_s15), 0  ;;  %p162_p3 = pnand %p895_p0, %p161_p2 }
   0x6   : > { %p193_p4 = scmp.lt.s32.totalorder (!%p162_p3), %s1102_s12, 1  ;;  %v1112_v0 = vmov (!%p162_p3), 0.0   ;;  %vm1113_vm0 = vmmov (!%p162_p3), 0   ;;  %s1114_s20 = smov (!%p162_p3), 121   ;;  %vm234_vm1 = vcmask (!%p162_p3), 1043456   ;;  %v1075_v6 = vld [vmem:[%s1261_s1 + $0x20] sm:$0xff] (!%p162_p3)  }
   0x7   : > { %165 = sbr.rel (%p162_p3) target bundleno = 579 (0x243), region = 32  ;;  %980 = vmatprep.subr.bf16.mxu0 (!%p162_p3), %v1112_v0  ;;  %982 = vmatprep.mubr.msk.bf16.mxu0 (!%p162_p3), %vm1113_vm0, %v1112_v0  ;;  %s1115_s21 = smov (!%p162_p3), 120   ;;  %vm230_vm2 = vcmask (!%p162_p3), 64512   ;;  %v1076_v10 = vld [vmem:[%s1261_s1 + $0x8] sm:$0xff] (!%p162_p3)   ;;  %v1078_v16 = vld [vmem:[%s1261_s1] sm:$0xff] (!%p162_p3)   ;;  %v1079_v19 = vld [vmem:[%s1261_s1 + $0x30] sm:$0xff] (!%p162_p3)  }
   0x8   : > { %956 = vmatprep.subr.bf16.mxu1 (!%p162_p3), %v1112_v0  ;;  %958 = vmatprep.mubr.msk.bf16.mxu1 (!%p162_p3), %vm1113_vm0, %v1112_v0  ;;  %s1116_s22 = smov (!%p162_p3), 127   ;;  %s1117_s23 = smov (!%p162_p3), 116   ;;  %v1077_v13 = vld [vmem:[%s1261_s1 + $0x28] sm:$0xff] (!%p162_p3)   ;;  %v1080_v22 = vld [vmem:[%s1261_s1 + $0x10] sm:$0xff] (!%p162_p3)   ;;  %v1081_v25 = vld [vmem:[%s1261_s1 + $0x38] sm:$0xff] (!%p162_p3)   ;;  %vm753_vm3 = vcmask (!%p162_p3), 195584  }
   0x9   : > { %s1118_s24 = smov (!%p162_p3), 115   ;;  %s1119_s25 = smov (!%p162_p3), 126   ;;  %v1082_v27 = vld [vmem:[%s1261_s1 + $0x18] sm:$0xff] (!%p162_p3)   ;;  %v1083_v28 = vld [vmem:[%s1261_s1 + $0x40] sm:$0xff] (!%p162_p3)  }
   0xa   : > { %s1120_s26 = smov (!%p162_p3), 114   ;;  %s1121_s27 = smov (!%p162_p3), 122   ;;  %v934_v34 = vld [vmem:[%s1262_s2] ss:$0 sm:$0xff] (!%p162_p3) }
   0xe   : > { %s1269_s12 = smov (!%p193_p4, %s1102_s12), 1 }
   0xf   : > { %s896_s16 = sshll.u32 %s1269_s12, 2 }
  0x10   : > { %s196_s19 = scalar_lea.vmem %s1260_s0, %s896_s16 }
  0x11   : > { %v214_v1 = vld [vmem:[%s196_s19] sm:$0xf] }
  0x12   : > { %v902_v2 = vcombine.low %v214_v1, %v214_v1  ;;  %v288_v11 = vsel %vm234_vm1, %v214_v1, 0 }
  0x14   : > { %457 = vrot.lane.b32.xlu0 %v902_v2, %s1114_s20  ;;  %516 = vrot.lane.b32.xlu1 %v902_v2, %s1115_s21 }
  0x18   : > { %228 = vrot.lane.b32.xlu0 %v902_v2, %s1116_s22  ;;  %575 = vrot.lane.b32.xlu1 %v902_v2, %s1117_s23 }
  0x1c   : > { %634 = vrot.lane.b32.xlu1 %v902_v2, %s1118_s24  ;;  %339 = vrot.lane.b32.xlu0 %v902_v2, %s1119_s25  ;;  %s937_s25 = sshll.u32 %s1269_s12, 4 }
  0x1d   : > { %s211_s28 = scalar_lea.vmem %s1263_s3, %s937_s25 }
  0x20   : > { %693 = vrot.lane.b32.xlu1 %v902_v2, %s1120_s26  ;;  %398 = vrot.lane.b32.xlu0 %v902_v2, %s1121_s27 }
  0x86   : > { %v458_v3 = vpop.permute.xlu0 %457  ;;  %v517_v4 = vpop.permute.xlu1 %516 }
  0x87   : > { %v463_v5 = vsel %vm234_vm1, %v458_v3, 0  ;;  %v522_v7 = vsel %vm234_vm1, %v517_v4, 0 }
  0x88   : > { %981 = vmatpush3.bf16.msra.mxu0 %v463_v5 }
  0x89   : > { %986 = vmatprep.subr.bf16.mxu0 %v1112_v0 }
  0x8a   : > { %v229_v8 = vpop.permute.xlu0 %228  ;;  %v576_v12 = vpop.permute.xlu1 %575 }
  0x8b   : > { %983 = vmatmul.mubr.msk.bf16.vlgmr.msra.gmra.mrb[0].mxu0 %vm230_vm2, %v1075_v6  ;;  %v236_v9 = vsel %vm234_vm1, %v229_v8, 0  ;;  %v581_v14 = vsel %vm234_vm1, %v576_v12, 0 }
  0x8c   : > { %957 = vmatpush3.bf16.msra.mxu1 %v236_v9  ;;  %987 = vmatpush3.bf16.msra.mxu0 %v522_v7 }
  0x8d   : > { %988 = vmatprep.mubr.msk.bf16.mxu0 %vm1113_vm0, %v1112_v0  ;;  %962 = vmatprep.subr.bf16.mxu1 %v1112_v0 }
  0x8e   : > { %992 = vmatprep.subr.bf16.mxu0 %v1112_v0  ;;  %v340_v15 = vpop.permute.xlu0 %339  ;;  %v635_v18 = vpop.permute.xlu1 %634 }
  0x8f   : > { %959 = vmatmul.mubr.msk.bf16.vlgmr.msra.gmra.mrb[0].mxu1 %vm230_vm2, %v1076_v10  ;;  %v345_v17 = vsel %vm234_vm1, %v340_v15, 0  ;;  %v640_v20 = vsel %vm234_vm1, %v635_v18, 0 }
  0x90   : > { %963 = vmatpush3.bf16.msra.mxu1 %v288_v11  ;;  %964 = vmatprep.mubr.msk.bf16.mxu1 %vm1113_vm0, %v1112_v0 }
  0x91   : > { %968 = vmatprep.subr.bf16.mxu1 %v1112_v0 }
  0x92   : > { %v399_v21 = vpop.permute.xlu0 %398  ;;  %v694_v24 = vpop.permute.xlu1 %693 }
  0x93   : > { %v404_v23 = vsel %vm234_vm1, %v399_v21, 0  ;;  %v699_v26 = vsel %vm234_vm1, %v694_v24, 0 }
  0x97   : > { %989 = vmatmul.mubr.msk.bf16.vlgmr.msra.gmra.mrb[0].mxu0 %vm230_vm2, %v1077_v13 }
  0x98   : > { %993 = vmatpush3.bf16.msra.mxu0 %v581_v14  ;;  %994 = vmatprep.mubr.msk.bf16.mxu0 %vm1113_vm0, %v1112_v0 }
  0x99   : > { %998 = vmatprep.subr.bf16.mxu0 %v1112_v0 }
  0x9b   : > { %965 = vmatmul.mubr.msk.bf16.vlgmr.msra.gmra.mrb[0].mxu1 %vm230_vm2, %v1078_v16 }
  0x9c   : > { %969 = vmatpush3.bf16.msra.mxu1 %v345_v17  ;;  %970 = vmatprep.mubr.msk.bf16.mxu1 %vm1113_vm0, %v1112_v0 }
  0x9d   : > { %974 = vmatprep.subr.bf16.mxu1 %v1112_v0 }
  0xa3   : > { %995 = vmatmul.mubr.msk.bf16.vlgmr.msra.gmra.mrb[0].mxu0 %vm230_vm2, %v1079_v19 }
  0xa4   : > { %999 = vmatpush3.bf16.msra.mxu0 %v640_v20  ;;  %1000 = vmatprep.mubr.msk.bf16.mxu0 %vm1113_vm0, %v1112_v0 }
  0xa5   : > { %1004 = vmatprep.subr.bf16.mxu0 %v1112_v0 }
  0xa7   : > { %971 = vmatmul.mubr.msk.bf16.vlgmr.msra.gmra.mrb[0].mxu1 %vm230_vm2, %v1080_v22 }
  0xa8   : > { %975 = vmatpush3.bf16.msra.mxu1 %v404_v23  ;;  %976 = vmatprep.mubr.msk.bf16.mxu1 %vm1113_vm0, %v1112_v0 }
  0xaf   : > { %1001 = vmatmul.mubr.msk.bf16.vlgmr.msra.gmra.mrb[0].mxu0 %vm230_vm2, %v1081_v25 }
  0xb0   : > { %1005 = vmatpush3.bf16.msra.mxu0 %v699_v26  ;;  %1006 = vmatprep.mubr.msk.bf16.mxu0 %vm1113_vm0, %v1112_v0 }
  0xb3   : > { %977 = vmatmul.mubr.msk.bf16.vlgmr.msra.gmra.mrb[0].mxu1 %vm230_vm2, %v1082_v27 }
  0xbb   : > { %1007 = vmatmul.mubr.msk.bf16.vlgmr.msra.gmra.mrb[0].mxu0 %vm230_vm2, %v1083_v28 }
 0x186   : > { %v440_v29 = vpop.f32.mrb[0].mxu1 }
 0x187   : > { %v978_v30 = vpop.f32.mrb[1].mxu1 }
 0x188   : > { %v443_v31 = vpop.f32.mrb[2].mxu1 }
 0x189   : > { %v979_v32 = vpop.f32.mrb[3].mxu1 }
 0x18e   : > { %v735_v33 = vpop.f32.mrb[0].mxu0 }
 0x18f   : > { %v1010_v35 = vadd.f32 %v735_v33, %v440_v29  ;;  %v1008_v36 = vpop.f32.mrb[1].mxu0 }
 0x190   : > { %v738_v37 = vpop.f32.mrb[2].mxu0 }
 0x191   : > { %v1011_v38 = vadd.f32 %v738_v37, %v443_v31  ;;  %v1009_v39 = vpop.f32.mrb[3].mxu0  ;;  %v751_v40 = vmul.f32 %v1010_v35, %v934_v34 }
 0x193   : > { %v754_v41 = vsel %vm753_vm3, %v751_v40, 0.0  ;;  %v752_v42 = vmul.f32 %v1011_v38, %v934_v34  ;;  %v762_v43 = vmul.f32 %v751_v40, %v751_v40 }
 0x194   : > { %755 = vadd.xlane.f32.xlu0 %v754_v41 }
 0x195   : > { %v757_v44 = vsel %vm753_vm3, %v752_v42, 0.0  ;;  %v764_v45 = vsel %vm753_vm3, %v762_v43, 0.0  ;;  %v763_v46 = vmul.f32 %v752_v42, %v752_v42 }
 0x196   : > { %758 = vadd.xlane.f32.xlu1 %v757_v44 }
 0x197   : > { %v767_v47 = vsel %vm753_vm3, %v763_v46, 0.0 }
 0x198   : > { %765 = vadd.xlane.f32.xlu0 %v764_v45 }
 0x19c   : > { %768 = vadd.xlane.f32.xlu0 %v767_v47 }
 0x221   : > { %v756_v48 = vpop.xlane.xlu0 %755 }
 0x222   : > { %v760_v49 = vmul.f32 0.0625, %v756_v48 }
 0x223   : > { %v759_v50 = vpop.xlane.xlu1 %758 }
 0x224   : > { %v772_v52 = vmul.f32 %v760_v49, %v760_v49  ;;  %v761_v53 = vmul.f32 0.0625, %v759_v50  ;;  %v778_v0 = vsub.f32 %v1010_v35, %v760_v49 }
 0x225   : > { %v766_v51 = vpop.xlane.xlu0 %765 }
 0x226   : > { %v770_v54 = vmul.f32 0.0625, %v766_v51  ;;  %v773_v57 = vmul.f32 %v761_v53, %v761_v53  ;;  %v779_v3 = vsub.f32 %v1011_v38, %v761_v53 }
 0x228   : > { %v774_v55 = vsub.f32 %v770_v54, %v772_v52 }
 0x229   : > { %v769_v56 = vpop.xlane.xlu0 %768 }
 0x22a   : > { %v776_v58 = vmax.f32 %v774_v55, 0.0  ;;  %v771_v59 = vmul.f32 0.0625, %v769_v56 }
 0x22c   : > { %v780_v60 = vadd.f32 1e-05, %v776_v58  ;;  %v775_v61 = vsub.f32 %v771_v59, %v773_v57 }
 0x22e   : > { %1084 = vrsqrt.f32 %v780_v60  ;;  %v777_v62 = vmax.f32 %v775_v61, 0.0 }
 0x230   : > { %v781_v63 = vadd.f32 1e-05, %v777_v62 }
 0x232   : > { %1086 = vrsqrt.f32 %v781_v63 }
 0x238   : > { %v1085_v1 = vpop.eup %1084 }
 0x239   : > { %v784_v2 = vmul.f32 %v1085_v1, %v778_v0 }
 0x23b   : > { %vm786_vm4 = vcmp.ge.f32.partialorder %v784_v2, 0.0  ;;  %v788_v4 = vmul.f32 0.2, %v784_v2 }
 0x23c   : > { %v1087_v5 = vpop.eup %1086 }
 0x23d   : > { %v790_v6 = vsel %vm786_vm4, %v784_v2, %v788_v4  ;;  %v785_v7 = vmul.f32 %v1087_v5, %v779_v3 }
 0x23e   : > { %792 = vst.msk [vmem:[%s211_s28] sm:$0xff] %vm753_vm3, %v790_v6 }
 0x23f   : > { %vm787_vm5 = vcmp.ge.f32.partialorder %v785_v7, 0.0  ;;  %v789_v8 = vmul.f32 0.2, %v785_v7 }
 0x241   : > { %v791_v9 = vsel %vm787_vm5, %v785_v7, %v789_v8 }
 0x242   : > { %793 = vst.msk [vmem:[%s211_s28 + $0x8] sm:$0xff] %vm753_vm3, %v791_v9 }
 0x243 PF: > { %s13_s14 = sadd.s32 1, %s1110_s14   ;;  %s1264_s12 = smov %s1106_s13 }
 0x244   : > { %p10_p5 = scmp.ge.s32.totalorder %s13_s14, 4   ;;  %s1265_s13 = smov %s1267_s15 }
 0x246   :  { %12 = sbr.rel (!%p10_p5) target bundleno = 2 (0x2), region = 73 }

// kernel: unet_dc_cascade.19
= control target key start
LH: loop header
LB: loop body
LE: loop exit
PB: predicated region body
PF: predicated region fallthrough
CT: control target
= control target key end

     0   :  { %s1131_s12 = smov 0   ;;  %s1133_s13 = smov 0   ;;  %s1240_s0 = inlined_call_operand.vmem [shape: bf16[2,16,38], index: 0, kind: input, shape index: {}]   ;;  %s1241_s1 = inlined_call_operand.vmem [shape: bf16[9,16,16], index: 1, kind: input, shape index: {}]   ;;  %s1242_s2 = inlined_call_operand.vmem [shape: f32[1,24], index: 2, kind: input, shape index: {}]   ;;  %s1243_s3 = inlined_call_operand.vmem [shape: f32[2,16,24], index: 3, kind: output, shape index: {}]  }
   0x1   :  { %s1135_s14 = smov 0  }
   0x2 LB: > { %s25_s15 = sadd.s32 1, %s1095_s13  ;;  %p882_p0 = scmp.ge.s32.totalorder %s1099_s14, 1  ;;  %s1099_s14 = sphi %s1135_s14, %s13_s14   ;;  %s1095_s13 = sphi %s1133_s13, %s1245_s13   ;;  %s1091_s12 = sphi %s1131_s12, %s1244_s12  }
   0x3   : > { %p27_p1 = scmp.ge.s32.totalorder %s25_s15, 2  ;;  %p162_p2 = scmp.lt.s32.totalorder %s1099_s14, 3 }
   0x5   : > { %s1247_s15 = smov (%p27_p1, %s25_s15), 0  ;;  %p163_p3 = pnand %p882_p0, %p162_p2 }
   0x6   : > { %p195_p4 = scmp.lt.s32.totalorder (!%p163_p3), %s1091_s12, 1  ;;  %v1101_v0 = vmov (!%p163_p3), 0.0   ;;  %vm1102_vm0 = vmmov (!%p163_p3), 0   ;;  %s1103_s20 = smov (!%p163_p3), 121   ;;  %v1064_v3 = vld [vmem:[%s1241_s1 + $0x20] sm:$0xff] (!%p163_p3)   ;;  %vm237_vm1 = vcmask (!%p163_p3), 130048  }
   0x7   : > { %166 = sbr.rel (%p163_p3) target bundleno = 576 (0x240), region = 32  ;;  %969 = vmatprep.subr.bf16.mxu0 (!%p163_p3), %v1101_v0  ;;  %971 = vmatprep.mubr.msk.bf16.mxu0 (!%p163_p3), %vm1102_vm0, %v1101_v0  ;;  %s1104_s21 = smov (!%p163_p3), 120   ;;  %v1065_v6 = vld [vmem:[%s1241_s1 + $0x8] sm:$0xff] (!%p163_p3)   ;;  %v1067_v9 = vld [vmem:[%s1241_s1] sm:$0xff] (!%p163_p3)   ;;  %v1068_v11 = vld [vmem:[%s1241_s1 + $0x30] sm:$0xff] (!%p163_p3)   ;;  %vm740_vm2 = vcmask (!%p163_p3), 195584  }
   0x8   : > { %945 = vmatprep.subr.bf16.mxu1 (!%p163_p3), %v1101_v0  ;;  %947 = vmatprep.mubr.msk.bf16.mxu1 (!%p163_p3), %vm1102_vm0, %v1101_v0  ;;  %s1105_s22 = smov (!%p163_p3), 127   ;;  %s1106_s23 = smov (!%p163_p3), 116   ;;  %v1066_v7 = vld [vmem:[%s1241_s1 + $0x28] sm:$0xff] (!%p163_p3)   ;;  %v1069_v13 = vld [vmem:[%s1241_s1 + $0x10] sm:$0xff] (!%p163_p3)   ;;  %v1070_v15 = vld [vmem:[%s1241_s1 + $0x38] sm:$0xff] (!%p163_p3)  }
   0x9   : > { %s1107_s24 = smov (!%p163_p3), 115   ;;  %s1108_s25 = smov (!%p163_p3), 126   ;;  %v1071_v17 = vld [vmem:[%s1241_s1 + $0x18] sm:$0xff] (!%p163_p3)   ;;  %v1072_v18 = vld [vmem:[%s1241_s1 + $0x40] sm:$0xff] (!%p163_p3)  }
   0xa   : > { %s1109_s26 = smov (!%p163_p3), 114   ;;  %s1110_s27 = smov (!%p163_p3), 122   ;;  %v922_v24 = vld [vmem:[%s1242_s2] ss:$0 sm:$0xff] (!%p163_p3) }
   0xe   : > { %s1249_s12 = smov (!%p195_p4, %s1091_s12), 1 }
   0xf   : > { %s925_s16 = sshll.u32 %s1249_s12, 3 }
  0x10   : > { %s199_s19 = scalar_lea.vmem %s1240_s0, %s925_s16 }
  0x11   : > { %v1063_v1 = vld [vmem:[%s199_s19] sm:$0xff]  }
  0x12   : > { %454 = vrot.lane.b32.xlu0 %v1063_v1, %s1103_s20  ;;  %511 = vrot.lane.b32.xlu1 %v1063_v1, %s1104_s21 }
  0x16   : > { %234 = vrot.lane.b32.xlu0 %v1063_v1, %s1105_s22  ;;  %568 = vrot.lane.b32.xlu1 %v1063_v1, %s1106_s23 }
  0x1a   : > { %625 = vrot.lane.b32.xlu1 %v1063_v1, %s1107_s24  ;;  %340 = vrot.lane.b32.xlu0 %v1063_v1, %s1108_s25  ;;  %s926_s25 = sshll.u32 %s1249_s12, 4 }
  0x1b   : > { %s214_s28 = scalar_lea.vmem %s1243_s3, %s926_s25 }
  0x1e   : > { %682 = vrot.lane.b32.xlu1 %v1063_v1, %s1109_s26  ;;  %397 = vrot.lane.b32.xlu0 %v1063_v1, %s1110_s27 }
  0x84   : > { %v455_v2 = vpop.permute.xlu0 %454  ;;  %v512_v4 = vpop.permute.xlu1 %511 }
  0x85   : > { %970 = vmatpush3.bf16.msra.mxu0 %v455_v2 }
  0x86   : > { %975 = vmatprep.subr.bf16.mxu0 %v1101_v0 }
  0x88   : > { %972 = vmatmul.mubr.msk.bf16.vlgmr.msra.gmra.mrb[0].mxu0 %vm237_vm1, %v1064_v3  ;;  %v235_v5 = vpop.permute.xlu0 %234  ;;  %v569_v8 = vpop.permute.xlu1 %568 }
  0x89   : > { %946 = vmatpush3.bf16.msra.mxu1 %v235_v5  ;;  %976 = vmatpush3.bf16.msra.mxu0 %v512_v4 }
  0x8a   : > { %977 = vmatprep.mubr.msk.bf16.mxu0 %vm1102_vm0, %v1101_v0  ;;  %951 = vmatprep.subr.bf16.mxu1 %v1101_v0 }
  0x8b   : > { %981 = vmatprep.subr.bf16.mxu0 %v1101_v0 }
  0x8c   : > { %948 = vmatmul.mubr.msk.bf16.vlgmr.msra.gmra.mrb[0].mxu1 %vm237_vm1, %v1065_v6  ;;  %v341_v10 = vpop.permute.xlu0 %340  ;;  %v626_v12 = vpop.permute.xlu1 %625 }
  0x8d   : > { %952 = vmatpush3.bf16.msra.mxu1 %v1063_v1  ;;  %953 = vmatprep.mubr.msk.bf16.mxu1 %vm1102_vm0, %v1101_v0 }
  0x8e   : > { %957 = vmatprep.subr.bf16.mxu1 %v1101_v0 }
  0x90   : > { %v398_v14 = vpop.permute.xlu0 %397  ;;  %v683_v16 = vpop.permute.xlu1 %682 }
  0x94   : > { %978 = vmatmul.mubr.msk.bf16.vlgmr.msra.gmra.mrb[0].mxu0 %vm237_vm1, %v1066_v7 }
  0x95   : > { %982 = vmatpush3.bf16.msra.mxu0 %v569_v8  ;;  %983 = vmatprep.mubr.msk.bf16.mxu0 %vm1102_vm0, %v1101_v0 }
  0x96   : > { %987 = vmatprep.subr.bf16.mxu0 %v1101_v0 }
  0x98   : > { %954 = vmatmul.mubr.msk.bf16.vlgmr.msra.gmra.mrb[0].mxu1 %vm237_vm1, %v1067_v9 }
  0x99   : > { %958 = vmatpush3.bf16.msra.mxu1 %v341_v10  ;;  %959 = vmatprep.mubr.msk.bf16.mxu1 %vm1102_vm0, %v1101_v0 }
  0x9a   : > { %963 = vmatprep.subr.bf16.mxu1 %v1101_v0 }
  0xa0   : > { %984 = vmatmul.mubr.msk.bf16.vlgmr.msra.gmra.mrb[0].mxu0 %vm237_vm1, %v1068_v11 }
  0xa1   : > { %988 = vmatpush3.bf16.msra.mxu0 %v626_v12  ;;  %989 = vmatprep.mubr.msk.bf16.mxu0 %vm1102_vm0, %v1101_v0 }
  0xa2   : > { %993 = vmatprep.subr.bf16.mxu0 %v1101_v0 }
  0xa4   : > { %960 = vmatmul.mubr.msk.bf16.vlgmr.msra.gmra.mrb[0].mxu1 %vm237_vm1, %v1069_v13 }
  0xa5   : > { %964 = vmatpush3.bf16.msra.mxu1 %v398_v14  ;;  %965 = vmatprep.mubr.msk.bf16.mxu1 %vm1102_vm0, %v1101_v0 }
  0xac   : > { %990 = vmatmul.mubr.msk.bf16.vlgmr.msra.gmra.mrb[0].mxu0 %vm237_vm1, %v1070_v15 }
  0xad   : > { %994 = vmatpush3.bf16.msra.mxu0 %v683_v16  ;;  %995 = vmatprep.mubr.msk.bf16.mxu0 %vm1102_vm0, %v1101_v0 }
  0xb0   : > { %966 = vmatmul.mubr.msk.bf16.vlgmr.msra.gmra.mrb[0].mxu1 %vm237_vm1, %v1071_v17 }
  0xb8   : > { %996 = vmatmul.mubr.msk.bf16.vlgmr.msra.gmra.mrb[0].mxu0 %vm237_vm1, %v1072_v18 }
 0x183   : > { %v437_v19 = vpop.f32.mrb[0].mxu1 }
 0x184   : > { %v967_v20 = vpop.f32.mrb[1].mxu1 }
 0x185   : > { %v440_v21 = vpop.f32.mrb[2].mxu1 }
 0x186   : > { %v968_v22 = vpop.f32.mrb[3].mxu1 }
 0x18b   : > { %v722_v23 = vpop.f32.mrb[0].mxu0 }
 0x18c   : > { %v999_v25 = vadd.f32 %v722_v23, %v437_v19  ;;  %v997_v26 = vpop.f32.mrb[1].mxu0 }
 0x18d   : > { %v725_v27 = vpop.f32.mrb[2].mxu0 }
 0x18e   : > { %v1000_v28 = vadd.f32 %v725_v27, %v440_v21  ;;  %v998_v29 = vpop.f32.mrb[3].mxu0  ;;  %v738_v30 = vmul.f32 %v999_v25, %v922_v24 }
 0x190   : > { %v741_v31 = vsel %vm740_vm2, %v738_v30, 0.0  ;;  %v739_v32 = vmul.f32 %v1000_v28, %v922_v24  ;;  %v749_v33 = vmul.f32 %v738_v30, %v738_v30 }
 0x191   : > { %742 = vadd.xlane.f32.xlu0 %v741_v31 }
 0x192   : > { %v744_v34 = vsel %vm740_vm2, %v739_v32, 0.0  ;;  %v751_v35 = vsel %vm740_vm2, %v749_v33, 0.0  ;;  %v750_v36 = vmul.f32 %v739_v32, %v739_v32 }
 0x193   : > { %745 = vadd.xlane.f32.xlu1 %v744_v34 }
 0x194   : > { %v754_v37 = vsel %vm740_vm2, %v750_v36, 0.0 }
 0x195   : > { %752 = vadd.xlane.f32.xlu0 %v751_v35 }
 0x199   : > { %755 = vadd.xlane.f32.xlu0 %v754_v37 }
 0x21e   : > { %v743_v38 = vpop.xlane.xlu0 %742 }
 0x21f   : > { %v747_v39 = vmul.f32 0.0625, %v743_v38 }
 0x220   : > { %v746_v40 = vpop.xlane.xlu1 %745 }
 0x221   : > { %v759_v42 = vmul.f32 %v747_v39, %v747_v39  ;;  %v748_v43 = vmul.f32 0.0625, %v746_v40  ;;  %v765_v54 = vsub.f32 %v999_v25, %v747_v39 }
 0x222   : > { %v753_v41 = vpop.xlane.xlu0 %752 }
 0x223   : > { %v757_v44 = vmul.f32 0.0625, %v753_v41  ;;  %v760_v47 = vmul.f32 %v748_v43, %v748_v43  ;;  %v766_v57 = vsub.f32 %v1000_v28, %v748_v43 }
 0x225   : > { %v761_v45 = vsub.f32 %v757_v44, %v759_v42 }
 0x226   : > { %v756_v46 = vpop.xlane.xlu0 %755 }
 0x227   : > { %v763_v48 = vmax.f32 %v761_v45, 0.0  ;;  %v758_v49 = vmul.f32 0.0625, %v756_v46 }
 0x229   : > { %v767_v50 = vadd.f32 1e-05, %v763_v48  ;;  %v762_v51 = vsub.f32 %v758_v49, %v760_v47 }
 0x22b   : > { %1073 = vrsqrt.f32 %v767_v50  ;;  %v764_v52 = vmax.f32 %v762_v51, 0.0 }
 0x22d   : > { %v768_v53 = vadd.f32 1e-05, %v764_v52 }
 0x22f   : > { %1075 = vrsqrt.f32 %v768_v53 }
 0x235   : > { %v1074_v55 = vpop.eup %1073 }
 0x236   : > { %v771_v56 = vmul.f32 %v1074_v55, %v765_v54 }
 0x238   : > { %vm773_vm3 = vcmp.ge.f32.partialorder %v771_v56, 0.0  ;;  %v775_v58 = vmul.f32 0.2, %v771_v56 }
 0x239   : > { %v1076_v59 = vpop.eup %1075 }
 0x23a   : > { %v777_v60 = vsel %vm773_vm3, %v771_v56, %v775_v58  ;;  %v772_v61 = vmul.f32 %v1076_v59, %v766_v57 }
 0x23b   : > { %779 = vst.msk [vmem:[%s214_s28] sm:$0xff] %vm740_vm2, %v777_v60 }
 0x23c   : > { %vm774_vm4 = vcmp.ge.f32.partialorder %v772_v61, 0.0  ;;  %v776_v62 = vmul.f32 0.2, %v772_v61 }
 0x23e   : > { %v778_v63 = vsel %vm774_vm4, %v772_v61, %v776_v62 }
 0x23f   : > { %780 = vst.msk [vmem:[%s214_s28 + $0x8] sm:$0xff] %vm740_vm2, %v778_v63 }
 0x240 PF: > { %s13_s14 = sadd.s32 1, %s1099_s14   ;;  %s1244_s12 = smov %s1095_s13 }
 0x241   : > { %p10_p5 = scmp.ge.s32.totalorder %s13_s14, 4   ;;  %s1245_s13 = smov %s1247_s15 }
 0x243   :  { %12 = sbr.rel (!%p10_p5) target bundleno = 2 (0x2), region = 73 }

// kernel: unet_dc_cascade.20
= control target key start
LH: loop header
LB: loop body
LE: loop exit
PB: predicated region body
PF: predicated region fallthrough
CT: control target
= control target key end

     0   :  { %s412_s9 = smov 0   ;;  %s453_s0 = inlined_call_operand.vmem [shape: bf16[2,16,16], index: 0, kind: input, shape index: {}]   ;;  %s454_s1 = inlined_call_operand.vmem [shape: bf16[32,16], index: 1, kind: input, shape index: {}]   ;;  %s455_s2 = inlined_call_operand.vmem [shape: f32[2,4,8,16], index: 2, kind: output, shape index: {}]  }
   0x1 LB: > { %s346_s10 = sadd.s32 4294967295, %s395_s9   ;;  %p350_p0 = scmp.ge.s32.totalorder %s395_s9, 1  ;;  %s395_s9 = sphi %s412_s9, %s12_s9  }
   0x2   : > { %p112_p1 = scmp.lt.s32.totalorder %s395_s9, 3 }
   0x4   : > { %p113_p2 = pnand %p350_p0, %p112_p1 }
   0x5   : > { %p134_p3 = scmp.lt.s32.totalorder (!%p113_p2), %s346_s10, 1  ;;  %v385_v0 = vld [vmem:[%s454_s1] sm:$0xff] (!%p113_p2)   ;;  %vm167_vm0 = vcmask (!%p113_p2), 130048   ;;  %v386_v2 = vld [vmem:[%s454_s1 + $0x8] sm:$0xff] (!%p113_p2)  }
   0x6   : > { %116 = sbr.rel (%p113_p2) target bundleno = 419 (0x1a3), region = 28  ;;  %372 = vmatprep.mubr.msk.bf16.mxu0 (!%p113_p2), %vm167_vm0, %v385_v0 }
   0xd   : > { %s457_s10 = smov (!%p134_p3, %s346_s10), 1 }
   0xe   : > { %s365_s13 = sshll.u32 %s457_s10, 3  ;;  %s366_s19 = sshll.u32 %s457_s10, 5 }
   0xf   : > { %s138_s16 = scalar_lea.vmem %s453_s0, %s365_s13  ;;  %s143_s22 = scalar_lea.vmem %s455_s2, %s366_s19 }
  0x10   : > { %v384_v1 = vld [vmem:[%s138_s16] sm:$0xff]  }
  0x11   : > { %370 = vmatprep.subr.bf16.mxu0 %v384_v1 }
  0x12   : > { %371 = vmatpush3.bf16.msra.mxu0 %v384_v1 }
  0x15   : > { %373 = vmatmul.mubr.msk.bf16.vlgmr.msra.gmra.mrb[0].mxu0 %vm167_vm0, %v386_v2 }
  0xe8   : > { %v374_v3 = vpop.f32.mrb[0].mxu0 }
  0xe9   : > { %v208_v4 = vpop.f32.mrb[1].mxu0  ;;  %v229_v5 = vsel %vm167_vm0, %v374_v3, 0.0  ;;  %v237_v16 = vmul.f32 %v374_v3, %v374_v3 }
  0xea   : > { %230 = vadd.xlane.f32.xlu1 %v229_v5  ;;  %v375_v6 = vpop.f32.mrb[2].mxu0  ;;  %v223_v7 = vsel %vm167_vm0, %v208_v4, 0.0  ;;  %v235_v10 = vmul.f32 %v208_v4, %v208_v4 }
  0xeb   : > { %224 = vadd.xlane.f32.xlu0 %v223_v7  ;;  %v211_v8 = vpop.f32.mrb[3].mxu0  ;;  %v232_v9 = vsel %vm167_vm0, %v375_v6, 0.0  ;;  %v238_v14 = vmul.f32 %v375_v6, %v375_v6  ;;  %v245_v18 = vsel %vm167_vm0, %v237_v16, 0.0 }
  0xec   : > { %v236_v11 = vmul.f32 %v211_v8, %v211_v8  ;;  %v226_v12 = vsel %vm167_vm0, %v211_v8, 0.0  ;;  %v239_v13 = vsel %vm167_vm0, %v235_v10, 0.0 }
  0xed   : > { %v248_v17 = vsel %vm167_vm0, %v238_v14, 0.0 }
  0xee   : > { %233 = vadd.xlane.f32.xlu1 %v232_v9  ;;  %v242_v15 = vsel %vm167_vm0, %v236_v11, 0.0 }
  0xef   : > { %227 = vadd.xlane.f32.xlu0 %v226_v12 }
  0xf2   : > { %240 = vadd.xlane.f32.xlu1 %v239_v13 }
  0xf3   : > { %243 = vadd.xlane.f32.xlu0 %v242_v15 }
  0xf6   : > { %249 = vadd.xlane.f32.xlu1 %v248_v17 }
  0xf7   : > { %246 = vadd.xlane.f32.xlu0 %v245_v18 }
 0x177   : > { %v231_v19 = vpop.xlane.xlu1 %230 }
 0x178   : > { %v225_v20 = vpop.xlane.xlu0 %224 }
 0x17b   : > { %v234_v21 = vpop.xlane.xlu1 %233 }
 0x17c   : > { %v228_v22 = vpop.xlane.xlu0 %227 }
 0x17d   : > { %v251_v23 = vadd.f32 %v228_v22, %v225_v20 }
 0x17f   : > { %v252_v24 = vadd.f32 %v251_v23, %v231_v19  ;;  %v241_v26 = vpop.xlane.xlu1 %240 }
 0x180   : > { %v244_v25 = vpop.xlane.xlu0 %243 }
 0x181   : > { %v253_v27 = vadd.f32 %v252_v24, %v234_v21  ;;  %v254_v28 = vadd.f32 %v244_v25, %v241_v26 }
 0x183   : > { %v257_v30 = vmul.f32 0.015625, %v253_v27  ;;  %v250_v32 = vpop.xlane.xlu1 %249 }
 0x184   : > { %v247_v29 = vpop.xlane.xlu0 %246 }
 0x185   : > { %v255_v31 = vadd.f32 %v254_v28, %v247_v29  ;;  %v259_v34 = vmul.f32 %v257_v30, %v257_v30  ;;  %v264_v39 = vsub.f32 %v208_v4, %v257_v30  ;;  %v270_v40 = vsub.f32 %v211_v8, %v257_v30 }
 0x186   : > { %v277_v41 = vsub.f32 %v374_v3, %v257_v30  ;;  %v284_v42 = vsub.f32 %v375_v6, %v257_v30 }
 0x187   : > { %v256_v33 = vadd.f32 %v255_v31, %v250_v32 }
 0x189   : > { %v258_v35 = vmul.f32 0.015625, %v256_v33 }
 0x18b   : > { %v260_v36 = vsub.f32 %v258_v35, %v259_v34 }
 0x18d   : > { %v261_v37 = vmax.f32 %v260_v36, 0.0 }
 0x18f   : > { %v262_v38 = vadd.f32 1e-05, %v261_v37 }
 0x191   : > { %387 = vrsqrt.f32 %v262_v38 }
 0x19b   : > { %v388_v43 = vpop.eup %387 }
 0x19c   : > { %v265_v44 = vmul.f32 %v388_v43, %v264_v39  ;;  %v271_v45 = vmul.f32 %v388_v43, %v270_v40  ;;  %v278_v46 = vmul.f32 %v388_v43, %v277_v41  ;;  %v285_v47 = vmul.f32 %v388_v43, %v284_v42 }
 0x19e   : > { %vm266_vm1 = vcmp.ge.f32.partialorder %v265_v44, 0.0  ;;  %v267_v48 = vmul.f32 0.2, %v265_v44  ;;  %vm272_vm2 = vcmp.ge.f32.partialorder %v271_v45, 0.0  ;;  %v273_v49 = vmul.f32 0.2, %v271_v45 }
 0x19f   : > { %vm279_vm3 = vcmp.ge.f32.partialorder %v278_v46, 0.0  ;;  %v280_v50 = vmul.f32 0.2, %v278_v46  ;;  %vm286_vm4 = vcmp.ge.f32.partialorder %v285_v47, 0.0  ;;  %v287_v51 = vmul.f32 0.2, %v285_v47 }
 0x1a0   : > { %v268_v52 = vsel %vm266_vm1, %v265_v44, %v267_v48  ;;  %v274_v53 = vsel %vm272_vm2, %v271_v45, %v273_v49 }
 0x1a1   : > { %269 = vst.msk [vmem:[%s143_s22] sm:$0xff] %vm167_vm0, %v268_v52  ;;  %360 = vst.msk [vmem:[%s143_s22 + $0x8] sm:$0xff] %vm167_vm0, %v274_v53  ;;  %v281_v54 = vsel %vm279_vm3, %v278_v46, %v280_v50  ;;  %v288_v55 = vsel %vm286_vm4, %v285_v47, %v287_v51 }
 0x1a2   : > { %361 = vst.msk [vmem:[%s143_s22 + $0x10] sm:$0xff] %vm167_vm0, %v281_v54  ;;  %362 = vst.msk [vmem:[%s143_s22 + $0x18] sm:$0xff] %vm167_vm0, %v288_v55 }
 0x1a3 PF: > { %s12_s9 = sadd.s32 1, %s395_s9  }
 0x1a4   : > { %p9_p4 = scmp.ge.s32.totalorder %s12_s9, 4  }
 0x1a6   :  { %11 = sbr.rel (!%p9_p4) target bundleno = 1 (0x1), region = 61 }

// kernel: unet_dc_cascade.23
= control target key start
LH: loop header
LB: loop body
LE: loop exit
PB: predicated region body
PF: predicated region fallthrough
CT: control target
= control target key end

     0   :  { %s403_s9 = smov 0   ;;  %s429_s0 = inlined_call_operand.vmem [shape: bf16[2,8,64], index: 0, kind: input, shape index: {}]   ;;  %s430_s1 = inlined_call_operand.vmem [shape: bf16[16,8], index: 1, kind: input, shape index: {}]   ;;  %s431_s2 = inlined_call_operand.vmem [shape: f32[2,4,4,64], index: 2, kind: output, shape index: {}]  }
   0x1 LB: > { %s337_s10 = sadd.s32 4294967295, %s383_s9   ;;  %p341_p0 = scmp.ge.s32.totalorder %s383_s9, 1  ;;  %s383_s9 = sphi %s403_s9, %s12_s9  }
   0x2   : > { %p111_p1 = scmp.lt.s32.totalorder %s383_s9, 3 }
   0x4   : > { %p112_p2 = pnand %p341_p0, %p111_p1 }
   0x5   : > { %p132_p3 = scmp.lt.s32.totalorder (!%p112_p2), %s337_s10, 1  ;;  %v385_v0 = vmov (!%p112_p2), 0.0   ;;  %vm386_vm0 = vmmov (!%p112_p2), 0   ;;  %vm154_vm1 = vcmask (!%p112_p2), 1043456   ;;  %v374_v3 = vld [vmem:[%s430_s1] sm:$0xff] (!%p112_p2)   ;;  %vm150_vm2 = vcmask (!%p112_p2), 64512  }
   0x6   : > { %115 = sbr.rel (%p112_p2) target bundleno = 544 (0x220), region = 28  ;;  %355 = vmatprep.subr.bf16.mxu0 (!%p112_p2), %v385_v0  ;;  %357 = vmatprep.mubr.msk.bf16.mxu0 (!%p112_p2), %vm386_vm0, %v385_v0  ;;  %vm199_vm3 = vcmask (!%p112_p2), 523264   ;;  %v387_v14 = vmov (!%p112_p2), 0   ;;  %vm254_vm4 = vcmask (!%p112_p2), 519168   ;;  %vm266_vm7 = vcmask (!%p112_p2), 523268  }
   0x7   : > { %372 = vset.pattern.permute.xlu0 (!%p112_p2), %v387_v14  ;;  %373 = vset.pattern.permute.xlu1 (!%p112_p2), %v387_v14 }
   0xd   : > { %s433_s10 = smov (!%p132_p3, %s337_s10), 1 }
   0xe   : > { %s342_s11 = sshll.u32 %s433_s10, 2  ;;  %s352_s17 = sshll.u32 %s433_s10, 4 }
   0xf   : > { %s135_s14 = scalar_lea.vmem %s429_s0, %s342_s11  ;;  %s140_s20 = scalar_lea.vmem %s431_s2, %s352_s17 }
  0x10   : > { %v144_v1 = vld [vmem:[%s135_s14] sm:$0xf] }
  0x11   : > { %v156_v2 = vsel %vm154_vm1, %v144_v1, 0 }
  0x12   : > { %356 = vmatpush3.bf16.msra.mxu0 %v156_v2 }
  0x15   : > { %358 = vmatmul.mubr.msk.bf16.vlgmr.msra.gmra.mrb[0].mxu0 %vm150_vm2, %v374_v3 }
  0xe8   : > { %v192_v4 = vpop.f32.mrb[0].mxu0 }
  0xe9   : > { %v359_v5 = vpop.f32.mrb[1].mxu0  ;;  %v200_v6 = vsel %vm199_vm3, %v192_v4, 0.0  ;;  %v206_v7 = vmul.f32 %v192_v4, %v192_v4 }
  0xea   : > { %201 = vadd.xlane.f32.xlu0 %v200_v6  ;;  %v195_v8 = vpop.f32.mrb[2].mxu0 }
  0xeb   : > { %v360_v9 = vpop.f32.mrb[3].mxu0  ;;  %v203_v10 = vsel %vm199_vm3, %v195_v8, 0.0  ;;  %v207_v11 = vmul.f32 %v195_v8, %v195_v8  ;;  %v208_v12 = vsel %vm199_vm3, %v206_v7, 0.0 }
  0xec   : > { %204 = vadd.xlane.f32.xlu1 %v203_v10 }
  0xed   : > { %v211_v13 = vsel %vm199_vm3, %v207_v11, 0.0 }
  0xee   : > { %209 = vadd.xlane.f32.xlu0 %v208_v12 }
  0xf0   : > { %212 = vadd.xlane.f32.xlu1 %v211_v13 }
 0x177   : > { %v202_v15 = vpop.xlane.xlu0 %201 }
 0x178   : > { %v215_v16 = vrot.slane %v202_v15, 4 }
 0x179   : > { %v205_v17 = vpop.xlane.xlu1 %204 }
 0x17a   : > { %v217_v18 = vadd.f32 %v215_v16, %v202_v15  ;;  %v220_v21 = vrot.slane %v205_v17, 4 }
 0x17b   : > { %v210_v19 = vpop.xlane.xlu0 %209 }
 0x17c   : > { %v218_v20 = vadd.f32 %v217_v18, %v205_v17  ;;  %v224_v22 = vrot.slane %v210_v19, 4 }
 0x17d   : > { %v213_v23 = vpop.xlane.xlu1 %212 }
 0x17e   : > { %v222_v24 = vadd.f32 %v220_v21, %v218_v20  ;;  %v226_v25 = vadd.f32 %v224_v22, %v210_v19  ;;  %v229_v27 = vrot.slane %v213_v23, 4 }
 0x180   : > { %v227_v26 = vadd.f32 %v226_v25, %v213_v23  ;;  %v232_v28 = vmul.f32 0.00390625, %v222_v24 }
 0x182   : > { %v231_v29 = vadd.f32 %v229_v27, %v227_v26  ;;  %241 = vperm.xlu0 %372, %v232_v28   ;;  %v234_v31 = vmul.f32 %v232_v28, %v232_v28 }
 0x184   : > { %v233_v30 = vmul.f32 0.00390625, %v231_v29 }
 0x186   : > { %v235_v32 = vsub.f32 %v233_v30, %v234_v31 }
 0x188   : > { %v236_v33 = vmax.f32 %v235_v32, 0.0 }
 0x18a   : > { %v237_v34 = vadd.f32 1e-05, %v236_v33 }
 0x18c   : > { %375 = vrsqrt.f32 %v237_v34 }
 0x196   : > { %v376_v35 = vpop.eup %375 }
 0x197   : > { %247 = vperm.xlu1 %373, %v376_v35  }
 0x201   : > { %v242_v36 = vpop.permute.xlu0 %241 }
 0x202   : > { %v256_v37 = vrot.slane %v242_v36, 4  ;;  %v244_v38 = vsub.f32 %v192_v4, %v242_v36  ;;  %v268_v39 = vsub.f32 %v195_v8, %v242_v36 }
 0x204   : > { %v258_v41 = vsub.f32 %v192_v4, %v256_v37  ;;  %v275_v45 = vsub.f32 %v195_v8, %v256_v37 }
 0x216   : > { %v248_v40 = vpop.permute.xlu1 %247 }
 0x217   : > { %v250_v42 = vmul.f32 %v248_v40, %v244_v38  ;;  %v259_v43 = vrot.slane %v248_v40, 4  ;;  %v269_v44 = vmul.f32 %v268_v39, %v248_v40 }
 0x219   : > { %vm251_vm5 = vcmp.ge.f32.partialorder %v250_v42, 0.0  ;;  %v252_v46 = vmul.f32 0.2, %v250_v42  ;;  %v261_v47 = vmul.f32 %v259_v43, %v258_v41  ;;  %vm270_vm6 = vcmp.ge.f32.partialorder %v269_v44, 0.0 }
 0x21a   : > { %v271_v48 = vmul.f32 0.2, %v269_v44  ;;  %v276_v49 = vmul.f32 %v275_v45, %v259_v43 }
 0x21b   : > { %v253_v50 = vsel %vm251_vm5, %v250_v42, %v252_v46  ;;  %vm262_vm8 = vcmp.ge.f32.partialorder %v261_v47, 0.0  ;;  %v263_v51 = vmul.f32 0.2, %v261_v47 }
 0x21c   : > { %255 = vst.msk [vmem:[%s140_s20] sm:$0xf] %vm254_vm4, %v253_v50  ;;  %v272_v52 = vsel %vm270_vm6, %v269_v44, %v271_v48  ;;  %vm277_vm9 = vcmp.ge.f32.partialorder %v276_v49, 0.0  ;;  %v278_v53 = vmul.f32 0.2, %v276_v49 }
 0x21d   : > { %v264_v54 = vsel %vm262_vm8, %v261_v47, %v263_v51  ;;  %348 = vst.msk [vmem:[%s140_s20 + $0x8] sm:$0xf] %vm254_vm4, %v272_v52 }
 0x21e   : > { %347 = vst.msk [vmem:[%s140_s20] sm:$0xf0] %vm266_vm7, %v264_v54  ;;  %v279_v55 = vsel %vm277_vm9, %v276_v49, %v278_v53 }
 0x21f   : > { %349 = vst.msk [vmem:[%s140_s20 + $0x8] sm:$0xf0] %vm266_vm7, %v279_v55 }
 0x220 PF: > { %s12_s9 = sadd.s32 1, %s383_s9  }
 0x221   : > { %p9_p4 = scmp.ge.s32.totalorder %s12_s9, 4  }
 0x223   :  { %11 = sbr.rel (!%p9_p4) target bundleno = 1 (0x1), region = 61 }

// kernel: unet_dc_cascade.21
= control target key start
LH: loop header
LB: loop body
LE: loop exit
PB: predicated region body
PF: predicated region fallthrough
CT: control target
= control target key end

     0   :  { %s990_s12 = smov 0   ;;  %s992_s13 = smov 0   ;;  %s1099_s0 = inlined_call_operand.vmem [shape: bf16[2,16,102], index: 0, kind: input, shape index: {}]   ;;  %s1100_s1 = inlined_call_operand.vmem [shape: bf16[9,8,16], index: 1, kind: input, shape index: {}]   ;;  %s1101_s2 = inlined_call_operand.vmem [shape: f32[1,80], index: 2, kind: input, shape index: {}]   ;;  %s1102_s3 = inlined_call_operand.vmem [shape: f32[2,8,80], index: 3, kind: output, shape index: {}]  }
   0x1   :  { %s994_s14 = smov 0  }
   0x2 LB: > { %s25_s15 = sadd.s32 1, %s954_s13  ;;  %p772_p0 = scmp.ge.s32.totalorder %s958_s14, 1  ;;  %s958_s14 = sphi %s994_s14, %s13_s14   ;;  %s954_s13 = sphi %s992_s13, %s1104_s13   ;;  %s950_s12 = sphi %s990_s12, %s1103_s12  }
   0x3   : > { %p27_p1 = scmp.ge.s32.totalorder %s25_s15, 2  ;;  %p160_p2 = scmp.lt.s32.totalorder %s958_s14, 3 }
   0x5   : > { %s1106_s15 = smov (%p27_p1, %s25_s15), 0  ;;  %p161_p3 = pnand %p772_p0, %p160_p2 }
   0x6   : > { %p190_p4 = scmp.lt.s32.totalorder (!%p161_p3), %s950_s12, 1  ;;  %v960_v0 = vmov (!%p161_p3), 0.0   ;;  %vm961_vm0 = vmmov (!%p161_p3), 0   ;;  %s962_s20 = smov (!%p161_p3), 117   ;;  %vm220_vm1 = vcmask (!%p161_p3), 130048   ;;  %vm659_vm2 = vcmask (!%p161_p3), 654336  }
   0x7   : > { %164 = sbr.rel (%p161_p3) target bundleno = 570 (0x23a), region = 32  ;;  %840 = vmatprep.subr.bf16.mxu0 (!%p161_p3), %v960_v0  ;;  %842 = vmatprep.mubr.msk.bf16.mxu0 (!%p161_p3), %vm961_vm0, %v960_v0  ;;  %s963_s21 = smov (!%p161_p3), 116   ;;  %v784_v3 = vld [vmem:[%s1100_s1 + $0x10] sm:$0xf] (!%p161_p3)  ;;  %v776_v6 = vld [vmem:[%s1100_s1 + $0x4] sm:$0xf] (!%p161_p3) }
   0x8   : > { %816 = vmatprep.subr.bf16.mxu1 (!%p161_p3), %v960_v0  ;;  %818 = vmatprep.mubr.msk.bf16.mxu1 (!%p161_p3), %vm961_vm0, %v960_v0  ;;  %s964_s22 = smov (!%p161_p3), 127   ;;  %s965_s23 = smov (!%p161_p3), 108   ;;  %v786_v7 = vld [vmem:[%s1100_s1 + $0x14] sm:$0xf] (!%p161_p3)  ;;  %v209_v9 = vld [vmem:[%s1100_s1] sm:$0xf] (!%p161_p3) }
   0x9   : > { %s966_s24 = smov (!%p161_p3), 107   ;;  %s967_s25 = smov (!%p161_p3), 126   ;;  %v788_v11 = vld [vmem:[%s1100_s1 + $0x18] sm:$0xf] (!%p161_p3)  ;;  %v780_v13 = vld [vmem:[%s1100_s1 + $0x8] sm:$0xf] (!%p161_p3) }
   0xa   : > { %s968_s26 = smov (!%p161_p3), 106   ;;  %s969_s27 = smov (!%p161_p3), 118   ;;  %v790_v15 = vld [vmem:[%s1100_s1 + $0x1c] sm:$0xf] (!%p161_p3)  ;;  %v782_v17 = vld [vmem:[%s1100_s1 + $0xc] sm:$0xf] (!%p161_p3) }
   0xb   : > { %v792_v18 = vld [vmem:[%s1100_s1 + $0x20] sm:$0xf] (!%p161_p3) }
   0xc   : > { %v794_v24 = vld [vmem:[%s1101_s2] ss:$0 sm:$0xff] (!%p161_p3) }
   0xe   : > { %s1108_s12 = smov (!%p190_p4, %s950_s12), 1 }
   0xf   : > { %s797_s16 = sshll.u32 %s1108_s12, 3 }
  0x10   : > { %s194_s19 = scalar_lea.vmem %s1099_s0, %s797_s16  ;;  %s205_s28 = scalar_lea.vmem %s1102_s3, %s797_s16 }
  0x11   : > { %v933_v1 = vld [vmem:[%s194_s19] sm:$0xff]  }
  0x12   : > { %408 = vrot.lane.b32.xlu0 %v933_v1, %s962_s20  ;;  %457 = vrot.lane.b32.xlu1 %v933_v1, %s963_s21 }
  0x16   : > { %217 = vrot.lane.b32.xlu0 %v933_v1, %s964_s22  ;;  %506 = vrot.lane.b32.xlu1 %v933_v1, %s965_s23 }
  0x1a   : > { %555 = vrot.lane.b32.xlu1 %v933_v1, %s966_s24  ;;  %310 = vrot.lane.b32.xlu0 %v933_v1, %s967_s25 }
  0x1e   : > { %604 = vrot.lane.b32.xlu1 %v933_v1, %s968_s26  ;;  %359 = vrot.lane.b32.xlu0 %v933_v1, %s969_s27 }
  0x84   : > { %v409_v2 = vpop.permute.xlu0 %408  ;;  %v458_v4 = vpop.permute.xlu1 %457 }
  0x85   : > { %841 = vmatpush3.bf16.msra.mxu0 %v409_v2 }
  0x86   : > { %846 = vmatprep.subr.bf16.mxu0 %v960_v0 }
  0x88   : > { %843 = vmatmul.mubr.msk.bf16.vlgmr.msra.gmra.mrb[0].mxu0 %vm220_vm1, %v784_v3  ;;  %v218_v5 = vpop.permute.xlu0 %217  ;;  %v507_v8 = vpop.permute.xlu1 %506 }
  0x89   : > { %817 = vmatpush3.bf16.msra.mxu1 %v218_v5  ;;  %847 = vmatpush3.bf16.msra.mxu0 %v458_v4 }
  0x8a   : > { %848 = vmatprep.mubr.msk.bf16.mxu0 %vm961_vm0, %v960_v0  ;;  %822 = vmatprep.subr.bf16.mxu1 %v960_v0 }
  0x8b   : > { %852 = vmatprep.subr.bf16.mxu0 %v960_v0 }
  0x8c   : > { %819 = vmatmul.mubr.msk.bf16.vlgmr.msra.gmra.mrb[0].mxu1 %vm220_vm1, %v776_v6  ;;  %v311_v10 = vpop.permute.xlu0 %310  ;;  %v556_v12 = vpop.permute.xlu1 %555 }
  0x8d   : > { %823 = vmatpush3.bf16.msra.mxu1 %v933_v1  ;;  %824 = vmatprep.mubr.msk.bf16.mxu1 %vm961_vm0, %v960_v0 }
  0x8e   : > { %828 = vmatprep.subr.bf16.mxu1 %v960_v0 }
  0x90   : > { %v360_v14 = vpop.permute.xlu0 %359  ;;  %v605_v16 = vpop.permute.xlu1 %604 }
  0x94   : > { %849 = vmatmul.mubr.msk.bf16.vlgmr.msra.gmra.mrb[0].mxu0 %vm220_vm1, %v786_v7 }
  0x95   : > { %853 = vmatpush3.bf16.msra.mxu0 %v507_v8  ;;  %854 = vmatprep.mubr.msk.bf16.mxu0 %vm961_vm0, %v960_v0 }
  0x96   : > { %858 = vmatprep.subr.bf16.mxu0 %v960_v0 }
  0x98   : > { %825 = vmatmul.mubr.msk.bf16.vlgmr.msra.gmra.mrb[0].mxu1 %vm220_vm1, %v209_v9 }
  0x99   : > { %829 = vmatpush3.bf16.msra.mxu1 %v311_v10  ;;  %830 = vmatprep.mubr.msk.bf16.mxu1 %vm961_vm0, %v960_v0 }
  0x9a   : > { %834 = vmatprep.subr.bf16.mxu1 %v960_v0 }
  0xa0   : > { %855 = vmatmul.mubr.msk.bf16.vlgmr.msra.gmra.mrb[0].mxu0 %vm220_vm1, %v788_v11 }
  0xa1   : > { %859 = vmatpush3.bf16.msra.mxu0 %v556_v12  ;;  %860 = vmatprep.mubr.msk.bf16.mxu0 %vm961_vm0, %v960_v0 }
  0xa2   : > { %864 = vmatprep.subr.bf16.mxu0 %v960_v0 }
  0xa4   : > { %831 = vmatmul.mubr.msk.bf16.vlgmr.msra.gmra.mrb[0].mxu1 %vm220_vm1, %v780_v13 }
  0xa5   : > { %835 = vmatpush3.bf16.msra.mxu1 %v360_v14  ;;  %836 = vmatprep.mubr.msk.bf16.mxu1 %vm961_vm0, %v960_v0 }
  0xac   : > { %861 = vmatmul.mubr.msk.bf16.vlgmr.msra.gmra.mrb[0].mxu0 %vm220_vm1, %v790_v15 }
  0xad   : > { %865 = vmatpush3.bf16.msra.mxu0 %v605_v16  ;;  %866 = vmatprep.mubr.msk.bf16.mxu0 %vm961_vm0, %v960_v0 }
  0xb0   : > { %837 = vmatmul.mubr.msk.bf16.vlgmr.msra.gmra.mrb[0].mxu1 %vm220_vm1, %v782_v17 }
  0xb8   : > { %867 = vmatmul.mubr.msk.bf16.vlgmr.msra.gmra.mrb[0].mxu0 %vm220_vm1, %v792_v18 }
 0x183   : > { %v399_v19 = vpop.f32.mrb[0].mxu1 }
 0x184   : > { %v838_v20 = vpop.f32.mrb[1].mxu1 }
 0x185   : > { %v402_v21 = vpop.f32.mrb[2].mxu1 }
 0x186   : > { %v839_v22 = vpop.f32.mrb[3].mxu1 }
 0x18b   : > { %v644_v23 = vpop.f32.mrb[0].mxu0 }
 0x18c   : > { %v870_v25 = vadd.f32 %v644_v23, %v399_v19  ;;  %v868_v26 = vpop.f32.mrb[1].mxu0 }
 0x18d   : > { %v647_v27 = vpop.f32.mrb[2].mxu0 }
 0x18e   : > { %v869_v28 = vpop.f32.mrb[3].mxu0  ;;  %v658_v29 = vmul.f32 %v870_v25, %v794_v24 }
 0x190   : > { %v660_v30 = vsel %vm659_vm2, %v658_v29, 0.0  ;;  %v664_v31 = vmul.f32 %v658_v29, %v658_v29 }
 0x191   : > { %661 = vadd.xlane.f32.xlu0 %v660_v30 }
 0x192   : > { %v665_v32 = vsel %vm659_vm2, %v664_v31, 0.0 }
 0x193   : > { %666 = vadd.xlane.f32.xlu1 %v665_v32 }
 0x21e   : > { %v662_v33 = vpop.xlane.xlu0 %661 }
 0x21f   : > { %v663_v34 = vmul.f32 0.015625, %v662_v33 }
 0x220   : > { %v667_v35 = vpop.xlane.xlu1 %666 }
 0x221   : > { %v669_v36 = vmul.f32 %v663_v34, %v663_v34  ;;  %v668_v37 = vmul.f32 0.015625, %v667_v35  ;;  %v672_v41 = vsub.f32 %v870_v25, %v663_v34 }
 0x223   : > { %v670_v38 = vsub.f32 %v668_v37, %v669_v36 }
 0x225   : > { %v671_v39 = vmax.f32 %v670_v38, 0.0 }
 0x227   : > { %v673_v40 = vadd.f32 1e-05, %v671_v39 }
 0x229   : > { %934 = vrsqrt.f32 %v673_v40 }
 0x233   : > { %v935_v42 = vpop.eup %934 }
 0x234   : > { %v675_v43 = vmul.f32 %v935_v42, %v672_v41 }
 0x236   : > { %vm676_vm3 = vcmp.ge.f32.partialorder %v675_v43, 0.0  ;;  %v677_v44 = vmul.f32 0.2, %v675_v43 }
 0x238   : > { %v678_v45 = vsel %vm676_vm3, %v675_v43, %v677_v44 }
 0x239   : > { %679 = vst.msk [vmem:[%s205_s28] sm:$0xff] %vm659_vm2, %v678_v45 }
 0x23a PF: > { %s13_s14 = sadd.s32 1, %s958_s14   ;;  %s1103_s12 = smov %s954_s13 }
 0x23b   : > { %p10_p5 = scmp.ge.s32.totalorder %s13_s14, 4   ;;  %s1104_s13 = smov %s1106_s15 }
 0x23d   :  { %12 = sbr.rel (!%p10_p5) target bundleno = 2 (0x2), region = 73 }

// kernel: custom-call
= control target key start
LH: loop header
LB: loop body
LE: loop exit
PB: predicated region body
PF: predicated region fallthrough
CT: control target
= control target key end

     0   :  { %2 = vsyncpa [#allocation0], 0  ;;  %s61_s0 = inlined_call_operand.hbm [shape: c64[2,1,16,16], index: 0, kind: input, shape index: {}]   ;;  %s62_s1 = inlined_call_operand.vmem [shape: f32[2,1,16,16], index: 1, kind: output, shape index: {}]  }
   0x1   :  { %s3_s8 = sshll.u32 %s62_s1, 4  ;;  %s9_s11 = scalar_lea.hbm %s61_s0, 512  ;;  %s4_s8 = int_to_ptr.vmem [resolvable:$true] %s3_s8 }
   0x2   :  { %p10_p0 = scmp.ne.s32.totalorder %s61_s0, %s9_s11  ;;  %s11_s16 = scalar_lea.hbm %s61_s0, 1024 }
   0x3   :  { %p12_p1 = scmp.lt.u32.totalorder %s11_s16, %s9_s11  ;;  %p13_p2 = scmp.lt.u32.totalorder %s9_s11, %s61_s0 }
   0x5   :  { %p14_p3 = por %p13_p2, %p12_p1 }
   0x7   :  { %p15_p4 = pnand %p14_p3, %p10_p0 }
   0x9   :  { %18 = shalt.err (!%p15_p4)  }
   0xa   :  { %s19_s1 = scalar_lea.vmem %s4_s8, 512  ;;  %p24_p6 = scmp.lt.s32.totalorder %s4_s8, %s4_s8 }
   0xb   :  { %p20_p5 = scmp.ne.s32.totalorder %s4_s8, %s19_s1  ;;  %p25_p7 = scmp.lt.s32.totalorder %s19_s1, %s19_s1 }
   0xd   :  { %p26_p8 = por %p25_p7, %p24_p6 }
   0xf   :  { %p27_p9 = pnand %p26_p8, %p20_p5 }
  0x11   :  { %30 = shalt.err (!%p27_p9)  }
  0x12   :  { %6 = dma.hbm_to_vmem [thread:$0]  %s61_s0, 512, %s4_s8, [#allocation0] }
  0x13   :  { %31 = dma.done.wait [#allocation0], 512  }
  0x14   :  { %32 = vsyncadd [#allocation0], 4294966784 }
  0x15   :  { %8 = vsyncpa [#allocation0], 1 }

// kernel: custom-call.1
= control target key start
LH: loop header
LB: loop body
LE: loop exit
PB: predicated region body
PF: predicated region fallthrough
CT: control target
= control target key end

     0   :  { %s59_s0 = inlined_call_operand.hbm [shape: c64[2,1,16,16], index: 0, kind: input, shape index: {}]   ;;  %s60_s1 = inlined_call_operand.vmem [shape: f32[2,1,16,16], index: 1, kind: output, shape index: {}]  }
   0x1   :  { %s2_s8 = scalar_lea.hbm %s59_s0, 512 }
   0x2   :  { %3 = vsyncpa [#allocation0], 0  ;;  %s4_s11 = sshll.u32 %s60_s1, 4  ;;  %s34_s14 = scalar_lea.hbm %s59_s0, 1024  ;;  %s5_s11 = int_to_ptr.vmem [resolvable:$true] %s4_s11 }
   0x3   :  { %p11_p0 = scmp.ne.s32.totalorder %s2_s8, %s34_s14  ;;  %p13_p1 = scmp.lt.u32.totalorder %s2_s8, %s59_s0 }
   0x4   :  { %p14_p2 = scmp.lt.u32.totalorder %s34_s14, %s34_s14  ;;  %p16_p4 = scmp.lt.u32.totalorder %s34_s14, %s2_s8 }
   0x6   :  { %p15_p3 = por %p14_p2, %p13_p1 }
   0x8   :  { %p17_p5 = por %p16_p4, %p15_p3 }
   0xa   :  { %p18_p6 = pnand %p17_p5, %p11_p0 }
   0xc   :  { %21 = shalt.err (!%p18_p6)  }
   0xd   :  { %s22_s17 = scalar_lea.vmem %s5_s11, 512  ;;  %p27_p8 = scmp.lt.s32.totalorder %s5_s11, %s5_s11 }
   0xe   :  { %p23_p7 = scmp.ne.s32.totalorder %s5_s11, %s22_s17  ;;  %p28_p9 = scmp.lt.s32.totalorder %s22_s17, %s22_s17 }
  0x10   :  { %p29_p10 = por %p28_p9, %p27_p8 }
  0x12   :  { %p30_p11 = pnand %p29_p10, %p23_p7 }
  0x14   :  { %33 = shalt.err (!%p30_p11)  }
  0x15   :  { %7 = dma.hbm_to_vmem [thread:$0]  %s2_s8, 512, %s5_s11, [#allocation0] }
  0x16   :  { %35 = dma.done.wait [#allocation0], 512  }
  0x17   :  { %36 = vsyncadd [#allocation0], 4294966784 }
  0x18   :  { %9 = vsyncpa [#allocation0], 1 }

// kernel: unet_dc_cascade.26
= control target key start
LH: loop header
LB: loop body
LE: loop exit
PB: predicated region body
PF: predicated region fallthrough
CT: control target
= control target key end

     0   :  { %s402_s14 = smov 0   ;;  %s426_s0 = inlined_call_operand.vmem [shape: f32[2,4,256], index: 0, kind: input, shape index: {}]   ;;  %s427_s1 = inlined_call_operand.vmem [shape: f32[1,4], index: 1, kind: input, shape index: {}]   ;;  %s428_s2 = inlined_call_operand.<no memory space> [shape: f32[1,1], index: 2, kind: input, shape index: {}]   ;;  %s429_s3 = inlined_call_operand.vmem [shape: f32[2,1,256], index: 3, kind: output, shape index: {}]  }
   0x1   :  { %v8_v0 = vstv %s428_s2 }
   0x2   :  { %9 = vst [vmem:[#allocation2] sm:$0x1] %v8_v0 }
   0x3 LB: > { %s341_s15 = sadd.s32 4294967295, %s374_s14   ;;  %p345_p0 = scmp.ge.s32.totalorder %s374_s14, 1  ;;  %s374_s14 = sphi %s402_s14, %s15_s14  }
   0x4   : > { %p139_p1 = scmp.lt.s32.totalorder %s374_s14, 3 }
   0x6   : > { %p140_p2 = pnand %p345_p0, %p139_p1 }
   0x7   : > { %p162_p3 = scmp.lt.s32.totalorder (!%p140_p2), %s341_s15, 1  ;;  %v376_v1 = vmov (!%p140_p2), 0.0   ;;  %v377_v3 = vmov (!%p140_p2), 0   ;;  %vm189_vm0 = vcmask (!%p140_p2), 1043456   ;;  %v171_v6 = vld [vmem:[%s427_s1] sm:$0x1] (!%p140_p2)  ;;  %v179_v7 = vlaneseq (!%p140_p2) }
   0x8   : > { %143 = sbr.rel (%p140_p2) target bundleno = 245 (0xf5), region = 32  ;;  %258 = vmatprep.mubr.f32.mxu0 (!%p140_p2), %v376_v1  ;;  %366 = vset.pattern.permute.xlu0 (!%p140_p2), %v377_v3  ;;  %vm185_vm1 = vcmask (!%p140_p2), 31744   ;;  %v378_v11 = vmov (!%p140_p2), 1966171168  }
   0x9   : > { %v173_v2 = vld [vmem:[#allocation2] sm:$0x1] (!%p140_p2)  ;;  %v180_v8 = vshrl.u32 (!%p140_p2), %v179_v7, 7  ;;  %v269_v12 = vunpack.c.l.s4 (!%p140_p2), %v378_v11  ;;  %vm285_vm2 = vcmp.lt.s32.totalorder (!%p140_p2), %v179_v7, 256 }
   0xa   : > { %176 = vperm.xlu0 (!%p140_p2), %366, %v173_v2  }
   0xb   : > { %v181_v9 = vsub.s32 (!%p140_p2), 0, %v180_v8  ;;  %v270_v14 = vunpack.c.0.s8 (!%p140_p2), %v269_v12 }
   0xd   : > { %v273_v19 = vsub.s32 (!%p140_p2), %v270_v14, %v180_v8 }
   0xf   : > { %s431_s15 = smov (!%p162_p3, %s341_s15), 1 }
  0x10   : > { %s354_s2 = sshll.u32 %s431_s15, 3  ;;  %s348_s21 = sshll.u32 %s431_s15, 1 }
  0x11   : > { %s166_s18 = scalar_lea.vmem %s426_s0, %s354_s2  ;;  %s170_s24 = scalar_lea.vmem %s429_s3, %s348_s21 }
  0x12   : > { %v172_v4 = vld [vmem:[%s166_s18] sm:$0xff] }
  0x13   : > { %v184_v5 = vcombine.high %v172_v4, %v172_v4 }
  0x15   : > { %349 = vmatprep.subr.msk.mxu0 %vm189_vm0, %v184_v5 }
  0x16   : > { %350 = vmatpush1.msk.msra.mxu0 %vm189_vm0, %v172_v4 }
  0x17   : > { %351 = vmatmul.mubr.msk.f32.vlgmr.msra.gmra.mrb[0].mxu0 %vm185_vm1, %v171_v6 }
  0x89   : > { %v177_v10 = vpop.permute.xlu0 %176 }
  0x8a   : > { %v182_v13 = vrot.slane %v177_v10, %v181_v9 }
  0xea   : > { %v260_v15 = vpop.f32.mrb[0].mxu0 }
  0xeb   : > { %v261_v16 = vadd.f32 %v260_v15, %v182_v13  ;;  %v262_v17 = vpop.f32.mrb[1].mxu0 }
  0xec   : > { %v263_v18 = vadd.f32 %v262_v17, %v182_v13 }
  0xee   : > { %v267_v20 = vcombine.low %v261_v16, %v263_v18 }
  0xf0   : > { %v274_v21 = vrot.slane %v267_v20, %v273_v19 }
  0xf2   : > { %v281_v22 = vrot.slane %v274_v21, %v273_v19 }
  0xf4   : > { %287 = vst.msk [vmem:[%s170_s24] sm:$0x3] %vm285_vm2, %v281_v22 }
  0xf5 PF: > { %s15_s14 = sadd.s32 1, %s374_s14  }
  0xf6   : > { %p12_p4 = scmp.ge.s32.totalorder %s15_s14, 4  }
  0xf8   :  { %14 = sbr.rel (!%p12_p4) target bundleno = 3 (0x3), region = 62 }

// kernel: unet_dc_cascade.24
= control target key start
LH: loop header
LB: loop body
LE: loop exit
PB: predicated region body
PF: predicated region fallthrough
CT: control target
= control target key end

     0   :  { %s1615_s12 = smov 0   ;;  %s1617_s13 = smov 0   ;;  %s1775_s0 = inlined_call_operand.vmem [shape: bf16[2,8,326], index: 0, kind: input, shape index: {}]   ;;  %s1776_s1 = inlined_call_operand.vmem [shape: bf16[9,4,8], index: 1, kind: input, shape index: {}]   ;;  %s1777_s2 = inlined_call_operand.vmem [shape: f32[1,288], index: 2, kind: input, shape index: {}]   ;;  %s1778_s3 = inlined_call_operand.vmem [shape: f32[2,4,288], index: 3, kind: output, shape index: {}]  }
   0x1   :  { %s1619_s14 = smov 0  }
   0x2 LB: > { %s25_s15 = sadd.s32 1, %s1578_s13  ;;  %p1340_p0 = scmp.ge.s32.totalorder %s1582_s14, 1  ;;  %s1582_s14 = sphi %s1619_s14, %s13_s14   ;;  %s1578_s13 = sphi %s1617_s13, %s1780_s13   ;;  %s1574_s12 = sphi %s1615_s12, %s1779_s12  }
   0x3   : > { %p27_p1 = scmp.ge.s32.totalorder %s25_s15, 2  ;;  %p160_p2 = scmp.lt.s32.totalorder %s1582_s14, 3 }
   0x5   : > { %s1782_s15 = smov (%p27_p1, %s25_s15), 0  ;;  %p161_p3 = pnand %p1340_p0, %p160_p2 }
   0x6   : > { %p192_p4 = scmp.lt.s32.totalorder (!%p161_p3), %s1574_s12, 1  ;;  %v1584_v0 = vmov (!%p161_p3), 0.0   ;;  %vm1585_vm0 = vmmov (!%p161_p3), 0   ;;  %v1586_v1 = vmov (!%p161_p3), 0   ;;  %s1587_s20 = smov (!%p161_p3), 127   ;;  %vm237_vm1 = vcmask (!%p161_p3), 1043456  }
   0x7   : > { %164 = sbr.rel (%p161_p3) target bundleno = 633 (0x279), region = 32  ;;  %1401 = vmatprep.subr.bf16.mxu1 (!%p161_p3), %v1584_v0  ;;  %1403 = vmatprep.mubr.msk.bf16.mxu1 (!%p161_p3), %vm1585_vm0, %v1584_v0  ;;  %s1588_s21 = smov (!%p161_p3), 126   ;;  %v1343_v9 = vld [vmem:[%s1776_s1 + $0x2] sm:$0x3] (!%p161_p3)  ;;  %vm233_vm2 = vcmask (!%p161_p3), 64512   ;;  %vm230_vm3 = vcmask (!%p161_p3), 1039360  }
   0x8   : > { %279 = vmatprep.mubr.bf16.mxu0 (!%p161_p3), %v1586_v1  ;;  %s1589_s22 = smov (!%p161_p3), 110   ;;  %s1590_s23 = smov (!%p161_p3), 109   ;;  %vm429_vm4 = vcmask (!%p161_p3), 1031168   ;;  %v213_v21 = vld [vmem:[%s1776_s1] sm:$0x3] (!%p161_p3)  ;;  %vm536_vm5 = vcmask (!%p161_p3), 900096  }
   0x9   : > { %s1591_s24 = smov (!%p161_p3), 108   ;;  %s1592_s25 = smov (!%p161_p3), 92   ;;  %v1353_v29 = vld [vmem:[%s1776_s1 + $0x4] sm:$0x3] (!%p161_p3)  ;;  %vm643_vm6 = vcmask (!%p161_p3), 891904   ;;  %vm750_vm7 = vcmask (!%p161_p3), 883712  }
   0xa   : > { %s1593_s26 = smov (!%p161_p3), 91   ;;  %s1594_s27 = smov (!%p161_p3), 90   ;;  %v1357_v37 = vld [vmem:[%s1776_s1 + $0x6] sm:$0x3] (!%p161_p3)  ;;  %v1361_v45 = vld [vmem:[%s1776_s1 + $0x8] sm:$0x3] (!%p161_p3) }
   0xb   : > { %vm857_vm8 = vcmask (!%p161_p3), 752640   ;;  %v1365_v53 = vld [vmem:[%s1776_s1 + $0xa] sm:$0x3] (!%p161_p3)  ;;  %vm964_vm9 = vcmask (!%p161_p3), 744448   ;;  %v1369_v61 = vld [vmem:[%s1776_s1 + $0xc] sm:$0x3] (!%p161_p3) }
   0xc   : > { %vm1071_vm10 = vcmask (!%p161_p3), 736256   ;;  %vm1193_vm11 = vcmask (!%p161_p3), 257024  }
   0xe   : > { %s1784_s12 = smov (!%p192_p4, %s1574_s12), 1 }
   0xf   : > { %s1519_s16 = smul.u32 12, %s1784_s12 }
  0x11   : > { %s196_s19 = scalar_lea.vmem %s1775_s0, %s1519_s16  ;;  %s209_s28 = scalar_lea.vmem %s1778_s3, %s1519_s16 }
  0x12   : > { %v1555_v2 = vld [vmem:[%s196_s19 + $0x8] ss:$0 sps:$4 sm:$0xff]   ;;  %v211_v3 = vld [vmem:[%s196_s19] sm:$0xff] }
  0x13   : > { %v1344_v4 = vcombine.low %v211_v3, %v211_v3  ;;  %228 = vrot.lane.b32.xlu1 %v1555_v2, %s1587_s20  ;;  %v1345_v5 = vcombine.high %v211_v3, %v211_v3  ;;  %v338_v10 = vsel %vm237_vm1, %v1555_v2, 0 }
  0x15   : > { %224 = vrot.lane.b32.xlu0 %v1344_v4, %s1587_s20  ;;  %v332_v17 = vsel %vm237_vm1, %v1344_v4, 0 }
  0x17   : > { %423 = vrot.lane.b32.xlu1 %v1344_v4, %s1588_s21 }
  0x19   : > { %226 = vrot.lane.b32.xlu0 %v1345_v5, %s1587_s20 }
  0x1b   : > { %427 = vrot.lane.b32.xlu1 %v1555_v2, %s1588_s21 }
  0x1d   : > { %425 = vrot.lane.b32.xlu0 %v1345_v5, %s1588_s21 }
  0x1f   : > { %532 = vrot.lane.b32.xlu1 %v1345_v5, %s1589_s22 }
  0x21   : > { %530 = vrot.lane.b32.xlu0 %v1344_v4, %s1589_s22 }
  0x23   : > { %637 = vrot.lane.b32.xlu1 %v1344_v4, %s1590_s23 }
  0x25   : > { %534 = vrot.lane.b32.xlu0 %v1555_v2, %s1589_s22 }
  0x27   : > { %641 = vrot.lane.b32.xlu1 %v1555_v2, %s1590_s23 }
  0x29   : > { %639 = vrot.lane.b32.xlu0 %v1345_v5, %s1590_s23 }
  0x2b   : > { %746 = vrot.lane.b32.xlu1 %v1345_v5, %s1591_s24 }
  0x2d   : > { %744 = vrot.lane.b32.xlu0 %v1344_v4, %s1591_s24 }
  0x2f   : > { %851 = vrot.lane.b32.xlu1 %v1344_v4, %s1592_s25 }
  0x31   : > { %748 = vrot.lane.b32.xlu0 %v1555_v2, %s1591_s24 }
  0x33   : > { %855 = vrot.lane.b32.xlu1 %v1555_v2, %s1592_s25 }
  0x35   : > { %853 = vrot.lane.b32.xlu0 %v1345_v5, %s1592_s25 }
  0x37   : > { %960 = vrot.lane.b32.xlu1 %v1345_v5, %s1593_s26 }
  0x39   : > { %958 = vrot.lane.b32.xlu0 %v1344_v4, %s1593_s26 }
  0x3b   : > { %1065 = vrot.lane.b32.xlu1 %v1344_v4, %s1594_s27 }
  0x3d   : > { %962 = vrot.lane.b32.xlu0 %v1555_v2, %s1593_s26 }
  0x3f   : > { %1069 = vrot.lane.b32.xlu1 %v1555_v2, %s1594_s27 }
  0x41   : > { %1067 = vrot.lane.b32.xlu0 %v1345_v5, %s1594_s27 }
  0x85   : > { %v229_v6 = vpop.permute.xlu1 %228 }
  0x86   : > { %v245_v8 = vsel %vm237_vm1, %v229_v6, 0 }
  0x87   : > { %v225_v7 = vpop.permute.xlu0 %224  ;;  %1402 = vmatpush3.bf16.msra.mxu1 %v245_v8 }
  0x88   : > { %1407 = vmatprep.subr.bf16.mxu1 %v1584_v0 }
  0x89   : > { %v424_v11 = vpop.permute.xlu1 %423 }
  0x8a   : > { %1404 = vmatmul.mubr.msk.bf16.vlgmr.msra.gmra.mrb[0].mxu1 %vm233_vm2, %v1343_v9 }
  0x8b   : > { %v227_v12 = vpop.permute.xlu0 %226  ;;  %1408 = vmatpush3.bf16.msra.mxu1 %v338_v10  ;;  %1409 = vmatprep.mubr.msk.bf16.mxu1 %vm1585_vm0, %v1584_v0  ;;  %v1377_v10 = vld [vmem:[%s1776_s1 + $0x10] sm:$0x3] }
  0x8c   : > { %v232_v13 = vsel %vm230_vm3, %v227_v12, %v229_v6  ;;  %v231_v14 = vsel %vm230_vm3, %v225_v7, %v227_v12  ;;  %1413 = vmatprep.subr.bf16.mxu1 %v1584_v0  ;;  %v1373_v6 = vld [vmem:[%s1776_s1 + $0xe] sm:$0x3] }
  0x8d   : > { %1347 = vmatprep.subr.msk.bf16.mxu0 %vm237_vm1, %v232_v13  ;;  %v239_v15 = vsel %vm237_vm1, %v231_v14, 0  ;;  %v428_v16 = vpop.permute.xlu1 %427 }
  0x8e   : > { %248 = vmatpush1.bf16.msra.mxu0 %v239_v15  ;;  %v442_v22 = vsel %vm237_vm1, %v428_v16, 0 }
  0x8f   : > { %1350 = vmatprep.subr.msk.bf16.mxu0 %vm237_vm1, %v1345_v5  ;;  %v426_v18 = vpop.permute.xlu0 %425 }
  0x90   : > { %v431_v19 = vsel %vm429_vm4, %v426_v18, %v428_v16  ;;  %v430_v23 = vsel %vm429_vm4, %v424_v11, %v426_v18  ;;  %v1172_v11 = vlaneseq }
  0x91   : > { %1348 = vmatmul.mubr.msk.bf16.vlgmr.msra.gmra.mrb[0].mxu0 %vm233_vm2, %v1343_v9  ;;  %v533_v24 = vpop.permute.xlu1 %532  ;;  %v436_v26 = vsel %vm237_vm1, %v430_v23, 0 }
  0x92   : > { %341 = vmatpush1.bf16.msra.mxu0 %v332_v17  ;;  %372 = vmatprep.mubr.bf16.mxu0 %v1586_v1  ;;  %v1173_v12 = vshrl.u32 %v1172_v11, 7 }
  0x93   : > { %1354 = vmatprep.subr.msk.bf16.mxu0 %vm237_vm1, %v431_v19  ;;  %v531_v20 = vpop.permute.xlu0 %530 }
  0x94   : > { %v537_v31 = vsel %vm536_vm5, %v531_v20, %v533_v24  ;;  %v1182_v13 = vsub.s32 2, %v1173_v12  ;;  %v1174_v14 = vsub.s32 0, %v1173_v12  ;;  %v1178_v16 = vsub.s32 1, %v1173_v12 }
  0x95   : > { %v638_v28 = vpop.permute.xlu1 %637  ;;  %v543_v34 = vsel %vm237_vm1, %v537_v31, 0 }
  0x96   : > { %1410 = vmatmul.mubr.msk.bf16.vlgmr.msra.gmra.mrb[0].mxu1 %vm233_vm2, %v213_v21 }
  0x97   : > { %1414 = vmatpush3.bf16.msra.mxu1 %v442_v22  ;;  %1415 = vmatprep.mubr.msk.bf16.mxu1 %vm1585_vm0, %v1584_v0  ;;  %v535_v25 = vpop.permute.xlu0 %534 }
  0x98   : > { %1419 = vmatprep.subr.bf16.mxu1 %v1584_v0  ;;  %v538_v27 = vsel %vm536_vm5, %v533_v24, %v535_v25  ;;  %v549_v30 = vsel %vm237_vm1, %v535_v25, 0 }
  0x99   : > { %v642_v33 = vpop.permute.xlu1 %641 }
  0x9a   : > { %v656_v38 = vsel %vm237_vm1, %v642_v33, 0 }
  0x9b   : > { %v640_v32 = vpop.permute.xlu0 %639 }
  0x9c   : > { %v645_v35 = vsel %vm643_vm6, %v640_v32, %v642_v33  ;;  %v644_v39 = vsel %vm643_vm6, %v638_v28, %v640_v32 }
  0x9d   : > { %1351 = vmatmul.mubr.msk.bf16.vlgmr.msra.gmra.mrb[0].mxu0 %vm233_vm2, %v213_v21  ;;  %v747_v40 = vpop.permute.xlu1 %746  ;;  %v650_v42 = vsel %vm237_vm1, %v644_v39, 0 }
  0x9e   : > { %445 = vmatpush1.bf16.msra.mxu0 %v436_v26  ;;  %476 = vmatprep.mubr.bf16.mxu0 %v1586_v1 }
  0x9f   : > { %1358 = vmatprep.subr.msk.bf16.mxu0 %vm237_vm1, %v538_v27  ;;  %v745_v36 = vpop.permute.xlu0 %744 }
  0xa0   : > { %v751_v47 = vsel %vm750_vm7, %v745_v36, %v747_v40 }
  0xa1   : > { %v852_v44 = vpop.permute.xlu1 %851  ;;  %v757_v50 = vsel %vm237_vm1, %v751_v47, 0 }
  0xa2   : > { %1416 = vmatmul.mubr.msk.bf16.vlgmr.msra.gmra.mrb[0].mxu1 %vm233_vm2, %v1353_v29 }
  0xa3   : > { %1420 = vmatpush3.bf16.msra.mxu1 %v549_v30  ;;  %1421 = vmatprep.mubr.msk.bf16.mxu1 %vm1585_vm0, %v1584_v0  ;;  %v749_v41 = vpop.permute.xlu0 %748 }
  0xa4   : > { %1425 = vmatprep.subr.bf16.mxu1 %v1584_v0  ;;  %v752_v43 = vsel %vm750_vm7, %v747_v40, %v749_v41  ;;  %v763_v46 = vsel %vm237_vm1, %v749_v41, 0 }
  0xa5   : > { %v856_v49 = vpop.permute.xlu1 %855 }
  0xa6   : > { %v870_v54 = vsel %vm237_vm1, %v856_v49, 0 }
  0xa7   : > { %v854_v48 = vpop.permute.xlu0 %853 }
  0xa8   : > { %v859_v51 = vsel %vm857_vm8, %v854_v48, %v856_v49  ;;  %v858_v55 = vsel %vm857_vm8, %v852_v44, %v854_v48 }
  0xa9   : > { %1355 = vmatmul.mubr.msk.bf16.vlgmr.msra.gmra.mrb[0].mxu0 %vm233_vm2, %v1353_v29  ;;  %v961_v56 = vpop.permute.xlu1 %960  ;;  %v864_v58 = vsel %vm237_vm1, %v858_v55, 0 }
  0xaa   : > { %552 = vmatpush1.bf16.msra.mxu0 %v543_v34  ;;  %583 = vmatprep.mubr.bf16.mxu0 %v1586_v1 }
  0xab   : > { %1362 = vmatprep.subr.msk.bf16.mxu0 %vm237_vm1, %v645_v35  ;;  %v959_v52 = vpop.permute.xlu0 %958 }
  0xac   : > { %v965_v63 = vsel %vm964_vm9, %v959_v52, %v961_v56 }
  0xad   : > { %v1066_v60 = vpop.permute.xlu1 %1065  ;;  %v971_v4 = vsel %vm237_vm1, %v965_v63, 0 }
  0xae   : > { %1422 = vmatmul.mubr.msk.bf16.vlgmr.msra.gmra.mrb[0].mxu1 %vm233_vm2, %v1357_v37 }
  0xaf   : > { %1426 = vmatpush3.bf16.msra.mxu1 %v656_v38  ;;  %1427 = vmatprep.mubr.msk.bf16.mxu1 %vm1585_vm0, %v1584_v0  ;;  %v963_v57 = vpop.permute.xlu0 %962 }
  0xb0   : > { %1431 = vmatprep.subr.bf16.mxu1 %v1584_v0  ;;  %v966_v59 = vsel %vm964_vm9, %v961_v56, %v963_v57  ;;  %v977_v62 = vsel %vm237_vm1, %v963_v57, 0 }
  0xb1   : > { %v1070_v3 = vpop.permute.xlu1 %1069 }
  0xb2   : > { %v1084_v7 = vsel %vm237_vm1, %v1070_v3, 0 }
  0xb3   : > { %v1068_v2 = vpop.permute.xlu0 %1067 }
  0xb4   : > { %v1073_v5 = vsel %vm1071_vm10, %v1068_v2, %v1070_v3  ;;  %v1072_v8 = vsel %vm1071_vm10, %v1066_v60, %v1068_v2 }
  0xb5   : > { %1359 = vmatmul.mubr.msk.bf16.vlgmr.msra.gmra.mrb[0].mxu0 %vm233_vm2, %v1357_v37  ;;  %v1078_v9 = vsel %vm237_vm1, %v1072_v8, 0 }
  0xb6   : > { %659 = vmatpush1.bf16.msra.mxu0 %v650_v42  ;;  %690 = vmatprep.mubr.bf16.mxu0 %v1586_v1 }
  0xb7   : > { %1366 = vmatprep.subr.msk.bf16.mxu0 %vm237_vm1, %v752_v43 }
  0xba   : > { %1428 = vmatmul.mubr.msk.bf16.vlgmr.msra.gmra.mrb[0].mxu1 %vm233_vm2, %v1361_v45 }
  0xbb   : > { %1432 = vmatpush3.bf16.msra.mxu1 %v763_v46  ;;  %1433 = vmatprep.mubr.msk.bf16.mxu1 %vm1585_vm0, %v1584_v0 }
  0xbc   : > { %1437 = vmatprep.subr.bf16.mxu1 %v1584_v0 }
  0xc1   : > { %1363 = vmatmul.mubr.msk.bf16.vlgmr.msra.gmra.mrb[0].mxu0 %vm233_vm2, %v1361_v45 }
  0xc2   : > { %766 = vmatpush1.bf16.msra.mxu0 %v757_v50  ;;  %797 = vmatprep.mubr.bf16.mxu0 %v1586_v1 }
  0xc3   : > { %1370 = vmatprep.subr.msk.bf16.mxu0 %vm237_vm1, %v859_v51 }
  0xc6   : > { %1434 = vmatmul.mubr.msk.bf16.vlgmr.msra.gmra.mrb[0].mxu1 %vm233_vm2, %v1365_v53 }
  0xc7   : > { %1438 = vmatpush3.bf16.msra.mxu1 %v870_v54  ;;  %1439 = vmatprep.mubr.msk.bf16.mxu1 %vm1585_vm0, %v1584_v0 }
  0xc8   : > { %1443 = vmatprep.subr.bf16.mxu1 %v1584_v0 }
  0xcd   : > { %1367 = vmatmul.mubr.msk.bf16.vlgmr.msra.gmra.mrb[0].mxu0 %vm233_vm2, %v1365_v53 }
  0xce   : > { %873 = vmatpush1.bf16.msra.mxu0 %v864_v58  ;;  %904 = vmatprep.mubr.bf16.mxu0 %v1586_v1 }
  0xcf   : > { %1374 = vmatprep.subr.msk.bf16.mxu0 %vm237_vm1, %v966_v59 }
  0xd2   : > { %1440 = vmatmul.mubr.msk.bf16.vlgmr.msra.gmra.mrb[0].mxu1 %vm233_vm2, %v1369_v61 }
  0xd3   : > { %1444 = vmatpush3.bf16.msra.mxu1 %v977_v62  ;;  %1445 = vmatprep.mubr.msk.bf16.mxu1 %vm1585_vm0, %v1584_v0 }
  0xd4   : > { %1449 = vmatprep.subr.bf16.mxu1 %v1584_v0 }
  0xd9   : > { %1371 = vmatmul.mubr.msk.bf16.vlgmr.msra.gmra.mrb[0].mxu0 %vm233_vm2, %v1369_v61 }
  0xda   : > { %980 = vmatpush1.bf16.msra.mxu0 %v971_v4  ;;  %1011 = vmatprep.mubr.bf16.mxu0 %v1586_v1 }
  0xdb   : > { %1378 = vmatprep.subr.msk.bf16.mxu0 %vm237_vm1, %v1073_v5 }
  0xde   : > { %1446 = vmatmul.mubr.msk.bf16.vlgmr.msra.gmra.mrb[0].mxu1 %vm233_vm2, %v1373_v6 }
  0xdf   : > { %1450 = vmatpush3.bf16.msra.mxu1 %v1084_v7  ;;  %1451 = vmatprep.mubr.msk.bf16.mxu1 %vm1585_vm0, %v1584_v0  ;;  %v1170_v0 = vld [vmem:[%s1777_s2] sm:$0x7] }
  0xe0   : > { %v1175_v20 = vrot.slane %v1170_v0, %v1174_v14  ;;  %v1179_v21 = vrot.slane %v1170_v0, %v1178_v16 }
  0xe5   : > { %1375 = vmatmul.mubr.msk.bf16.vlgmr.msra.gmra.mrb[0].mxu0 %vm233_vm2, %v1373_v6 }
  0xe6   : > { %1087 = vmatpush1.bf16.msra.mxu0 %v1078_v9  ;;  %1118 = vmatprep.mubr.bf16.mxu0 %v1586_v1  ;;  %v1183_v1 = vrot.slane %v1170_v0, %v1182_v13 }
  0xea   : > { %1452 = vmatmul.mubr.msk.bf16.vlgmr.msra.gmra.mrb[0].mxu1 %vm233_vm2, %v1377_v10 }
  0xf1   : > { %1379 = vmatmul.mubr.msk.bf16.vlgmr.msra.gmra.mrb[0].mxu0 %vm233_vm2, %v1377_v10 }
 0x1bd   : > { %v1161_v15 = vpop.f32.mrb[0].mxu1 }
 0x1be   : > { %v1453_v17 = vpop.f32.mrb[1].mxu1  ;;  %v1189_v22 = vmul.f32 %v1183_v1, %v1161_v15 }
 0x1bf   : > { %v1164_v18 = vpop.f32.mrb[2].mxu1 }
 0x1c0   : > { %v1454_v19 = vpop.f32.mrb[3].mxu1  ;;  %v1201_v31 = vmul.f32 %v1189_v22, %v1189_v22  ;;  %v1194_v36 = vsel %vm1193_vm11, %v1189_v22, 0.0 }
 0x1c2   : > { %v1205_v40 = vsel %vm1193_vm11, %v1201_v31, 0.0 }
 0x1c4   : > { %v1120_v23 = vpop.f32.mrb[0].mxu0 }
 0x1c5   : > { %v1187_v24 = vmul.f32 %v1175_v20, %v1120_v23  ;;  %v1122_v25 = vpop.f32.mrb[1].mxu0 }
 0x1c6   : > { %v1188_v26 = vmul.f32 %v1179_v21, %v1122_v25  ;;  %v1124_v27 = vpop.f32.mrb[2].mxu0 }
 0x1c7   : > { %v1190_v28 = vsel %vm237_vm1, %v1187_v24, 0.0  ;;  %v1199_v29 = vmul.f32 %v1187_v24, %v1187_v24  ;;  %v1125_v30 = vpop.f32.mrb[3].mxu0 }
 0x1c8   : > { %v1191_v32 = vsel %vm237_vm1, %v1188_v26, 0.0  ;;  %v1200_v33 = vmul.f32 %v1188_v26, %v1188_v26 }
 0x1c9   : > { %v1192_v34 = vadd.f32 %v1191_v32, %v1190_v28  ;;  %v1202_v35 = vsel %vm237_vm1, %v1199_v29, 0.0 }
 0x1ca   : > { %v1203_v37 = vsel %vm237_vm1, %v1200_v33, 0.0 }
 0x1cb   : > { %v1195_v38 = vadd.f32 %v1194_v36, %v1192_v34  ;;  %v1204_v39 = vadd.f32 %v1203_v37, %v1202_v35 }
 0x1cd   : > { %1196 = vadd.xlane.f32.xlu0 %v1195_v38  ;;  %v1206_v41 = vadd.f32 %v1205_v40, %v1204_v39 }
 0x1cf   : > { %1207 = vadd.xlane.f32.xlu1 %v1206_v41 }
 0x25a   : > { %v1197_v42 = vpop.xlane.xlu0 %1196 }
 0x25b   : > { %v1198_v43 = vmul.f32 0.00390625, %v1197_v42 }
 0x25c   : > { %v1208_v44 = vpop.xlane.xlu1 %1207 }
 0x25d   : > { %v1209_v45 = vmul.f32 0.00390625, %v1208_v44  ;;  %v1210_v46 = vmul.f32 %v1198_v43, %v1198_v43  ;;  %v1213_v50 = vsub.f32 %v1120_v23, %v1198_v43  ;;  %v1214_v51 = vsub.f32 %v1122_v25, %v1198_v43 }
 0x25e   : > { %v1215_v52 = vsub.f32 %v1161_v15, %v1198_v43 }
 0x25f   : > { %v1211_v47 = vsub.f32 %v1209_v45, %v1210_v46 }
 0x261   : > { %v1212_v48 = vmax.f32 %v1211_v47, 0.0 }
 0x263   : > { %v1216_v49 = vadd.f32 1e-05, %v1212_v48 }
 0x265   : > { %1558 = vrsqrt.f32 %v1216_v49 }
 0x26f   : > { %v1559_v53 = vpop.eup %1558 }
 0x270   : > { %v1218_v54 = vmul.f32 %v1559_v53, %v1213_v50  ;;  %v1219_v55 = vmul.f32 %v1559_v53, %v1214_v51  ;;  %v1220_v56 = vmul.f32 %v1559_v53, %v1215_v52 }
 0x272   : > { %vm1221_vm12 = vcmp.ge.f32.partialorder %v1218_v54, 0.0  ;;  %vm1222_vm13 = vcmp.ge.f32.partialorder %v1219_v55, 0.0  ;;  %vm1223_vm14 = vcmp.ge.f32.partialorder %v1220_v56, 0.0  ;;  %v1224_v57 = vmul.f32 0.2, %v1218_v54 }
 0x273   : > { %v1225_v58 = vmul.f32 0.2, %v1219_v55  ;;  %v1226_v59 = vmul.f32 0.2, %v1220_v56 }
 0x274   : > { %v1227_v60 = vsel %vm1221_vm12, %v1218_v54, %v1224_v57 }
 0x275   : > { %v1228_v61 = vsel %vm1222_vm13, %v1219_v55, %v1225_v58  ;;  %v1229_v62 = vsel %vm1223_vm14, %v1220_v56, %v1226_v59 }
 0x276   : > { %v1232_v63 = vcombine.low %v1227_v60, %v1228_v61  ;;  %1235 = vst.msk [vmem:[%s209_s28 + $0x8] sm:$0xf] %vm1193_vm11, %v1229_v62 }
 0x278   : > { %1234 = vst [vmem:[%s209_s28] sm:$0xff] %v1232_v63 }
 0x279 PF: > { %s13_s14 = sadd.s32 1, %s1582_s14   ;;  %s1779_s12 = smov %s1578_s13 }
 0x27a   : > { %p10_p5 = scmp.ge.s32.totalorder %s13_s14, 4   ;;  %s1780_s13 = smov %s1782_s15 }
 0x27c   :  { %12 = sbr.rel (!%p10_p5) target bundleno = 2 (0x2), region = 73 }

// kernel: unet_dc_cascade.27
= control target key start
LH: loop header
LB: loop body
LE: loop exit
PB: predicated region body
PF: predicated region fallthrough
CT: control target
= control target key end

     0   :  { %15 = vsyncpa [#allocation4], 0  ;;  %s1896_s0 = inlined_call_operand.vmem [shape: f32[2,1,16,16], index: 0, kind: input, shape index: {}]   ;;  %s1897_s1 = inlined_call_operand.vmem [shape: f32[2,1,16,16], index: 1, kind: input, shape index: {}]   ;;  %s1898_s2 = inlined_call_operand.vmem [shape: f32[2,1,16,16], index: 2, kind: input, shape index: {}]   ;;  %s1899_s3 = inlined_call_operand.vmem [shape: f32[2,1,16,16], index: 3, kind: input, shape index: {}]   ;;  %s1900_s4 = inlined_call_operand.vmem [shape: f32[2], index: 4, kind: input, shape index: {}]   ;;  %s1901_s5 = inlined_call_operand.vmem [shape: f32[2], index: 5, kind: input, shape index: {}]   ;;  %s1902_s6 = inlined_call_operand.vmem [shape: f32[32,16], index: 6, kind: input, shape index: {}]   ;;  %s1903_s7 = inlined_call_operand.vmem [shape: f32[16,32], index: 7, kind: input, shape index: {}]   ;;  %s1904_s8 = inlined_call_operand.vmem [shape: f32[32,16], index: 8, kind: input, shape index: {}]   ;;  %s1905_s9 = inlined_call_operand.vmem [shape: f32[16,32], index: 9, kind: input, shape index: {}]   ;;  %s1906_s10 = inlined_call_operand.hbm [shape: f32[2,1,16,16], index: 10, kind: output, shape index: {}]  }
   0x1   :  { %16 = vsyncpa [#allocation6], 0 }
   0x2   :  { %17 = vsyncpa [#allocation3], 0 }
   0x3   :  { %19 = vsyncpa [#allocation3 + $0x1], 0  ;;  %s1657_s13 = smov 0   ;;  %s1659_s14 = smov 0  }
   0x4   :  { %s1661_s15 = smov 0   ;;  %s1663_s16 = smov 0  }
   0x5 LB: > { %s1678_s17 = sadd.s32 4294967295, %s1593_s16   ;;  %s1257_s18 = sadd.s32 4294967294, %s1593_s16   ;;  %s1593_s16 = sphi %s1663_s16, %s1924_s16   ;;  %s1589_s15 = sphi %s1661_s15, %s1923_s15   ;;  %s1585_s14 = sphi %s1659_s14, %s1922_s14   ;;  %s1581_s13 = sphi %s1657_s13, %s1921_s13  }
   0x6   : > { %s1682_s19 = sadd.s32 1, %s1593_s16   ;;  %s262_s20 = sadd.s32 1, %s1589_s15 }
   0x7   : > { %s259_s21 = ssub.s32 %s1593_s16, %s1682_s19  ;;  %p272_p0 = scmp.ne.s32.totalorder %s1589_s15, %s1585_s14 }
   0x8   : > { %p260_p1 = scmp.eq.s32.totalorder %s259_s21, 0  ;;  %p273_p2 = scmp.eq.s32.totalorder %s1678_s17, 1 }
   0x9   : > { %p278_p3 = scmp.ne.s32.totalorder %s1585_s14, %s1581_s13  ;;  %p279_p4 = scmp.eq.s32.totalorder %s1257_s18, 1 }
   0xa   : > { %s1693_s22 = scalar_select %p260_p1, %s1589_s15, %s262_s20  }
   0xb   : > { %p1695_p5 = por %p273_p2, %p272_p0  ;;  %p1699_p6 = por %p279_p4, %p278_p3 }
   0xc   : > { %p1258_p7 = scmp.ge.s32.totalorder %s1593_s16, 1  ;;  %p286_p8 = scmp.lt.s32.totalorder %s1593_s16, 3 }
   0xd   : > { %s1910_s23 = scalar_select %p1695_p5, 1, 0 }
   0xe   : > { %s1911_s24 = scalar_select %p1699_p6, 1, 0 }
   0xf   : > { %p1907_p9 = scmp.eq.s32.totalorder %s1678_s17, 0  ;;  %p1706_p10 = pnand %p1258_p7, %p286_p8 }
  0x10   : > { %s299_s28 = sshll.u32 %s1900_s4, 4  ;;  %s310_s11 = sshll.u32 %s1901_s5, 4  ;;  %s300_s28 = int_to_ptr.vmem [resolvable:$true] %s299_s28  ;;  %s311_s11 = int_to_ptr.vmem [resolvable:$true] %s310_s11 }
  0x11   : > { %s1912_s25 = scalar_select %p1706_p10, 1, 0 }
  0x12   : > { %p1428_p11 = pneg %p1706_p10  ;;  %s1493_s18 = scalar_lea.vmem %s300_s28, 16 }
  0x13   : > { %p1494_p13 = scmp.ne.s32.totalorder %s300_s28, %s1493_s18  ;;  %p1501_p3 = scmp.lt.s32.totalorder %s300_s28, %s300_s28 }
  0x14   : > { %p1720_p12 = pnand %p1907_p9, %p1428_p11  ;;  %p1502_p4 = scmp.lt.s32.totalorder %s1493_s18, %s1493_s18 }
  0x16   : > { %p1495_p0 = pneg %p1720_p12  ;;  %p1503_p7 = por %p1502_p4, %p1501_p3 }
  0x18   : > { %p1496_p1 = pnand %p1495_p0, %p1494_p13 }
  0x1a   : > { %p1497_p2 = pneg %p1496_p1 }
  0x1c   : > { %p1504_p8 = pnand %p1503_p7, %p1497_p2 }
  0x1e   : > { %1507 = shalt.err (!%p1504_p8)
}
  0x1f   : > { %s1595_s20 = smov [#allocation2]   ;;  %s1508_s21 = scalar_lea.vmem %s311_s11, 16 }
  0x20   : > { %1431 = dma.vmem_to_smem (!%p1720_p12), %s300_s28, 16, %s1595_s20, [#allocation4]  }
  0x21   : > { %p1509_p11 = scmp.ne.s32.totalorder %s311_s11, %s1508_s21  ;;  %p1516_p5 = scmp.lt.s32.totalorder %s311_s11, %s311_s11 }
  0x22   : > { %p1517_p10 = scmp.lt.s32.totalorder %s1508_s21, %s1508_s21 }
  0x23   : > { %p1511_p9 = pnand %p1509_p11, %p1495_p0 }
  0x24   : > { %p1518_p13 = por %p1517_p10, %p1516_p5 }
  0x25   : > { %p1512_p6 = pneg %p1511_p9 }
  0x27   : > { %p1519_p1 = pnand %p1518_p13, %p1512_p6 }
  0x29   : > { %1522 = shalt.err (!%p1519_p1)
}
  0x2a   : > { %s1596_s26 = smov [#allocation5]   ;;  %p1914_p2 = scmp.ne.s32.totalorder %s1912_s25, 0 }
  0x2b   : > { %1434 = dma.vmem_to_smem (!%p1720_p12), %s311_s11, 16, %s1596_s26, [#allocation6]  }
  0x2c   : > { %367 = sbr.rel (%p1914_p2) target bundleno = 1696 (0x6a0), region = 60  ;;  %p1915_p3 = scmp.eq.s32.totalorder (!%p1914_p2), %s1678_s17, 0 }
  0x33   : > { %1568 = dma.done.wait (%p1915_p3), [#allocation4], 16   ;;  %p1916_p4 = pmov %p1915_p3 }
  0x34   : > { %p1917_p9 = pmov %p1915_p3 }
  0x35   : > { %1570 = vsyncadd (%p1916_p4), [#allocation4], 4294967280 }
  0x36   : > { %1572 = dma.done.wait (%p1917_p9), [#allocation6], 16   ;;  %p1918_p5 = pmov %p1915_p3 }
  0x38   : > { %1574 = vsyncadd (%p1918_p5), [#allocation6], 4294967280 }
  0x39   : > { %377 = sfence }
  0x3a   : > { %p425_p6 = scmp.lt.s32.totalorder %s1678_s17, 1  ;;  %s445_s25 = sld [smem:[#allocation2 + %s1678_s17]]  ;;  %v455_v0 = vld [vmem:[%s1902_s6] sm:$0xff]  ;;  %vm459_vm0 = vcmask 130048   ;;  %v457_v1 = vld [vmem:[%s1902_s6 + $0x10] sm:$0xff]  ;;  %v558_v9 = vld [vmem:[%s1903_s7 + $0x8] sm:$0xff] }
  0x3b   : > { %s446_s11 = sld [smem:[#allocation5 + %s1678_s17]]  ;;  %1340 = vmatprep.mubr.msk.f32.mxu0 %vm459_vm0, %v455_v0  ;;  %1343 = vmatprep.mubr.msk.f32.mxu1 %vm459_vm0, %v457_v1  ;;  %v557_v8 = vld [vmem:[%s1903_s7] sm:$0xff]  ;;  %v456_v14 = vld [vmem:[%s1902_s6 + $0x8] sm:$0xff]  ;;  %v458_v15 = vld [vmem:[%s1902_s6 + $0x18] sm:$0xff]  ;;  %s1597_s21 = smov 16  }
  0x3c   : > { %s426_s12 = scalar_select %p425_p6, %s1678_s17, 1  ;;  %v1394_v13 = vpack.c.bf16 %v558_v9, %v557_v8  ;;  %v708_v38 = vld [vmem:[%s1904_s8] sm:$0xff]  ;;  %v709_v57 = vld [vmem:[%s1904_s8 + $0x8] sm:$0xff]  ;;  %v710_v58 = vld [vmem:[%s1904_s8 + $0x10] sm:$0xff] }
  0x3d   : > { %v711_v59 = vld [vmem:[%s1904_s8 + $0x18] sm:$0xff]  ;;  %v906_v0 = vld [vmem:[%s1905_s9] sm:$0xff]  ;;  %v907_v1 = vld [vmem:[%s1905_s9 + $0x8] sm:$0xff]  ;;  %p1919_p12 = scmp.ne.s32.totalorder %s1910_s23, 0 }
  0x3e   : > { %s1752_s18 = sshll.u32 %s426_s12, 4 }
  0x3f   : > { %s429_s26 = scalar_lea.vmem %s1896_s0, %s1752_s18  ;;  %s439_s29 = scalar_lea.vmem %s1898_s2, %s1752_s18 }
  0x40   : > { %v447_v2 = vld [vmem:[%s429_s26] sm:$0xff]  ;;  %v448_v3 = vld [vmem:[%s429_s26 + $0x8] sm:$0xff]  ;;  %v1760_v5 = vstv %s445_s25  ;;  %s1598_s26 = smov 112  }
  0x41   : > { %v1758_v4 = vstv %s446_s11  ;;  %s444_s11 = scalar_lea.vmem %s1899_s3, %s1752_s18  ;;  %v684_v28 = vld [vmem:[%s439_s29] sm:$0xff]  ;;  %v685_v32 = vld [vmem:[%s439_s29 + $0x8] sm:$0xff]  ;;  %s434_s29 = scalar_lea.vmem %s1897_s1, %s1752_s18 }
  0x42   : > { %v450_v6 = vmul.f32 %v1758_v4, %v447_v2  ;;  %v451_v7 = vmul.f32 %v1758_v4, %v448_v3  ;;  %v674_v29 = vld [vmem:[%s444_s11] sm:$0xff]  ;;  %v675_v34 = vld [vmem:[%s444_s11 + $0x8] sm:$0xff]  ;;  %v1406_v2 = vpack.c.bf16 %v907_v1, %v906_v0 }
  0x43   : > { %v676_v41 = vld [vmem:[%s434_s29] sm:$0xff]  ;;  %v677_v48 = vld [vmem:[%s434_s29 + $0x8] sm:$0xff]  ;;  %s1599_s29 = smov [#allocation7]  }
  0x44   : > { %v453_v10 = vadd.f32 %v1760_v5, %v450_v6  ;;  %v454_v11 = vadd.f32 %v1760_v5, %v451_v7  ;;  %s1527_s18 = sshll.u32 %s1599_s29, 4  ;;  %s1528_s18 = int_to_ptr.vmem [resolvable:$false] %s1527_s18 }
  0x46   : > { %v1390_v12 = vpack.c.bf16 %v454_v11, %v453_v10 }
  0x48   : > { %1391 = vmatprep.subr.bf16.mxu0 %v1390_v12  ;;  %1414 = vmatprep.subr.bf16.mxu1 %v1390_v12 }
  0x49   : > { %1393 = vmatpush3.bf16.msra.mxu0 %v1390_v12  ;;  %1415 = vmatpush3.bf16.msra.mxu1 %v1390_v12 }
  0x4a   : > { %1395 = vmatprep.subr.bf16.mxu1 %v1394_v13 }
  0x4c   : > { %1341 = vmatmul.mubr.msk.f32.vlgmr.msra.gmra.mrb[0].mxu0 %vm459_vm0, %v456_v14  ;;  %1344 = vmatmul.mubr.msk.f32.vlgmr.msra.gmra.mrb[0].mxu1 %vm459_vm0, %v458_v15 }
  0x4d   : > { %1397 = vmatpush3.bf16.msra.mxu1 %v1394_v13  ;;  %1360 = vmatprep.mubr.msk.f32.mxu0 %vm459_vm0, %v708_v38 }
  0x4e   : > { %1407 = vmatprep.subr.bf16.mxu1 %v1406_v2 }
 0x11f   : > { %v1342_v16 = vpop.f32.mrb[0].mxu0  ;;  %v1345_v17 = vpop.f32.mrb[0].mxu1 }
 0x120   : > { %v538_v18 = vpop.f32.mrb[1].mxu0  ;;  %v548_v19 = vpop.f32.mrb[1].mxu1 }
 0x121   : > { %1350 = vmatprep.mubr.msk.f32.mxu1 %vm459_vm0, %v538_v18 }
 0x122   : > { %1351 = vmatmul.mubr.msk.f32.vlgmr.msra.gmra.mrb[2].mxu1 %vm459_vm0, %v1342_v16 }
 0x123   : > { %1353 = vmatprep.mubr.msk.f32.mxu1 %vm459_vm0, %v548_v19  ;;  %1409 = vmatpush3.bf16.msra.mxu1 %v1406_v2 }
 0x124   : > { %1411 = vmatprep.subr.bf16.mxu1 %v1406_v2 }
 0x126   : > { %1354 = vmatmul.mubr.msk.f32.gmra.mrb[4].mxu1 %vm459_vm0, %v1345_v17 }
 0x1f5   : > { %v1352_v20 = vpop.f32.mrb[2].mxu1 }
 0x1f6   : > { %v637_v21 = vpop.f32.mrb[3].mxu1 }
 0x1f9   : > { %v1355_v22 = vpop.f32.mrb[4].mxu1 }
 0x1fa   : > { %v647_v23 = vpop.f32.mrb[5].mxu1 }
 0x1fb   : > { %666 = vrot.lane.b32.xlu0 %v647_v23, %s1597_s21 }
 0x1ff   : > { %668 = vrot.lane.b32.xlu0 %v1355_v22, %s1597_s21 }
 0x26d   : > { %v667_v24 = vpop.permute.xlu0 %666 }
 0x26e   : > { %v672_v25 = vadd.f32 %v667_v24, %v637_v21 }
 0x270   : > { %688 = vrot.lane.b32.xlu1 %v672_v25, %s1598_s26 }
 0x271   : > { %v669_v26 = vpop.permute.xlu0 %668 }
 0x272   : > { %v673_v27 = vadd.f32 %v1352_v20, %v669_v26 }
 0x274   : > { %690 = vrot.lane.b32.xlu1 %v673_v27, %s1598_s26 }
 0x2e2   : > { %v689_v30 = vpop.permute.xlu1 %688 }
 0x2e3   : > { %v694_v31 = vsub.f32 %v684_v28, %v689_v30 }
 0x2e5   : > { %v696_v33 = vmul.f32 %v694_v31, %v674_v29 }
 0x2e6   : > { %v691_v35 = vpop.permute.xlu1 %690 }
 0x2e7   : > { %v695_v36 = vsub.f32 %v685_v32, %v691_v35  ;;  %700 = vrot.lane.b32.xlu0 %v696_v33, %s1597_s21 }
 0x2e9   : > { %v697_v37 = vmul.f32 %v695_v36, %v675_v34 }
 0x2eb   : > { %658 = vrot.lane.b32.xlu0 %v647_v23, %s1598_s26  ;;  %702 = vrot.lane.b32.xlu1 %v697_v37, %s1597_s21 }
 0x2ef   : > { %660 = vrot.lane.b32.xlu1 %v1355_v22, %s1598_s26 }
 0x359   : > { %v701_v39 = vpop.permute.xlu0 %700 }
 0x35a   : > { %v706_v43 = vadd.f32 %v701_v39, %v672_v25 }
 0x35d   : > { %v703_v40 = vpop.permute.xlu1 %702  ;;  %v659_v42 = vpop.permute.xlu0 %658 }
 0x35e   : > { %v707_v44 = vadd.f32 %v703_v40, %v673_v27  ;;  %v664_v45 = vsub.f32 %v637_v21, %v659_v42 }
 0x360   : > { %v1482_v46 = vpack.i.bf16 %v707_v44, %v706_v43  ;;  %v678_v47 = vsub.f32 %v676_v41, %v664_v45 }
 0x361   : > { %v661_v49 = vpop.permute.xlu1 %660 }
 0x362   : > { %v665_v50 = vsub.f32 %v1352_v20, %v661_v49  ;;  %1483 = vrot.lane.b32.xlu0 %v1482_v46, %s1598_s26  ;;  %v680_v51 = vmul.f32 %v678_v47, %v674_v29 }
 0x364   : > { %v679_v52 = vsub.f32 %v677_v48, %v665_v50  ;;  %v682_v54 = vadd.f32 %v680_v51, %v664_v45 }
 0x366   : > { %v681_v53 = vmul.f32 %v679_v52, %v675_v34 }
 0x368   : > { %v683_v55 = vadd.f32 %v681_v53, %v665_v50 }
 0x36a   : > { %v1398_v56 = vpack.c.bf16 %v683_v55, %v682_v54 }
 0x36c   : > { %1399 = vmatprep.subr.bf16.mxu0 %v1398_v56 }
 0x36d   : > { %1401 = vmatpush3.bf16.msra.mxu0 %v1398_v56 }
 0x370   : > { %1361 = vmatmul.mubr.msk.f32.vlgmr.msra.gmra.mrb[2].mxu0 %vm459_vm0, %v709_v57 }
 0x371   : > { %1363 = vmatprep.mubr.msk.f32.mxu0 %vm459_vm0, %v710_v58 }
 0x374   : > { %1364 = vmatmul.mubr.msk.f32.gmra.mrb[4].mxu0 %vm459_vm0, %v711_v59 }
 0x375   : > { %1370 = vmatprep.mubr.msk.f32.mxu0 %vm459_vm0, %v708_v38 }
 0x3d4   : > { %v1484_v60 = vpop.permute.xlu0 %1483 }
 0x3d5   : > { %v1486_v61 = vunpack.i.h.bf16 %v1484_v60  ;;  %v1485_v62 = vunpack.i.l.bf16 %v1484_v60 }
 0x3d7   : > { %v1402_v63 = vpack.c.bf16 %v1486_v61, %v1485_v62 }
 0x3d9   : > { %1403 = vmatprep.subr.bf16.mxu0 %v1402_v63 }
 0x3da   : > { %1405 = vmatpush3.bf16.msra.mxu0 %v1402_v63 }
 0x3dd   : > { %1371 = vmatmul.mubr.msk.f32.vlgmr.msra.gmra.mrb[4].mxu0 %vm459_vm0, %v709_v57 }
 0x3de   : > { %1373 = vmatprep.mubr.msk.f32.mxu0 %vm459_vm0, %v710_v58 }
 0x3e1   : > { %1374 = vmatmul.mubr.msk.f32.gmra.mrb[6].mxu0 %vm459_vm0, %v711_v59 }
 0x443   : > { %v1362_v3 = vpop.f32.mrb[2].mxu0 }
 0x444   : > { %v790_v6 = vpop.f32.mrb[3].mxu0 }
 0x4b0   : > { %v1372_v7 = vpop.f32.mrb[4].mxu0 }
 0x4b1   : > { %v883_v8 = vpop.f32.mrb[5].mxu0 }
 0x4b4   : > { %v1375_v9 = vpop.f32.mrb[6].mxu0 }
 0x4b5   : > { %v903_v10 = vsub.f32 %v1362_v3, %v1375_v9  ;;  %v893_v11 = vpop.f32.mrb[7].mxu0 }
 0x4b6   : > { %v902_v12 = vsub.f32 %v790_v6, %v893_v11 }
 0x4b8   : > { %1380 = vmatprep.mubr.msk.f32.mxu1 %vm459_vm0, %v902_v12 }
 0x4b9   : > { %1381 = vmatmul.mubr.msk.f32.vlgmr.msra.gmra.mrb[6].mxu1 %vm459_vm0, %v903_v10 }
 0x4ba   : > { %1413 = vmatpush3.bf16.msra.mxu1 %v1406_v2  ;;  %1387 = vmatprep.mubr.msk.f32.mxu1 %vm459_vm0, %v883_v8 }
 0x4bd   : > { %1388 = vmatmul.mubr.msk.f32.vlgmr.msra.gmra.mrb[8].mxu1 %vm459_vm0, %v1372_v7 }
 0x58c   : > { %v1382_v13 = vpop.f32.mrb[6].mxu1 }
 0x58d   : > { %v980_v14 = vpop.f32.mrb[7].mxu1 }
 0x590   : > { %v1389_v15 = vpop.f32.mrb[8].mxu1 }
 0x591   : > { %1082 = vrot.lane.b32.xlu0 %v1389_v15, %s1597_s21  ;;  %v1061_v16 = vpop.f32.mrb[9].mxu1 }
 0x592   : > { %1080 = vrot.lane.b32.xlu1 %v1061_v16, %s1597_s21  ;;  %s422_s21 = sand.u32 1, %s1585_s14  }
 0x593   : > { %s1265_s30 = sshll.u32 %s422_s21, 4 }
 0x594   : > { %s424_s25 = scalar_lea.vmem [#allocation7], %s1265_s30  ;;  %s1529_s30 = scalar_lea.vmem %s1528_s18, 512 }
 0x595   : > { %1074 = vrot.lane.b32.xlu0 %v1389_v15, %s1598_s26  ;;  %s1137_s11 = sshll.u32 %s424_s25, 4  ;;  %s1851_s11 = int_to_ptr.vmem [resolvable:$true] %s1137_s11 }
 0x596   : > { %1072 = vrot.lane.b32.xlu1 %v1061_v16, %s1598_s26  ;;  %s1523_s28 = scalar_lea.vmem %s1851_s11, 256  ;;  %p1530_p8 = scmp.lt.s32.totalorder %s1851_s11, %s1528_s18 }
 0x597   : > { %p1524_p10 = scmp.ne.s32.totalorder %s1851_s11, %s1523_s28  ;;  %p1531_p11 = scmp.lt.s32.totalorder %s1529_s30, %s1523_s28 }
 0x599   : > { %p1525_p0 = pnand %p1524_p10, %p1919_p12  ;;  %p1532_p13 = por %p1531_p11, %p1530_p8 }
 0x59b   : > { %p1526_p7 = pneg %p1525_p0 }
 0x59d   : > { %p1533_p1 = pnand %p1532_p13, %p1526_p7 }
 0x603   : > { %v1083_v17 = vpop.permute.xlu0 %1082 }
 0x604   : > { %v1087_v18 = vadd.f32 %v1382_v13, %v1083_v17  ;;  %v1081_v19 = vpop.permute.xlu1 %1080 }
 0x605   : > { %v1086_v20 = vadd.f32 %v1081_v19, %v980_v14 }
 0x606   : > { %v1091_v21 = vmul.f32 %v1087_v18, %v1087_v18 }
 0x607   : > { %v1090_v22 = vmul.f32 %v1086_v20, %v1086_v20  ;;  %v1075_v23 = vpop.permute.xlu0 %1074 }
 0x608   : > { %1096 = vrot.lane.b32.xlu0 %v1091_v21, %s1598_s26  ;;  %v1073_v24 = vpop.permute.xlu1 %1072  ;;  %v1079_v25 = vsub.f32 %v1382_v13, %v1075_v23 }
 0x609   : > { %1094 = vrot.lane.b32.xlu1 %v1090_v22, %s1598_s26  ;;  %v1078_v26 = vsub.f32 %v980_v14, %v1073_v24  ;;  %s1303_s26 = sshll.u32 %s1678_s17, 8  ;;  %s1855_s17 = scalar_lea.sflag [#allocation3], %s422_s21 }
 0x60a   : > { %v1089_v27 = vmul.f32 %v1079_v25, %v1079_v25  ;;  %s1849_s27 = scalar_lea.hbm %s1906_s10, %s1303_s26 }
 0x60b   : > { %v1088_v28 = vmul.f32 %v1078_v26, %v1078_v26 }
 0x67a   : > { %v1097_v29 = vpop.permute.xlu0 %1096 }
 0x67b   : > { %v1101_v30 = vadd.f32 %v1097_v29, %v1089_v27  ;;  %v1095_v31 = vpop.permute.xlu1 %1094 }
 0x67c   : > { %v1100_v32 = vadd.f32 %v1095_v31, %v1088_v28 }
 0x67d   : > { %1487 = vrsqrt.f32 %v1101_v30  ;;  %vm1111_vm1 = vcmp.eq.f32.partialorder %v1101_v30, inf  ;;  %v1114_v36 = vand.u32 2147483648, %v1101_v30  ;;  %vm1113_vm2 = vcmp.eq.f32.partialorder %v1101_v30, 0.0 }
 0x67e   : > { %1489 = vrsqrt.f32 %v1100_v32  ;;  %vm1104_vm3 = vcmp.eq.f32.partialorder %v1100_v32, inf  ;;  %v1107_v39 = vand.u32 2147483648, %v1100_v32  ;;  %vm1106_vm4 = vcmp.eq.f32.partialorder %v1100_v32, 0.0 }
 0x67f   : > { %1491 = vrcp.f32 %v1758_v4 }
 0x687   : > { %v1488_v33 = vpop.eup %1487 }
 0x688   : > { %v1490_v34 = vpop.eup %1489  ;;  %v1110_v35 = vmul.f32 %v1488_v33, %v1101_v30 }
 0x689   : > { %v1103_v37 = vmul.f32 %v1490_v34, %v1100_v32  ;;  %v1492_v40 = vpop.eup %1491 }
 0x68a   : > { %v1112_v38 = vsel %vm1111_vm1, %v1101_v30, %v1110_v35 }
 0x68b   : > { %v1105_v41 = vsel %vm1104_vm3, %v1100_v32, %v1103_v37  ;;  %v1115_v42 = vsel %vm1113_vm2, %v1114_v36, %v1112_v38 }
 0x68c   : > { %v1108_v4 = vsel %vm1106_vm4, %v1107_v39, %v1105_v41  ;;  %v1117_v43 = vsub.f32 %v1115_v42, %v1760_v5 }
 0x68d   : > { %v1116_v44 = vsub.f32 %v1108_v4, %v1760_v5 }
 0x68e   : > { %v1120_v45 = vmul.f32 %v1492_v40, %v1117_v43 }
 0x68f   : > { %v1119_v46 = vmul.f32 %v1492_v40, %v1116_v44 }
 0x690   : > { %1122 = vst.msk [vmem:[%s424_s25 + $0x8] sm:$0xff] %vm459_vm0, %v1120_v45 }
 0x691   : > { %1121 = vst.msk [vmem:[%s424_s25] sm:$0xff] %vm459_vm0, %v1119_v46 }
 0x692   : > { %1536 = shalt.err (!%p1533_p1)
}
 0x693   : > { %s1537_s21 = scalar_lea.hbm %s1849_s27, 256  ;;  %s1541_s12 = scalar_lea.hbm %s1906_s10, 512 }
 0x694   : > { %p1538_p2 = scmp.ne.s32.totalorder %s1849_s27, %s1537_s21  ;;  %p1542_p9 = scmp.lt.u32.totalorder %s1849_s27, %s1906_s10 }
 0x695   : > { %p1543_p5 = scmp.lt.u32.totalorder %s1541_s12, %s1537_s21  ;;  %p1545_p10 = scmp.lt.u32.totalorder %s1537_s21, %s1849_s27 }
 0x696   : > { %p1539_p3 = pnand %p1538_p2, %p1919_p12 }
 0x697   : > { %p1544_p6 = por %p1543_p5, %p1542_p9 }
 0x698   : > { %p1540_p4 = pneg %p1539_p3 }
 0x699   : > { %p1546_p0 = por %p1545_p10, %p1544_p6 }
 0x69b   : > { %p1547_p7 = pnand %p1546_p0, %p1540_p4 }
 0x69d   : > { %1550 = shalt.err (!%p1547_p7)
}
 0x69e   : > { %s1600_s28 = smov 128   ;;  %s1601_s18 = smov 8  }
 0x69f   : > { %1426 = dma.vmem_to_hbm [thread:$0]  (%p1919_p12), %s1851_s11, 256, %s1849_s27, %s1855_s17, %s1600_s28, %s1600_s28, %s1601_s18  }
 0x6a0 PF: > { %p1443_p8 = scmp.ge.s32.totalorder %s1593_s16, 2  ;;  %s1152_s30 = sand.u32 1, %s1581_s13  }
 0x6a1   : > { %p1920_p11 = scmp.ne.s32.totalorder %s1911_s24, 0  ;;  %s1153_s21 = scalar_lea.sflag [#allocation3], %s1152_s30 }
 0x6a3   : > { %p1436_p13 = pnand %p1443_p8, %p1920_p11 }
 0x6a5   : > { %1576 = dma.done.wait (!%p1436_p13), %s1153_s21, 256  }
 0x6a6   : > { %1578 = vsyncadd (!%p1436_p13), %s1153_s21, 4294967040  ;;  %p22_p1 = scmp.ge.s32.totalorder %s1682_s19, 4   ;;  %s1921_s13 = smov %s1585_s14 }
 0x6a7   : > { %s1922_s14 = smov %s1589_s15  ;;  %s1923_s15 = smov %s1693_s22 }
 0x6a8   : > { %s1924_s16 = smov %s1682_s19  ;;  %24 = sbr.rel (!%p22_p1) target bundleno = 5 (0x5), region = 113 }
 0x6af   :  { %1158 = vsyncpa [#allocation3], 1 }
 0x6b0   :  { %1160 = vsyncpa [#allocation3 + $0x1], 1 }
 0x6b1   :  { %1161 = vsyncpa [#allocation4], 1 }
 0x6b2   :  { %1163 = vsyncpa [#allocation4 + $0x1], 1 }
 0x6b3   :  { %1164 = vsyncpa [#allocation6], 1 }

</bundles_post_ra>
